<compile_context>
chip_gen: v5e
topology: v5e:2x2
jax: 0.10.0
libtpu: 0.0.40
codegen_flags: <defaults>
</compile_context>

<pallas_src>
import numpy as np
import jax
import jax.numpy as jnp
from jax.experimental import pallas as pl
from jax.experimental.pallas import tpu as pltpu

KSIZE = 4
EPS = 1e-5
SLOPE = 0.2
LANES = 128
COMPUTE_DTYPE = jnp.bfloat16       # MXU operand / activation-slab dtype


def _round_up(v, m):
    return ((v + m - 1) // m) * m


# ---------------------------------------------------------------------------
# Kernel factory: fused conv (4 accumulating MXU dots over the s2d input)
#                 + bias | InstanceNorm(affine) + LeakyReLU
#                 [+ fused final 4x4 conv -> scalar score epilogue]
# ---------------------------------------------------------------------------
def _make_kernel(L, W2, n_valid, use_bias, use_norm, use_act, fuse_final):
    offsets = (0, 1, W2, W2 + 1)           # 2x2 taps (a, b) -> row shift a*W2+b
    inv_n = 1.0 / float(n_valid)

    def kernel(*refs):
        i = 0
        x_ref = refs[i]; i += 1            # (1, R, C4)   bf16 s2d input rows
        w_ref = refs[i]; i += 1            # (4, C4, Cp)  bf16 packed weights
        b_ref = g_ref = be_ref = m_ref = wf_ref = bf_ref = None
        if use_bias:
            b_ref = refs[i]; i += 1        # (1, Cp) f32
        if use_norm:
            g_ref = refs[i]; i += 1        # (1, Cp) f32 gamma
            be_ref = refs[i]; i += 1       # (1, Cp) f32 beta
            m_ref = refs[i]; i += 1        # (L, 1)  f32 valid-row mask
        if fuse_final:
            wf_ref = refs[i]; i += 1       # (L, Cp) f32 final conv weights
            bf_ref = refs[i]; i += 1       # (1, Cp) f32 final conv bias
        o_ref = refs[i]

        # Conv as 4 accumulating MXU dots: the stride-2 4x4 conv on the padded
        # input equals a stride-1 2x2 conv on the space-to-depth input, and
        # each 2x2 tap is a *contiguous* window of the flattened (H2*W2, 4*Cin)
        # tensor shifted by a*W2 + b.  bf16 operands, f32 accumulation.
        acc = None
        for t, off in enumerate(offsets):
            xs = x_ref[0, pl.ds(off, L), :]                          # (L, C4)
            part = jnp.dot(xs, w_ref[t],
                           preferred_element_type=jnp.float32)       # (L, Cp)
            acc = part if acc is None else acc + part

        if use_bias:
            acc = acc + b_ref[...]

        if use_norm:
            # InstanceNorm2d: one-pass masked stats + single scale/shift FMA.
            m = m_ref[...]                                            # (L, 1)
            s1 = jnp.sum(acc * m, axis=0, keepdims=True) * inv_n      # mean
            s2 = jnp.sum(acc * acc * m, axis=0, keepdims=True) * inv_n
            var = s2 - s1 * s1                                        # biased
            scale = g_ref[...] * jax.lax.rsqrt(var + EPS)
            shift = be_ref[...] - s1 * scale
            acc = acc * scale + shift

        if use_act:
            acc = jnp.where(acc >= 0, acc, SLOPE * acc)               # LeakyReLU

        if fuse_final:
            # Final 4x4 conv (single 1x1 output) on the resident activations;
            # garbage rows / padding lanes carry zero weight.
            prod = acc * wf_ref[...]
            col = jnp.sum(prod, axis=0, keepdims=True)                # (1, Cp)
            s = jnp.sum(col, axis=1, keepdims=True)                   # (1, 1)
            o_ref[0] = (s + bf_ref[...]).astype(o_ref.dtype)          # (1, Cp)
        else:
            o_ref[0] = acc.astype(o_ref.dtype)                        # lane-dense

    return kernel


def fused_conv_pallas(x_flat, w_pack, dims, *, bias=None, gamma=None, beta=None,
                      mask=None, final_w=None, final_b=None, use_act=True,
                      out_dtype=COMPUTE_DTYPE):
    N, R, C4 = x_flat.shape
    Cp = w_pack.shape[-1]
    Ho, Wo, _H2, W2, L = dims
    use_bias = bias is not None
    use_norm = gamma is not None
    fuse_final = final_w is not None

    kernel = _make_kernel(L, W2, Ho * Wo, use_bias, use_norm, use_act, fuse_final)

    # Weight / bias / norm operands have constant index maps; at production
    # scale they would be single-buffered (pipeline_mode=pl.Buffered(1)) to
    # halve their VMEM footprint -- negligible here (all < 128 KiB).
    in_specs = [
        pl.BlockSpec((1, R, C4), lambda n: (n, 0, 0)),
        pl.BlockSpec((4, C4, Cp), lambda n: (0, 0, 0)),
    ]
    args = [x_flat, w_pack]
    if use_bias:
        in_specs.append(pl.BlockSpec((1, Cp), lambda n: (0, 0)))
        args.append(bias)
    if use_norm:
        in_specs += [pl.BlockSpec((1, Cp), lambda n: (0, 0)),
                     pl.BlockSpec((1, Cp), lambda n: (0, 0)),
                     pl.BlockSpec((L, 1), lambda n: (0, 0))]
        args += [gamma, beta, mask]
    if fuse_final:
        in_specs += [pl.BlockSpec((L, Cp), lambda n: (0, 0)),
                     pl.BlockSpec((1, Cp), lambda n: (0, 0))]
        args += [final_w, final_b]

    if fuse_final:
        out_shape = jax.ShapeDtypeStruct((N, 1, Cp), jnp.float32)
        out_spec = pl.BlockSpec((1, 1, Cp), lambda n: (n, 0, 0))
    else:
        out_shape = jax.ShapeDtypeStruct((N, L, Cp), out_dtype)
        out_spec = pl.BlockSpec((1, L, Cp), lambda n: (n, 0, 0))

    return pl.pallas_call(
        kernel,
        out_shape=out_shape,
        grid=(N,),
        in_specs=in_specs,
        out_specs=out_spec,
        compiler_params=pltpu.CompilerParams(
            dimension_semantics=("parallel",),
            vmem_limit_bytes=32 * 1024 * 1024),
    )(*args)


# ---------------------------------------------------------------------------
# Host-side layout plumbing (pad / space-to-depth reshape / parameter packing)
# ---------------------------------------------------------------------------
def _prep_input(x_nhwc, pad):
    """Zero-pad, space-to-depth(2) (pure reshape/transpose, no duplication),
    flatten spatial, pad rows, cast to the MXU operand dtype."""
    N, H, W, C = x_nhwc.shape
    if pad:
        x_nhwc = jnp.pad(x_nhwc, ((0, 0), (pad, pad), (pad, pad), (0, 0)))
    Hp, Wp = H + 2 * pad, W + 2 * pad
    assert Hp % 2 == 0 and Wp % 2 == 0
    H2, W2 = Hp // 2, Wp // 2
    Ho, Wo = H2 - 1, W2 - 1                 # conv output spatial (k=4, s=2)
    xs = x_nhwc.reshape(N, H2, 2, W2, 2, C)
    xs = xs.transpose(0, 1, 3, 2, 4, 5).reshape(N, H2 * W2, 4 * C)
    L = Ho * W2                             # padded-width output rows
    R = _round_up(H2 * W2 + 1, 8)           # max row index touched is H2*W2
    xs = jnp.pad(xs, ((0, 0), (0, R - H2 * W2), (0, 0)))
    return xs.astype(COMPUTE_DTYPE), (Ho, Wo, H2, W2, L)


def _prep_weight(w_hwio, cp):
    """(4,4,Cin,Cout) HWIO -> (4, 4*Cin, cp) matching the s2d channel order,
    zero-padded to cp output lanes (lane-dense outputs)."""
    _, _, cin, cout = w_hwio.shape
    w = w_hwio.reshape(2, 2, 2, 2, cin, cout)        # (a, hs, b, ws, c, o)
    w = w.transpose(0, 2, 1, 3, 4, 5)                # (a, b, hs, ws, c, o)
    w = w.reshape(4, 4 * cin, cout)
    w = jnp.pad(w, ((0, 0), (0, 0), (0, cp - cout)))
    return w.astype(COMPUTE_DTYPE)


def _pad_vec(v, cp):
    return jnp.pad(v.astype(jnp.float32), ((0, 0), (0, cp - v.shape[1])))


def _valid_mask(L, W2, Wo):
    rows = ((np.arange(L) % W2) < Wo).astype(np.float32)
    return jnp.asarray(rows[:, None])                 # (L, 1)


# ---------------------------------------------------------------------------
# Parameter init (deterministic, synthetic) — shapes follow Critic.__init__
# ---------------------------------------------------------------------------
def init_critic_params(key, img_channels, features_c):
    fc = features_c
    chans = [(img_channels, fc), (fc, 2 * fc), (2 * fc, 4 * fc),
             (4 * fc, 8 * fc), (8 * fc, 1)]
    params = []
    for i, (cin, cout) in enumerate(chans):
        key, kw, kb, kg, kbe = jax.random.split(key, 5)
        w = (jax.random.normal(kw, (KSIZE, KSIZE, cin, cout), jnp.float32)
             * (1.0 / np.sqrt(KSIZE * KSIZE * cin)))
        layer = {"w": w}
        if i in (0, 4):  # plain Conv2d with bias (first and last layers)
            layer["bias"] = jax.random.normal(kb, (1, cout), jnp.float32) * 0.1
        else:            # _block: conv(bias=False) + InstanceNorm2d(affine)
            layer["gamma"] = 1.0 + 0.1 * jax.random.normal(kg, (1, cout), jnp.float32)
            layer["beta"] = 0.1 * jax.random.normal(kbe, (1, cout), jnp.float32)
        params.append(layer)
    return params


# ---------------------------------------------------------------------------
# Full Critic forward (Pallas path)
# ---------------------------------------------------------------------------
def critic_forward(params, x_nchw):
    x = jnp.transpose(x_nchw, (0, 2, 3, 1)).astype(jnp.float32)    # NCHW -> NHWC
    N = x.shape[0]

    # Layers 0-2: Conv(+bias)+LReLU  /  Conv+InstanceNorm+LReLU, one kernel each.
    for li in range(3):
        layer = params[li]
        cout = layer["w"].shape[-1]
        cp = _round_up(cout, LANES)
        x_flat, dims = _prep_input(x, pad=1)
        Ho, Wo, _H2, W2, L = dims
        w_pack = _prep_weight(layer["w"], cp)
        kwargs = {}
        if "bias" in layer:
            kwargs["bias"] = _pad_vec(layer["bias"], cp)
        else:
            kwargs["gamma"] = _pad_vec(layer["gamma"], cp)
            kwargs["beta"] = _pad_vec(layer["beta"], cp)
            kwargs["mask"] = _valid_mask(L, W2, Wo)
        y = fused_conv_pallas(x_flat, w_pack, dims, use_act=True,
                              out_dtype=COMPUTE_DTYPE, **kwargs)
        # lane-dense padded slab (bf16) -> true NHWC activations for next layer
        x = y.reshape(N, Ho, W2, cp)[:, :, :Wo, :cout]

    # Layer 3 (_block) fused with the final Conv2d (1x1 spatial, Cout=1).
    l3, l4 = params[3], params[4]
    cout3 = l3["w"].shape[-1]
    cp = _round_up(cout3, LANES)
    x_flat, dims = _prep_input(x, pad=1)
    Ho, Wo, _H2, W2, L = dims
    assert Ho == KSIZE and Wo == KSIZE, \
        "final-conv fusion expects a 4x4 pre-final map (64x64 input)"
    w_pack = _prep_weight(l3["w"], cp)
    wf = jnp.zeros((Ho, W2, cp), jnp.float32)
    wf = wf.at[:, :Wo, :cout3].set(l4["w"][:, :, :, 0])
    wf = wf.reshape(L, cp)
    bf = jnp.broadcast_to(l4["bias"][0, 0], (1, cp)).astype(jnp.float32)
    score = fused_conv_pallas(
        x_flat, w_pack, dims, use_act=True,
        gamma=_pad_vec(l3["gamma"], cp), beta=_pad_vec(l3["beta"], cp),
        mask=_valid_mask(L, W2, Wo),
        final_w=wf, final_b=bf)
    return score[:, 0, 0].reshape(N, 1, 1, 1)                       # NCHW (N,1,1,1)


# ---------------------------------------------------------------------------
# Pure-JAX reference at the same compute precision (bf16 MXU operands for the
# first four convs, f32 for the fused final conv) for the sanity check.
# ---------------------------------------------------------------------------
def critic_forward_ref(params, x_nchw):
    x = jnp.transpose(x_nchw, (0, 2, 3, 1)).astype(jnp.float32)
    cfg = [(1, True), (1, True), (1, True), (1, True), (0, False)]
    for idx, (layer, (pad, act)) in enumerate(zip(params, cfg)):
        w = layer["w"]
        if idx < 4:
            lhs, rhs = x.astype(COMPUTE_DTYPE), w.astype(COMPUTE_DTYPE)
        else:
            lhs, rhs = x, w
        y = jax.lax.conv_general_dilated(
            lhs, rhs, window_strides=(2, 2),
            padding=[(pad, pad), (pad, pad)],
            dimension_numbers=("NHWC", "HWIO", "NHWC"),
            preferred_element_type=jnp.float32)
        if "bias" in layer:
            y = y + layer["bias"].reshape(1, 1, 1, -1)
        if "gamma" in layer:
            mean = jnp.mean(y, axis=(1, 2), keepdims=True)
            var = jnp.mean((y - mean) ** 2, axis=(1, 2), keepdims=True)
            y = (y - mean) * jax.lax.rsqrt(var + EPS)
            y = (y * layer["gamma"].reshape(1, 1, 1, -1)
                 + layer["beta"].reshape(1, 1, 1, -1))
        if act:
            y = jnp.where(y >= 0, y, SLOPE * y)
        x = y
    return jnp.transpose(x, (0, 3, 1, 2))


if __name__ == "__main__":
    # 64x64 input: five stride-2 convs (last one pad=0) reduce to a 1x1 score.
    batch, img_channels, features_c, hw = 2, 3, 4, 64

    key = jax.random.PRNGKey(0)
    key, kx = jax.random.split(key)
    x = jax.random.normal(kx, (batch, img_channels, hw, hw), jnp.float32)
    params = init_critic_params(key, img_channels, features_c)

    out = jax.block_until_ready(jax.jit(critic_forward)(params, x))
    assert out.shape == (batch, 1, 1, 1), out.shape

    ref = jax.block_until_ready(jax.jit(critic_forward_ref)(params, x))
    np.testing.assert_allclose(np.asarray(out), np.asarray(ref),
                               rtol=1e-2, atol=1e-2)
    print("KERNEL_OK")
</pallas_src>

<mosaic_0001>
module attributes {stable_mosaic.version = 11 : i64} {
  func.func @kernel(%arg0: i32, %arg1: memref<1x1096x12xbf16, #tpu.memory_space<vmem>>, %arg2: memref<4x12x128xbf16, #tpu.memory_space<vmem>>, %arg3: memref<1x128xf32, #tpu.memory_space<vmem>>, %arg4: memref<1x1056x128xbf16, #tpu.memory_space<vmem>>) attributes {dimension_semantics = [#tpu.dimension_semantics<parallel>], iteration_bounds = array<i64: 2>, scalar_prefetch = 0 : i64, scratch_operands = 0 : i64, tpu.core_type = #tpu.core_type<tc>, window_params = [{transform_indices = @transform_0, window_bounds = array<i64: 1, 1096, 12>}, {pipeline_mode = #tpu.pipeline_mode<synchronous>, transform_indices = @transform_1, window_bounds = array<i64: 4, 12, 128>}, {pipeline_mode = #tpu.pipeline_mode<synchronous>, transform_indices = @transform_2, window_bounds = array<i64: 1, 128>}, {transform_indices = @transform_3, window_bounds = array<i64: 1, 1056, 128>}]} {
    %c0 = arith.constant 0 : index
    %c0_0 = arith.constant 0 : index
    %c0_1 = arith.constant 0 : index
    %0 = vector.load %arg1[%c0, %c0_0, %c0_1] : memref<1x1096x12xbf16, #tpu.memory_space<vmem>>, vector<1x1056x12xbf16>
    %1 = vector.shape_cast %0 : vector<1x1056x12xbf16> to vector<1056x12xbf16>
    %c0_2 = arith.constant 0 : index
    %c0_3 = arith.constant 0 : index
    %c0_4 = arith.constant 0 : index
    %2 = vector.load %arg2[%c0_2, %c0_3, %c0_4] : memref<4x12x128xbf16, #tpu.memory_space<vmem>>, vector<1x12x128xbf16>
    %3 = vector.shape_cast %2 : vector<1x12x128xbf16> to vector<12x128xbf16>
    %cst = arith.constant dense<0.000000e+00> : vector<1056x128xf32>
    %4 = tpu.matmul %1, %3, %cst {dimension_numbers = #tpu.dot_dimension_numbers<[1], [0], [0], [1], [0, 0, 1, 1], [], []>} : vector<1056x12xbf16>, vector<12x128xbf16>, vector<1056x128xf32> -> vector<1056x128xf32>
    %c0_5 = arith.constant 0 : index
    %c1 = arith.constant 1 : index
    %c0_6 = arith.constant 0 : index
    %5 = vector.load %arg1[%c0_5, %c1, %c0_6] : memref<1x1096x12xbf16, #tpu.memory_space<vmem>>, vector<1x1056x12xbf16>
    %6 = vector.shape_cast %5 : vector<1x1056x12xbf16> to vector<1056x12xbf16>
    %c1_7 = arith.constant 1 : index
    %c0_8 = arith.constant 0 : index
    %c0_9 = arith.constant 0 : index
    %7 = vector.load %arg2[%c1_7, %c0_8, %c0_9] : memref<4x12x128xbf16, #tpu.memory_space<vmem>>, vector<1x12x128xbf16>
    %8 = vector.shape_cast %7 : vector<1x12x128xbf16> to vector<12x128xbf16>
    %cst_10 = arith.constant dense<0.000000e+00> : vector<1056x128xf32>
    %9 = tpu.matmul %6, %8, %cst_10 {dimension_numbers = #tpu.dot_dimension_numbers<[1], [0], [0], [1], [0, 0, 1, 1], [], []>} : vector<1056x12xbf16>, vector<12x128xbf16>, vector<1056x128xf32> -> vector<1056x128xf32>
    %10 = arith.addf %4, %9 : vector<1056x128xf32>
    %c0_11 = arith.constant 0 : index
    %c33 = arith.constant 33 : index
    %c0_12 = arith.constant 0 : index
    %11 = vector.load %arg1[%c0_11, %c33, %c0_12] : memref<1x1096x12xbf16, #tpu.memory_space<vmem>>, vector<1x1056x12xbf16>
    %12 = vector.shape_cast %11 : vector<1x1056x12xbf16> to vector<1056x12xbf16>
    %c2 = arith.constant 2 : index
    %c0_13 = arith.constant 0 : index
    %c0_14 = arith.constant 0 : index
    %13 = vector.load %arg2[%c2, %c0_13, %c0_14] : memref<4x12x128xbf16, #tpu.memory_space<vmem>>, vector<1x12x128xbf16>
    %14 = vector.shape_cast %13 : vector<1x12x128xbf16> to vector<12x128xbf16>
    %cst_15 = arith.constant dense<0.000000e+00> : vector<1056x128xf32>
    %15 = tpu.matmul %12, %14, %cst_15 {dimension_numbers = #tpu.dot_dimension_numbers<[1], [0], [0], [1], [0, 0, 1, 1], [], []>} : vector<1056x12xbf16>, vector<12x128xbf16>, vector<1056x128xf32> -> vector<1056x128xf32>
    %16 = arith.addf %10, %15 : vector<1056x128xf32>
    %c0_16 = arith.constant 0 : index
    %c34 = arith.constant 34 : index
    %c0_17 = arith.constant 0 : index
    %17 = vector.load %arg1[%c0_16, %c34, %c0_17] : memref<1x1096x12xbf16, #tpu.memory_space<vmem>>, vector<1x1056x12xbf16>
    %18 = vector.shape_cast %17 : vector<1x1056x12xbf16> to vector<1056x12xbf16>
    %c3 = arith.constant 3 : index
    %c0_18 = arith.constant 0 : index
    %c0_19 = arith.constant 0 : index
    %19 = vector.load %arg2[%c3, %c0_18, %c0_19] : memref<4x12x128xbf16, #tpu.memory_space<vmem>>, vector<1x12x128xbf16>
    %20 = vector.shape_cast %19 : vector<1x12x128xbf16> to vector<12x128xbf16>
    %cst_20 = arith.constant dense<0.000000e+00> : vector<1056x128xf32>
    %21 = tpu.matmul %18, %20, %cst_20 {dimension_numbers = #tpu.dot_dimension_numbers<[1], [0], [0], [1], [0, 0, 1, 1], [], []>} : vector<1056x12xbf16>, vector<12x128xbf16>, vector<1056x128xf32> -> vector<1056x128xf32>
    %22 = arith.addf %16, %21 : vector<1056x128xf32>
    %c0_21 = arith.constant 0 : index
    %c0_22 = arith.constant 0 : index
    %23 = vector.load %arg3[%c0_21, %c0_22] : memref<1x128xf32, #tpu.memory_space<vmem>>, vector<1x128xf32>
    %24 = vector.broadcast %23 : vector<1x128xf32> to vector<1056x128xf32>
    %25 = arith.addf %22, %24 : vector<1056x128xf32>
    %cst_23 = arith.constant 0.000000e+00 : f32
    %26 = vector.broadcast %cst_23 : f32 to vector<1056x128xf32>
    %27 = arith.cmpf oge, %25, %26 : vector<1056x128xf32>
    %cst_24 = arith.constant 2.000000e-01 : f32
    %28 = vector.broadcast %cst_24 : f32 to vector<1056x128xf32>
    %29 = arith.mulf %28, %25 : vector<1056x128xf32>
    %30 = arith.select %27, %25, %29 : vector<1056x128xi1>, vector<1056x128xf32>
    %31 = arith.truncf %30 : vector<1056x128xf32> to vector<1056x128xbf16>
    %c0_25 = arith.constant 0 : index
    %c0_26 = arith.constant 0 : index
    %c0_27 = arith.constant 0 : index
    %32 = vector.load %arg4[%c0_25, %c0_26, %c0_27] : memref<1x1056x128xbf16, #tpu.memory_space<vmem>>, vector<1x1056x128xbf16>
    %33 = vector.shape_cast %32 : vector<1x1056x128xbf16> to vector<1056x128xbf16>
    %34 = vector.shape_cast %31 : vector<1056x128xbf16> to vector<1x1056x128xbf16>
    tpu.vector_store %arg4[%c0_25, %c0_26, %c0_27], %34 {strides = array<i32>} : memref<1x1056x128xbf16, #tpu.memory_space<vmem>>, vector<1x1056x128xbf16>,
    return
  }
  func.func @transform_0(%arg0: i32) -> (i32, i32, i32) {
    %c0_i32 = arith.constant 0 : i32
    %c0_i32_0 = arith.constant 0 : i32
    %c0_i32_1 = arith.constant 0 : i32
    return %arg0, %c0_i32, %c0_i32_0 : i32, i32, i32
  }
  func.func @transform_1(%arg0: i32) -> (i32, i32, i32) {
    %c0_i32 = arith.constant 0 : i32
    %c0_i32_0 = arith.constant 0 : i32
    %c0_i32_1 = arith.constant 0 : i32
    %c0_i32_2 = arith.constant 0 : i32
    return %c0_i32, %c0_i32_0, %c0_i32_1 : i32, i32, i32
  }
  func.func @transform_2(%arg0: i32) -> (i32, i32) {
    %c0_i32 = arith.constant 0 : i32
    %c0_i32_0 = arith.constant 0 : i32
    %c0_i32_1 = arith.constant 0 : i32
    return %c0_i32, %c0_i32_0 : i32, i32
  }
  func.func @transform_3(%arg0: i32) -> (i32, i32, i32) {
    %c0_i32 = arith.constant 0 : i32
    %c0_i32_0 = arith.constant 0 : i32
    %c0_i32_1 = arith.constant 0 : i32
    return %arg0, %c0_i32, %c0_i32_0 : i32, i32, i32
  }
}

module attributes {stable_mosaic.version = 11 : i64} {
  func.func @kernel(%arg0: i32, %arg1: memref<1x296x16xbf16, #tpu.memory_space<vmem>>, %arg2: memref<4x16x128xbf16, #tpu.memory_space<vmem>>, %arg3: memref<1x128xf32, #tpu.memory_space<vmem>>, %arg4: memref<1x128xf32, #tpu.memory_space<vmem>>, %arg5: memref<272x1xf32, #tpu.memory_space<vmem>>, %arg6: memref<1x272x128xbf16, #tpu.memory_space<vmem>>) attributes {dimension_semantics = [#tpu.dimension_semantics<parallel>], iteration_bounds = array<i64: 2>, scalar_prefetch = 0 : i64, scratch_operands = 0 : i64, tpu.core_type = #tpu.core_type<tc>, window_params = [{transform_indices = @transform_0, window_bounds = array<i64: 1, 296, 16>}, {pipeline_mode = #tpu.pipeline_mode<synchronous>, transform_indices = @transform_1, window_bounds = array<i64: 4, 16, 128>}, {pipeline_mode = #tpu.pipeline_mode<synchronous>, transform_indices = @transform_2, window_bounds = array<i64: 1, 128>}, {pipeline_mode = #tpu.pipeline_mode<synchronous>, transform_indices = @transform_3, window_bounds = array<i64: 1, 128>}, {pipeline_mode = #tpu.pipeline_mode<synchronous>, transform_indices = @transform_4, window_bounds = array<i64: 272, 1>}, {transform_indices = @transform_5, window_bounds = array<i64: 1, 272, 128>}]} {
    %c0 = arith.constant 0 : index
    %c0_0 = arith.constant 0 : index
    %c0_1 = arith.constant 0 : index
    %0 = vector.load %arg1[%c0, %c0_0, %c0_1] : memref<1x296x16xbf16, #tpu.memory_space<vmem>>, vector<1x272x16xbf16>
    %1 = vector.shape_cast %0 : vector<1x272x16xbf16> to vector<272x16xbf16>
    %c0_2 = arith.constant 0 : index
    %c0_3 = arith.constant 0 : index
    %c0_4 = arith.constant 0 : index
    %2 = vector.load %arg2[%c0_2, %c0_3, %c0_4] : memref<4x16x128xbf16, #tpu.memory_space<vmem>>, vector<1x16x128xbf16>
    %3 = vector.shape_cast %2 : vector<1x16x128xbf16> to vector<16x128xbf16>
    %cst = arith.constant dense<0.000000e+00> : vector<272x128xf32>
    %4 = tpu.matmul %1, %3, %cst {dimension_numbers = #tpu.dot_dimension_numbers<[1], [0], [0], [1], [0, 0, 1, 1], [], []>} : vector<272x16xbf16>, vector<16x128xbf16>, vector<272x128xf32> -> vector<272x128xf32>
    %c0_5 = arith.constant 0 : index
    %c1 = arith.constant 1 : index
    %c0_6 = arith.constant 0 : index
    %5 = vector.load %arg1[%c0_5, %c1, %c0_6] : memref<1x296x16xbf16, #tpu.memory_space<vmem>>, vector<1x272x16xbf16>
    %6 = vector.shape_cast %5 : vector<1x272x16xbf16> to vector<272x16xbf16>
    %c1_7 = arith.constant 1 : index
    %c0_8 = arith.constant 0 : index
    %c0_9 = arith.constant 0 : index
    %7 = vector.load %arg2[%c1_7, %c0_8, %c0_9] : memref<4x16x128xbf16, #tpu.memory_space<vmem>>, vector<1x16x128xbf16>
    %8 = vector.shape_cast %7 : vector<1x16x128xbf16> to vector<16x128xbf16>
    %cst_10 = arith.constant dense<0.000000e+00> : vector<272x128xf32>
    %9 = tpu.matmul %6, %8, %cst_10 {dimension_numbers = #tpu.dot_dimension_numbers<[1], [0], [0], [1], [0, 0, 1, 1], [], []>} : vector<272x16xbf16>, vector<16x128xbf16>, vector<272x128xf32> -> vector<272x128xf32>
    %10 = arith.addf %4, %9 : vector<272x128xf32>
    %c0_11 = arith.constant 0 : index
    %c17 = arith.constant 17 : index
    %c0_12 = arith.constant 0 : index
    %11 = vector.load %arg1[%c0_11, %c17, %c0_12] : memref<1x296x16xbf16, #tpu.memory_space<vmem>>, vector<1x272x16xbf16>
    %12 = vector.shape_cast %11 : vector<1x272x16xbf16> to vector<272x16xbf16>
    %c2 = arith.constant 2 : index
    %c0_13 = arith.constant 0 : index
    %c0_14 = arith.constant 0 : index
    %13 = vector.load %arg2[%c2, %c0_13, %c0_14] : memref<4x16x128xbf16, #tpu.memory_space<vmem>>, vector<1x16x128xbf16>
    %14 = vector.shape_cast %13 : vector<1x16x128xbf16> to vector<16x128xbf16>
    %cst_15 = arith.constant dense<0.000000e+00> : vector<272x128xf32>
    %15 = tpu.matmul %12, %14, %cst_15 {dimension_numbers = #tpu.dot_dimension_numbers<[1], [0], [0], [1], [0, 0, 1, 1], [], []>} : vector<272x16xbf16>, vector<16x128xbf16>, vector<272x128xf32> -> vector<272x128xf32>
    %16 = arith.addf %10, %15 : vector<272x128xf32>
    %c0_16 = arith.constant 0 : index
    %c18 = arith.constant 18 : index
    %c0_17 = arith.constant 0 : index
    %17 = vector.load %arg1[%c0_16, %c18, %c0_17] : memref<1x296x16xbf16, #tpu.memory_space<vmem>>, vector<1x272x16xbf16>
    %18 = vector.shape_cast %17 : vector<1x272x16xbf16> to vector<272x16xbf16>
    %c3 = arith.constant 3 : index
    %c0_18 = arith.constant 0 : index
    %c0_19 = arith.constant 0 : index
    %19 = vector.load %arg2[%c3, %c0_18, %c0_19] : memref<4x16x128xbf16, #tpu.memory_space<vmem>>, vector<1x16x128xbf16>
    %20 = vector.shape_cast %19 : vector<1x16x128xbf16> to vector<16x128xbf16>
    %cst_20 = arith.constant dense<0.000000e+00> : vector<272x128xf32>
    %21 = tpu.matmul %18, %20, %cst_20 {dimension_numbers = #tpu.dot_dimension_numbers<[1], [0], [0], [1], [0, 0, 1, 1], [], []>} : vector<272x16xbf16>, vector<16x128xbf16>, vector<272x128xf32> -> vector<272x128xf32>
    %22 = arith.addf %16, %21 : vector<272x128xf32>
    %c0_21 = arith.constant 0 : index
    %c0_22 = arith.constant 0 : index
    %23 = vector.load %arg5[%c0_21, %c0_22] : memref<272x1xf32, #tpu.memory_space<vmem>>, vector<272x1xf32>
    %24 = vector.broadcast %23 : vector<272x1xf32> to vector<272x128xf32>
    %25 = arith.mulf %22, %24 : vector<272x128xf32>
    %cst_23 = arith.constant dense<0.000000e+00> : vector<128xf32>
    %26 = vector.multi_reduction <add>, %25, %cst_23 [0] : vector<272x128xf32> to vector<128xf32>
    %27 = vector.shape_cast %26 : vector<128xf32> to vector<1x128xf32>
    %cst_24 = arith.constant 3.906250e-03 : f32
    %28 = vector.broadcast %cst_24 : f32 to vector<1x128xf32>
    %29 = arith.mulf %27, %28 : vector<1x128xf32>
    %30 = arith.mulf %22, %22 : vector<272x128xf32>
    %31 = vector.broadcast %23 : vector<272x1xf32> to vector<272x128xf32>
    %32 = arith.mulf %30, %31 : vector<272x128xf32>
    %cst_25 = arith.constant dense<0.000000e+00> : vector<128xf32>
    %33 = vector.multi_reduction <add>, %32, %cst_25 [0] : vector<272x128xf32> to vector<128xf32>
    %34 = vector.shape_cast %33 : vector<128xf32> to vector<1x128xf32>
    %cst_26 = arith.constant 3.906250e-03 : f32
    %35 = vector.broadcast %cst_26 : f32 to vector<1x128xf32>
    %36 = arith.mulf %34, %35 : vector<1x128xf32>
    %37 = arith.mulf %29, %29 : vector<1x128xf32>
    %38 = arith.subf %36, %37 : vector<1x128xf32>
    %c0_27 = arith.constant 0 : index
    %c0_28 = arith.constant 0 : index
    %39 = vector.load %arg3[%c0_27, %c0_28] : memref<1x128xf32, #tpu.memory_space<vmem>>, vector<1x128xf32>
    %cst_29 = arith.constant 9.99999974E-6 : f32
    %40 = vector.broadcast %cst_29 : f32 to vector<1x128xf32>
    %41 = arith.addf %38, %40 : vector<1x128xf32>
    %42 = math.rsqrt %41 : vector<1x128xf32>
    %43 = arith.mulf %39, %42 : vector<1x128xf32>
    %c0_30 = arith.constant 0 : index
    %c0_31 = arith.constant 0 : index
    %44 = vector.load %arg4[%c0_30, %c0_31] : memref<1x128xf32, #tpu.memory_space<vmem>>, vector<1x128xf32>
    %45 = arith.mulf %29, %43 : vector<1x128xf32>
    %46 = arith.subf %44, %45 : vector<1x128xf32>
    %47 = vector.broadcast %43 : vector<1x128xf32> to vector<272x128xf32>
    %48 = arith.mulf %22, %47 : vector<272x128xf32>
    %49 = vector.broadcast %46 : vector<1x128xf32> to vector<272x128xf32>
    %50 = arith.addf %48, %49 : vector<272x128xf32>
    %cst_32 = arith.constant 0.000000e+00 : f32
    %51 = vector.broadcast %cst_32 : f32 to vector<272x128xf32>
    %52 = arith.cmpf oge, %50, %51 : vector<272x128xf32>
    %cst_33 = arith.constant 2.000000e-01 : f32
    %53 = vector.broadcast %cst_33 : f32 to vector<272x128xf32>
    %54 = arith.mulf %53, %50 : vector<272x128xf32>
    %55 = arith.select %52, %50, %54 : vector<272x128xi1>, vector<272x128xf32>
    %56 = arith.truncf %55 : vector<272x128xf32> to vector<272x128xbf16>
    %c0_34 = arith.constant 0 : index
    %c0_35 = arith.constant 0 : index
    %c0_36 = arith.constant 0 : index
    %57 = vector.load %arg6[%c0_34, %c0_35, %c0_36] : memref<1x272x128xbf16, #tpu.memory_space<vmem>>, vector<1x272x128xbf16>
    %58 = vector.shape_cast %57 : vector<1x272x128xbf16> to vector<272x128xbf16>
    %59 = vector.shape_cast %56 : vector<272x128xbf16> to vector<1x272x128xbf16>
    tpu.vector_store %arg6[%c0_34, %c0_35, %c0_36], %59 {strides = array<i32>} : memref<1x272x128xbf16, #tpu.memory_space<vmem>>, vector<1x272x128xbf16>,
    return
  }
  func.func @transform_0(%arg0: i32) -> (i32, i32, i32) {
    %c0_i32 = arith.constant 0 : i32
    %c0_i32_0 = arith.constant 0 : i32
    %c0_i32_1 = arith.constant 0 : i32
    return %arg0, %c0_i32, %c0_i32_0 : i32, i32, i32
  }
  func.func @transform_1(%arg0: i32) -> (i32, i32, i32) {
    %c0_i32 = arith.constant 0 : i32
    %c0_i32_0 = arith.constant 0 : i32
    %c0_i32_1 = arith.constant 0 : i32
    %c0_i32_2 = arith.constant 0 : i32
    return %c0_i32, %c0_i32_0, %c0_i32_1 : i32, i32, i32
  }
  func.func @transform_2(%arg0: i32) -> (i32, i32) {
    %c0_i32 = arith.constant 0 : i32
    %c0_i32_0 = arith.constant 0 : i32
    %c0_i32_1 = arith.constant 0 : i32
    return %c0_i32, %c0_i32_0 : i32, i32
  }
  func.func @transform_3(%arg0: i32) -> (i32, i32) {
    %c0_i32 = arith.constant 0 : i32
    %c0_i32_0 = arith.constant 0 : i32
    %c0_i32_1 = arith.constant 0 : i32
    return %c0_i32, %c0_i32_0 : i32, i32
  }
  func.func @transform_4(%arg0: i32) -> (i32, i32) {
    %c0_i32 = arith.constant 0 : i32
    %c0_i32_0 = arith.constant 0 : i32
    %c0_i32_1 = arith.constant 0 : i32
    return %c0_i32, %c0_i32_0 : i32, i32
  }
  func.func @transform_5(%arg0: i32) -> (i32, i32, i32) {
    %c0_i32 = arith.constant 0 : i32
    %c0_i32_0 = arith.constant 0 : i32
    %c0_i32_1 = arith.constant 0 : i32
    return %arg0, %c0_i32, %c0_i32_0 : i32, i32, i32
  }
}

module attributes {stable_mosaic.version = 11 : i64} {
  func.func @kernel(%arg0: i32, %arg1: memref<1x88x32xbf16, #tpu.memory_space<vmem>>, %arg2: memref<4x32x128xbf16, #tpu.memory_space<vmem>>, %arg3: memref<1x128xf32, #tpu.memory_space<vmem>>, %arg4: memref<1x128xf32, #tpu.memory_space<vmem>>, %arg5: memref<72x1xf32, #tpu.memory_space<vmem>>, %arg6: memref<1x72x128xbf16, #tpu.memory_space<vmem>>) attributes {dimension_semantics = [#tpu.dimension_semantics<parallel>], iteration_bounds = array<i64: 2>, scalar_prefetch = 0 : i64, scratch_operands = 0 : i64, tpu.core_type = #tpu.core_type<tc>, window_params = [{transform_indices = @transform_0, window_bounds = array<i64: 1, 88, 32>}, {pipeline_mode = #tpu.pipeline_mode<synchronous>, transform_indices = @transform_1, window_bounds = array<i64: 4, 32, 128>}, {pipeline_mode = #tpu.pipeline_mode<synchronous>, transform_indices = @transform_2, window_bounds = array<i64: 1, 128>}, {pipeline_mode = #tpu.pipeline_mode<synchronous>, transform_indices = @transform_3, window_bounds = array<i64: 1, 128>}, {pipeline_mode = #tpu.pipeline_mode<synchronous>, transform_indices = @transform_4, window_bounds = array<i64: 72, 1>}, {transform_indices = @transform_5, window_bounds = array<i64: 1, 72, 128>}]} {
    %c0 = arith.constant 0 : index
    %c0_0 = arith.constant 0 : index
    %c0_1 = arith.constant 0 : index
    %0 = vector.load %arg1[%c0, %c0_0, %c0_1] : memref<1x88x32xbf16, #tpu.memory_space<vmem>>, vector<1x72x32xbf16>
    %1 = vector.shape_cast %0 : vector<1x72x32xbf16> to vector<72x32xbf16>
    %c0_2 = arith.constant 0 : index
    %c0_3 = arith.constant 0 : index
    %c0_4 = arith.constant 0 : index
    %2 = vector.load %arg2[%c0_2, %c0_3, %c0_4] : memref<4x32x128xbf16, #tpu.memory_space<vmem>>, vector<1x32x128xbf16>
    %3 = vector.shape_cast %2 : vector<1x32x128xbf16> to vector<32x128xbf16>
    %cst = arith.constant dense<0.000000e+00> : vector<72x128xf32>
    %4 = tpu.matmul %1, %3, %cst {dimension_numbers = #tpu.dot_dimension_numbers<[1], [0], [0], [1], [0, 0, 1, 1], [], []>} : vector<72x32xbf16>, vector<32x128xbf16>, vector<72x128xf32> -> vector<72x128xf32>
    %c0_5 = arith.constant 0 : index
    %c1 = arith.constant 1 : index
    %c0_6 = arith.constant 0 : index
    %5 = vector.load %arg1[%c0_5, %c1, %c0_6] : memref<1x88x32xbf16, #tpu.memory_space<vmem>>, vector<1x72x32xbf16>
    %6 = vector.shape_cast %5 : vector<1x72x32xbf16> to vector<72x32xbf16>
    %c1_7 = arith.constant 1 : index
    %c0_8 = arith.constant 0 : index
    %c0_9 = arith.constant 0 : index
    %7 = vector.load %arg2[%c1_7, %c0_8, %c0_9] : memref<4x32x128xbf16, #tpu.memory_space<vmem>>, vector<1x32x128xbf16>
    %8 = vector.shape_cast %7 : vector<1x32x128xbf16> to vector<32x128xbf16>
    %cst_10 = arith.constant dense<0.000000e+00> : vector<72x128xf32>
    %9 = tpu.matmul %6, %8, %cst_10 {dimension_numbers = #tpu.dot_dimension_numbers<[1], [0], [0], [1], [0, 0, 1, 1], [], []>} : vector<72x32xbf16>, vector<32x128xbf16>, vector<72x128xf32> -> vector<72x128xf32>
    %10 = arith.addf %4, %9 : vector<72x128xf32>
    %c0_11 = arith.constant 0 : index
    %c9 = arith.constant 9 : index
    %c0_12 = arith.constant 0 : index
    %11 = vector.load %arg1[%c0_11, %c9, %c0_12] : memref<1x88x32xbf16, #tpu.memory_space<vmem>>, vector<1x72x32xbf16>
    %12 = vector.shape_cast %11 : vector<1x72x32xbf16> to vector<72x32xbf16>
    %c2 = arith.constant 2 : index
    %c0_13 = arith.constant 0 : index
    %c0_14 = arith.constant 0 : index
    %13 = vector.load %arg2[%c2, %c0_13, %c0_14] : memref<4x32x128xbf16, #tpu.memory_space<vmem>>, vector<1x32x128xbf16>
    %14 = vector.shape_cast %13 : vector<1x32x128xbf16> to vector<32x128xbf16>
    %cst_15 = arith.constant dense<0.000000e+00> : vector<72x128xf32>
    %15 = tpu.matmul %12, %14, %cst_15 {dimension_numbers = #tpu.dot_dimension_numbers<[1], [0], [0], [1], [0, 0, 1, 1], [], []>} : vector<72x32xbf16>, vector<32x128xbf16>, vector<72x128xf32> -> vector<72x128xf32>
    %16 = arith.addf %10, %15 : vector<72x128xf32>
    %c0_16 = arith.constant 0 : index
    %c10 = arith.constant 10 : index
    %c0_17 = arith.constant 0 : index
    %17 = vector.load %arg1[%c0_16, %c10, %c0_17] : memref<1x88x32xbf16, #tpu.memory_space<vmem>>, vector<1x72x32xbf16>
    %18 = vector.shape_cast %17 : vector<1x72x32xbf16> to vector<72x32xbf16>
    %c3 = arith.constant 3 : index
    %c0_18 = arith.constant 0 : index
    %c0_19 = arith.constant 0 : index
    %19 = vector.load %arg2[%c3, %c0_18, %c0_19] : memref<4x32x128xbf16, #tpu.memory_space<vmem>>, vector<1x32x128xbf16>
    %20 = vector.shape_cast %19 : vector<1x32x128xbf16> to vector<32x128xbf16>
    %cst_20 = arith.constant dense<0.000000e+00> : vector<72x128xf32>
    %21 = tpu.matmul %18, %20, %cst_20 {dimension_numbers = #tpu.dot_dimension_numbers<[1], [0], [0], [1], [0, 0, 1, 1], [], []>} : vector<72x32xbf16>, vector<32x128xbf16>, vector<72x128xf32> -> vector<72x128xf32>
    %22 = arith.addf %16, %21 : vector<72x128xf32>
    %c0_21 = arith.constant 0 : index
    %c0_22 = arith.constant 0 : index
    %23 = vector.load %arg5[%c0_21, %c0_22] : memref<72x1xf32, #tpu.memory_space<vmem>>, vector<72x1xf32>
    %24 = vector.broadcast %23 : vector<72x1xf32> to vector<72x128xf32>
    %25 = arith.mulf %22, %24 : vector<72x128xf32>
    %cst_23 = arith.constant dense<0.000000e+00> : vector<128xf32>
    %26 = vector.multi_reduction <add>, %25, %cst_23 [0] : vector<72x128xf32> to vector<128xf32>
    %27 = vector.shape_cast %26 : vector<128xf32> to vector<1x128xf32>
    %cst_24 = arith.constant 1.562500e-02 : f32
    %28 = vector.broadcast %cst_24 : f32 to vector<1x128xf32>
    %29 = arith.mulf %27, %28 : vector<1x128xf32>
    %30 = arith.mulf %22, %22 : vector<72x128xf32>
    %31 = vector.broadcast %23 : vector<72x1xf32> to vector<72x128xf32>
    %32 = arith.mulf %30, %31 : vector<72x128xf32>
    %cst_25 = arith.constant dense<0.000000e+00> : vector<128xf32>
    %33 = vector.multi_reduction <add>, %32, %cst_25 [0] : vector<72x128xf32> to vector<128xf32>
    %34 = vector.shape_cast %33 : vector<128xf32> to vector<1x128xf32>
    %cst_26 = arith.constant 1.562500e-02 : f32
    %35 = vector.broadcast %cst_26 : f32 to vector<1x128xf32>
    %36 = arith.mulf %34, %35 : vector<1x128xf32>
    %37 = arith.mulf %29, %29 : vector<1x128xf32>
    %38 = arith.subf %36, %37 : vector<1x128xf32>
    %c0_27 = arith.constant 0 : index
    %c0_28 = arith.constant 0 : index
    %39 = vector.load %arg3[%c0_27, %c0_28] : memref<1x128xf32, #tpu.memory_space<vmem>>, vector<1x128xf32>
    %cst_29 = arith.constant 9.99999974E-6 : f32
    %40 = vector.broadcast %cst_29 : f32 to vector<1x128xf32>
    %41 = arith.addf %38, %40 : vector<1x128xf32>
    %42 = math.rsqrt %41 : vector<1x128xf32>
    %43 = arith.mulf %39, %42 : vector<1x128xf32>
    %c0_30 = arith.constant 0 : index
    %c0_31 = arith.constant 0 : index
    %44 = vector.load %arg4[%c0_30, %c0_31] : memref<1x128xf32, #tpu.memory_space<vmem>>, vector<1x128xf32>
    %45 = arith.mulf %29, %43 : vector<1x128xf32>
    %46 = arith.subf %44, %45 : vector<1x128xf32>
    %47 = vector.broadcast %43 : vector<1x128xf32> to vector<72x128xf32>
    %48 = arith.mulf %22, %47 : vector<72x128xf32>
    %49 = vector.broadcast %46 : vector<1x128xf32> to vector<72x128xf32>
    %50 = arith.addf %48, %49 : vector<72x128xf32>
    %cst_32 = arith.constant 0.000000e+00 : f32
    %51 = vector.broadcast %cst_32 : f32 to vector<72x128xf32>
    %52 = arith.cmpf oge, %50, %51 : vector<72x128xf32>
    %cst_33 = arith.constant 2.000000e-01 : f32
    %53 = vector.broadcast %cst_33 : f32 to vector<72x128xf32>
    %54 = arith.mulf %53, %50 : vector<72x128xf32>
    %55 = arith.select %52, %50, %54 : vector<72x128xi1>, vector<72x128xf32>
    %56 = arith.truncf %55 : vector<72x128xf32> to vector<72x128xbf16>
    %c0_34 = arith.constant 0 : index
    %c0_35 = arith.constant 0 : index
    %c0_36 = arith.constant 0 : index
    %57 = vector.load %arg6[%c0_34, %c0_35, %c0_36] : memref<1x72x128xbf16, #tpu.memory_space<vmem>>, vector<1x72x128xbf16>
    %58 = vector.shape_cast %57 : vector<1x72x128xbf16> to vector<72x128xbf16>
    %59 = vector.shape_cast %56 : vector<72x128xbf16> to vector<1x72x128xbf16>
    tpu.vector_store %arg6[%c0_34, %c0_35, %c0_36], %59 {strides = array<i32>} : memref<1x72x128xbf16, #tpu.memory_space<vmem>>, vector<1x72x128xbf16>,
    return
  }
  func.func @transform_0(%arg0: i32) -> (i32, i32, i32) {
    %c0_i32 = arith.constant 0 : i32
    %c0_i32_0 = arith.constant 0 : i32
    %c0_i32_1 = arith.constant 0 : i32
    return %arg0, %c0_i32, %c0_i32_0 : i32, i32, i32
  }
  func.func @transform_1(%arg0: i32) -> (i32, i32, i32) {
    %c0_i32 = arith.constant 0 : i32
    %c0_i32_0 = arith.constant 0 : i32
    %c0_i32_1 = arith.constant 0 : i32
    %c0_i32_2 = arith.constant 0 : i32
    return %c0_i32, %c0_i32_0, %c0_i32_1 : i32, i32, i32
  }
  func.func @transform_2(%arg0: i32) -> (i32, i32) {
    %c0_i32 = arith.constant 0 : i32
    %c0_i32_0 = arith.constant 0 : i32
    %c0_i32_1 = arith.constant 0 : i32
    return %c0_i32, %c0_i32_0 : i32, i32
  }
  func.func @transform_3(%arg0: i32) -> (i32, i32) {
    %c0_i32 = arith.constant 0 : i32
    %c0_i32_0 = arith.constant 0 : i32
    %c0_i32_1 = arith.constant 0 : i32
    return %c0_i32, %c0_i32_0 : i32, i32
  }
  func.func @transform_4(%arg0: i32) -> (i32, i32) {
    %c0_i32 = arith.constant 0 : i32
    %c0_i32_0 = arith.constant 0 : i32
    %c0_i32_1 = arith.constant 0 : i32
    return %c0_i32, %c0_i32_0 : i32, i32
  }
  func.func @transform_5(%arg0: i32) -> (i32, i32, i32) {
    %c0_i32 = arith.constant 0 : i32
    %c0_i32_0 = arith.constant 0 : i32
    %c0_i32_1 = arith.constant 0 : i32
    return %arg0, %c0_i32, %c0_i32_0 : i32, i32, i32
  }
}

module attributes {stable_mosaic.version = 11 : i64} {
  func.func @kernel(%arg0: i32, %arg1: memref<1x32x64xbf16, #tpu.memory_space<vmem>>, %arg2: memref<4x64x128xbf16, #tpu.memory_space<vmem>>, %arg3: memref<1x128xf32, #tpu.memory_space<vmem>>, %arg4: memref<1x128xf32, #tpu.memory_space<vmem>>, %arg5: memref<20x1xf32, #tpu.memory_space<vmem>>, %arg6: memref<20x128xf32, #tpu.memory_space<vmem>>, %arg7: memref<1x128xf32, #tpu.memory_space<vmem>>, %arg8: memref<1x1x128xf32, #tpu.memory_space<vmem>>) attributes {dimension_semantics = [#tpu.dimension_semantics<parallel>], iteration_bounds = array<i64: 2>, scalar_prefetch = 0 : i64, scratch_operands = 0 : i64, tpu.core_type = #tpu.core_type<tc>, window_params = [{transform_indices = @transform_0, window_bounds = array<i64: 1, 32, 64>}, {pipeline_mode = #tpu.pipeline_mode<synchronous>, transform_indices = @transform_1, window_bounds = array<i64: 4, 64, 128>}, {pipeline_mode = #tpu.pipeline_mode<synchronous>, transform_indices = @transform_2, window_bounds = array<i64: 1, 128>}, {pipeline_mode = #tpu.pipeline_mode<synchronous>, transform_indices = @transform_3, window_bounds = array<i64: 1, 128>}, {pipeline_mode = #tpu.pipeline_mode<synchronous>, transform_indices = @transform_4, window_bounds = array<i64: 20, 1>}, {pipeline_mode = #tpu.pipeline_mode<synchronous>, transform_indices = @transform_5, window_bounds = array<i64: 20, 128>}, {pipeline_mode = #tpu.pipeline_mode<synchronous>, transform_indices = @transform_6, window_bounds = array<i64: 1, 128>}, {transform_indices = @transform_7, window_bounds = array<i64: 1, 1, 128>}]} {
    %c0 = arith.constant 0 : index
    %c0_0 = arith.constant 0 : index
    %c0_1 = arith.constant 0 : index
    %0 = vector.load %arg1[%c0, %c0_0, %c0_1] : memref<1x32x64xbf16, #tpu.memory_space<vmem>>, vector<1x20x64xbf16>
    %1 = vector.shape_cast %0 : vector<1x20x64xbf16> to vector<20x64xbf16>
    %c0_2 = arith.constant 0 : index
    %c0_3 = arith.constant 0 : index
    %c0_4 = arith.constant 0 : index
    %2 = vector.load %arg2[%c0_2, %c0_3, %c0_4] : memref<4x64x128xbf16, #tpu.memory_space<vmem>>, vector<1x64x128xbf16>
    %3 = vector.shape_cast %2 : vector<1x64x128xbf16> to vector<64x128xbf16>
    %cst = arith.constant dense<0.000000e+00> : vector<20x128xf32>
    %4 = tpu.matmul %1, %3, %cst {dimension_numbers = #tpu.dot_dimension_numbers<[1], [0], [0], [1], [0, 0, 1, 1], [], []>} : vector<20x64xbf16>, vector<64x128xbf16>, vector<20x128xf32> -> vector<20x128xf32>
    %c0_5 = arith.constant 0 : index
    %c1 = arith.constant 1 : index
    %c0_6 = arith.constant 0 : index
    %5 = vector.load %arg1[%c0_5, %c1, %c0_6] : memref<1x32x64xbf16, #tpu.memory_space<vmem>>, vector<1x20x64xbf16>
    %6 = vector.shape_cast %5 : vector<1x20x64xbf16> to vector<20x64xbf16>
    %c1_7 = arith.constant 1 : index
    %c0_8 = arith.constant 0 : index
    %c0_9 = arith.constant 0 : index
    %7 = vector.load %arg2[%c1_7, %c0_8, %c0_9] : memref<4x64x128xbf16, #tpu.memory_space<vmem>>, vector<1x64x128xbf16>
    %8 = vector.shape_cast %7 : vector<1x64x128xbf16> to vector<64x128xbf16>
    %cst_10 = arith.constant dense<0.000000e+00> : vector<20x128xf32>
    %9 = tpu.matmul %6, %8, %cst_10 {dimension_numbers = #tpu.dot_dimension_numbers<[1], [0], [0], [1], [0, 0, 1, 1], [], []>} : vector<20x64xbf16>, vector<64x128xbf16>, vector<20x128xf32> -> vector<20x128xf32>
    %10 = arith.addf %4, %9 : vector<20x128xf32>
    %c0_11 = arith.constant 0 : index
    %c5 = arith.constant 5 : index
    %c0_12 = arith.constant 0 : index
    %11 = vector.load %arg1[%c0_11, %c5, %c0_12] : memref<1x32x64xbf16, #tpu.memory_space<vmem>>, vector<1x20x64xbf16>
    %12 = vector.shape_cast %11 : vector<1x20x64xbf16> to vector<20x64xbf16>
    %c2 = arith.constant 2 : index
    %c0_13 = arith.constant 0 : index
    %c0_14 = arith.constant 0 : index
    %13 = vector.load %arg2[%c2, %c0_13, %c0_14] : memref<4x64x128xbf16, #tpu.memory_space<vmem>>, vector<1x64x128xbf16>
    %14 = vector.shape_cast %13 : vector<1x64x128xbf16> to vector<64x128xbf16>
    %cst_15 = arith.constant dense<0.000000e+00> : vector<20x128xf32>
    %15 = tpu.matmul %12, %14, %cst_15 {dimension_numbers = #tpu.dot_dimension_numbers<[1], [0], [0], [1], [0, 0, 1, 1], [], []>} : vector<20x64xbf16>, vector<64x128xbf16>, vector<20x128xf32> -> vector<20x128xf32>
    %16 = arith.addf %10, %15 : vector<20x128xf32>
    %c0_16 = arith.constant 0 : index
    %c6 = arith.constant 6 : index
    %c0_17 = arith.constant 0 : index
    %17 = vector.load %arg1[%c0_16, %c6, %c0_17] : memref<1x32x64xbf16, #tpu.memory_space<vmem>>, vector<1x20x64xbf16>
    %18 = vector.shape_cast %17 : vector<1x20x64xbf16> to vector<20x64xbf16>
    %c3 = arith.constant 3 : index
    %c0_18 = arith.constant 0 : index
    %c0_19 = arith.constant 0 : index
    %19 = vector.load %arg2[%c3, %c0_18, %c0_19] : memref<4x64x128xbf16, #tpu.memory_space<vmem>>, vector<1x64x128xbf16>
    %20 = vector.shape_cast %19 : vector<1x64x128xbf16> to vector<64x128xbf16>
    %cst_20 = arith.constant dense<0.000000e+00> : vector<20x128xf32>
    %21 = tpu.matmul %18, %20, %cst_20 {dimension_numbers = #tpu.dot_dimension_numbers<[1], [0], [0], [1], [0, 0, 1, 1], [], []>} : vector<20x64xbf16>, vector<64x128xbf16>, vector<20x128xf32> -> vector<20x128xf32>
    %22 = arith.addf %16, %21 : vector<20x128xf32>
    %c0_21 = arith.constant 0 : index
    %c0_22 = arith.constant 0 : index
    %23 = vector.load %arg5[%c0_21, %c0_22] : memref<20x1xf32, #tpu.memory_space<vmem>>, vector<20x1xf32>
    %24 = vector.broadcast %23 : vector<20x1xf32> to vector<20x128xf32>
    %25 = arith.mulf %22, %24 : vector<20x128xf32>
    %cst_23 = arith.constant dense<0.000000e+00> : vector<128xf32>
    %26 = vector.multi_reduction <add>, %25, %cst_23 [0] : vector<20x128xf32> to vector<128xf32>
    %27 = vector.shape_cast %26 : vector<128xf32> to vector<1x128xf32>
    %cst_24 = arith.constant 6.250000e-02 : f32
    %28 = vector.broadcast %cst_24 : f32 to vector<1x128xf32>
    %29 = arith.mulf %27, %28 : vector<1x128xf32>
    %30 = arith.mulf %22, %22 : vector<20x128xf32>
    %31 = vector.broadcast %23 : vector<20x1xf32> to vector<20x128xf32>
    %32 = arith.mulf %30, %31 : vector<20x128xf32>
    %cst_25 = arith.constant dense<0.000000e+00> : vector<128xf32>
    %33 = vector.multi_reduction <add>, %32, %cst_25 [0] : vector<20x128xf32> to vector<128xf32>
    %34 = vector.shape_cast %33 : vector<128xf32> to vector<1x128xf32>
    %cst_26 = arith.constant 6.250000e-02 : f32
    %35 = vector.broadcast %cst_26 : f32 to vector<1x128xf32>
    %36 = arith.mulf %34, %35 : vector<1x128xf32>
    %37 = arith.mulf %29, %29 : vector<1x128xf32>
    %38 = arith.subf %36, %37 : vector<1x128xf32>
    %c0_27 = arith.constant 0 : index
    %c0_28 = arith.constant 0 : index
    %39 = vector.load %arg3[%c0_27, %c0_28] : memref<1x128xf32, #tpu.memory_space<vmem>>, vector<1x128xf32>
    %cst_29 = arith.constant 9.99999974E-6 : f32
    %40 = vector.broadcast %cst_29 : f32 to vector<1x128xf32>
    %41 = arith.addf %38, %40 : vector<1x128xf32>
    %42 = math.rsqrt %41 : vector<1x128xf32>
    %43 = arith.mulf %39, %42 : vector<1x128xf32>
    %c0_30 = arith.constant 0 : index
    %c0_31 = arith.constant 0 : index
    %44 = vector.load %arg4[%c0_30, %c0_31] : memref<1x128xf32, #tpu.memory_space<vmem>>, vector<1x128xf32>
    %45 = arith.mulf %29, %43 : vector<1x128xf32>
    %46 = arith.subf %44, %45 : vector<1x128xf32>
    %47 = vector.broadcast %43 : vector<1x128xf32> to vector<20x128xf32>
    %48 = arith.mulf %22, %47 : vector<20x128xf32>
    %49 = vector.broadcast %46 : vector<1x128xf32> to vector<20x128xf32>
    %50 = arith.addf %48, %49 : vector<20x128xf32>
    %cst_32 = arith.constant 0.000000e+00 : f32
    %51 = vector.broadcast %cst_32 : f32 to vector<20x128xf32>
    %52 = arith.cmpf oge, %50, %51 : vector<20x128xf32>
    %cst_33 = arith.constant 2.000000e-01 : f32
    %53 = vector.broadcast %cst_33 : f32 to vector<20x128xf32>
    %54 = arith.mulf %53, %50 : vector<20x128xf32>
    %55 = arith.select %52, %50, %54 : vector<20x128xi1>, vector<20x128xf32>
    %c0_34 = arith.constant 0 : index
    %c0_35 = arith.constant 0 : index
    %56 = vector.load %arg6[%c0_34, %c0_35] : memref<20x128xf32, #tpu.memory_space<vmem>>, vector<20x128xf32>
    %57 = arith.mulf %55, %56 : vector<20x128xf32>
    %cst_36 = arith.constant dense<0.000000e+00> : vector<128xf32>
    %58 = vector.multi_reduction <add>, %57, %cst_36 [0] : vector<20x128xf32> to vector<128xf32>
    %59 = vector.shape_cast %58 : vector<128xf32> to vector<1x128xf32>
    %cst_37 = arith.constant dense<0.000000e+00> : vector<1xf32>
    %60 = vector.multi_reduction <add>, %59, %cst_37 [1] : vector<1x128xf32> to vector<1xf32>
    %61 = vector.shape_cast %60 : vector<1xf32> to vector<1x1xf32>
    %c0_38 = arith.constant 0 : index
    %c0_39 = arith.constant 0 : index
    %62 = vector.load %arg7[%c0_38, %c0_39] : memref<1x128xf32, #tpu.memory_space<vmem>>, vector<1x128xf32>
    %63 = vector.broadcast %61 : vector<1x1xf32> to vector<1x128xf32>
    %64 = arith.addf %63, %62 : vector<1x128xf32>
    %c0_40 = arith.constant 0 : index
    %c0_41 = arith.constant 0 : index
    %c0_42 = arith.constant 0 : index
    %65 = vector.load %arg8[%c0_40, %c0_41, %c0_42] : memref<1x1x128xf32, #tpu.memory_space<vmem>>, vector<1x1x128xf32>
    %66 = vector.shape_cast %65 : vector<1x1x128xf32> to vector<1x128xf32>
    %67 = vector.shape_cast %64 : vector<1x128xf32> to vector<1x1x128xf32>
    tpu.vector_store %arg8[%c0_40, %c0_41, %c0_42], %67 {strides = array<i32>} : memref<1x1x128xf32, #tpu.memory_space<vmem>>, vector<1x1x128xf32>,
    return
  }
  func.func @transform_0(%arg0: i32) -> (i32, i32, i32) {
    %c0_i32 = arith.constant 0 : i32
    %c0_i32_0 = arith.constant 0 : i32
    %c0_i32_1 = arith.constant 0 : i32
    return %arg0, %c0_i32, %c0_i32_0 : i32, i32, i32
  }
  func.func @transform_1(%arg0: i32) -> (i32, i32, i32) {
    %c0_i32 = arith.constant 0 : i32
    %c0_i32_0 = arith.constant 0 : i32
    %c0_i32_1 = arith.constant 0 : i32
    %c0_i32_2 = arith.constant 0 : i32
    return %c0_i32, %c0_i32_0, %c0_i32_1 : i32, i32, i32
  }
  func.func @transform_2(%arg0: i32) -> (i32, i32) {
    %c0_i32 = arith.constant 0 : i32
    %c0_i32_0 = arith.constant 0 : i32
    %c0_i32_1 = arith.constant 0 : i32
    return %c0_i32, %c0_i32_0 : i32, i32
  }
  func.func @transform_3(%arg0: i32) -> (i32, i32) {
    %c0_i32 = arith.constant 0 : i32
    %c0_i32_0 = arith.constant 0 : i32
    %c0_i32_1 = arith.constant 0 : i32
    return %c0_i32, %c0_i32_0 : i32, i32
  }
  func.func @transform_4(%arg0: i32) -> (i32, i32) {
    %c0_i32 = arith.constant 0 : i32
    %c0_i32_0 = arith.constant 0 : i32
    %c0_i32_1 = arith.constant 0 : i32
    return %c0_i32, %c0_i32_0 : i32, i32
  }
  func.func @transform_5(%arg0: i32) -> (i32, i32) {
    %c0_i32 = arith.constant 0 : i32
    %c0_i32_0 = arith.constant 0 : i32
    %c0_i32_1 = arith.constant 0 : i32
    return %c0_i32, %c0_i32_0 : i32, i32
  }
  func.func @transform_6(%arg0: i32) -> (i32, i32) {
    %c0_i32 = arith.constant 0 : i32
    %c0_i32_0 = arith.constant 0 : i32
    %c0_i32_1 = arith.constant 0 : i32
    return %c0_i32, %c0_i32_0 : i32, i32
  }
  func.func @transform_7(%arg0: i32) -> (i32, i32, i32) {
    %c0_i32 = arith.constant 0 : i32
    %c0_i32_0 = arith.constant 0 : i32
    %c0_i32_1 = arith.constant 0 : i32
    return %arg0, %c0_i32, %c0_i32_0 : i32, i32, i32
  }
}

</mosaic_0001>

<bundles_post_ra>
// kernel: critic_forward.4
= control target key start
LH: loop header
LB: loop body
LE: loop exit
PB: predicated region body
PF: predicated region fallthrough
CT: control target
= control target key end

     0   :  { %s6950_s12 = smov 0   ;;  %s8381_s0 = inlined_call_operand.vmem [shape: bf16[2,1096,12], index: 0, kind: input, shape index: {}]   ;;  %s8382_s1 = inlined_call_operand.vmem [shape: bf16[4,12,128], index: 1, kind: input, shape index: {}]   ;;  %s8383_s2 = inlined_call_operand.vmem [shape: f32[1,128], index: 2, kind: input, shape index: {}]   ;;  %s8384_s3 = inlined_call_operand.vmem [shape: bf16[2,1056,128], index: 3, kind: output, shape index: {}]  }
   0x1 LB: > { %s5549_s13 = sadd.s32 4294967295, %s6928_s12   ;;  %p5553_p0 = scmp.ge.s32.totalorder %s6928_s12, 1  ;;  %s6928_s12 = sphi %s6950_s12, %s13_s12  }
   0x2   : > { %p137_p1 = scmp.lt.s32.totalorder %s6928_s12, 3 }
   0x4   : > { %p138_p2 = pnand %p5553_p0, %p137_p1 }
   0x5   : > { %p161_p3 = scmp.lt.s32.totalorder (!%p138_p2), %s5549_s13, 1 }
   0x6   : > { %141 = sbr.rel (%p138_p2) target bundleno = 1219 (0x4c3), region = 32 }
   0xb   : > { %v5894_v0 = vld [vmem:[%s8382_s1] sm:$0xf]  ;;  %v6434_v1 = vld [vmem:[%s8382_s1] sm:$0x30]  ;;  %vm1380_vm0 = vcmask 1045504   ;;  %s8386_s13 = smov (!%p161_p3, %s5549_s13), 1 }
   0xc   : > { %v5895_v2 = vor.u32 %v6434_v1, %v5894_v0  ;;  %v6298_v3 = vld [vmem:[%s8382_s1 + $0x18] sm:$0xf]  ;;  %v6502_v4 = vld [vmem:[%s8382_s1 + $0x18] sm:$0x30]  ;;  %v6226_v6 = vld [vmem:[%s8382_s1 + $0x10] sm:$0xf] }
   0xd   : > { %v6299_v5 = vor.u32 %v6502_v4, %v6298_v3  ;;  %v6501_v7 = vld [vmem:[%s8382_s1 + $0x10] sm:$0x30]  ;;  %v5824_v10 = vld [vmem:[%s8382_s1 + $0x8] sm:$0xf]  ;;  %v6435_v11 = vld [vmem:[%s8382_s1 + $0x8] sm:$0x30] }
   0xe   : > { %v1861_v8 = vsel %vm1380_vm0, %v5895_v2, 0  ;;  %v6227_v9 = vor.u32 %v6501_v7, %v6226_v6  ;;  %s6906_s30 = smul.u32 548, %s8386_s13  ;;  %v5825_v13 = vor.u32 %v6435_v11, %v5824_v10  ;;  %vm1181_vm1 = vcmask 97280  }
   0xf   : > { %1870 = vmatpush.bf16.msra.mxu1 %v1861_v8  ;;  %v4225_v12 = vsel %vm1380_vm0, %v6299_v5, 0  ;;  %vm3887_vm2 = vcmask 1046528   ;;  %vm643_vm3 = vsmask.f32 7424  ;;  %s6907_s9 = smul.u32 528, %s8386_s13 }
  0x10   : > { %4234 = vmatpush.bf16.msra.mxu3 %v4225_v12  ;;  %v3407_v14 = vsel %vm1380_vm0, %v6227_v9, 0  ;;  %s6991_s6 = scalar_lea.vmem %s8381_s0, %s6906_s30  ;;  %v1382_v15 = vsel %vm1380_vm0, %v5825_v13, 0 }
  0x11   : > { %3416 = vmatpush.bf16.msra.mxu2 %v3407_v14  ;;  %v6368_v16 = vld [vmem:[%s6991_s6] sm:$0xff]  ;;  %v6838_v17 = vld [vmem:[%s6991_s6 + $0x10] sm:$0xf0]  ;;  %v6436_v18 = vld [vmem:[%s6991_s6 + $0x18] sm:$0xff]  ;;  %1391 = vmatpush.bf16.msra.mxu0 %v1382_v15  ;;  %s7109_s13 = scalar_lea.vmem %s8384_s3, %s6907_s9 }
  0x12   : > { %v6839_v19 = vld [vmem:[%s6991_s6 + $0x10] sm:$0xe]  ;;  %v6369_v21 = vld [vmem:[%s6991_s6 + $0x8] sm:$0xff]  ;;  %v647_v22 = vshll.u32 %v6368_v16, 16  ;;  %5896 = vmatmul.msk.bf16.vlgmr.msra.gmra.mxu1 %vm1181_vm1, %v6368_v16  ;;  %v3889_v24 = vrot.slane %v6436_v18, 1  ;;  %v2679_v27 = vshll.u32 %v6436_v18, 16 }
  0x13   : > { %v6837_v20 = vld [vmem:[%s6991_s6 + $0x10] sm:$0xff]   ;;  %v6840_v23 = vor.u32 %v6839_v19, %v6838_v17  ;;  %v645_v28 = vshrl.u32 %v6368_v16, 16  ;;  %v652_v29 = vshll.u32 %v6369_v21, 16  ;;  %v6437_v41 = vld [vmem:[%s6991_s6 + $0x20] sm:$0xff]  ;;  %v656_v42 = vshrl.u32 %v6369_v21, 16  ;;  %v6371_v54 = vld [vmem:[%s6991_s6 + $0x18] sm:$0xff] }
  0x14   : > { %v2672_v25 = vshrl.u32 %v6837_v20, 16  ;;  %v2674_v26 = vshll.u32 %v6837_v20, 16  ;;  %v649_v31 = vrot.slane %v647_v22, 1  ;;  %v2681_v33 = vrot.slane %v2679_v27, 1  ;;  %v6370_v40 = vld [vmem:[%s6991_s6 + $0x10] sm:$0xff]  ;;  %v6438_v55 = vld [vmem:[%s6991_s6 + $0x28] sm:$0xff] }
  0x15   : > { %v3888_v30 = vrot.slane %v6840_v23, 1  ;;  %v654_v34 = vrot.slane %v652_v29, 1  ;;  %v660_v43 = vshll.u32 %v6370_v40, 16  ;;  %v2683_v44 = vshrl.u32 %v6436_v18, 16  ;;  %v6372_v4 = vld [vmem:[%s6991_s6 + $0x20] sm:$0xff]  ;;  %v6439_v5 = vld [vmem:[%s6991_s6 + $0x30] sm:$0xff] }
  0x16   : > { %v2676_v32 = vrot.slane %v2674_v26, 1  ;;  %v650_v36 = vor.u32 %v649_v31, %v645_v28  ;;  %v2687_v45 = vshll.u32 %v6437_v41, 16  ;;  %v3891_v46 = vrot.slane %v6437_v41, 1  ;;  %v6373_v18 = vld [vmem:[%s6991_s6 + $0x28] sm:$0xff]  ;;  %v6440_v19 = vld [vmem:[%s6991_s6 + $0x38] sm:$0xff] }
  0x17   : > { %v3890_v35 = vsel %vm3887_vm2, %v3888_v30, %v3889_v24  ;;  %v658_v47 = vor.u32 %v656_v42, %v654_v34  ;;  %v662_v48 = vrot.slane %v660_v43, 1  ;;  %v2685_v49 = vor.u32 %v2683_v44, %v2681_v33 }
  0x18   : > { %6300 = vmatmul.msk.bf16.vlgmr.msra.gmra.mxu3 %vm1181_vm1, %v3890_v35  ;;  %v2677_v37 = vor.u32 %v2676_v32, %v2672_v25  ;;  %v655_v38 = vsel %vm643_vm3, %v650_v36, %v654_v34  ;;  %v2689_v50 = vrot.slane %v2687_v45, 1  ;;  %v3892_v51 = vsel %vm3887_vm2, %v3889_v24, %v3891_v46  ;;  %v6374_v32 = vld [vmem:[%s6991_s6 + $0x30] sm:$0xff] }
  0x19   : > { %5826 = vmatmul.msk.bf16.vlgmr.msra.gmra.mxu0 %vm1181_vm1, %v655_v38  ;;  %v663_v52 = vsel %vm643_vm3, %v658_v47, %v662_v48  ;;  %v664_v56 = vshrl.u32 %v6370_v40, 16  ;;  %v668_v57 = vshll.u32 %v6371_v54, 16  ;;  %v2691_v58 = vshrl.u32 %v6437_v41, 16  ;;  %v6442_v47 = vld [vmem:[%s6991_s6 + $0x48] sm:$0xff] }
  0x1a   : > { %v2682_v39 = vsel %vm643_vm3, %v2677_v37, %v2681_v33  ;;  %v2690_v53 = vsel %vm643_vm3, %v2685_v49, %v2689_v50  ;;  %v2695_v59 = vshll.u32 %v6438_v55, 16  ;;  %v3893_v60 = vrot.slane %v6438_v55, 1  ;;  %v6441_v33 = vld [vmem:[%s6991_s6 + $0x40] sm:$0xff] }
  0x1b   : > { %6228 = vmatmul.msk.bf16.vlgmr.msra.gmra.mxu2 %vm1181_vm1, %v2682_v39  ;;  %v666_v61 = vor.u32 %v664_v56, %v662_v48  ;;  %v670_v62 = vrot.slane %v668_v57, 1  ;;  %v2693_v63 = vor.u32 %v2691_v58, %v2689_v50  ;;  %v672_v6 = vshrl.u32 %v6371_v54, 16 }
  0x1c   : > { %v2697_v0 = vrot.slane %v2695_v59, 1  ;;  %v3894_v1 = vsel %vm3887_vm2, %v3891_v46, %v3893_v60  ;;  %v676_v7 = vshll.u32 %v6372_v4, 16  ;;  %v2699_v8 = vshrl.u32 %v6438_v55, 16  ;;  %v6375_v46 = vld [vmem:[%s6991_s6 + $0x38] sm:$0xff] }
  0x1d   : > { %v671_v2 = vsel %vm643_vm3, %v666_v61, %v670_v62  ;;  %v2703_v9 = vshll.u32 %v6439_v5, 16  ;;  %v3895_v10 = vrot.slane %v6439_v5, 1  ;;  %v674_v11 = vor.u32 %v672_v6, %v670_v62  ;;  %v6443_v61 = vld [vmem:[%s6991_s6 + $0x50] sm:$0xff] }
  0x1e   : > { %v2698_v3 = vsel %vm643_vm3, %v2693_v63, %v2697_v0  ;;  %v678_v12 = vrot.slane %v676_v7, 1  ;;  %v2701_v13 = vor.u32 %v2699_v8, %v2697_v0  ;;  %v680_v20 = vshrl.u32 %v6372_v4, 16 }
  0x1f   : > { %v2705_v14 = vrot.slane %v2703_v9, 1  ;;  %v3896_v15 = vsel %vm3887_vm2, %v3893_v60, %v3895_v10  ;;  %v2707_v22 = vshrl.u32 %v6439_v5, 16  ;;  %v2711_v23 = vshll.u32 %v6440_v19, 16  ;;  %v6376_v60 = vld [vmem:[%s6991_s6 + $0x40] sm:$0xff] }
  0x20   : > { %v679_v16 = vsel %vm643_vm3, %v674_v11, %v678_v12  ;;  %v3897_v24 = vrot.slane %v6440_v19, 1  ;;  %v682_v25 = vor.u32 %v680_v20, %v678_v12  ;;  %v688_v34 = vshrl.u32 %v6373_v18, 16  ;;  %v6444_v11 = vld [vmem:[%s6991_s6 + $0x58] sm:$0xff] }
  0x21   : > { %v2706_v17 = vsel %vm643_vm3, %v2701_v13, %v2705_v14  ;;  %v2709_v27 = vor.u32 %v2707_v22, %v2705_v14  ;;  %v2713_v28 = vrot.slane %v2711_v23, 1  ;;  %v692_v35 = vshll.u32 %v6374_v32, 16 }
  0x22   : > { %5897 = vmatmul.msk.bf16.gmra.mxu1 %vm1181_vm1, %v6369_v21  ;;  %v684_v21 = vshll.u32 %v6373_v18, 16  ;;  %v3898_v29 = vsel %vm3887_vm2, %v3895_v10, %v3897_v24  ;;  %v2715_v36 = vshrl.u32 %v6440_v19, 16  ;;  %v2719_v37 = vshll.u32 %v6441_v33, 16  ;;  %v6377_v10 = vld [vmem:[%s6991_s6 + $0x48] sm:$0xff] }
  0x23   : > { %v2714_v31 = vsel %vm643_vm3, %v2709_v27, %v2713_v28  ;;  %v3899_v38 = vrot.slane %v6441_v33, 1  ;;  %v696_v48 = vshrl.u32 %v6374_v32, 16  ;;  %v700_v49 = vshll.u32 %v6375_v46, 16 }
  0x24   : > { %v686_v26 = vrot.slane %v684_v21, 1  ;;  %v2717_v41 = vor.u32 %v2715_v36, %v2713_v28  ;;  %v2721_v42 = vrot.slane %v2719_v37, 1  ;;  %v2723_v50 = vshrl.u32 %v6441_v33, 16 }
  0x25   : > { %v3900_v43 = vsel %vm3887_vm2, %v3897_v24, %v3899_v38  ;;  %v704_v62 = vshrl.u32 %v6375_v46, 16  ;;  %v708_v63 = vshll.u32 %v6376_v60, 16  ;;  %v2731_v0 = vshrl.u32 %v6442_v47, 16 }
  0x26   : > { %v687_v30 = vsel %vm643_vm3, %v682_v25, %v686_v26  ;;  %v690_v39 = vor.u32 %v688_v34, %v686_v26  ;;  %v2722_v45 = vsel %vm643_vm3, %v2717_v41, %v2721_v42  ;;  %v2725_v55 = vor.u32 %v2723_v50, %v2721_v42  ;;  %v7088_v41 = vld [vmem:[%s8383_s2] ss:$0 sm:$0xff] }
  0x27   : > { %v712_v12 = vshrl.u32 %v6376_v60, 16  ;;  %v716_v13 = vshll.u32 %v6377_v10, 16  ;;  %v720_v34 = vshrl.u32 %v6377_v10, 16  ;;  %v2747_v37 = vshrl.u32 %v6444_v11, 16 }
  0x28   : > { %6301 = vmatmul.msk.bf16.gmra.mxu3 %vm1181_vm1, %v3892_v51  ;;  %v2727_v51 = vshll.u32 %v6442_v47, 16 }
  0x29   : > { %5827 = vmatmul.msk.bf16.gmra.mxu0 %vm1181_vm1, %v663_v52  ;;  %v3901_v52 = vrot.slane %v6442_v47, 1  ;;  %v718_v19 = vrot.slane %v716_v13, 1 }
  0x2a   : > { %v2729_v56 = vrot.slane %v2727_v51, 1 }
  0x2b   : > { %6229 = vmatmul.msk.bf16.gmra.mxu2 %vm1181_vm1, %v2690_v53  ;;  %v3902_v57 = vsel %vm3887_vm2, %v3899_v38, %v3901_v52 }
  0x2c   : > { %v2730_v59 = vsel %vm643_vm3, %v2725_v55, %v2729_v56  ;;  %v2733_v5 = vor.u32 %v2731_v0, %v2729_v56 }
  0x32   : > { %5898 = vmatmul.msk.bf16.gmra.mxu1 %vm1181_vm1, %v6370_v40  ;;  %v694_v40 = vrot.slane %v692_v35, 1 }
  0x34   : > { %v695_v44 = vsel %vm643_vm3, %v690_v39, %v694_v40  ;;  %v698_v53 = vor.u32 %v696_v48, %v694_v40 }
  0x38   : > { %6302 = vmatmul.msk.bf16.gmra.mxu3 %vm1181_vm1, %v3894_v1  ;;  %v2735_v1 = vshll.u32 %v6443_v61, 16 }
  0x39   : > { %5828 = vmatmul.msk.bf16.gmra.mxu0 %vm1181_vm1, %v671_v2  ;;  %v3903_v2 = vrot.slane %v6443_v61, 1 }
  0x3a   : > { %v2737_v6 = vrot.slane %v2735_v1, 1 }
  0x3b   : > { %6230 = vmatmul.msk.bf16.gmra.mxu2 %vm1181_vm1, %v2698_v3  ;;  %v3904_v7 = vsel %vm3887_vm2, %v3901_v52, %v3903_v2 }
  0x3c   : > { %v2738_v9 = vsel %vm643_vm3, %v2733_v5, %v2737_v6 }
  0x42   : > { %5899 = vmatmul.msk.bf16.gmra.mxu1 %vm1181_vm1, %v6371_v54  ;;  %v702_v54 = vrot.slane %v700_v49, 1 }
  0x44   : > { %v703_v58 = vsel %vm643_vm3, %v698_v53, %v702_v54  ;;  %v706_v3 = vor.u32 %v704_v62, %v702_v54  ;;  %v7104_v62 = vld [vmem:[%s6991_s6 + $0x68] sm:$0xff] }
  0x48   : > { %6303 = vmatmul.msk.bf16.gmra.mxu3 %vm1181_vm1, %v3896_v15  ;;  %v2739_v15 = vshrl.u32 %v6443_v61, 16  ;;  %v7101_v61 = vld [vmem:[%s6991_s6 + $0x58] sm:$0xff] }
  0x49   : > { %5829 = vmatmul.msk.bf16.gmra.mxu0 %vm1181_vm1, %v679_v16  ;;  %v2743_v16 = vshll.u32 %v6444_v11, 16 }
  0x4a   : > { %v2741_v20 = vor.u32 %v2739_v15, %v2737_v6  ;;  %v732_v6 = vshll.u32 %v7101_v61, 16 }
  0x4b   : > { %6231 = vmatmul.msk.bf16.gmra.mxu2 %vm1181_vm1, %v2706_v17  ;;  %v3905_v17 = vrot.slane %v6444_v11, 1  ;;  %v2745_v21 = vrot.slane %v2743_v16, 1  ;;  %v3909_v11 = vrot.slane %v7104_v62, 1 }
  0x4c   : > { %v734_v15 = vrot.slane %v732_v6, 1 }
  0x4d   : > { %v3906_v22 = vsel %vm3887_vm2, %v3903_v2, %v3905_v17  ;;  %v2746_v25 = vsel %vm643_vm3, %v2741_v20, %v2745_v21 }
  0x52   : > { %5900 = vmatmul.msk.bf16.gmra.mxu1 %vm1181_vm1, %v6372_v4  ;;  %v710_v4 = vrot.slane %v708_v63, 1 }
  0x54   : > { %v711_v8 = vsel %vm643_vm3, %v706_v3, %v710_v4 }
  0x58   : > { %6304 = vmatmul.msk.bf16.gmra.mxu3 %vm1181_vm1, %v3898_v29  ;;  %v6378_v29 = vld [vmem:[%s6991_s6 + $0x50] sm:$0xff] }
  0x59   : > { %5830 = vmatmul.msk.bf16.gmra.mxu0 %vm1181_vm1, %v687_v30  ;;  %v7081_v30 = vld [vmem:[%s6991_s6 + $0x60] sm:$0xff]  ;;  %v724_v35 = vshll.u32 %v6378_v29, 16  ;;  %v728_v1 = vshrl.u32 %v6378_v29, 16 }
  0x5a   : > { %v2751_v38 = vshll.u32 %v7081_v30, 16  ;;  %v3907_v39 = vrot.slane %v7081_v30, 1 }
  0x5b   : > { %6232 = vmatmul.msk.bf16.gmra.mxu2 %vm1181_vm1, %v2714_v31 }
  0x5c   : > { %v3908_v48 = vsel %vm3887_vm2, %v3905_v17, %v3907_v39 }
  0x62   : > { %5901 = vmatmul.msk.bf16.gmra.mxu1 %vm1181_vm1, %v6373_v18  ;;  %v714_v18 = vor.u32 %v712_v12, %v710_v4 }
  0x64   : > { %v719_v24 = vsel %vm643_vm3, %v714_v18, %v718_v19 }
  0x68   : > { %6305 = vmatmul.msk.bf16.gmra.mxu3 %vm1181_vm1, %v3900_v43  ;;  %v722_v43 = vor.u32 %v720_v34, %v718_v19  ;;  %v3910_v19 = vsel %vm3887_vm2, %v3907_v39, %v3909_v11 }
  0x69   : > { %5831 = vmatmul.msk.bf16.gmra.mxu0 %vm1181_vm1, %v695_v44  ;;  %v726_v44 = vrot.slane %v724_v35, 1 }
  0x6b   : > { %6233 = vmatmul.msk.bf16.gmra.mxu2 %vm1181_vm1, %v2722_v45  ;;  %v2749_v45 = vor.u32 %v2747_v37, %v2745_v21  ;;  %v727_v53 = vsel %vm643_vm3, %v722_v43, %v726_v44 }
  0x72   : > { %5902 = vmatmul.msk.bf16.gmra.mxu1 %vm1181_vm1, %v6374_v32 }
  0x78   : > { %6306 = vmatmul.msk.bf16.gmra.mxu3 %vm1181_vm1, %v3902_v57 }
  0x79   : > { %5832 = vmatmul.msk.bf16.gmra.mxu0 %vm1181_vm1, %v703_v58 }
  0x7b   : > { %6234 = vmatmul.msk.bf16.gmra.mxu2 %vm1181_vm1, %v2730_v59 }
  0x82   : > { %5903 = vmatmul.msk.bf16.gmra.mxu1 %vm1181_vm1, %v6375_v46  ;;  %v2753_v46 = vrot.slane %v2751_v38, 1 }
  0x84   : > { %v2754_v54 = vsel %vm643_vm3, %v2749_v45, %v2753_v46  ;;  %v2763_v45 = vshrl.u32 %v7104_v62, 16 }
  0x88   : > { %6307 = vmatmul.msk.bf16.gmra.mxu3 %vm1181_vm1, %v3904_v7 }
  0x89   : > { %5833 = vmatmul.msk.bf16.gmra.mxu0 %vm1181_vm1, %v711_v8 }
  0x8b   : > { %6235 = vmatmul.msk.bf16.gmra.mxu2 %vm1181_vm1, %v2738_v9  ;;  %v2755_v9 = vshrl.u32 %v7081_v30, 16 }
  0x8d   : > { %v2757_v16 = vor.u32 %v2755_v9, %v2753_v46 }
  0x8f   : > { %v1872_v14 = vpop.f32.mrf.mxu1 }
  0x92   : > { %5904 = vmatmul.msk.bf16.gmra.mxu1 %vm1181_vm1, %v6376_v60 }
  0x96   : > { %v1393_v23 = vpop.f32.mrf.mxu0 }
  0x97   : > { %v1874_v26 = vpop.f32.mrf.mxu1  ;;  %v1873_v27 = vadd.f32 %v1872_v14, %v1393_v23  ;;  %v730_v14 = vor.u32 %v728_v1, %v726_v44 }
  0x98   : > { %6308 = vmatmul.msk.bf16.gmra.mxu3 %vm1181_vm1, %v3906_v22 }
  0x99   : > { %5834 = vmatmul.msk.bf16.gmra.mxu0 %vm1181_vm1, %v719_v24  ;;  %v735_v24 = vsel %vm643_vm3, %v730_v14, %v734_v15 }
  0x9b   : > { %6236 = vmatmul.msk.bf16.gmra.mxu2 %vm1181_vm1, %v2746_v25  ;;  %v4236_v28 = vpop.f32.mrf.mxu3 }
  0x9e   : > { %v3418_v31 = vpop.f32.mrf.mxu2  ;;  %v1395_v33 = vpop.f32.mrf.mxu0 }
  0x9f   : > { %v3748_v32 = vadd.f32 %v3418_v31, %v1873_v27  ;;  %v1877_v36 = vpop.f32.mrf.mxu1  ;;  %v1875_v47 = vadd.f32 %v1874_v26, %v1395_v33  ;;  %v7129_v33 = vld [vmem:[%s6991_s6 + $0x70] sm:$0xff] }
  0xa0   : > { %v2767_v46 = vshll.u32 %v7129_v33, 16 }
  0xa1   : > { %v4566_v40 = vadd.f32 %v4236_v28, %v3748_v32  ;;  %v7126_v32 = vld [vmem:[%s6991_s6 + $0x60] sm:$0xff] }
  0xa2   : > { %5905 = vmatmul.msk.bf16.gmra.mxu1 %vm1181_vm1, %v6377_v10  ;;  %v2759_v10 = vshll.u32 %v7104_v62, 16 }
  0xa3   : > { %v4238_v42 = vpop.f32.mrf.mxu3  ;;  %v4702_v50 = vadd.f32 %v7088_v41, %v4566_v40 }
  0xa4   : > { %v2761_v17 = vrot.slane %v2759_v10, 1 }
  0xa5   : > { %v4966_v57 = vmul.f32 0.2, %v4702_v50  ;;  %vm4834_vm4 = vcmp.ge.f32.partialorder %v4702_v50, 0.0 }
  0xa6   : > { %v3420_v49 = vpop.f32.mrf.mxu2  ;;  %v1398_v52 = vpop.f32.mrf.mxu0  ;;  %v2762_v25 = vsel %vm643_vm3, %v2757_v16, %v2761_v17  ;;  %v2771_v16 = vshrl.u32 %v7129_v33, 16 }
  0xa7   : > { %v3749_v51 = vadd.f32 %v3420_v49, %v1875_v47  ;;  %v1879_v55 = vpop.f32.mrf.mxu1  ;;  %v1878_v59 = vadd.f32 %v1877_v36, %v1398_v52  ;;  %v5098_v2 = vsel %vm4834_vm4, %v4702_v50, %v4966_v57  ;;  %v736_v36 = vshrl.u32 %v7101_v61, 16 }
  0xa8   : > { %6309 = vmatmul.msk.bf16.gmra.mxu3 %vm1181_vm1, %v3908_v48  ;;  %v3911_v47 = vrot.slane %v7129_v33, 1  ;;  %v2765_v52 = vor.u32 %v2763_v45, %v2761_v17 }
  0xa9   : > { %v4567_v56 = vadd.f32 %v4238_v42, %v3749_v51  ;;  %5835 = vmatmul.msk.bf16.gmra.mxu0 %vm1181_vm1, %v727_v53  ;;  %v740_v42 = vshll.u32 %v7126_v32, 16  ;;  %v738_v50 = vor.u32 %v736_v36, %v734_v15  ;;  %v2769_v53 = vrot.slane %v2767_v46, 1 }
  0xab   : > { %v4703_v58 = vadd.f32 %v7088_v41, %v4567_v56  ;;  %6237 = vmatmul.msk.bf16.gmra.mxu2 %vm1181_vm1, %v2754_v54  ;;  %v4241_v60 = vpop.f32.mrf.mxu3  ;;  %v742_v51 = vrot.slane %v740_v42, 1 }
  0xad   : > { %vm4835_vm5 = vcmp.ge.f32.partialorder %v4703_v58, 0.0  ;;  %v4967_v63 = vmul.f32 0.2, %v4703_v58 }
  0xae   : > { %v3423_v0 = vpop.f32.mrf.mxu2  ;;  %v1400_v5 = vpop.f32.mrf.mxu0 }
  0xaf   : > { %v5099_v3 = vsel %vm4835_vm5, %v4703_v58, %v4967_v63  ;;  %v3750_v4 = vadd.f32 %v3423_v0, %v1878_v59  ;;  %v1882_v8 = vpop.f32.mrf.mxu1  ;;  %v1880_v18 = vadd.f32 %v1879_v55, %v1400_v5  ;;  %v3912_v55 = vsel %vm3887_vm2, %v3909_v11, %v3911_v47  ;;  %v7151_v5 = vld [vmem:[%s6991_s6 + $0x78] sm:$0xff] }
  0xb0   : > { %v6510_v7 = vpack.c.bf16 %v5099_v3, %v5098_v2  ;;  %v2775_v17 = vshll.u32 %v7151_v5, 16 }
  0xb1   : > { %v4568_v12 = vadd.f32 %v4241_v60, %v3750_v4  ;;  %v743_v60 = vsel %vm643_vm3, %v738_v50, %v742_v51  ;;  %v7148_v4 = vld [vmem:[%s6991_s6 + $0x68] sm:$0xff] }
  0xb2   : > { %6511 = vst [vmem:[%s7109_s13] sm:$0xff] %v6510_v7   ;;  %5906 = vmatmul.msk.bf16.gmra.mxu1 %vm1181_vm1, %v6378_v29 }
  0xb3   : > { %v4243_v13 = vpop.f32.mrf.mxu3  ;;  %v4704_v21 = vadd.f32 %v7088_v41, %v4568_v12 }
  0xb5   : > { %v4968_v28 = vmul.f32 0.2, %v4704_v21  ;;  %vm4836_vm6 = vcmp.ge.f32.partialorder %v4704_v21, 0.0 }
  0xb6   : > { %v3425_v20 = vpop.f32.mrf.mxu2  ;;  %v1403_v23 = vpop.f32.mrf.mxu0 }
  0xb7   : > { %v3751_v22 = vadd.f32 %v3425_v20, %v1880_v18  ;;  %v1884_v26 = vpop.f32.mrf.mxu1  ;;  %v1883_v30 = vadd.f32 %v1882_v8, %v1403_v23  ;;  %v5100_v37 = vsel %vm4836_vm6, %v4704_v21, %v4968_v28  ;;  %v744_v8 = vshrl.u32 %v7126_v32, 16 }
  0xb8   : > { %6310 = vmatmul.msk.bf16.gmra.mxu3 %vm1181_vm1, %v3910_v19  ;;  %v3913_v18 = vrot.slane %v7151_v5, 1  ;;  %v2773_v23 = vor.u32 %v2771_v16, %v2769_v53 }
  0xb9   : > { %v4569_v27 = vadd.f32 %v4243_v13, %v3751_v22  ;;  %5836 = vmatmul.msk.bf16.gmra.mxu0 %vm1181_vm1, %v735_v24  ;;  %v748_v13 = vshll.u32 %v7148_v4, 16  ;;  %v746_v21 = vor.u32 %v744_v8, %v742_v51  ;;  %v2777_v24 = vrot.slane %v2775_v17, 1 }
  0xbb   : > { %v4705_v29 = vadd.f32 %v7088_v41, %v4569_v27  ;;  %6238 = vmatmul.msk.bf16.gmra.mxu2 %vm1181_vm1, %v2762_v25  ;;  %v4246_v31 = vpop.f32.mrf.mxu3  ;;  %v750_v22 = vrot.slane %v748_v13, 1 }
  0xbd   : > { %vm4837_vm7 = vcmp.ge.f32.partialorder %v4705_v29, 0.0  ;;  %v4969_v34 = vmul.f32 0.2, %v4705_v29 }
  0xbe   : > { %v3428_v35 = vpop.f32.mrf.mxu2  ;;  %v1405_v40 = vpop.f32.mrf.mxu0 }
  0xbf   : > { %v5101_v38 = vsel %vm4837_vm7, %v4705_v29, %v4969_v34  ;;  %v3752_v39 = vadd.f32 %v3428_v35, %v1883_v30  ;;  %v1887_v44 = vpop.f32.mrf.mxu1  ;;  %v1885_v54 = vadd.f32 %v1884_v26, %v1405_v40  ;;  %v3914_v26 = vsel %vm3887_vm2, %v3911_v47, %v3913_v18  ;;  %v7173_v40 = vld [vmem:[%s6991_s6 + $0x80] sm:$0xff] }
  0xc0   : > { %v6515_v43 = vpack.c.bf16 %v5101_v38, %v5100_v37 }
  0xc1   : > { %v4570_v48 = vadd.f32 %v4246_v31, %v3752_v39  ;;  %v751_v31 = vsel %vm643_vm3, %v746_v21, %v750_v22  ;;  %v7170_v39 = vld [vmem:[%s6991_s6 + $0x70] sm:$0xff] }
  0xc2   : > { %6841 = vst [vmem:[%s7109_s13 + $0x8] sm:$0xff] %v6515_v43   ;;  %5907 = vmatmul.msk.bf16.gmra.mxu1 %vm1181_vm1, %v7101_v61  ;;  %v2770_v61 = vsel %vm643_vm3, %v2765_v52, %v2769_v53  ;;  %v2779_v52 = vshrl.u32 %v7151_v5, 16  ;;  %v2783_v53 = vshll.u32 %v7173_v40, 16 }
  0xc3   : > { %v4248_v49 = vpop.f32.mrf.mxu3  ;;  %v4706_v57 = vadd.f32 %v7088_v41, %v4570_v48 }
  0xc5   : > { %v4970_v0 = vmul.f32 0.2, %v4706_v57  ;;  %vm4838_vm8 = vcmp.ge.f32.partialorder %v4706_v57, 0.0 }
  0xc6   : > { %v3430_v56 = vpop.f32.mrf.mxu2  ;;  %v1408_v59 = vpop.f32.mrf.mxu0 }
  0xc7   : > { %v3753_v58 = vadd.f32 %v3430_v56, %v1885_v54  ;;  %v1889_v62 = vpop.f32.mrf.mxu1  ;;  %v1888_v2 = vadd.f32 %v1887_v44, %v1408_v59  ;;  %v5102_v9 = vsel %vm4838_vm8, %v4706_v57, %v4970_v0  ;;  %v752_v44 = vshrl.u32 %v7148_v4, 16 }
  0xc8   : > { %6311 = vmatmul.msk.bf16.gmra.mxu3 %vm1181_vm1, %v3912_v55  ;;  %v3915_v54 = vrot.slane %v7173_v40, 1  ;;  %v2781_v59 = vor.u32 %v2779_v52, %v2777_v24 }
  0xc9   : > { %v4571_v63 = vadd.f32 %v4248_v49, %v3753_v58  ;;  %5837 = vmatmul.msk.bf16.gmra.mxu0 %vm1181_vm1, %v743_v60  ;;  %v756_v49 = vshll.u32 %v7170_v39, 16  ;;  %v754_v57 = vor.u32 %v752_v44, %v750_v22  ;;  %v2785_v60 = vrot.slane %v2783_v53, 1 }
  0xcb   : > { %v4707_v1 = vadd.f32 %v7088_v41, %v4571_v63  ;;  %6239 = vmatmul.msk.bf16.gmra.mxu2 %vm1181_vm1, %v2770_v61  ;;  %v4251_v3 = vpop.f32.mrf.mxu3  ;;  %v758_v58 = vrot.slane %v756_v49, 1 }
  0xcd   : > { %vm4839_vm9 = vcmp.ge.f32.partialorder %v4707_v1, 0.0  ;;  %v4971_v6 = vmul.f32 0.2, %v4707_v1 }
  0xce   : > { %v3433_v7 = vpop.f32.mrf.mxu2  ;;  %v1410_v12 = vpop.f32.mrf.mxu0 }
  0xcf   : > { %v5103_v10 = vsel %vm4839_vm9, %v4707_v1, %v4971_v6  ;;  %v3754_v11 = vadd.f32 %v3433_v7, %v1888_v2  ;;  %v1892_v15 = vpop.f32.mrf.mxu1  ;;  %v1890_v25 = vadd.f32 %v1889_v62, %v1410_v12  ;;  %v3916_v62 = vsel %vm3887_vm2, %v3913_v18, %v3915_v54  ;;  %v7195_v12 = vld [vmem:[%s6991_s6 + $0x88] sm:$0xff] }
  0xd0   : > { %v6520_v14 = vpack.c.bf16 %v5103_v10, %v5102_v9 }
  0xd1   : > { %v4572_v19 = vadd.f32 %v4251_v3, %v3754_v11  ;;  %v759_v3 = vsel %vm643_vm3, %v754_v57, %v758_v58  ;;  %v7192_v11 = vld [vmem:[%s6991_s6 + $0x78] sm:$0xff] }
  0xd2   : > { %6842 = vst [vmem:[%s7109_s13 + $0x10] sm:$0xff] %v6520_v14   ;;  %5908 = vmatmul.msk.bf16.gmra.mxu1 %vm1181_vm1, %v7126_v32  ;;  %v2778_v32 = vsel %vm643_vm3, %v2773_v23, %v2777_v24  ;;  %v2787_v23 = vshrl.u32 %v7173_v40, 16  ;;  %v2791_v24 = vshll.u32 %v7195_v12, 16 }
  0xd3   : > { %v4253_v20 = vpop.f32.mrf.mxu3  ;;  %v4708_v28 = vadd.f32 %v7088_v41, %v4572_v19 }
  0xd5   : > { %v4972_v35 = vmul.f32 0.2, %v4708_v28  ;;  %vm4840_vm10 = vcmp.ge.f32.partialorder %v4708_v28, 0.0 }
  0xd6   : > { %v3435_v27 = vpop.f32.mrf.mxu2  ;;  %v1413_v30 = vpop.f32.mrf.mxu0 }
  0xd7   : > { %v3755_v29 = vadd.f32 %v3435_v27, %v1890_v25  ;;  %v1894_v33 = vpop.f32.mrf.mxu1  ;;  %v1893_v37 = vadd.f32 %v1892_v15, %v1413_v30  ;;  %v5104_v45 = vsel %vm4840_vm10, %v4708_v28, %v4972_v35  ;;  %v760_v15 = vshrl.u32 %v7170_v39, 16 }
  0xd8   : > { %6312 = vmatmul.msk.bf16.gmra.mxu3 %vm1181_vm1, %v3914_v26  ;;  %v3917_v25 = vrot.slane %v7195_v12, 1  ;;  %v2789_v30 = vor.u32 %v2787_v23, %v2785_v60 }
  0xd9   : > { %v4573_v34 = vadd.f32 %v4253_v20, %v3755_v29  ;;  %5838 = vmatmul.msk.bf16.gmra.mxu0 %vm1181_vm1, %v751_v31  ;;  %v764_v20 = vshll.u32 %v7192_v11, 16  ;;  %v762_v28 = vor.u32 %v760_v15, %v758_v58  ;;  %v2793_v31 = vrot.slane %v2791_v24, 1 }
  0xdb   : > { %v4709_v36 = vadd.f32 %v7088_v41, %v4573_v34  ;;  %6240 = vmatmul.msk.bf16.gmra.mxu2 %vm1181_vm1, %v2778_v32  ;;  %v4256_v38 = vpop.f32.mrf.mxu3  ;;  %v766_v29 = vrot.slane %v764_v20, 1 }
  0xdd   : > { %vm4841_vm11 = vcmp.ge.f32.partialorder %v4709_v36, 0.0  ;;  %v4973_v42 = vmul.f32 0.2, %v4709_v36 }
  0xde   : > { %v3438_v43 = vpop.f32.mrf.mxu2  ;;  %v1415_v48 = vpop.f32.mrf.mxu0 }
  0xdf   : > { %v5105_v46 = vsel %vm4841_vm11, %v4709_v36, %v4973_v42  ;;  %v3756_v47 = vadd.f32 %v3438_v43, %v1893_v37  ;;  %v1897_v51 = vpop.f32.mrf.mxu1  ;;  %v1895_v61 = vadd.f32 %v1894_v33, %v1415_v48  ;;  %v3918_v33 = vsel %vm3887_vm2, %v3915_v54, %v3917_v25  ;;  %v7217_v48 = vld [vmem:[%s6991_s6 + $0x90] sm:$0xff] }
  0xe0   : > { %v6525_v50 = vpack.c.bf16 %v5105_v46, %v5104_v45 }
  0xe1   : > { %v4574_v55 = vadd.f32 %v4256_v38, %v3756_v47  ;;  %v767_v38 = vsel %vm643_vm3, %v762_v28, %v766_v29  ;;  %v7214_v47 = vld [vmem:[%s6991_s6 + $0x80] sm:$0xff] }
  0xe2   : > { %6843 = vst [vmem:[%s7109_s13 + $0x18] sm:$0xff] %v6525_v50   ;;  %5909 = vmatmul.msk.bf16.gmra.mxu1 %vm1181_vm1, %v7148_v4  ;;  %v2786_v4 = vsel %vm643_vm3, %v2781_v59, %v2785_v60  ;;  %v2795_v59 = vshrl.u32 %v7195_v12, 16  ;;  %v2799_v60 = vshll.u32 %v7217_v48, 16 }
  0xe3   : > { %v4258_v56 = vpop.f32.mrf.mxu3  ;;  %v4710_v0 = vadd.f32 %v7088_v41, %v4574_v55 }
  0xe5   : > { %v4974_v7 = vmul.f32 0.2, %v4710_v0  ;;  %vm4842_vm12 = vcmp.ge.f32.partialorder %v4710_v0, 0.0 }
  0xe6   : > { %v3440_v63 = vpop.f32.mrf.mxu2  ;;  %v1418_v2 = vpop.f32.mrf.mxu0 }
  0xe7   : > { %v3757_v1 = vadd.f32 %v3440_v63, %v1895_v61  ;;  %v1899_v5 = vpop.f32.mrf.mxu1  ;;  %v1898_v9 = vadd.f32 %v1897_v51, %v1418_v2  ;;  %v5106_v16 = vsel %vm4842_vm12, %v4710_v0, %v4974_v7  ;;  %v768_v51 = vshrl.u32 %v7192_v11, 16 }
  0xe8   : > { %6313 = vmatmul.msk.bf16.gmra.mxu3 %vm1181_vm1, %v3916_v62  ;;  %v3919_v61 = vrot.slane %v7217_v48, 1  ;;  %v2797_v2 = vor.u32 %v2795_v59, %v2793_v31 }
  0xe9   : > { %v4575_v6 = vadd.f32 %v4258_v56, %v3757_v1  ;;  %5839 = vmatmul.msk.bf16.gmra.mxu0 %vm1181_vm1, %v759_v3  ;;  %v772_v56 = vshll.u32 %v7214_v47, 16  ;;  %v770_v0 = vor.u32 %v768_v51, %v766_v29  ;;  %v2801_v3 = vrot.slane %v2799_v60, 1 }
  0xeb   : > { %v4711_v8 = vadd.f32 %v7088_v41, %v4575_v6  ;;  %6241 = vmatmul.msk.bf16.gmra.mxu2 %vm1181_vm1, %v2786_v4  ;;  %v4261_v10 = vpop.f32.mrf.mxu3  ;;  %v774_v1 = vrot.slane %v772_v56, 1 }
  0xed   : > { %vm4843_vm13 = vcmp.ge.f32.partialorder %v4711_v8, 0.0  ;;  %v4975_v13 = vmul.f32 0.2, %v4711_v8 }
  0xee   : > { %v3443_v14 = vpop.f32.mrf.mxu2  ;;  %v1420_v19 = vpop.f32.mrf.mxu0 }
  0xef   : > { %v5107_v17 = vsel %vm4843_vm13, %v4711_v8, %v4975_v13  ;;  %v3758_v18 = vadd.f32 %v3443_v14, %v1898_v9  ;;  %v1902_v22 = vpop.f32.mrf.mxu1  ;;  %v1900_v32 = vadd.f32 %v1899_v5, %v1420_v19  ;;  %v3920_v5 = vsel %vm3887_vm2, %v3917_v25, %v3919_v61  ;;  %v7239_v19 = vld [vmem:[%s6991_s6 + $0x98] sm:$0xff] }
  0xf0   : > { %v6530_v21 = vpack.c.bf16 %v5107_v17, %v5106_v16 }
  0xf1   : > { %v4576_v26 = vadd.f32 %v4261_v10, %v3758_v18  ;;  %v775_v10 = vsel %vm643_vm3, %v770_v0, %v774_v1  ;;  %v7236_v18 = vld [vmem:[%s6991_s6 + $0x88] sm:$0xff] }
  0xf2   : > { %6844 = vst [vmem:[%s7109_s13 + $0x20] sm:$0xff] %v6530_v21   ;;  %5910 = vmatmul.msk.bf16.gmra.mxu1 %vm1181_vm1, %v7170_v39  ;;  %v2794_v39 = vsel %vm643_vm3, %v2789_v30, %v2793_v31  ;;  %v2803_v30 = vshrl.u32 %v7217_v48, 16  ;;  %v2807_v31 = vshll.u32 %v7239_v19, 16 }
  0xf3   : > { %v4263_v27 = vpop.f32.mrf.mxu3  ;;  %v4712_v35 = vadd.f32 %v7088_v41, %v4576_v26 }
  0xf5   : > { %v4976_v43 = vmul.f32 0.2, %v4712_v35  ;;  %vm4844_vm14 = vcmp.ge.f32.partialorder %v4712_v35, 0.0 }
  0xf6   : > { %v3445_v34 = vpop.f32.mrf.mxu2  ;;  %v1423_v37 = vpop.f32.mrf.mxu0 }
  0xf7   : > { %v3759_v36 = vadd.f32 %v3445_v34, %v1900_v32  ;;  %v1904_v40 = vpop.f32.mrf.mxu1  ;;  %v1903_v45 = vadd.f32 %v1902_v22, %v1423_v37  ;;  %v5108_v52 = vsel %vm4844_vm14, %v4712_v35, %v4976_v43  ;;  %v776_v22 = vshrl.u32 %v7214_v47, 16 }
  0xf8   : > { %6314 = vmatmul.msk.bf16.gmra.mxu3 %vm1181_vm1, %v3918_v33  ;;  %v3921_v32 = vrot.slane %v7239_v19, 1  ;;  %v2805_v37 = vor.u32 %v2803_v30, %v2801_v3 }
  0xf9   : > { %v4577_v42 = vadd.f32 %v4263_v27, %v3759_v36  ;;  %5840 = vmatmul.msk.bf16.gmra.mxu0 %vm1181_vm1, %v767_v38  ;;  %v780_v27 = vshll.u32 %v7236_v18, 16  ;;  %v778_v35 = vor.u32 %v776_v22, %v774_v1  ;;  %v2809_v38 = vrot.slane %v2807_v31, 1 }
  0xfb   : > { %v4713_v44 = vadd.f32 %v7088_v41, %v4577_v42  ;;  %6242 = vmatmul.msk.bf16.gmra.mxu2 %vm1181_vm1, %v2794_v39  ;;  %v4266_v46 = vpop.f32.mrf.mxu3  ;;  %v782_v36 = vrot.slane %v780_v27, 1 }
  0xfd   : > { %vm4845_vm15 = vcmp.ge.f32.partialorder %v4713_v44, 0.0  ;;  %v4977_v49 = vmul.f32 0.2, %v4713_v44 }
  0xfe   : > { %v3448_v50 = vpop.f32.mrf.mxu2  ;;  %v1425_v55 = vpop.f32.mrf.mxu0 }
  0xff   : > { %v5109_v53 = vsel %vm4845_vm15, %v4713_v44, %v4977_v49  ;;  %v3760_v54 = vadd.f32 %v3448_v50, %v1903_v45  ;;  %v1907_v58 = vpop.f32.mrf.mxu1  ;;  %v1905_v4 = vadd.f32 %v1904_v40, %v1425_v55  ;;  %v3922_v40 = vsel %vm3887_vm2, %v3919_v61, %v3921_v32  ;;  %v7261_v55 = vld [vmem:[%s6991_s6 + $0xa0] sm:$0xff] }
 0x100   : > { %v6535_v57 = vpack.c.bf16 %v5109_v53, %v5108_v52 }
 0x101   : > { %v4578_v62 = vadd.f32 %v4266_v46, %v3760_v54  ;;  %v783_v46 = vsel %vm643_vm3, %v778_v35, %v782_v36  ;;  %v7258_v54 = vld [vmem:[%s6991_s6 + $0x90] sm:$0xff] }
 0x102   : > { %6845 = vst [vmem:[%s7109_s13 + $0x28] sm:$0xff] %v6535_v57   ;;  %5911 = vmatmul.msk.bf16.gmra.mxu1 %vm1181_vm1, %v7192_v11  ;;  %v2802_v11 = vsel %vm643_vm3, %v2797_v2, %v2801_v3  ;;  %v2811_v2 = vshrl.u32 %v7239_v19, 16  ;;  %v2815_v3 = vshll.u32 %v7261_v55, 16 }
 0x103   : > { %v4268_v63 = vpop.f32.mrf.mxu3  ;;  %v4714_v7 = vadd.f32 %v7088_v41, %v4578_v62 }
 0x105   : > { %v4978_v14 = vmul.f32 0.2, %v4714_v7  ;;  %vm4846_vm0 = vcmp.ge.f32.partialorder %v4714_v7, 0.0 }
 0x106   : > { %v3450_v6 = vpop.f32.mrf.mxu2  ;;  %v1428_v9 = vpop.f32.mrf.mxu0 }
 0x107   : > { %v3761_v8 = vadd.f32 %v3450_v6, %v1905_v4  ;;  %v1909_v12 = vpop.f32.mrf.mxu1  ;;  %v1908_v16 = vadd.f32 %v1907_v58, %v1428_v9  ;;  %v5110_v23 = vsel %vm4846_vm0, %v4714_v7, %v4978_v14  ;;  %v784_v58 = vshrl.u32 %v7236_v18, 16 }
 0x108   : > { %6315 = vmatmul.msk.bf16.gmra.mxu3 %vm1181_vm1, %v3920_v5  ;;  %v3923_v4 = vrot.slane %v7261_v55, 1  ;;  %v2813_v9 = vor.u32 %v2811_v2, %v2809_v38 }
 0x109   : > { %v4579_v13 = vadd.f32 %v4268_v63, %v3761_v8  ;;  %5841 = vmatmul.msk.bf16.gmra.mxu0 %vm1181_vm1, %v775_v10  ;;  %v788_v63 = vshll.u32 %v7258_v54, 16  ;;  %v786_v7 = vor.u32 %v784_v58, %v782_v36  ;;  %v2817_v10 = vrot.slane %v2815_v3, 1 }
 0x10b   : > { %v4715_v15 = vadd.f32 %v7088_v41, %v4579_v13  ;;  %6243 = vmatmul.msk.bf16.gmra.mxu2 %vm1181_vm1, %v2802_v11  ;;  %v4271_v17 = vpop.f32.mrf.mxu3  ;;  %v790_v8 = vrot.slane %v788_v63, 1 }
 0x10d   : > { %vm4847_vm4 = vcmp.ge.f32.partialorder %v4715_v15, 0.0  ;;  %v4979_v20 = vmul.f32 0.2, %v4715_v15 }
 0x10e   : > { %v3453_v21 = vpop.f32.mrf.mxu2  ;;  %v1430_v26 = vpop.f32.mrf.mxu0 }
 0x10f   : > { %v5111_v24 = vsel %vm4847_vm4, %v4715_v15, %v4979_v20  ;;  %v3762_v25 = vadd.f32 %v3453_v21, %v1908_v16  ;;  %v1912_v29 = vpop.f32.mrf.mxu1  ;;  %v1910_v39 = vadd.f32 %v1909_v12, %v1430_v26  ;;  %v3924_v12 = vsel %vm3887_vm2, %v3921_v32, %v3923_v4  ;;  %v7283_v26 = vld [vmem:[%s6991_s6 + $0xa8] sm:$0xff] }
 0x110   : > { %v6540_v28 = vpack.c.bf16 %v5111_v24, %v5110_v23 }
 0x111   : > { %v4580_v33 = vadd.f32 %v4271_v17, %v3762_v25  ;;  %v791_v17 = vsel %vm643_vm3, %v786_v7, %v790_v8  ;;  %v7280_v25 = vld [vmem:[%s6991_s6 + $0x98] sm:$0xff] }
 0x112   : > { %6846 = vst [vmem:[%s7109_s13 + $0x30] sm:$0xff] %v6540_v28   ;;  %5912 = vmatmul.msk.bf16.gmra.mxu1 %vm1181_vm1, %v7214_v47  ;;  %v2810_v47 = vsel %vm643_vm3, %v2805_v37, %v2809_v38  ;;  %v2819_v37 = vshrl.u32 %v7261_v55, 16  ;;  %v2823_v38 = vshll.u32 %v7283_v26, 16 }
 0x113   : > { %v4273_v34 = vpop.f32.mrf.mxu3  ;;  %v4716_v43 = vadd.f32 %v7088_v41, %v4580_v33 }
 0x115   : > { %v4980_v50 = vmul.f32 0.2, %v4716_v43  ;;  %vm4848_vm5 = vcmp.ge.f32.partialorder %v4716_v43, 0.0 }
 0x116   : > { %v3455_v42 = vpop.f32.mrf.mxu2  ;;  %v1433_v45 = vpop.f32.mrf.mxu0 }
 0x117   : > { %v3763_v44 = vadd.f32 %v3455_v42, %v1910_v39  ;;  %v1914_v48 = vpop.f32.mrf.mxu1  ;;  %v1913_v52 = vadd.f32 %v1912_v29, %v1433_v45  ;;  %v5112_v59 = vsel %vm4848_vm5, %v4716_v43, %v4980_v50  ;;  %v792_v29 = vshrl.u32 %v7258_v54, 16 }
 0x118   : > { %6316 = vmatmul.msk.bf16.gmra.mxu3 %vm1181_vm1, %v3922_v40  ;;  %v3925_v39 = vrot.slane %v7283_v26, 1  ;;  %v2821_v45 = vor.u32 %v2819_v37, %v2817_v10 }
 0x119   : > { %v4581_v49 = vadd.f32 %v4273_v34, %v3763_v44  ;;  %5842 = vmatmul.msk.bf16.gmra.mxu0 %vm1181_vm1, %v783_v46  ;;  %v796_v34 = vshll.u32 %v7280_v25, 16  ;;  %v794_v43 = vor.u32 %v792_v29, %v790_v8  ;;  %v2825_v46 = vrot.slane %v2823_v38, 1 }
 0x11b   : > { %v4717_v51 = vadd.f32 %v7088_v41, %v4581_v49  ;;  %6244 = vmatmul.msk.bf16.gmra.mxu2 %vm1181_vm1, %v2810_v47  ;;  %v4276_v53 = vpop.f32.mrf.mxu3  ;;  %v798_v44 = vrot.slane %v796_v34, 1 }
 0x11d   : > { %vm4849_vm6 = vcmp.ge.f32.partialorder %v4717_v51, 0.0  ;;  %v4981_v56 = vmul.f32 0.2, %v4717_v51 }
 0x11e   : > { %v3458_v57 = vpop.f32.mrf.mxu2  ;;  %v1435_v62 = vpop.f32.mrf.mxu0 }
 0x11f   : > { %v5113_v60 = vsel %vm4849_vm6, %v4717_v51, %v4981_v56  ;;  %v3764_v61 = vadd.f32 %v3458_v57, %v1913_v52  ;;  %v1917_v1 = vpop.f32.mrf.mxu1  ;;  %v1915_v11 = vadd.f32 %v1914_v48, %v1435_v62  ;;  %v3926_v48 = vsel %vm3887_vm2, %v3923_v4, %v3925_v39  ;;  %v7305_v62 = vld [vmem:[%s6991_s6 + $0xb0] sm:$0xff] }
 0x120   : > { %v6545_v0 = vpack.c.bf16 %v5113_v60, %v5112_v59 }
 0x121   : > { %v4582_v5 = vadd.f32 %v4276_v53, %v3764_v61  ;;  %v799_v53 = vsel %vm643_vm3, %v794_v43, %v798_v44  ;;  %v7302_v61 = vld [vmem:[%s6991_s6 + $0xa0] sm:$0xff] }
 0x122   : > { %6847 = vst [vmem:[%s7109_s13 + $0x38] sm:$0xff] %v6545_v0   ;;  %5913 = vmatmul.msk.bf16.gmra.mxu1 %vm1181_vm1, %v7236_v18  ;;  %v2818_v18 = vsel %vm643_vm3, %v2813_v9, %v2817_v10  ;;  %v2827_v9 = vshrl.u32 %v7283_v26, 16  ;;  %v2831_v10 = vshll.u32 %v7305_v62, 16 }
 0x123   : > { %v4278_v6 = vpop.f32.mrf.mxu3  ;;  %v4718_v14 = vadd.f32 %v7088_v41, %v4582_v5 }
 0x125   : > { %v4982_v21 = vmul.f32 0.2, %v4718_v14  ;;  %vm4850_vm7 = vcmp.ge.f32.partialorder %v4718_v14, 0.0 }
 0x126   : > { %v3460_v13 = vpop.f32.mrf.mxu2  ;;  %v1438_v16 = vpop.f32.mrf.mxu0 }
 0x127   : > { %v3765_v15 = vadd.f32 %v3460_v13, %v1915_v11  ;;  %v1919_v19 = vpop.f32.mrf.mxu1  ;;  %v1918_v23 = vadd.f32 %v1917_v1, %v1438_v16  ;;  %v5114_v30 = vsel %vm4850_vm7, %v4718_v14, %v4982_v21  ;;  %v800_v1 = vshrl.u32 %v7280_v25, 16 }
 0x128   : > { %6317 = vmatmul.msk.bf16.gmra.mxu3 %vm1181_vm1, %v3924_v12  ;;  %v3927_v11 = vrot.slane %v7305_v62, 1  ;;  %v2829_v16 = vor.u32 %v2827_v9, %v2825_v46 }
 0x129   : > { %v4583_v20 = vadd.f32 %v4278_v6, %v3765_v15  ;;  %5843 = vmatmul.msk.bf16.gmra.mxu0 %vm1181_vm1, %v791_v17  ;;  %v804_v6 = vshll.u32 %v7302_v61, 16  ;;  %v802_v14 = vor.u32 %v800_v1, %v798_v44  ;;  %v2833_v17 = vrot.slane %v2831_v10, 1 }
 0x12b   : > { %v4719_v22 = vadd.f32 %v7088_v41, %v4583_v20  ;;  %6245 = vmatmul.msk.bf16.gmra.mxu2 %vm1181_vm1, %v2818_v18  ;;  %v4281_v24 = vpop.f32.mrf.mxu3  ;;  %v806_v15 = vrot.slane %v804_v6, 1 }
 0x12d   : > { %vm4851_vm8 = vcmp.ge.f32.partialorder %v4719_v22, 0.0  ;;  %v4983_v27 = vmul.f32 0.2, %v4719_v22 }
 0x12e   : > { %v3463_v28 = vpop.f32.mrf.mxu2  ;;  %v1440_v33 = vpop.f32.mrf.mxu0 }
 0x12f   : > { %v5115_v31 = vsel %vm4851_vm8, %v4719_v22, %v4983_v27  ;;  %v3766_v32 = vadd.f32 %v3463_v28, %v1918_v23  ;;  %v1922_v36 = vpop.f32.mrf.mxu1  ;;  %v1920_v47 = vadd.f32 %v1919_v19, %v1440_v33  ;;  %v3928_v19 = vsel %vm3887_vm2, %v3925_v39, %v3927_v11  ;;  %v7327_v33 = vld [vmem:[%s6991_s6 + $0xb8] sm:$0xff] }
 0x130   : > { %v6550_v35 = vpack.c.bf16 %v5115_v31, %v5114_v30 }
 0x131   : > { %v4584_v40 = vadd.f32 %v4281_v24, %v3766_v32  ;;  %v807_v24 = vsel %vm643_vm3, %v802_v14, %v806_v15  ;;  %v7324_v32 = vld [vmem:[%s6991_s6 + $0xa8] sm:$0xff] }
 0x132   : > { %6848 = vst [vmem:[%s7109_s13 + $0x40] sm:$0xff] %v6550_v35   ;;  %5914 = vmatmul.msk.bf16.gmra.mxu1 %vm1181_vm1, %v7258_v54  ;;  %v2826_v54 = vsel %vm643_vm3, %v2821_v45, %v2825_v46  ;;  %v2835_v45 = vshrl.u32 %v7305_v62, 16  ;;  %v2839_v46 = vshll.u32 %v7327_v33, 16 }
 0x133   : > { %v4283_v42 = vpop.f32.mrf.mxu3  ;;  %v4720_v50 = vadd.f32 %v7088_v41, %v4584_v40 }
 0x135   : > { %v4984_v57 = vmul.f32 0.2, %v4720_v50  ;;  %vm4852_vm9 = vcmp.ge.f32.partialorder %v4720_v50, 0.0 }
 0x136   : > { %v3465_v49 = vpop.f32.mrf.mxu2  ;;  %v1443_v52 = vpop.f32.mrf.mxu0 }
 0x137   : > { %v3767_v51 = vadd.f32 %v3465_v49, %v1920_v47  ;;  %v1924_v55 = vpop.f32.mrf.mxu1  ;;  %v1923_v59 = vadd.f32 %v1922_v36, %v1443_v52  ;;  %v5116_v2 = vsel %vm4852_vm9, %v4720_v50, %v4984_v57  ;;  %v808_v36 = vshrl.u32 %v7302_v61, 16 }
 0x138   : > { %6318 = vmatmul.msk.bf16.gmra.mxu3 %vm1181_vm1, %v3926_v48  ;;  %v3929_v47 = vrot.slane %v7327_v33, 1  ;;  %v2837_v52 = vor.u32 %v2835_v45, %v2833_v17 }
 0x139   : > { %v4585_v56 = vadd.f32 %v4283_v42, %v3767_v51  ;;  %5844 = vmatmul.msk.bf16.gmra.mxu0 %vm1181_vm1, %v799_v53  ;;  %v812_v42 = vshll.u32 %v7324_v32, 16  ;;  %v810_v50 = vor.u32 %v808_v36, %v806_v15  ;;  %v2841_v53 = vrot.slane %v2839_v46, 1 }
 0x13a   : > { %v2843_v15 = vshrl.u32 %v7327_v33, 16 }
 0x13b   : > { %v4721_v58 = vadd.f32 %v7088_v41, %v4585_v56  ;;  %6246 = vmatmul.msk.bf16.gmra.mxu2 %vm1181_vm1, %v2826_v54  ;;  %v4286_v60 = vpop.f32.mrf.mxu3  ;;  %v814_v51 = vrot.slane %v812_v42, 1 }
 0x13d   : > { %vm4853_vm10 = vcmp.ge.f32.partialorder %v4721_v58, 0.0  ;;  %v4985_v63 = vmul.f32 0.2, %v4721_v58 }
 0x13e   : > { %v3468_v0 = vpop.f32.mrf.mxu2  ;;  %v1445_v5 = vpop.f32.mrf.mxu0 }
 0x13f   : > { %v5117_v3 = vsel %vm4853_vm10, %v4721_v58, %v4985_v63  ;;  %v3768_v4 = vadd.f32 %v3468_v0, %v1923_v59  ;;  %v1927_v8 = vpop.f32.mrf.mxu1  ;;  %v1925_v18 = vadd.f32 %v1924_v55, %v1445_v5  ;;  %v3930_v55 = vsel %vm3887_vm2, %v3927_v11, %v3929_v47  ;;  %v7349_v5 = vld [vmem:[%s6991_s6 + $0xc0] sm:$0xff] }
 0x140   : > { %v6555_v7 = vpack.c.bf16 %v5117_v3, %v5116_v2 }
 0x141   : > { %v4586_v12 = vadd.f32 %v4286_v60, %v3768_v4  ;;  %v815_v60 = vsel %vm643_vm3, %v810_v50, %v814_v51  ;;  %v7346_v4 = vld [vmem:[%s6991_s6 + $0xb0] sm:$0xff] }
 0x142   : > { %6849 = vst [vmem:[%s7109_s13 + $0x48] sm:$0xff] %v6555_v7   ;;  %5915 = vmatmul.msk.bf16.gmra.mxu1 %vm1181_vm1, %v7280_v25  ;;  %v2834_v25 = vsel %vm643_vm3, %v2829_v16, %v2833_v17  ;;  %v2847_v16 = vshll.u32 %v7349_v5, 16  ;;  %v3931_v17 = vrot.slane %v7349_v5, 1 }
 0x143   : > { %v4288_v13 = vpop.f32.mrf.mxu3  ;;  %v4722_v21 = vadd.f32 %v7088_v41, %v4586_v12 }
 0x145   : > { %v4986_v28 = vmul.f32 0.2, %v4722_v21  ;;  %vm4854_vm11 = vcmp.ge.f32.partialorder %v4722_v21, 0.0 }
 0x146   : > { %v3470_v20 = vpop.f32.mrf.mxu2  ;;  %v1448_v23 = vpop.f32.mrf.mxu0 }
 0x147   : > { %v3769_v22 = vadd.f32 %v3470_v20, %v1925_v18  ;;  %v1929_v26 = vpop.f32.mrf.mxu1  ;;  %v1928_v30 = vadd.f32 %v1927_v8, %v1448_v23  ;;  %v5118_v37 = vsel %vm4854_vm11, %v4722_v21, %v4986_v28  ;;  %v816_v8 = vshrl.u32 %v7324_v32, 16 }
 0x148   : > { %6319 = vmatmul.msk.bf16.gmra.mxu3 %vm1181_vm1, %v3928_v19  ;;  %v2849_v23 = vrot.slane %v2847_v16, 1 }
 0x149   : > { %v4587_v27 = vadd.f32 %v4288_v13, %v3769_v22  ;;  %5845 = vmatmul.msk.bf16.gmra.mxu0 %vm1181_vm1, %v807_v24  ;;  %v818_v20 = vor.u32 %v816_v8, %v814_v51  ;;  %v2845_v22 = vor.u32 %v2843_v15, %v2841_v53 }
 0x14b   : > { %v4723_v29 = vadd.f32 %v7088_v41, %v4587_v27  ;;  %6247 = vmatmul.msk.bf16.gmra.mxu2 %vm1181_vm1, %v2834_v25  ;;  %v4291_v31 = vpop.f32.mrf.mxu3  ;;  %v3932_v25 = vsel %vm3887_vm2, %v3929_v47, %v3931_v17  ;;  %v7363_v27 = vld [vmem:[%s8383_s2] ss:$0 sm:$0xff] }
 0x14d   : > { %vm4855_vm12 = vcmp.ge.f32.partialorder %v4723_v29, 0.0  ;;  %v4987_v34 = vmul.f32 0.2, %v4723_v29 }
 0x14e   : > { %v3473_v35 = vpop.f32.mrf.mxu2  ;;  %v1450_v40 = vpop.f32.mrf.mxu0 }
 0x14f   : > { %v5119_v38 = vsel %vm4855_vm12, %v4723_v29, %v4987_v34  ;;  %v3770_v39 = vadd.f32 %v3473_v35, %v1928_v30  ;;  %v1932_v44 = vpop.f32.mrf.mxu1  ;;  %v1930_v54 = vadd.f32 %v1929_v26, %v1450_v40  ;;  %v7376_v40 = vld [vmem:[%s6991_s6 + $0xc8] sm:$0xff] }
 0x150   : > { %v6560_v43 = vpack.c.bf16 %v5119_v38, %v5118_v37 }
 0x151   : > { %v4588_v48 = vadd.f32 %v4291_v31, %v3770_v39  ;;  %v7373_v39 = vld [vmem:[%s6991_s6 + $0xb8] sm:$0xff] }
 0x152   : > { %6850 = vst [vmem:[%s7109_s13 + $0x50] sm:$0xff] %v6560_v43   ;;  %5916 = vmatmul.msk.bf16.gmra.mxu1 %vm1181_vm1, %v7302_v61  ;;  %v2842_v61 = vsel %vm643_vm3, %v2837_v52, %v2841_v53  ;;  %v2851_v52 = vshrl.u32 %v7349_v5, 16  ;;  %v2855_v53 = vshll.u32 %v7376_v40, 16 }
 0x153   : > { %v4293_v49 = vpop.f32.mrf.mxu3  ;;  %v4724_v57 = vadd.f32 %v7088_v41, %v4588_v48 }
 0x155   : > { %v4988_v0 = vmul.f32 0.2, %v4724_v57  ;;  %vm4856_vm13 = vcmp.ge.f32.partialorder %v4724_v57, 0.0 }
 0x156   : > { %v3475_v56 = vpop.f32.mrf.mxu2  ;;  %v1453_v59 = vpop.f32.mrf.mxu0 }
 0x157   : > { %v3771_v58 = vadd.f32 %v3475_v56, %v1930_v54  ;;  %v1934_v62 = vpop.f32.mrf.mxu1  ;;  %v1933_v2 = vadd.f32 %v1932_v44, %v1453_v59  ;;  %v5120_v9 = vsel %vm4856_vm13, %v4724_v57, %v4988_v0  ;;  %v824_v44 = vshrl.u32 %v7346_v4, 16 }
 0x158   : > { %6320 = vmatmul.msk.bf16.gmra.mxu3 %vm1181_vm1, %v3930_v55  ;;  %v3933_v54 = vrot.slane %v7376_v40, 1  ;;  %v2853_v59 = vor.u32 %v2851_v52, %v2849_v23 }
 0x159   : > { %v4589_v63 = vadd.f32 %v4293_v49, %v3771_v58  ;;  %5846 = vmatmul.msk.bf16.gmra.mxu0 %vm1181_vm1, %v815_v60  ;;  %v828_v49 = vshll.u32 %v7373_v39, 16  ;;  %v2857_v60 = vrot.slane %v2855_v53, 1 }
 0x15b   : > { %v4725_v1 = vadd.f32 %v7088_v41, %v4589_v63  ;;  %6248 = vmatmul.msk.bf16.gmra.mxu2 %vm1181_vm1, %v2842_v61  ;;  %v4296_v3 = vpop.f32.mrf.mxu3  ;;  %v820_v41 = vshll.u32 %v7346_v4, 16  ;;  %v830_v58 = vrot.slane %v828_v49, 1 }
 0x15d   : > { %vm4857_vm14 = vcmp.ge.f32.partialorder %v4725_v1, 0.0  ;;  %v4989_v6 = vmul.f32 0.2, %v4725_v1  ;;  %v822_v21 = vrot.slane %v820_v41, 1 }
 0x15e   : > { %v3478_v7 = vpop.f32.mrf.mxu2  ;;  %v1455_v12 = vpop.f32.mrf.mxu0 }
 0x15f   : > { %v5121_v10 = vsel %vm4857_vm14, %v4725_v1, %v4989_v6  ;;  %v3772_v11 = vadd.f32 %v3478_v7, %v1933_v2  ;;  %v1937_v14 = vpop.f32.mrf.mxu1  ;;  %v1935_v24 = vadd.f32 %v1934_v62, %v1455_v12  ;;  %v823_v31 = vsel %vm643_vm3, %v818_v20, %v822_v21  ;;  %v7398_v12 = vld [vmem:[%s6991_s6 + $0xd0] sm:$0xff] }
 0x160   : > { %v6565_v13 = vpack.c.bf16 %v5121_v10, %v5120_v9  ;;  %v826_v57 = vor.u32 %v824_v44, %v822_v21  ;;  %v3934_v62 = vsel %vm3887_vm2, %v3931_v17, %v3933_v54 }
 0x161   : > { %v4590_v18 = vadd.f32 %v4296_v3, %v3772_v11  ;;  %v7395_v11 = vld [vmem:[%s6991_s6 + $0xc0] sm:$0xff] }
 0x162   : > { %6851 = vst [vmem:[%s7109_s13 + $0x58] sm:$0xff] %v6565_v13   ;;  %5917 = vmatmul.msk.bf16.gmra.mxu1 %vm1181_vm1, %v7324_v32  ;;  %v2850_v32 = vsel %vm643_vm3, %v2845_v22, %v2849_v23  ;;  %v831_v3 = vsel %vm643_vm3, %v826_v57, %v830_v58  ;;  %v2859_v22 = vshrl.u32 %v7376_v40, 16  ;;  %v2863_v23 = vshll.u32 %v7398_v12, 16 }
 0x163   : > { %v4298_v19 = vpop.f32.mrf.mxu3  ;;  %v4726_v28 = vadd.f32 %v7363_v27, %v4590_v18 }
 0x165   : > { %v4990_v35 = vmul.f32 0.2, %v4726_v28  ;;  %vm4858_vm15 = vcmp.ge.f32.partialorder %v4726_v28, 0.0 }
 0x166   : > { %v3480_v26 = vpop.f32.mrf.mxu2  ;;  %v1458_v30 = vpop.f32.mrf.mxu0 }
 0x167   : > { %v3773_v29 = vadd.f32 %v3480_v26, %v1935_v24  ;;  %v1939_v33 = vpop.f32.mrf.mxu1  ;;  %v1938_v37 = vadd.f32 %v1937_v14, %v1458_v30  ;;  %v5122_v45 = vsel %vm4858_vm15, %v4726_v28, %v4990_v35  ;;  %v832_v14 = vshrl.u32 %v7373_v39, 16 }
 0x168   : > { %6321 = vmatmul.msk.bf16.gmra.mxu3 %vm1181_vm1, %v3932_v25  ;;  %v3935_v24 = vrot.slane %v7398_v12, 1  ;;  %v2861_v30 = vor.u32 %v2859_v22, %v2857_v60 }
 0x169   : > { %v4591_v34 = vadd.f32 %v4298_v19, %v3773_v29  ;;  %5847 = vmatmul.msk.bf16.gmra.mxu0 %vm1181_vm1, %v823_v31  ;;  %v836_v19 = vshll.u32 %v7395_v11, 16  ;;  %v834_v28 = vor.u32 %v832_v14, %v830_v58  ;;  %v2865_v31 = vrot.slane %v2863_v23, 1 }
 0x16b   : > { %v4727_v36 = vadd.f32 %v7363_v27, %v4591_v34  ;;  %6249 = vmatmul.msk.bf16.gmra.mxu2 %vm1181_vm1, %v2850_v32  ;;  %v4301_v38 = vpop.f32.mrf.mxu3  ;;  %v838_v29 = vrot.slane %v836_v19, 1 }
 0x16d   : > { %vm4859_vm0 = vcmp.ge.f32.partialorder %v4727_v36, 0.0  ;;  %v4991_v42 = vmul.f32 0.2, %v4727_v36 }
 0x16e   : > { %v3483_v43 = vpop.f32.mrf.mxu2  ;;  %v1460_v48 = vpop.f32.mrf.mxu0 }
 0x16f   : > { %v5123_v46 = vsel %vm4859_vm0, %v4727_v36, %v4991_v42  ;;  %v3774_v47 = vadd.f32 %v3483_v43, %v1938_v37  ;;  %v1942_v51 = vpop.f32.mrf.mxu1  ;;  %v1940_v61 = vadd.f32 %v1939_v33, %v1460_v48  ;;  %v3936_v33 = vsel %vm3887_vm2, %v3933_v54, %v3935_v24  ;;  %v7420_v48 = vld [vmem:[%s6991_s6 + $0xd8] sm:$0xff] }
 0x170   : > { %v6570_v50 = vpack.c.bf16 %v5123_v46, %v5122_v45 }
 0x171   : > { %v4592_v55 = vadd.f32 %v4301_v38, %v3774_v47  ;;  %v839_v38 = vsel %vm643_vm3, %v834_v28, %v838_v29  ;;  %v7417_v47 = vld [vmem:[%s6991_s6 + $0xc8] sm:$0xff] }
 0x172   : > { %6852 = vst [vmem:[%s7109_s13 + $0x60] sm:$0xff] %v6570_v50   ;;  %5918 = vmatmul.msk.bf16.gmra.mxu1 %vm1181_vm1, %v7346_v4  ;;  %v2858_v4 = vsel %vm643_vm3, %v2853_v59, %v2857_v60  ;;  %v2867_v59 = vshrl.u32 %v7398_v12, 16  ;;  %v2871_v60 = vshll.u32 %v7420_v48, 16 }
 0x173   : > { %v4303_v56 = vpop.f32.mrf.mxu3  ;;  %v4728_v0 = vadd.f32 %v7363_v27, %v4592_v55 }
 0x175   : > { %v4992_v7 = vmul.f32 0.2, %v4728_v0  ;;  %vm4860_vm4 = vcmp.ge.f32.partialorder %v4728_v0, 0.0 }
 0x176   : > { %v3485_v63 = vpop.f32.mrf.mxu2  ;;  %v1463_v2 = vpop.f32.mrf.mxu0 }
 0x177   : > { %v3775_v1 = vadd.f32 %v3485_v63, %v1940_v61  ;;  %v1944_v5 = vpop.f32.mrf.mxu1  ;;  %v1943_v9 = vadd.f32 %v1942_v51, %v1463_v2  ;;  %v5124_v15 = vsel %vm4860_vm4, %v4728_v0, %v4992_v7  ;;  %v840_v51 = vshrl.u32 %v7395_v11, 16 }
 0x178   : > { %6322 = vmatmul.msk.bf16.gmra.mxu3 %vm1181_vm1, %v3934_v62  ;;  %v3937_v61 = vrot.slane %v7420_v48, 1  ;;  %v2869_v2 = vor.u32 %v2867_v59, %v2865_v31 }
 0x179   : > { %v4593_v6 = vadd.f32 %v4303_v56, %v3775_v1  ;;  %5848 = vmatmul.msk.bf16.gmra.mxu0 %vm1181_vm1, %v831_v3  ;;  %v844_v56 = vshll.u32 %v7417_v47, 16  ;;  %v842_v0 = vor.u32 %v840_v51, %v838_v29  ;;  %v2873_v3 = vrot.slane %v2871_v60, 1 }
 0x17b   : > { %v4729_v8 = vadd.f32 %v7363_v27, %v4593_v6  ;;  %6250 = vmatmul.msk.bf16.gmra.mxu2 %vm1181_vm1, %v2858_v4  ;;  %v4306_v10 = vpop.f32.mrf.mxu3  ;;  %v846_v1 = vrot.slane %v844_v56, 1 }
 0x17d   : > { %vm4861_vm5 = vcmp.ge.f32.partialorder %v4729_v8, 0.0  ;;  %v4993_v41 = vmul.f32 0.2, %v4729_v8 }
 0x17e   : > { %v3488_v13 = vpop.f32.mrf.mxu2  ;;  %v1465_v18 = vpop.f32.mrf.mxu0 }
 0x17f   : > { %v5125_v16 = vsel %vm4861_vm5, %v4729_v8, %v4993_v41  ;;  %v3776_v17 = vadd.f32 %v3488_v13, %v1943_v9  ;;  %v1947_v21 = vpop.f32.mrf.mxu1  ;;  %v1945_v32 = vadd.f32 %v1944_v5, %v1465_v18  ;;  %v3938_v5 = vsel %vm3887_vm2, %v3935_v24, %v3937_v61  ;;  %v7442_v18 = vld [vmem:[%s6991_s6 + $0xe0] sm:$0xff] }
 0x180   : > { %v6575_v20 = vpack.c.bf16 %v5125_v16, %v5124_v15 }
 0x181   : > { %v4594_v25 = vadd.f32 %v4306_v10, %v3776_v17  ;;  %v847_v10 = vsel %vm643_vm3, %v842_v0, %v846_v1  ;;  %v7439_v17 = vld [vmem:[%s6991_s6 + $0xd0] sm:$0xff] }
 0x182   : > { %6853 = vst [vmem:[%s7109_s13 + $0x68] sm:$0xff] %v6575_v20   ;;  %5919 = vmatmul.msk.bf16.gmra.mxu1 %vm1181_vm1, %v7373_v39  ;;  %v2866_v39 = vsel %vm643_vm3, %v2861_v30, %v2865_v31  ;;  %v2875_v30 = vshrl.u32 %v7420_v48, 16  ;;  %v2879_v31 = vshll.u32 %v7442_v18, 16 }
 0x183   : > { %v4308_v26 = vpop.f32.mrf.mxu3  ;;  %v4730_v35 = vadd.f32 %v7363_v27, %v4594_v25 }
 0x185   : > { %v4994_v43 = vmul.f32 0.2, %v4730_v35  ;;  %vm4862_vm6 = vcmp.ge.f32.partialorder %v4730_v35, 0.0 }
 0x186   : > { %v3490_v34 = vpop.f32.mrf.mxu2  ;;  %v1468_v37 = vpop.f32.mrf.mxu0 }
 0x187   : > { %v3777_v36 = vadd.f32 %v3490_v34, %v1945_v32  ;;  %v1949_v40 = vpop.f32.mrf.mxu1  ;;  %v1948_v45 = vadd.f32 %v1947_v21, %v1468_v37  ;;  %v5126_v52 = vsel %vm4862_vm6, %v4730_v35, %v4994_v43  ;;  %v848_v21 = vshrl.u32 %v7417_v47, 16 }
 0x188   : > { %6323 = vmatmul.msk.bf16.gmra.mxu3 %vm1181_vm1, %v3936_v33  ;;  %v3939_v32 = vrot.slane %v7442_v18, 1  ;;  %v2877_v37 = vor.u32 %v2875_v30, %v2873_v3 }
 0x189   : > { %v4595_v42 = vadd.f32 %v4308_v26, %v3777_v36  ;;  %5849 = vmatmul.msk.bf16.gmra.mxu0 %vm1181_vm1, %v839_v38  ;;  %v852_v26 = vshll.u32 %v7439_v17, 16  ;;  %v850_v35 = vor.u32 %v848_v21, %v846_v1  ;;  %v2881_v38 = vrot.slane %v2879_v31, 1 }
 0x18b   : > { %v4731_v44 = vadd.f32 %v7363_v27, %v4595_v42  ;;  %6251 = vmatmul.msk.bf16.gmra.mxu2 %vm1181_vm1, %v2866_v39  ;;  %v4311_v46 = vpop.f32.mrf.mxu3  ;;  %v854_v36 = vrot.slane %v852_v26, 1 }
 0x18d   : > { %vm4863_vm7 = vcmp.ge.f32.partialorder %v4731_v44, 0.0  ;;  %v4995_v49 = vmul.f32 0.2, %v4731_v44 }
 0x18e   : > { %v3493_v50 = vpop.f32.mrf.mxu2  ;;  %v1470_v55 = vpop.f32.mrf.mxu0 }
 0x18f   : > { %v5127_v53 = vsel %vm4863_vm7, %v4731_v44, %v4995_v49  ;;  %v3778_v54 = vadd.f32 %v3493_v50, %v1948_v45  ;;  %v1952_v58 = vpop.f32.mrf.mxu1  ;;  %v1950_v4 = vadd.f32 %v1949_v40, %v1470_v55  ;;  %v3940_v40 = vsel %vm3887_vm2, %v3937_v61, %v3939_v32  ;;  %v7464_v55 = vld [vmem:[%s6991_s6 + $0xe8] sm:$0xff] }
 0x190   : > { %v6580_v57 = vpack.c.bf16 %v5127_v53, %v5126_v52 }
 0x191   : > { %v4596_v62 = vadd.f32 %v4311_v46, %v3778_v54  ;;  %v855_v46 = vsel %vm643_vm3, %v850_v35, %v854_v36  ;;  %v7461_v54 = vld [vmem:[%s6991_s6 + $0xd8] sm:$0xff] }
 0x192   : > { %6854 = vst [vmem:[%s7109_s13 + $0x70] sm:$0xff] %v6580_v57   ;;  %5920 = vmatmul.msk.bf16.gmra.mxu1 %vm1181_vm1, %v7395_v11  ;;  %v2874_v11 = vsel %vm643_vm3, %v2869_v2, %v2873_v3  ;;  %v2883_v2 = vshrl.u32 %v7442_v18, 16  ;;  %v2887_v3 = vshll.u32 %v7464_v55, 16 }
 0x193   : > { %v4313_v63 = vpop.f32.mrf.mxu3  ;;  %v4732_v7 = vadd.f32 %v7363_v27, %v4596_v62 }
 0x195   : > { %v4996_v13 = vmul.f32 0.2, %v4732_v7  ;;  %vm4864_vm8 = vcmp.ge.f32.partialorder %v4732_v7, 0.0 }
 0x196   : > { %v3495_v6 = vpop.f32.mrf.mxu2  ;;  %v1473_v9 = vpop.f32.mrf.mxu0 }
 0x197   : > { %v3779_v8 = vadd.f32 %v3495_v6, %v1950_v4  ;;  %v1954_v12 = vpop.f32.mrf.mxu1  ;;  %v1953_v15 = vadd.f32 %v1952_v58, %v1473_v9  ;;  %v5128_v22 = vsel %vm4864_vm8, %v4732_v7, %v4996_v13  ;;  %v856_v58 = vshrl.u32 %v7439_v17, 16 }
 0x198   : > { %6324 = vmatmul.msk.bf16.gmra.mxu3 %vm1181_vm1, %v3938_v5  ;;  %v3941_v4 = vrot.slane %v7464_v55, 1  ;;  %v2885_v9 = vor.u32 %v2883_v2, %v2881_v38 }
 0x199   : > { %v4597_v41 = vadd.f32 %v4313_v63, %v3779_v8  ;;  %5850 = vmatmul.msk.bf16.gmra.mxu0 %vm1181_vm1, %v847_v10  ;;  %v860_v63 = vshll.u32 %v7461_v54, 16  ;;  %v858_v7 = vor.u32 %v856_v58, %v854_v36  ;;  %v2889_v10 = vrot.slane %v2887_v3, 1 }
 0x19b   : > { %v4733_v14 = vadd.f32 %v7363_v27, %v4597_v41  ;;  %6252 = vmatmul.msk.bf16.gmra.mxu2 %vm1181_vm1, %v2874_v11  ;;  %v4316_v16 = vpop.f32.mrf.mxu3  ;;  %v862_v8 = vrot.slane %v860_v63, 1 }
 0x19d   : > { %vm4865_vm9 = vcmp.ge.f32.partialorder %v4733_v14, 0.0  ;;  %v4997_v19 = vmul.f32 0.2, %v4733_v14 }
 0x19e   : > { %v3498_v20 = vpop.f32.mrf.mxu2  ;;  %v1475_v25 = vpop.f32.mrf.mxu0 }
 0x19f   : > { %v5129_v23 = vsel %vm4865_vm9, %v4733_v14, %v4997_v19  ;;  %v3780_v24 = vadd.f32 %v3498_v20, %v1953_v15  ;;  %v1957_v29 = vpop.f32.mrf.mxu1  ;;  %v1955_v39 = vadd.f32 %v1954_v12, %v1475_v25  ;;  %v3942_v12 = vsel %vm3887_vm2, %v3939_v32, %v3941_v4  ;;  %v7486_v25 = vld [vmem:[%s6991_s6 + $0xf0] sm:$0xff] }
 0x1a0   : > { %v6585_v28 = vpack.c.bf16 %v5129_v23, %v5128_v22 }
 0x1a1   : > { %v4598_v33 = vadd.f32 %v4316_v16, %v3780_v24  ;;  %v863_v16 = vsel %vm643_vm3, %v858_v7, %v862_v8  ;;  %v7483_v24 = vld [vmem:[%s6991_s6 + $0xe0] sm:$0xff] }
 0x1a2   : > { %6855 = vst [vmem:[%s7109_s13 + $0x78] sm:$0xff] %v6585_v28   ;;  %5921 = vmatmul.msk.bf16.gmra.mxu1 %vm1181_vm1, %v7417_v47  ;;  %v2882_v47 = vsel %vm643_vm3, %v2877_v37, %v2881_v38  ;;  %v2891_v37 = vshrl.u32 %v7464_v55, 16  ;;  %v2895_v38 = vshll.u32 %v7486_v25, 16 }
 0x1a3   : > { %v4318_v34 = vpop.f32.mrf.mxu3  ;;  %v4734_v43 = vadd.f32 %v7363_v27, %v4598_v33 }
 0x1a5   : > { %v4998_v50 = vmul.f32 0.2, %v4734_v43  ;;  %vm4866_vm10 = vcmp.ge.f32.partialorder %v4734_v43, 0.0 }
 0x1a6   : > { %v3500_v42 = vpop.f32.mrf.mxu2  ;;  %v1478_v45 = vpop.f32.mrf.mxu0 }
 0x1a7   : > { %v3781_v44 = vadd.f32 %v3500_v42, %v1955_v39  ;;  %v1959_v48 = vpop.f32.mrf.mxu1  ;;  %v1958_v52 = vadd.f32 %v1957_v29, %v1478_v45  ;;  %v5130_v59 = vsel %vm4866_vm10, %v4734_v43, %v4998_v50  ;;  %v864_v29 = vshrl.u32 %v7461_v54, 16 }
 0x1a8   : > { %6325 = vmatmul.msk.bf16.gmra.mxu3 %vm1181_vm1, %v3940_v40  ;;  %v3943_v39 = vrot.slane %v7486_v25, 1  ;;  %v2893_v45 = vor.u32 %v2891_v37, %v2889_v10 }
 0x1a9   : > { %v4599_v49 = vadd.f32 %v4318_v34, %v3781_v44  ;;  %5851 = vmatmul.msk.bf16.gmra.mxu0 %vm1181_vm1, %v855_v46  ;;  %v868_v34 = vshll.u32 %v7483_v24, 16  ;;  %v866_v43 = vor.u32 %v864_v29, %v862_v8  ;;  %v2897_v46 = vrot.slane %v2895_v38, 1 }
 0x1ab   : > { %v4735_v51 = vadd.f32 %v7363_v27, %v4599_v49  ;;  %6253 = vmatmul.msk.bf16.gmra.mxu2 %vm1181_vm1, %v2882_v47  ;;  %v4321_v53 = vpop.f32.mrf.mxu3  ;;  %v870_v44 = vrot.slane %v868_v34, 1 }
 0x1ad   : > { %vm4867_vm11 = vcmp.ge.f32.partialorder %v4735_v51, 0.0  ;;  %v4999_v56 = vmul.f32 0.2, %v4735_v51 }
 0x1ae   : > { %v3503_v57 = vpop.f32.mrf.mxu2  ;;  %v1480_v62 = vpop.f32.mrf.mxu0 }
 0x1af   : > { %v5131_v60 = vsel %vm4867_vm11, %v4735_v51, %v4999_v56  ;;  %v3782_v61 = vadd.f32 %v3503_v57, %v1958_v52  ;;  %v1962_v1 = vpop.f32.mrf.mxu1  ;;  %v1960_v11 = vadd.f32 %v1959_v48, %v1480_v62  ;;  %v3944_v48 = vsel %vm3887_vm2, %v3941_v4, %v3943_v39  ;;  %v7508_v62 = vld [vmem:[%s6991_s6 + $0xf8] sm:$0xff] }
 0x1b0   : > { %v6590_v0 = vpack.c.bf16 %v5131_v60, %v5130_v59 }
 0x1b1   : > { %v4600_v5 = vadd.f32 %v4321_v53, %v3782_v61  ;;  %v871_v53 = vsel %vm643_vm3, %v866_v43, %v870_v44  ;;  %v7505_v61 = vld [vmem:[%s6991_s6 + $0xe8] sm:$0xff] }
 0x1b2   : > { %6856 = vst [vmem:[%s7109_s13 + $0x80] sm:$0xff] %v6590_v0   ;;  %5922 = vmatmul.msk.bf16.gmra.mxu1 %vm1181_vm1, %v7439_v17  ;;  %v2890_v17 = vsel %vm643_vm3, %v2885_v9, %v2889_v10  ;;  %v2899_v9 = vshrl.u32 %v7486_v25, 16  ;;  %v2903_v10 = vshll.u32 %v7508_v62, 16 }
 0x1b3   : > { %v4323_v6 = vpop.f32.mrf.mxu3  ;;  %v4736_v13 = vadd.f32 %v7363_v27, %v4600_v5 }
 0x1b5   : > { %v5000_v20 = vmul.f32 0.2, %v4736_v13  ;;  %vm4868_vm12 = vcmp.ge.f32.partialorder %v4736_v13, 0.0 }
 0x1b6   : > { %v3505_v41 = vpop.f32.mrf.mxu2  ;;  %v1483_v15 = vpop.f32.mrf.mxu0 }
 0x1b7   : > { %v3783_v14 = vadd.f32 %v3505_v41, %v1960_v11  ;;  %v1964_v18 = vpop.f32.mrf.mxu1  ;;  %v1963_v22 = vadd.f32 %v1962_v1, %v1483_v15  ;;  %v5132_v30 = vsel %vm4868_vm12, %v4736_v13, %v5000_v20  ;;  %v872_v1 = vshrl.u32 %v7483_v24, 16 }
 0x1b8   : > { %6326 = vmatmul.msk.bf16.gmra.mxu3 %vm1181_vm1, %v3942_v12  ;;  %v3945_v11 = vrot.slane %v7508_v62, 1  ;;  %v2901_v15 = vor.u32 %v2899_v9, %v2897_v46 }
 0x1b9   : > { %v4601_v19 = vadd.f32 %v4323_v6, %v3783_v14  ;;  %5852 = vmatmul.msk.bf16.gmra.mxu0 %vm1181_vm1, %v863_v16  ;;  %v876_v6 = vshll.u32 %v7505_v61, 16  ;;  %v874_v13 = vor.u32 %v872_v1, %v870_v44  ;;  %v2905_v16 = vrot.slane %v2903_v10, 1 }
 0x1bb   : > { %v4737_v21 = vadd.f32 %v7363_v27, %v4601_v19  ;;  %6254 = vmatmul.msk.bf16.gmra.mxu2 %vm1181_vm1, %v2890_v17  ;;  %v4326_v23 = vpop.f32.mrf.mxu3  ;;  %v878_v14 = vrot.slane %v876_v6, 1 }
 0x1bd   : > { %vm4869_vm13 = vcmp.ge.f32.partialorder %v4737_v21, 0.0  ;;  %v5001_v26 = vmul.f32 0.2, %v4737_v21 }
 0x1be   : > { %v3508_v28 = vpop.f32.mrf.mxu2  ;;  %v1485_v33 = vpop.f32.mrf.mxu0 }
 0x1bf   : > { %v5133_v31 = vsel %vm4869_vm13, %v4737_v21, %v5001_v26  ;;  %v3784_v32 = vadd.f32 %v3508_v28, %v1963_v22  ;;  %v1967_v36 = vpop.f32.mrf.mxu1  ;;  %v1965_v47 = vadd.f32 %v1964_v18, %v1485_v33  ;;  %v3946_v18 = vsel %vm3887_vm2, %v3943_v39, %v3945_v11  ;;  %v7530_v33 = vld [vmem:[%s6991_s6 + $0x100] sm:$0xff] }
 0x1c0   : > { %v6595_v35 = vpack.c.bf16 %v5133_v31, %v5132_v30 }
 0x1c1   : > { %v4602_v40 = vadd.f32 %v4326_v23, %v3784_v32  ;;  %v879_v23 = vsel %vm643_vm3, %v874_v13, %v878_v14  ;;  %v7527_v32 = vld [vmem:[%s6991_s6 + $0xf0] sm:$0xff] }
 0x1c2   : > { %6857 = vst [vmem:[%s7109_s13 + $0x88] sm:$0xff] %v6595_v35   ;;  %5923 = vmatmul.msk.bf16.gmra.mxu1 %vm1181_vm1, %v7461_v54  ;;  %v2898_v54 = vsel %vm643_vm3, %v2893_v45, %v2897_v46  ;;  %v2907_v45 = vshrl.u32 %v7508_v62, 16  ;;  %v2911_v46 = vshll.u32 %v7530_v33, 16 }
 0x1c3   : > { %v4328_v42 = vpop.f32.mrf.mxu3  ;;  %v4738_v50 = vadd.f32 %v7363_v27, %v4602_v40 }
 0x1c5   : > { %v5002_v57 = vmul.f32 0.2, %v4738_v50  ;;  %vm4870_vm14 = vcmp.ge.f32.partialorder %v4738_v50, 0.0 }
 0x1c6   : > { %v3510_v49 = vpop.f32.mrf.mxu2  ;;  %v1488_v52 = vpop.f32.mrf.mxu0 }
 0x1c7   : > { %v3785_v51 = vadd.f32 %v3510_v49, %v1965_v47  ;;  %v1969_v55 = vpop.f32.mrf.mxu1  ;;  %v1968_v59 = vadd.f32 %v1967_v36, %v1488_v52  ;;  %v5134_v2 = vsel %vm4870_vm14, %v4738_v50, %v5002_v57  ;;  %v880_v36 = vshrl.u32 %v7505_v61, 16 }
 0x1c8   : > { %6327 = vmatmul.msk.bf16.gmra.mxu3 %vm1181_vm1, %v3944_v48  ;;  %v3947_v47 = vrot.slane %v7530_v33, 1  ;;  %v2909_v52 = vor.u32 %v2907_v45, %v2905_v16 }
 0x1c9   : > { %v4603_v56 = vadd.f32 %v4328_v42, %v3785_v51  ;;  %5853 = vmatmul.msk.bf16.gmra.mxu0 %vm1181_vm1, %v871_v53  ;;  %v884_v42 = vshll.u32 %v7527_v32, 16  ;;  %v882_v50 = vor.u32 %v880_v36, %v878_v14  ;;  %v2913_v53 = vrot.slane %v2911_v46, 1 }
 0x1cb   : > { %v4739_v58 = vadd.f32 %v7363_v27, %v4603_v56  ;;  %6255 = vmatmul.msk.bf16.gmra.mxu2 %vm1181_vm1, %v2898_v54  ;;  %v4331_v60 = vpop.f32.mrf.mxu3  ;;  %v886_v51 = vrot.slane %v884_v42, 1 }
 0x1cd   : > { %vm4871_vm15 = vcmp.ge.f32.partialorder %v4739_v58, 0.0  ;;  %v5003_v63 = vmul.f32 0.2, %v4739_v58 }
 0x1ce   : > { %v3513_v0 = vpop.f32.mrf.mxu2  ;;  %v1490_v5 = vpop.f32.mrf.mxu0 }
 0x1cf   : > { %v5135_v3 = vsel %vm4871_vm15, %v4739_v58, %v5003_v63  ;;  %v3786_v4 = vadd.f32 %v3513_v0, %v1968_v59  ;;  %v1972_v8 = vpop.f32.mrf.mxu1  ;;  %v1970_v17 = vadd.f32 %v1969_v55, %v1490_v5  ;;  %v3948_v55 = vsel %vm3887_vm2, %v3945_v11, %v3947_v47  ;;  %v7552_v5 = vld [vmem:[%s6991_s6 + $0x108] sm:$0xff] }
 0x1d0   : > { %v6600_v7 = vpack.c.bf16 %v5135_v3, %v5134_v2 }
 0x1d1   : > { %v4604_v12 = vadd.f32 %v4331_v60, %v3786_v4  ;;  %v887_v60 = vsel %vm643_vm3, %v882_v50, %v886_v51  ;;  %v7549_v4 = vld [vmem:[%s6991_s6 + $0xf8] sm:$0xff] }
 0x1d2   : > { %6858 = vst [vmem:[%s7109_s13 + $0x90] sm:$0xff] %v6600_v7   ;;  %5924 = vmatmul.msk.bf16.gmra.mxu1 %vm1181_vm1, %v7483_v24  ;;  %v2906_v24 = vsel %vm643_vm3, %v2901_v15, %v2905_v16  ;;  %v2915_v15 = vshrl.u32 %v7530_v33, 16  ;;  %v2919_v16 = vshll.u32 %v7552_v5, 16 }
 0x1d3   : > { %v4333_v41 = vpop.f32.mrf.mxu3  ;;  %v4740_v20 = vadd.f32 %v7363_v27, %v4604_v12 }
 0x1d5   : > { %v5004_v28 = vmul.f32 0.2, %v4740_v20  ;;  %vm4872_vm0 = vcmp.ge.f32.partialorder %v4740_v20, 0.0 }
 0x1d6   : > { %v3515_v19 = vpop.f32.mrf.mxu2  ;;  %v1493_v22 = vpop.f32.mrf.mxu0 }
 0x1d7   : > { %v3787_v21 = vadd.f32 %v3515_v19, %v1970_v17  ;;  %v1974_v25 = vpop.f32.mrf.mxu1  ;;  %v1973_v30 = vadd.f32 %v1972_v8, %v1493_v22  ;;  %v5136_v37 = vsel %vm4872_vm0, %v4740_v20, %v5004_v28  ;;  %v888_v8 = vshrl.u32 %v7527_v32, 16 }
 0x1d8   : > { %6328 = vmatmul.msk.bf16.gmra.mxu3 %vm1181_vm1, %v3946_v18  ;;  %v3949_v17 = vrot.slane %v7552_v5, 1  ;;  %v2917_v22 = vor.u32 %v2915_v15, %v2913_v53 }
 0x1d9   : > { %v4605_v26 = vadd.f32 %v4333_v41, %v3787_v21  ;;  %5854 = vmatmul.msk.bf16.gmra.mxu0 %vm1181_vm1, %v879_v23  ;;  %v892_v41 = vshll.u32 %v7549_v4, 16  ;;  %v890_v20 = vor.u32 %v888_v8, %v886_v51  ;;  %v2921_v23 = vrot.slane %v2919_v16, 1 }
 0x1db   : > { %v4741_v29 = vadd.f32 %v7363_v27, %v4605_v26  ;;  %6256 = vmatmul.msk.bf16.gmra.mxu2 %vm1181_vm1, %v2906_v24  ;;  %v4336_v31 = vpop.f32.mrf.mxu3  ;;  %v894_v21 = vrot.slane %v892_v41, 1 }
 0x1dd   : > { %vm4873_vm4 = vcmp.ge.f32.partialorder %v4741_v29, 0.0  ;;  %v5005_v34 = vmul.f32 0.2, %v4741_v29 }
 0x1de   : > { %v3518_v35 = vpop.f32.mrf.mxu2  ;;  %v1495_v40 = vpop.f32.mrf.mxu0 }
 0x1df   : > { %v5137_v38 = vsel %vm4873_vm4, %v4741_v29, %v5005_v34  ;;  %v3788_v39 = vadd.f32 %v3518_v35, %v1973_v30  ;;  %v1977_v44 = vpop.f32.mrf.mxu1  ;;  %v1975_v54 = vadd.f32 %v1974_v25, %v1495_v40  ;;  %v3950_v25 = vsel %vm3887_vm2, %v3947_v47, %v3949_v17  ;;  %v7574_v40 = vld [vmem:[%s6991_s6 + $0x110] sm:$0xff] }
 0x1e0   : > { %v6605_v43 = vpack.c.bf16 %v5137_v38, %v5136_v37 }
 0x1e1   : > { %v4606_v48 = vadd.f32 %v4336_v31, %v3788_v39  ;;  %v895_v31 = vsel %vm643_vm3, %v890_v20, %v894_v21  ;;  %v7571_v39 = vld [vmem:[%s6991_s6 + $0x100] sm:$0xff] }
 0x1e2   : > { %6859 = vst [vmem:[%s7109_s13 + $0x98] sm:$0xff] %v6605_v43   ;;  %5925 = vmatmul.msk.bf16.gmra.mxu1 %vm1181_vm1, %v7505_v61  ;;  %v2914_v61 = vsel %vm643_vm3, %v2909_v52, %v2913_v53  ;;  %v2923_v52 = vshrl.u32 %v7552_v5, 16  ;;  %v2927_v53 = vshll.u32 %v7574_v40, 16 }
 0x1e3   : > { %v4338_v49 = vpop.f32.mrf.mxu3  ;;  %v4742_v57 = vadd.f32 %v7363_v27, %v4606_v48 }
 0x1e5   : > { %v5006_v0 = vmul.f32 0.2, %v4742_v57  ;;  %vm4874_vm5 = vcmp.ge.f32.partialorder %v4742_v57, 0.0 }
 0x1e6   : > { %v3520_v56 = vpop.f32.mrf.mxu2  ;;  %v1498_v59 = vpop.f32.mrf.mxu0 }
 0x1e7   : > { %v3789_v58 = vadd.f32 %v3520_v56, %v1975_v54  ;;  %v1979_v62 = vpop.f32.mrf.mxu1  ;;  %v1978_v2 = vadd.f32 %v1977_v44, %v1498_v59  ;;  %v5138_v9 = vsel %vm4874_vm5, %v4742_v57, %v5006_v0  ;;  %v896_v44 = vshrl.u32 %v7549_v4, 16 }
 0x1e8   : > { %6329 = vmatmul.msk.bf16.gmra.mxu3 %vm1181_vm1, %v3948_v55  ;;  %v3951_v54 = vrot.slane %v7574_v40, 1  ;;  %v2925_v59 = vor.u32 %v2923_v52, %v2921_v23 }
 0x1e9   : > { %v4607_v63 = vadd.f32 %v4338_v49, %v3789_v58  ;;  %5855 = vmatmul.msk.bf16.gmra.mxu0 %vm1181_vm1, %v887_v60  ;;  %v900_v49 = vshll.u32 %v7571_v39, 16  ;;  %v898_v57 = vor.u32 %v896_v44, %v894_v21  ;;  %v2929_v60 = vrot.slane %v2927_v53, 1 }
 0x1eb   : > { %v4743_v1 = vadd.f32 %v7363_v27, %v4607_v63  ;;  %6257 = vmatmul.msk.bf16.gmra.mxu2 %vm1181_vm1, %v2914_v61  ;;  %v4341_v3 = vpop.f32.mrf.mxu3  ;;  %v902_v58 = vrot.slane %v900_v49, 1 }
 0x1ed   : > { %vm4875_vm6 = vcmp.ge.f32.partialorder %v4743_v1, 0.0  ;;  %v5007_v6 = vmul.f32 0.2, %v4743_v1 }
 0x1ee   : > { %v3523_v7 = vpop.f32.mrf.mxu2  ;;  %v1500_v12 = vpop.f32.mrf.mxu0 }
 0x1ef   : > { %v5139_v10 = vsel %vm4875_vm6, %v4743_v1, %v5007_v6  ;;  %v3790_v11 = vadd.f32 %v3523_v7, %v1978_v2  ;;  %v1982_v14 = vpop.f32.mrf.mxu1  ;;  %v1980_v24 = vadd.f32 %v1979_v62, %v1500_v12  ;;  %v3952_v62 = vsel %vm3887_vm2, %v3949_v17, %v3951_v54  ;;  %v7596_v12 = vld [vmem:[%s6991_s6 + $0x118] sm:$0xff] }
 0x1f0   : > { %v6610_v13 = vpack.c.bf16 %v5139_v10, %v5138_v9 }
 0x1f1   : > { %v4608_v18 = vadd.f32 %v4341_v3, %v3790_v11  ;;  %v903_v3 = vsel %vm643_vm3, %v898_v57, %v902_v58  ;;  %v7593_v11 = vld [vmem:[%s6991_s6 + $0x108] sm:$0xff] }
 0x1f2   : > { %6860 = vst [vmem:[%s7109_s13 + $0xa0] sm:$0xff] %v6610_v13   ;;  %5926 = vmatmul.msk.bf16.gmra.mxu1 %vm1181_vm1, %v7527_v32  ;;  %v2922_v32 = vsel %vm643_vm3, %v2917_v22, %v2921_v23  ;;  %v2931_v22 = vshrl.u32 %v7574_v40, 16  ;;  %v2935_v23 = vshll.u32 %v7596_v12, 16 }
 0x1f3   : > { %v4343_v19 = vpop.f32.mrf.mxu3  ;;  %v4744_v28 = vadd.f32 %v7363_v27, %v4608_v18 }
 0x1f5   : > { %v5008_v35 = vmul.f32 0.2, %v4744_v28  ;;  %vm4876_vm7 = vcmp.ge.f32.partialorder %v4744_v28, 0.0 }
 0x1f6   : > { %v3525_v26 = vpop.f32.mrf.mxu2  ;;  %v1503_v30 = vpop.f32.mrf.mxu0 }
 0x1f7   : > { %v3791_v29 = vadd.f32 %v3525_v26, %v1980_v24  ;;  %v1984_v33 = vpop.f32.mrf.mxu1  ;;  %v1983_v37 = vadd.f32 %v1982_v14, %v1503_v30  ;;  %v5140_v45 = vsel %vm4876_vm7, %v4744_v28, %v5008_v35  ;;  %v904_v14 = vshrl.u32 %v7571_v39, 16 }
 0x1f8   : > { %6330 = vmatmul.msk.bf16.gmra.mxu3 %vm1181_vm1, %v3950_v25  ;;  %v3953_v24 = vrot.slane %v7596_v12, 1  ;;  %v2933_v30 = vor.u32 %v2931_v22, %v2929_v60 }
 0x1f9   : > { %v4609_v34 = vadd.f32 %v4343_v19, %v3791_v29  ;;  %5856 = vmatmul.msk.bf16.gmra.mxu0 %vm1181_vm1, %v895_v31  ;;  %v908_v19 = vshll.u32 %v7593_v11, 16  ;;  %v906_v28 = vor.u32 %v904_v14, %v902_v58  ;;  %v2937_v31 = vrot.slane %v2935_v23, 1  ;;  %v7637_v14 = vld [vmem:[%s8383_s2] ss:$0 sm:$0xff] }
 0x1fb   : > { %v4745_v36 = vadd.f32 %v7363_v27, %v4609_v34  ;;  %6258 = vmatmul.msk.bf16.gmra.mxu2 %vm1181_vm1, %v2922_v32  ;;  %v4346_v38 = vpop.f32.mrf.mxu3  ;;  %v910_v29 = vrot.slane %v908_v19, 1 }
 0x1fd   : > { %vm4877_vm8 = vcmp.ge.f32.partialorder %v4745_v36, 0.0  ;;  %v5009_v42 = vmul.f32 0.2, %v4745_v36 }
 0x1fe   : > { %v3528_v43 = vpop.f32.mrf.mxu2  ;;  %v1505_v48 = vpop.f32.mrf.mxu0 }
 0x1ff   : > { %v5141_v46 = vsel %vm4877_vm8, %v4745_v36, %v5009_v42  ;;  %v3792_v47 = vadd.f32 %v3528_v43, %v1983_v37  ;;  %v1987_v51 = vpop.f32.mrf.mxu1  ;;  %v1985_v61 = vadd.f32 %v1984_v33, %v1505_v48  ;;  %v3954_v33 = vsel %vm3887_vm2, %v3951_v54, %v3953_v24  ;;  %v7618_v48 = vld [vmem:[%s6991_s6 + $0x120] sm:$0xff] }
 0x200   : > { %v6615_v50 = vpack.c.bf16 %v5141_v46, %v5140_v45 }
 0x201   : > { %v4610_v55 = vadd.f32 %v4346_v38, %v3792_v47  ;;  %v911_v38 = vsel %vm643_vm3, %v906_v28, %v910_v29  ;;  %v7615_v47 = vld [vmem:[%s6991_s6 + $0x110] sm:$0xff] }
 0x202   : > { %6861 = vst [vmem:[%s7109_s13 + $0xa8] sm:$0xff] %v6615_v50   ;;  %5927 = vmatmul.msk.bf16.gmra.mxu1 %vm1181_vm1, %v7549_v4  ;;  %v2930_v4 = vsel %vm643_vm3, %v2925_v59, %v2929_v60  ;;  %v2939_v59 = vshrl.u32 %v7596_v12, 16  ;;  %v2943_v60 = vshll.u32 %v7618_v48, 16 }
 0x203   : > { %v4348_v56 = vpop.f32.mrf.mxu3  ;;  %v4746_v0 = vadd.f32 %v7363_v27, %v4610_v55 }
 0x205   : > { %v5010_v7 = vmul.f32 0.2, %v4746_v0  ;;  %vm4878_vm9 = vcmp.ge.f32.partialorder %v4746_v0, 0.0 }
 0x206   : > { %v3530_v63 = vpop.f32.mrf.mxu2  ;;  %v1508_v2 = vpop.f32.mrf.mxu0 }
 0x207   : > { %v3793_v1 = vadd.f32 %v3530_v63, %v1985_v61  ;;  %v1989_v5 = vpop.f32.mrf.mxu1  ;;  %v1988_v9 = vadd.f32 %v1987_v51, %v1508_v2  ;;  %v5142_v15 = vsel %vm4878_vm9, %v4746_v0, %v5010_v7  ;;  %v912_v51 = vshrl.u32 %v7593_v11, 16 }
 0x208   : > { %6331 = vmatmul.msk.bf16.gmra.mxu3 %vm1181_vm1, %v3952_v62  ;;  %v3955_v61 = vrot.slane %v7618_v48, 1  ;;  %v2941_v2 = vor.u32 %v2939_v59, %v2937_v31 }
 0x209   : > { %v4611_v6 = vadd.f32 %v4348_v56, %v3793_v1  ;;  %5857 = vmatmul.msk.bf16.gmra.mxu0 %vm1181_vm1, %v903_v3  ;;  %v916_v56 = vshll.u32 %v7615_v47, 16  ;;  %v914_v0 = vor.u32 %v912_v51, %v910_v29  ;;  %v2945_v3 = vrot.slane %v2943_v60, 1 }
 0x20b   : > { %v4747_v8 = vadd.f32 %v7363_v27, %v4611_v6  ;;  %6259 = vmatmul.msk.bf16.gmra.mxu2 %vm1181_vm1, %v2930_v4  ;;  %v4351_v10 = vpop.f32.mrf.mxu3  ;;  %v918_v1 = vrot.slane %v916_v56, 1 }
 0x20d   : > { %vm4879_vm10 = vcmp.ge.f32.partialorder %v4747_v8, 0.0  ;;  %v5011_v41 = vmul.f32 0.2, %v4747_v8 }
 0x20e   : > { %v3533_v13 = vpop.f32.mrf.mxu2  ;;  %v1510_v18 = vpop.f32.mrf.mxu0 }
 0x20f   : > { %v5143_v16 = vsel %vm4879_vm10, %v4747_v8, %v5011_v41  ;;  %v3794_v17 = vadd.f32 %v3533_v13, %v1988_v9  ;;  %v1992_v21 = vpop.f32.mrf.mxu1  ;;  %v1990_v32 = vadd.f32 %v1989_v5, %v1510_v18  ;;  %v3956_v5 = vsel %vm3887_vm2, %v3953_v24, %v3955_v61  ;;  %v7645_v18 = vld [vmem:[%s6991_s6 + $0x128] sm:$0xff] }
 0x210   : > { %v6620_v20 = vpack.c.bf16 %v5143_v16, %v5142_v15 }
 0x211   : > { %v4612_v25 = vadd.f32 %v4351_v10, %v3794_v17  ;;  %v919_v10 = vsel %vm643_vm3, %v914_v0, %v918_v1  ;;  %v7642_v17 = vld [vmem:[%s6991_s6 + $0x118] sm:$0xff] }
 0x212   : > { %6862 = vst [vmem:[%s7109_s13 + $0xb0] sm:$0xff] %v6620_v20   ;;  %5928 = vmatmul.msk.bf16.gmra.mxu1 %vm1181_vm1, %v7571_v39  ;;  %v2938_v39 = vsel %vm643_vm3, %v2933_v30, %v2937_v31  ;;  %v2947_v30 = vshrl.u32 %v7618_v48, 16  ;;  %v2951_v31 = vshll.u32 %v7645_v18, 16 }
 0x213   : > { %v4353_v26 = vpop.f32.mrf.mxu3  ;;  %v4748_v35 = vadd.f32 %v7363_v27, %v4612_v25 }
 0x215   : > { %v5012_v43 = vmul.f32 0.2, %v4748_v35  ;;  %vm4880_vm11 = vcmp.ge.f32.partialorder %v4748_v35, 0.0 }
 0x216   : > { %v3535_v34 = vpop.f32.mrf.mxu2  ;;  %v1513_v37 = vpop.f32.mrf.mxu0 }
 0x217   : > { %v3795_v36 = vadd.f32 %v3535_v34, %v1990_v32  ;;  %v1994_v40 = vpop.f32.mrf.mxu1  ;;  %v1993_v45 = vadd.f32 %v1992_v21, %v1513_v37  ;;  %v5144_v52 = vsel %vm4880_vm11, %v4748_v35, %v5012_v43  ;;  %v920_v21 = vshrl.u32 %v7615_v47, 16 }
 0x218   : > { %6332 = vmatmul.msk.bf16.gmra.mxu3 %vm1181_vm1, %v3954_v33  ;;  %v3957_v32 = vrot.slane %v7645_v18, 1  ;;  %v2949_v37 = vor.u32 %v2947_v30, %v2945_v3 }
 0x219   : > { %v4613_v42 = vadd.f32 %v4353_v26, %v3795_v36  ;;  %5858 = vmatmul.msk.bf16.gmra.mxu0 %vm1181_vm1, %v911_v38  ;;  %v924_v26 = vshll.u32 %v7642_v17, 16  ;;  %v922_v35 = vor.u32 %v920_v21, %v918_v1  ;;  %v2953_v38 = vrot.slane %v2951_v31, 1 }
 0x21b   : > { %v4749_v44 = vadd.f32 %v7363_v27, %v4613_v42  ;;  %6260 = vmatmul.msk.bf16.gmra.mxu2 %vm1181_vm1, %v2938_v39  ;;  %v4356_v46 = vpop.f32.mrf.mxu3  ;;  %v926_v36 = vrot.slane %v924_v26, 1 }
 0x21d   : > { %vm4881_vm12 = vcmp.ge.f32.partialorder %v4749_v44, 0.0  ;;  %v5013_v49 = vmul.f32 0.2, %v4749_v44 }
 0x21e   : > { %v3538_v50 = vpop.f32.mrf.mxu2  ;;  %v1515_v55 = vpop.f32.mrf.mxu0 }
 0x21f   : > { %v5145_v53 = vsel %vm4881_vm12, %v4749_v44, %v5013_v49  ;;  %v3796_v54 = vadd.f32 %v3538_v50, %v1993_v45  ;;  %v1997_v58 = vpop.f32.mrf.mxu1  ;;  %v1995_v4 = vadd.f32 %v1994_v40, %v1515_v55  ;;  %v3958_v40 = vsel %vm3887_vm2, %v3955_v61, %v3957_v32  ;;  %v7667_v55 = vld [vmem:[%s6991_s6 + $0x130] sm:$0xff] }
 0x220   : > { %v6625_v57 = vpack.c.bf16 %v5145_v53, %v5144_v52 }
 0x221   : > { %v4614_v62 = vadd.f32 %v4356_v46, %v3796_v54  ;;  %v927_v46 = vsel %vm643_vm3, %v922_v35, %v926_v36  ;;  %v7664_v54 = vld [vmem:[%s6991_s6 + $0x120] sm:$0xff] }
 0x222   : > { %6863 = vst [vmem:[%s7109_s13 + $0xb8] sm:$0xff] %v6625_v57   ;;  %5929 = vmatmul.msk.bf16.gmra.mxu1 %vm1181_vm1, %v7593_v11  ;;  %v2946_v11 = vsel %vm643_vm3, %v2941_v2, %v2945_v3  ;;  %v2955_v2 = vshrl.u32 %v7645_v18, 16  ;;  %v2959_v3 = vshll.u32 %v7667_v55, 16 }
 0x223   : > { %v4358_v63 = vpop.f32.mrf.mxu3  ;;  %v4750_v7 = vadd.f32 %v7363_v27, %v4614_v62 }
 0x225   : > { %v5014_v13 = vmul.f32 0.2, %v4750_v7  ;;  %vm4882_vm13 = vcmp.ge.f32.partialorder %v4750_v7, 0.0 }
 0x226   : > { %v3540_v6 = vpop.f32.mrf.mxu2  ;;  %v1518_v9 = vpop.f32.mrf.mxu0 }
 0x227   : > { %v3797_v8 = vadd.f32 %v3540_v6, %v1995_v4  ;;  %v1999_v12 = vpop.f32.mrf.mxu1  ;;  %v1998_v15 = vadd.f32 %v1997_v58, %v1518_v9  ;;  %v5146_v22 = vsel %vm4882_vm13, %v4750_v7, %v5014_v13  ;;  %v928_v58 = vshrl.u32 %v7642_v17, 16 }
 0x228   : > { %6333 = vmatmul.msk.bf16.gmra.mxu3 %vm1181_vm1, %v3956_v5  ;;  %v3959_v4 = vrot.slane %v7667_v55, 1  ;;  %v2957_v9 = vor.u32 %v2955_v2, %v2953_v38 }
 0x229   : > { %v4615_v41 = vadd.f32 %v4358_v63, %v3797_v8  ;;  %5859 = vmatmul.msk.bf16.gmra.mxu0 %vm1181_vm1, %v919_v10  ;;  %v932_v63 = vshll.u32 %v7664_v54, 16  ;;  %v930_v7 = vor.u32 %v928_v58, %v926_v36  ;;  %v2961_v10 = vrot.slane %v2959_v3, 1 }
 0x22b   : > { %v4751_v27 = vadd.f32 %v7637_v14, %v4615_v41  ;;  %6261 = vmatmul.msk.bf16.gmra.mxu2 %vm1181_vm1, %v2946_v11  ;;  %v4361_v16 = vpop.f32.mrf.mxu3  ;;  %v934_v8 = vrot.slane %v932_v63, 1 }
 0x22d   : > { %vm4883_vm14 = vcmp.ge.f32.partialorder %v4751_v27, 0.0  ;;  %v5015_v19 = vmul.f32 0.2, %v4751_v27 }
 0x22e   : > { %v3543_v20 = vpop.f32.mrf.mxu2  ;;  %v1520_v25 = vpop.f32.mrf.mxu0 }
 0x22f   : > { %v5147_v23 = vsel %vm4883_vm14, %v4751_v27, %v5015_v19  ;;  %v3798_v24 = vadd.f32 %v3543_v20, %v1998_v15  ;;  %v2002_v29 = vpop.f32.mrf.mxu1  ;;  %v2000_v39 = vadd.f32 %v1999_v12, %v1520_v25  ;;  %v3960_v12 = vsel %vm3887_vm2, %v3957_v32, %v3959_v4  ;;  %v7689_v25 = vld [vmem:[%s6991_s6 + $0x138] sm:$0xff] }
 0x230   : > { %v6630_v28 = vpack.c.bf16 %v5147_v23, %v5146_v22 }
 0x231   : > { %v4616_v33 = vadd.f32 %v4361_v16, %v3798_v24  ;;  %v935_v16 = vsel %vm643_vm3, %v930_v7, %v934_v8  ;;  %v7686_v24 = vld [vmem:[%s6991_s6 + $0x128] sm:$0xff] }
 0x232   : > { %6864 = vst [vmem:[%s7109_s13 + $0xc0] sm:$0xff] %v6630_v28   ;;  %5930 = vmatmul.msk.bf16.gmra.mxu1 %vm1181_vm1, %v7615_v47  ;;  %v2954_v47 = vsel %vm643_vm3, %v2949_v37, %v2953_v38  ;;  %v2963_v37 = vshrl.u32 %v7667_v55, 16  ;;  %v2967_v38 = vshll.u32 %v7689_v25, 16 }
 0x233   : > { %v4363_v34 = vpop.f32.mrf.mxu3  ;;  %v4752_v43 = vadd.f32 %v7637_v14, %v4616_v33 }
 0x235   : > { %v5016_v50 = vmul.f32 0.2, %v4752_v43  ;;  %vm4884_vm15 = vcmp.ge.f32.partialorder %v4752_v43, 0.0 }
 0x236   : > { %v3545_v42 = vpop.f32.mrf.mxu2  ;;  %v1523_v45 = vpop.f32.mrf.mxu0 }
 0x237   : > { %v3799_v44 = vadd.f32 %v3545_v42, %v2000_v39  ;;  %v2004_v48 = vpop.f32.mrf.mxu1  ;;  %v2003_v52 = vadd.f32 %v2002_v29, %v1523_v45  ;;  %v5148_v59 = vsel %vm4884_vm15, %v4752_v43, %v5016_v50  ;;  %v936_v29 = vshrl.u32 %v7664_v54, 16 }
 0x238   : > { %6334 = vmatmul.msk.bf16.gmra.mxu3 %vm1181_vm1, %v3958_v40  ;;  %v3961_v39 = vrot.slane %v7689_v25, 1  ;;  %v2965_v45 = vor.u32 %v2963_v37, %v2961_v10 }
 0x239   : > { %v4617_v49 = vadd.f32 %v4363_v34, %v3799_v44  ;;  %5860 = vmatmul.msk.bf16.gmra.mxu0 %vm1181_vm1, %v927_v46  ;;  %v940_v34 = vshll.u32 %v7686_v24, 16  ;;  %v938_v43 = vor.u32 %v936_v29, %v934_v8  ;;  %v2969_v46 = vrot.slane %v2967_v38, 1 }
 0x23b   : > { %v4753_v51 = vadd.f32 %v7637_v14, %v4617_v49  ;;  %6262 = vmatmul.msk.bf16.gmra.mxu2 %vm1181_vm1, %v2954_v47  ;;  %v4366_v53 = vpop.f32.mrf.mxu3  ;;  %v942_v44 = vrot.slane %v940_v34, 1 }
 0x23d   : > { %vm4885_vm0 = vcmp.ge.f32.partialorder %v4753_v51, 0.0  ;;  %v5017_v56 = vmul.f32 0.2, %v4753_v51 }
 0x23e   : > { %v3548_v57 = vpop.f32.mrf.mxu2  ;;  %v1525_v62 = vpop.f32.mrf.mxu0 }
 0x23f   : > { %v5149_v60 = vsel %vm4885_vm0, %v4753_v51, %v5017_v56  ;;  %v3800_v61 = vadd.f32 %v3548_v57, %v2003_v52  ;;  %v2007_v1 = vpop.f32.mrf.mxu1  ;;  %v2005_v11 = vadd.f32 %v2004_v48, %v1525_v62  ;;  %v3962_v48 = vsel %vm3887_vm2, %v3959_v4, %v3961_v39  ;;  %v7711_v62 = vld [vmem:[%s6991_s6 + $0x140] sm:$0xff] }
 0x240   : > { %v6635_v0 = vpack.c.bf16 %v5149_v60, %v5148_v59 }
 0x241   : > { %v4618_v5 = vadd.f32 %v4366_v53, %v3800_v61  ;;  %v943_v53 = vsel %vm643_vm3, %v938_v43, %v942_v44  ;;  %v7708_v61 = vld [vmem:[%s6991_s6 + $0x130] sm:$0xff] }
 0x242   : > { %6865 = vst [vmem:[%s7109_s13 + $0xc8] sm:$0xff] %v6635_v0   ;;  %5931 = vmatmul.msk.bf16.gmra.mxu1 %vm1181_vm1, %v7642_v17  ;;  %v2962_v17 = vsel %vm643_vm3, %v2957_v9, %v2961_v10  ;;  %v2971_v9 = vshrl.u32 %v7689_v25, 16  ;;  %v2975_v10 = vshll.u32 %v7711_v62, 16 }
 0x243   : > { %v4368_v6 = vpop.f32.mrf.mxu3  ;;  %v4754_v13 = vadd.f32 %v7637_v14, %v4618_v5 }
 0x245   : > { %v5018_v20 = vmul.f32 0.2, %v4754_v13  ;;  %vm4886_vm4 = vcmp.ge.f32.partialorder %v4754_v13, 0.0 }
 0x246   : > { %v3550_v41 = vpop.f32.mrf.mxu2  ;;  %v1528_v15 = vpop.f32.mrf.mxu0 }
 0x247   : > { %v3801_v27 = vadd.f32 %v3550_v41, %v2005_v11  ;;  %v2009_v18 = vpop.f32.mrf.mxu1  ;;  %v2008_v22 = vadd.f32 %v2007_v1, %v1528_v15  ;;  %v5150_v30 = vsel %vm4886_vm4, %v4754_v13, %v5018_v20  ;;  %v944_v1 = vshrl.u32 %v7686_v24, 16 }
 0x248   : > { %6335 = vmatmul.msk.bf16.gmra.mxu3 %vm1181_vm1, %v3960_v12  ;;  %v3963_v11 = vrot.slane %v7711_v62, 1  ;;  %v2973_v15 = vor.u32 %v2971_v9, %v2969_v46 }
 0x249   : > { %v4619_v19 = vadd.f32 %v4368_v6, %v3801_v27  ;;  %5861 = vmatmul.msk.bf16.gmra.mxu0 %vm1181_vm1, %v935_v16  ;;  %v948_v6 = vshll.u32 %v7708_v61, 16  ;;  %v946_v13 = vor.u32 %v944_v1, %v942_v44  ;;  %v2977_v16 = vrot.slane %v2975_v10, 1 }
 0x24b   : > { %v4755_v21 = vadd.f32 %v7637_v14, %v4619_v19  ;;  %6263 = vmatmul.msk.bf16.gmra.mxu2 %vm1181_vm1, %v2962_v17  ;;  %v4371_v23 = vpop.f32.mrf.mxu3  ;;  %v950_v27 = vrot.slane %v948_v6, 1 }
 0x24d   : > { %vm4887_vm5 = vcmp.ge.f32.partialorder %v4755_v21, 0.0  ;;  %v5019_v26 = vmul.f32 0.2, %v4755_v21 }
 0x24e   : > { %v3553_v28 = vpop.f32.mrf.mxu2  ;;  %v1530_v33 = vpop.f32.mrf.mxu0 }
 0x24f   : > { %v5151_v31 = vsel %vm4887_vm5, %v4755_v21, %v5019_v26  ;;  %v3802_v32 = vadd.f32 %v3553_v28, %v2008_v22  ;;  %v2012_v36 = vpop.f32.mrf.mxu1  ;;  %v2010_v47 = vadd.f32 %v2009_v18, %v1530_v33  ;;  %v3964_v18 = vsel %vm3887_vm2, %v3961_v39, %v3963_v11  ;;  %v7733_v33 = vld [vmem:[%s6991_s6 + $0x148] sm:$0xff] }
 0x250   : > { %v6640_v35 = vpack.c.bf16 %v5151_v31, %v5150_v30 }
 0x251   : > { %v4620_v40 = vadd.f32 %v4371_v23, %v3802_v32  ;;  %v951_v23 = vsel %vm643_vm3, %v946_v13, %v950_v27  ;;  %v7730_v32 = vld [vmem:[%s6991_s6 + $0x138] sm:$0xff] }
 0x252   : > { %6866 = vst [vmem:[%s7109_s13 + $0xd0] sm:$0xff] %v6640_v35   ;;  %5932 = vmatmul.msk.bf16.gmra.mxu1 %vm1181_vm1, %v7664_v54  ;;  %v2970_v54 = vsel %vm643_vm3, %v2965_v45, %v2969_v46  ;;  %v2979_v45 = vshrl.u32 %v7711_v62, 16  ;;  %v2983_v46 = vshll.u32 %v7733_v33, 16 }
 0x253   : > { %v4373_v42 = vpop.f32.mrf.mxu3  ;;  %v4756_v50 = vadd.f32 %v7637_v14, %v4620_v40 }
 0x255   : > { %v5020_v57 = vmul.f32 0.2, %v4756_v50  ;;  %vm4888_vm6 = vcmp.ge.f32.partialorder %v4756_v50, 0.0 }
 0x256   : > { %v3555_v49 = vpop.f32.mrf.mxu2  ;;  %v1533_v52 = vpop.f32.mrf.mxu0 }
 0x257   : > { %v3803_v51 = vadd.f32 %v3555_v49, %v2010_v47  ;;  %v2014_v55 = vpop.f32.mrf.mxu1  ;;  %v2013_v59 = vadd.f32 %v2012_v36, %v1533_v52  ;;  %v5152_v2 = vsel %vm4888_vm6, %v4756_v50, %v5020_v57  ;;  %v952_v36 = vshrl.u32 %v7708_v61, 16 }
 0x258   : > { %6336 = vmatmul.msk.bf16.gmra.mxu3 %vm1181_vm1, %v3962_v48  ;;  %v3965_v47 = vrot.slane %v7733_v33, 1  ;;  %v2981_v52 = vor.u32 %v2979_v45, %v2977_v16 }
 0x259   : > { %v4621_v56 = vadd.f32 %v4373_v42, %v3803_v51  ;;  %5862 = vmatmul.msk.bf16.gmra.mxu0 %vm1181_vm1, %v943_v53  ;;  %v956_v42 = vshll.u32 %v7730_v32, 16  ;;  %v954_v50 = vor.u32 %v952_v36, %v950_v27  ;;  %v2985_v53 = vrot.slane %v2983_v46, 1 }
 0x25b   : > { %v4757_v58 = vadd.f32 %v7637_v14, %v4621_v56  ;;  %6264 = vmatmul.msk.bf16.gmra.mxu2 %vm1181_vm1, %v2970_v54  ;;  %v4376_v60 = vpop.f32.mrf.mxu3  ;;  %v958_v51 = vrot.slane %v956_v42, 1 }
 0x25d   : > { %vm4889_vm7 = vcmp.ge.f32.partialorder %v4757_v58, 0.0  ;;  %v5021_v63 = vmul.f32 0.2, %v4757_v58 }
 0x25e   : > { %v3558_v0 = vpop.f32.mrf.mxu2  ;;  %v1535_v5 = vpop.f32.mrf.mxu0 }
 0x25f   : > { %v5153_v3 = vsel %vm4889_vm7, %v4757_v58, %v5021_v63  ;;  %v3804_v4 = vadd.f32 %v3558_v0, %v2013_v59  ;;  %v2017_v8 = vpop.f32.mrf.mxu1  ;;  %v2015_v17 = vadd.f32 %v2014_v55, %v1535_v5  ;;  %v3966_v55 = vsel %vm3887_vm2, %v3963_v11, %v3965_v47  ;;  %v7755_v5 = vld [vmem:[%s6991_s6 + $0x150] sm:$0xff] }
 0x260   : > { %v6645_v7 = vpack.c.bf16 %v5153_v3, %v5152_v2 }
 0x261   : > { %v4622_v12 = vadd.f32 %v4376_v60, %v3804_v4  ;;  %v959_v60 = vsel %vm643_vm3, %v954_v50, %v958_v51  ;;  %v7752_v4 = vld [vmem:[%s6991_s6 + $0x140] sm:$0xff] }
 0x262   : > { %6867 = vst [vmem:[%s7109_s13 + $0xd8] sm:$0xff] %v6645_v7   ;;  %5933 = vmatmul.msk.bf16.gmra.mxu1 %vm1181_vm1, %v7686_v24  ;;  %v2978_v24 = vsel %vm643_vm3, %v2973_v15, %v2977_v16  ;;  %v2987_v15 = vshrl.u32 %v7733_v33, 16  ;;  %v2991_v16 = vshll.u32 %v7755_v5, 16 }
 0x263   : > { %v4378_v41 = vpop.f32.mrf.mxu3  ;;  %v4758_v20 = vadd.f32 %v7637_v14, %v4622_v12 }
 0x265   : > { %v5022_v28 = vmul.f32 0.2, %v4758_v20  ;;  %vm4890_vm8 = vcmp.ge.f32.partialorder %v4758_v20, 0.0 }
 0x266   : > { %v3560_v19 = vpop.f32.mrf.mxu2  ;;  %v1538_v22 = vpop.f32.mrf.mxu0 }
 0x267   : > { %v3805_v21 = vadd.f32 %v3560_v19, %v2015_v17  ;;  %v2019_v25 = vpop.f32.mrf.mxu1  ;;  %v2018_v30 = vadd.f32 %v2017_v8, %v1538_v22  ;;  %v5154_v37 = vsel %vm4890_vm8, %v4758_v20, %v5022_v28  ;;  %v960_v8 = vshrl.u32 %v7730_v32, 16 }
 0x268   : > { %6337 = vmatmul.msk.bf16.gmra.mxu3 %vm1181_vm1, %v3964_v18  ;;  %v3967_v17 = vrot.slane %v7755_v5, 1  ;;  %v2989_v22 = vor.u32 %v2987_v15, %v2985_v53 }
 0x269   : > { %v4623_v26 = vadd.f32 %v4378_v41, %v3805_v21  ;;  %5863 = vmatmul.msk.bf16.gmra.mxu0 %vm1181_vm1, %v951_v23  ;;  %v964_v41 = vshll.u32 %v7752_v4, 16  ;;  %v962_v20 = vor.u32 %v960_v8, %v958_v51  ;;  %v2993_v23 = vrot.slane %v2991_v16, 1 }
 0x26b   : > { %v4759_v29 = vadd.f32 %v7637_v14, %v4623_v26  ;;  %6265 = vmatmul.msk.bf16.gmra.mxu2 %vm1181_vm1, %v2978_v24  ;;  %v4381_v31 = vpop.f32.mrf.mxu3  ;;  %v966_v21 = vrot.slane %v964_v41, 1 }
 0x26d   : > { %vm4891_vm9 = vcmp.ge.f32.partialorder %v4759_v29, 0.0  ;;  %v5023_v34 = vmul.f32 0.2, %v4759_v29 }
 0x26e   : > { %v3563_v35 = vpop.f32.mrf.mxu2  ;;  %v1540_v40 = vpop.f32.mrf.mxu0 }
 0x26f   : > { %v5155_v38 = vsel %vm4891_vm9, %v4759_v29, %v5023_v34  ;;  %v3806_v39 = vadd.f32 %v3563_v35, %v2018_v30  ;;  %v2022_v44 = vpop.f32.mrf.mxu1  ;;  %v2020_v54 = vadd.f32 %v2019_v25, %v1540_v40  ;;  %v3968_v25 = vsel %vm3887_vm2, %v3965_v47, %v3967_v17  ;;  %v7777_v40 = vld [vmem:[%s6991_s6 + $0x158] sm:$0xff] }
 0x270   : > { %v6650_v43 = vpack.c.bf16 %v5155_v38, %v5154_v37 }
 0x271   : > { %v4624_v48 = vadd.f32 %v4381_v31, %v3806_v39  ;;  %v967_v31 = vsel %vm643_vm3, %v962_v20, %v966_v21  ;;  %v7774_v39 = vld [vmem:[%s6991_s6 + $0x148] sm:$0xff] }
 0x272   : > { %6868 = vst [vmem:[%s7109_s13 + $0xe0] sm:$0xff] %v6650_v43   ;;  %5934 = vmatmul.msk.bf16.gmra.mxu1 %vm1181_vm1, %v7708_v61  ;;  %v2986_v61 = vsel %vm643_vm3, %v2981_v52, %v2985_v53  ;;  %v2995_v52 = vshrl.u32 %v7755_v5, 16  ;;  %v2999_v53 = vshll.u32 %v7777_v40, 16 }
 0x273   : > { %v4383_v49 = vpop.f32.mrf.mxu3  ;;  %v4760_v57 = vadd.f32 %v7637_v14, %v4624_v48 }
 0x275   : > { %v5024_v0 = vmul.f32 0.2, %v4760_v57  ;;  %vm4892_vm10 = vcmp.ge.f32.partialorder %v4760_v57, 0.0 }
 0x276   : > { %v3565_v56 = vpop.f32.mrf.mxu2  ;;  %v1543_v59 = vpop.f32.mrf.mxu0 }
 0x277   : > { %v3807_v58 = vadd.f32 %v3565_v56, %v2020_v54  ;;  %v2024_v62 = vpop.f32.mrf.mxu1  ;;  %v2023_v2 = vadd.f32 %v2022_v44, %v1543_v59  ;;  %v5156_v9 = vsel %vm4892_vm10, %v4760_v57, %v5024_v0  ;;  %v968_v44 = vshrl.u32 %v7752_v4, 16 }
 0x278   : > { %6338 = vmatmul.msk.bf16.gmra.mxu3 %vm1181_vm1, %v3966_v55  ;;  %v3969_v54 = vrot.slane %v7777_v40, 1  ;;  %v2997_v59 = vor.u32 %v2995_v52, %v2993_v23 }
 0x279   : > { %v4625_v63 = vadd.f32 %v4383_v49, %v3807_v58  ;;  %5864 = vmatmul.msk.bf16.gmra.mxu0 %vm1181_vm1, %v959_v60  ;;  %v972_v49 = vshll.u32 %v7774_v39, 16  ;;  %v970_v57 = vor.u32 %v968_v44, %v966_v21  ;;  %v3001_v60 = vrot.slane %v2999_v53, 1 }
 0x27b   : > { %v4761_v1 = vadd.f32 %v7637_v14, %v4625_v63  ;;  %6266 = vmatmul.msk.bf16.gmra.mxu2 %vm1181_vm1, %v2986_v61  ;;  %v4386_v3 = vpop.f32.mrf.mxu3  ;;  %v974_v58 = vrot.slane %v972_v49, 1 }
 0x27d   : > { %vm4893_vm11 = vcmp.ge.f32.partialorder %v4761_v1, 0.0  ;;  %v5025_v6 = vmul.f32 0.2, %v4761_v1 }
 0x27e   : > { %v3568_v7 = vpop.f32.mrf.mxu2  ;;  %v1545_v12 = vpop.f32.mrf.mxu0 }
 0x27f   : > { %v5157_v10 = vsel %vm4893_vm11, %v4761_v1, %v5025_v6  ;;  %v3808_v11 = vadd.f32 %v3568_v7, %v2023_v2  ;;  %v2027_v27 = vpop.f32.mrf.mxu1  ;;  %v2025_v24 = vadd.f32 %v2024_v62, %v1545_v12  ;;  %v3970_v62 = vsel %vm3887_vm2, %v3967_v17, %v3969_v54  ;;  %v7799_v12 = vld [vmem:[%s6991_s6 + $0x160] sm:$0xff] }
 0x280   : > { %v6655_v13 = vpack.c.bf16 %v5157_v10, %v5156_v9 }
 0x281   : > { %v4626_v18 = vadd.f32 %v4386_v3, %v3808_v11  ;;  %v975_v3 = vsel %vm643_vm3, %v970_v57, %v974_v58  ;;  %v7796_v11 = vld [vmem:[%s6991_s6 + $0x150] sm:$0xff] }
 0x282   : > { %6869 = vst [vmem:[%s7109_s13 + $0xe8] sm:$0xff] %v6655_v13   ;;  %5935 = vmatmul.msk.bf16.gmra.mxu1 %vm1181_vm1, %v7730_v32  ;;  %v2994_v32 = vsel %vm643_vm3, %v2989_v22, %v2993_v23  ;;  %v3003_v22 = vshrl.u32 %v7777_v40, 16  ;;  %v3007_v23 = vshll.u32 %v7799_v12, 16 }
 0x283   : > { %v4388_v19 = vpop.f32.mrf.mxu3  ;;  %v4762_v28 = vadd.f32 %v7637_v14, %v4626_v18 }
 0x285   : > { %v5026_v35 = vmul.f32 0.2, %v4762_v28  ;;  %vm4894_vm12 = vcmp.ge.f32.partialorder %v4762_v28, 0.0 }
 0x286   : > { %v3570_v26 = vpop.f32.mrf.mxu2  ;;  %v1548_v30 = vpop.f32.mrf.mxu0 }
 0x287   : > { %v3809_v29 = vadd.f32 %v3570_v26, %v2025_v24  ;;  %v2029_v33 = vpop.f32.mrf.mxu1  ;;  %v2028_v37 = vadd.f32 %v2027_v27, %v1548_v30  ;;  %v5158_v45 = vsel %vm4894_vm12, %v4762_v28, %v5026_v35  ;;  %v976_v27 = vshrl.u32 %v7774_v39, 16 }
 0x288   : > { %6339 = vmatmul.msk.bf16.gmra.mxu3 %vm1181_vm1, %v3968_v25  ;;  %v3971_v24 = vrot.slane %v7799_v12, 1  ;;  %v3005_v30 = vor.u32 %v3003_v22, %v3001_v60 }
 0x289   : > { %v4627_v34 = vadd.f32 %v4388_v19, %v3809_v29  ;;  %5865 = vmatmul.msk.bf16.gmra.mxu0 %vm1181_vm1, %v967_v31  ;;  %v980_v19 = vshll.u32 %v7796_v11, 16  ;;  %v978_v28 = vor.u32 %v976_v27, %v974_v58  ;;  %v3009_v31 = vrot.slane %v3007_v23, 1 }
 0x28b   : > { %v4763_v36 = vadd.f32 %v7637_v14, %v4627_v34  ;;  %6267 = vmatmul.msk.bf16.gmra.mxu2 %vm1181_vm1, %v2994_v32  ;;  %v4391_v38 = vpop.f32.mrf.mxu3  ;;  %v982_v29 = vrot.slane %v980_v19, 1 }
 0x28d   : > { %vm4895_vm13 = vcmp.ge.f32.partialorder %v4763_v36, 0.0  ;;  %v5027_v42 = vmul.f32 0.2, %v4763_v36 }
 0x28e   : > { %v3573_v43 = vpop.f32.mrf.mxu2  ;;  %v1550_v48 = vpop.f32.mrf.mxu0 }
 0x28f   : > { %v5159_v46 = vsel %vm4895_vm13, %v4763_v36, %v5027_v42  ;;  %v3810_v47 = vadd.f32 %v3573_v43, %v2028_v37  ;;  %v2032_v51 = vpop.f32.mrf.mxu1  ;;  %v2030_v61 = vadd.f32 %v2029_v33, %v1550_v48  ;;  %v3972_v33 = vsel %vm3887_vm2, %v3969_v54, %v3971_v24  ;;  %v7821_v48 = vld [vmem:[%s6991_s6 + $0x168] sm:$0xff] }
 0x290   : > { %v6660_v50 = vpack.c.bf16 %v5159_v46, %v5158_v45 }
 0x291   : > { %v4628_v55 = vadd.f32 %v4391_v38, %v3810_v47  ;;  %v983_v38 = vsel %vm643_vm3, %v978_v28, %v982_v29  ;;  %v7818_v47 = vld [vmem:[%s6991_s6 + $0x158] sm:$0xff] }
 0x292   : > { %6870 = vst [vmem:[%s7109_s13 + $0xf0] sm:$0xff] %v6660_v50   ;;  %5936 = vmatmul.msk.bf16.gmra.mxu1 %vm1181_vm1, %v7752_v4  ;;  %v3002_v4 = vsel %vm643_vm3, %v2997_v59, %v3001_v60  ;;  %v3011_v59 = vshrl.u32 %v7799_v12, 16  ;;  %v3015_v60 = vshll.u32 %v7821_v48, 16 }
 0x293   : > { %v4393_v56 = vpop.f32.mrf.mxu3  ;;  %v4764_v0 = vadd.f32 %v7637_v14, %v4628_v55 }
 0x295   : > { %v5028_v7 = vmul.f32 0.2, %v4764_v0  ;;  %vm4896_vm14 = vcmp.ge.f32.partialorder %v4764_v0, 0.0 }
 0x296   : > { %v3575_v63 = vpop.f32.mrf.mxu2  ;;  %v1553_v2 = vpop.f32.mrf.mxu0 }
 0x297   : > { %v3811_v1 = vadd.f32 %v3575_v63, %v2030_v61  ;;  %v2034_v5 = vpop.f32.mrf.mxu1  ;;  %v2033_v9 = vadd.f32 %v2032_v51, %v1553_v2  ;;  %v5160_v15 = vsel %vm4896_vm14, %v4764_v0, %v5028_v7  ;;  %v984_v51 = vshrl.u32 %v7796_v11, 16 }
 0x298   : > { %6340 = vmatmul.msk.bf16.gmra.mxu3 %vm1181_vm1, %v3970_v62  ;;  %v3973_v61 = vrot.slane %v7821_v48, 1  ;;  %v3013_v2 = vor.u32 %v3011_v59, %v3009_v31 }
 0x299   : > { %v4629_v6 = vadd.f32 %v4393_v56, %v3811_v1  ;;  %5866 = vmatmul.msk.bf16.gmra.mxu0 %vm1181_vm1, %v975_v3  ;;  %v988_v56 = vshll.u32 %v7818_v47, 16  ;;  %v986_v0 = vor.u32 %v984_v51, %v982_v29  ;;  %v3017_v3 = vrot.slane %v3015_v60, 1 }
 0x29b   : > { %v4765_v8 = vadd.f32 %v7637_v14, %v4629_v6  ;;  %6268 = vmatmul.msk.bf16.gmra.mxu2 %vm1181_vm1, %v3002_v4  ;;  %v4396_v10 = vpop.f32.mrf.mxu3  ;;  %v990_v1 = vrot.slane %v988_v56, 1 }
 0x29d   : > { %vm4897_vm15 = vcmp.ge.f32.partialorder %v4765_v8, 0.0  ;;  %v5029_v41 = vmul.f32 0.2, %v4765_v8 }
 0x29e   : > { %v3578_v13 = vpop.f32.mrf.mxu2  ;;  %v1555_v18 = vpop.f32.mrf.mxu0 }
 0x29f   : > { %v5161_v16 = vsel %vm4897_vm15, %v4765_v8, %v5029_v41  ;;  %v3812_v17 = vadd.f32 %v3578_v13, %v2033_v9  ;;  %v2037_v21 = vpop.f32.mrf.mxu1  ;;  %v2035_v32 = vadd.f32 %v2034_v5, %v1555_v18  ;;  %v3974_v5 = vsel %vm3887_vm2, %v3971_v24, %v3973_v61  ;;  %v7843_v18 = vld [vmem:[%s6991_s6 + $0x170] sm:$0xff] }
 0x2a0   : > { %v6665_v20 = vpack.c.bf16 %v5161_v16, %v5160_v15 }
 0x2a1   : > { %v4630_v25 = vadd.f32 %v4396_v10, %v3812_v17  ;;  %v991_v10 = vsel %vm643_vm3, %v986_v0, %v990_v1  ;;  %v7840_v17 = vld [vmem:[%s6991_s6 + $0x160] sm:$0xff] }
 0x2a2   : > { %6871 = vst [vmem:[%s7109_s13 + $0xf8] sm:$0xff] %v6665_v20   ;;  %5937 = vmatmul.msk.bf16.gmra.mxu1 %vm1181_vm1, %v7774_v39  ;;  %v3010_v39 = vsel %vm643_vm3, %v3005_v30, %v3009_v31  ;;  %v3019_v30 = vshrl.u32 %v7821_v48, 16  ;;  %v3023_v31 = vshll.u32 %v7843_v18, 16 }
 0x2a3   : > { %v4398_v26 = vpop.f32.mrf.mxu3  ;;  %v4766_v35 = vadd.f32 %v7637_v14, %v4630_v25 }
 0x2a5   : > { %v5030_v43 = vmul.f32 0.2, %v4766_v35  ;;  %vm4898_vm0 = vcmp.ge.f32.partialorder %v4766_v35, 0.0 }
 0x2a6   : > { %v3580_v34 = vpop.f32.mrf.mxu2  ;;  %v1558_v37 = vpop.f32.mrf.mxu0 }
 0x2a7   : > { %v3813_v36 = vadd.f32 %v3580_v34, %v2035_v32  ;;  %v2039_v40 = vpop.f32.mrf.mxu1  ;;  %v2038_v45 = vadd.f32 %v2037_v21, %v1558_v37  ;;  %v5162_v52 = vsel %vm4898_vm0, %v4766_v35, %v5030_v43  ;;  %v992_v21 = vshrl.u32 %v7818_v47, 16 }
 0x2a8   : > { %6341 = vmatmul.msk.bf16.gmra.mxu3 %vm1181_vm1, %v3972_v33  ;;  %v3975_v32 = vrot.slane %v7843_v18, 1  ;;  %v3021_v37 = vor.u32 %v3019_v30, %v3017_v3 }
 0x2a9   : > { %v4631_v42 = vadd.f32 %v4398_v26, %v3813_v36  ;;  %5867 = vmatmul.msk.bf16.gmra.mxu0 %vm1181_vm1, %v983_v38  ;;  %v996_v26 = vshll.u32 %v7840_v17, 16  ;;  %v994_v35 = vor.u32 %v992_v21, %v990_v1  ;;  %v3025_v38 = vrot.slane %v3023_v31, 1 }
 0x2ab   : > { %v4767_v44 = vadd.f32 %v7637_v14, %v4631_v42  ;;  %6269 = vmatmul.msk.bf16.gmra.mxu2 %vm1181_vm1, %v3010_v39  ;;  %v4401_v46 = vpop.f32.mrf.mxu3  ;;  %v998_v36 = vrot.slane %v996_v26, 1 }
 0x2ad   : > { %vm4899_vm4 = vcmp.ge.f32.partialorder %v4767_v44, 0.0  ;;  %v5031_v49 = vmul.f32 0.2, %v4767_v44 }
 0x2ae   : > { %v3583_v50 = vpop.f32.mrf.mxu2  ;;  %v1560_v55 = vpop.f32.mrf.mxu0 }
 0x2af   : > { %v5163_v53 = vsel %vm4899_vm4, %v4767_v44, %v5031_v49  ;;  %v3814_v54 = vadd.f32 %v3583_v50, %v2038_v45  ;;  %v2042_v58 = vpop.f32.mrf.mxu1  ;;  %v2040_v4 = vadd.f32 %v2039_v40, %v1560_v55  ;;  %v3976_v40 = vsel %vm3887_vm2, %v3973_v61, %v3975_v32  ;;  %v7865_v55 = vld [vmem:[%s6991_s6 + $0x178] sm:$0xff] }
 0x2b0   : > { %v6670_v57 = vpack.c.bf16 %v5163_v53, %v5162_v52 }
 0x2b1   : > { %v4632_v62 = vadd.f32 %v4401_v46, %v3814_v54  ;;  %v999_v46 = vsel %vm643_vm3, %v994_v35, %v998_v36  ;;  %v7862_v54 = vld [vmem:[%s6991_s6 + $0x168] sm:$0xff] }
 0x2b2   : > { %6872 = vst [vmem:[%s7109_s13 + $0x100] sm:$0xff] %v6670_v57   ;;  %5938 = vmatmul.msk.bf16.gmra.mxu1 %vm1181_vm1, %v7796_v11  ;;  %v3018_v11 = vsel %vm643_vm3, %v3013_v2, %v3017_v3  ;;  %v3027_v2 = vshrl.u32 %v7843_v18, 16  ;;  %v3031_v3 = vshll.u32 %v7865_v55, 16 }
 0x2b3   : > { %v4403_v63 = vpop.f32.mrf.mxu3  ;;  %v4768_v7 = vadd.f32 %v7637_v14, %v4632_v62 }
 0x2b5   : > { %v5032_v13 = vmul.f32 0.2, %v4768_v7  ;;  %vm4900_vm5 = vcmp.ge.f32.partialorder %v4768_v7, 0.0 }
 0x2b6   : > { %v3585_v6 = vpop.f32.mrf.mxu2  ;;  %v1563_v9 = vpop.f32.mrf.mxu0 }
 0x2b7   : > { %v3815_v8 = vadd.f32 %v3585_v6, %v2040_v4  ;;  %v2044_v12 = vpop.f32.mrf.mxu1  ;;  %v2043_v15 = vadd.f32 %v2042_v58, %v1563_v9  ;;  %v5164_v22 = vsel %vm4900_vm5, %v4768_v7, %v5032_v13  ;;  %v1000_v58 = vshrl.u32 %v7840_v17, 16 }
 0x2b8   : > { %6342 = vmatmul.msk.bf16.gmra.mxu3 %vm1181_vm1, %v3974_v5  ;;  %v3977_v4 = vrot.slane %v7865_v55, 1  ;;  %v3029_v9 = vor.u32 %v3027_v2, %v3025_v38 }
 0x2b9   : > { %v4633_v41 = vadd.f32 %v4403_v63, %v3815_v8  ;;  %5868 = vmatmul.msk.bf16.gmra.mxu0 %vm1181_vm1, %v991_v10  ;;  %v1004_v63 = vshll.u32 %v7862_v54, 16  ;;  %v1002_v7 = vor.u32 %v1000_v58, %v998_v36  ;;  %v3033_v10 = vrot.slane %v3031_v3, 1 }
 0x2bb   : > { %v4769_v27 = vadd.f32 %v7637_v14, %v4633_v41  ;;  %6270 = vmatmul.msk.bf16.gmra.mxu2 %vm1181_vm1, %v3018_v11  ;;  %v4406_v16 = vpop.f32.mrf.mxu3  ;;  %v1006_v8 = vrot.slane %v1004_v63, 1 }
 0x2bd   : > { %vm4901_vm6 = vcmp.ge.f32.partialorder %v4769_v27, 0.0  ;;  %v5033_v19 = vmul.f32 0.2, %v4769_v27 }
 0x2be   : > { %v3588_v20 = vpop.f32.mrf.mxu2  ;;  %v1565_v25 = vpop.f32.mrf.mxu0 }
 0x2bf   : > { %v5165_v23 = vsel %vm4901_vm6, %v4769_v27, %v5033_v19  ;;  %v3816_v24 = vadd.f32 %v3588_v20, %v2043_v15  ;;  %v2047_v29 = vpop.f32.mrf.mxu1  ;;  %v2045_v39 = vadd.f32 %v2044_v12, %v1565_v25  ;;  %v3978_v12 = vsel %vm3887_vm2, %v3975_v32, %v3977_v4  ;;  %v7887_v25 = vld [vmem:[%s6991_s6 + $0x180] sm:$0xff] }
 0x2c0   : > { %v6675_v28 = vpack.c.bf16 %v5165_v23, %v5164_v22 }
 0x2c1   : > { %v4634_v33 = vadd.f32 %v4406_v16, %v3816_v24  ;;  %v1007_v16 = vsel %vm643_vm3, %v1002_v7, %v1006_v8  ;;  %v7884_v24 = vld [vmem:[%s6991_s6 + $0x170] sm:$0xff] }
 0x2c2   : > { %6873 = vst [vmem:[%s7109_s13 + $0x108] sm:$0xff] %v6675_v28   ;;  %5939 = vmatmul.msk.bf16.gmra.mxu1 %vm1181_vm1, %v7818_v47  ;;  %v3026_v47 = vsel %vm643_vm3, %v3021_v37, %v3025_v38  ;;  %v3035_v37 = vshrl.u32 %v7865_v55, 16  ;;  %v3039_v38 = vshll.u32 %v7887_v25, 16 }
 0x2c3   : > { %v4408_v34 = vpop.f32.mrf.mxu3  ;;  %v4770_v43 = vadd.f32 %v7637_v14, %v4634_v33 }
 0x2c5   : > { %v5034_v50 = vmul.f32 0.2, %v4770_v43  ;;  %vm4902_vm7 = vcmp.ge.f32.partialorder %v4770_v43, 0.0 }
 0x2c6   : > { %v3590_v42 = vpop.f32.mrf.mxu2  ;;  %v1568_v45 = vpop.f32.mrf.mxu0 }
 0x2c7   : > { %v3817_v44 = vadd.f32 %v3590_v42, %v2045_v39  ;;  %v2049_v48 = vpop.f32.mrf.mxu1  ;;  %v2048_v52 = vadd.f32 %v2047_v29, %v1568_v45  ;;  %v5166_v59 = vsel %vm4902_vm7, %v4770_v43, %v5034_v50  ;;  %v1008_v29 = vshrl.u32 %v7862_v54, 16 }
 0x2c8   : > { %6343 = vmatmul.msk.bf16.gmra.mxu3 %vm1181_vm1, %v3976_v40  ;;  %v3979_v39 = vrot.slane %v7887_v25, 1  ;;  %v3037_v45 = vor.u32 %v3035_v37, %v3033_v10 }
 0x2c9   : > { %v4635_v49 = vadd.f32 %v4408_v34, %v3817_v44  ;;  %5869 = vmatmul.msk.bf16.gmra.mxu0 %vm1181_vm1, %v999_v46  ;;  %v1012_v34 = vshll.u32 %v7884_v24, 16  ;;  %v1010_v43 = vor.u32 %v1008_v29, %v1006_v8  ;;  %v3041_v46 = vrot.slane %v3039_v38, 1 }
 0x2ca   : > { %v3043_v8 = vshrl.u32 %v7887_v25, 16 }
 0x2cb   : > { %v4771_v51 = vadd.f32 %v7637_v14, %v4635_v49  ;;  %6271 = vmatmul.msk.bf16.gmra.mxu2 %vm1181_vm1, %v3026_v47  ;;  %v4411_v53 = vpop.f32.mrf.mxu3  ;;  %v1014_v44 = vrot.slane %v1012_v34, 1 }
 0x2cd   : > { %vm4903_vm8 = vcmp.ge.f32.partialorder %v4771_v51, 0.0  ;;  %v5035_v56 = vmul.f32 0.2, %v4771_v51 }
 0x2ce   : > { %v3593_v57 = vpop.f32.mrf.mxu2  ;;  %v1570_v62 = vpop.f32.mrf.mxu0 }
 0x2cf   : > { %v5167_v60 = vsel %vm4903_vm8, %v4771_v51, %v5035_v56  ;;  %v3818_v61 = vadd.f32 %v3593_v57, %v2048_v52  ;;  %v2052_v1 = vpop.f32.mrf.mxu1  ;;  %v2050_v11 = vadd.f32 %v2049_v48, %v1570_v62  ;;  %v3980_v48 = vsel %vm3887_vm2, %v3977_v4, %v3979_v39  ;;  %v7909_v62 = vld [vmem:[%s6991_s6 + $0x188] sm:$0xff] }
 0x2d0   : > { %v6680_v0 = vpack.c.bf16 %v5167_v60, %v5166_v59 }
 0x2d1   : > { %v4636_v5 = vadd.f32 %v4411_v53, %v3818_v61  ;;  %v1015_v53 = vsel %vm643_vm3, %v1010_v43, %v1014_v44  ;;  %v7906_v61 = vld [vmem:[%s6991_s6 + $0x178] sm:$0xff] }
 0x2d2   : > { %6874 = vst [vmem:[%s7109_s13 + $0x110] sm:$0xff] %v6680_v0   ;;  %5940 = vmatmul.msk.bf16.gmra.mxu1 %vm1181_vm1, %v7840_v17  ;;  %v3034_v17 = vsel %vm643_vm3, %v3029_v9, %v3033_v10  ;;  %v3047_v9 = vshll.u32 %v7909_v62, 16  ;;  %v3981_v10 = vrot.slane %v7909_v62, 1 }
 0x2d3   : > { %v4413_v6 = vpop.f32.mrf.mxu3  ;;  %v4772_v13 = vadd.f32 %v7637_v14, %v4636_v5 }
 0x2d5   : > { %v5036_v20 = vmul.f32 0.2, %v4772_v13  ;;  %vm4904_vm9 = vcmp.ge.f32.partialorder %v4772_v13, 0.0 }
 0x2d6   : > { %v3595_v41 = vpop.f32.mrf.mxu2  ;;  %v1573_v15 = vpop.f32.mrf.mxu0 }
 0x2d7   : > { %v3819_v27 = vadd.f32 %v3595_v41, %v2050_v11  ;;  %v2054_v18 = vpop.f32.mrf.mxu1  ;;  %v2053_v22 = vadd.f32 %v2052_v1, %v1573_v15  ;;  %v5168_v30 = vsel %vm4904_vm9, %v4772_v13, %v5036_v20  ;;  %v1016_v1 = vshrl.u32 %v7884_v24, 16 }
 0x2d8   : > { %6344 = vmatmul.msk.bf16.gmra.mxu3 %vm1181_vm1, %v3978_v12  ;;  %v3049_v15 = vrot.slane %v3047_v9, 1 }
 0x2d9   : > { %v4637_v19 = vadd.f32 %v4413_v6, %v3819_v27  ;;  %5870 = vmatmul.msk.bf16.gmra.mxu0 %vm1181_vm1, %v1007_v16  ;;  %v1018_v41 = vor.u32 %v1016_v1, %v1014_v44  ;;  %v3045_v27 = vor.u32 %v3043_v8, %v3041_v46 }
 0x2db   : > { %v4773_v21 = vadd.f32 %v7637_v14, %v4637_v19  ;;  %6272 = vmatmul.msk.bf16.gmra.mxu2 %vm1181_vm1, %v3034_v17  ;;  %v4416_v23 = vpop.f32.mrf.mxu3  ;;  %v3982_v17 = vsel %vm3887_vm2, %v3979_v39, %v3981_v10  ;;  %v7923_v19 = vld [vmem:[%s8383_s2] ss:$0 sm:$0xff] }
 0x2dd   : > { %vm4905_vm10 = vcmp.ge.f32.partialorder %v4773_v21, 0.0  ;;  %v5037_v26 = vmul.f32 0.2, %v4773_v21 }
 0x2de   : > { %v3598_v28 = vpop.f32.mrf.mxu2  ;;  %v1575_v33 = vpop.f32.mrf.mxu0 }
 0x2df   : > { %v5169_v31 = vsel %vm4905_vm10, %v4773_v21, %v5037_v26  ;;  %v3820_v32 = vadd.f32 %v3598_v28, %v2053_v22  ;;  %v2057_v36 = vpop.f32.mrf.mxu1  ;;  %v2055_v47 = vadd.f32 %v2054_v18, %v1575_v33  ;;  %v7936_v33 = vld [vmem:[%s6991_s6 + $0x190] sm:$0xff] }
 0x2e0   : > { %v6685_v35 = vpack.c.bf16 %v5169_v31, %v5168_v30 }
 0x2e1   : > { %v4638_v40 = vadd.f32 %v4416_v23, %v3820_v32  ;;  %v7933_v32 = vld [vmem:[%s6991_s6 + $0x180] sm:$0xff] }
 0x2e2   : > { %6875 = vst [vmem:[%s7109_s13 + $0x118] sm:$0xff] %v6685_v35   ;;  %5941 = vmatmul.msk.bf16.gmra.mxu1 %vm1181_vm1, %v7862_v54  ;;  %v3042_v54 = vsel %vm643_vm3, %v3037_v45, %v3041_v46  ;;  %v3051_v45 = vshrl.u32 %v7909_v62, 16  ;;  %v3055_v46 = vshll.u32 %v7936_v33, 16 }
 0x2e3   : > { %v4418_v42 = vpop.f32.mrf.mxu3  ;;  %v4774_v50 = vadd.f32 %v7637_v14, %v4638_v40 }
 0x2e5   : > { %v5038_v57 = vmul.f32 0.2, %v4774_v50  ;;  %vm4906_vm11 = vcmp.ge.f32.partialorder %v4774_v50, 0.0 }
 0x2e6   : > { %v3600_v49 = vpop.f32.mrf.mxu2  ;;  %v1578_v52 = vpop.f32.mrf.mxu0 }
 0x2e7   : > { %v3821_v51 = vadd.f32 %v3600_v49, %v2055_v47  ;;  %v2059_v55 = vpop.f32.mrf.mxu1  ;;  %v2058_v59 = vadd.f32 %v2057_v36, %v1578_v52  ;;  %v5170_v2 = vsel %vm4906_vm11, %v4774_v50, %v5038_v57  ;;  %v1024_v36 = vshrl.u32 %v7906_v61, 16 }
 0x2e8   : > { %6345 = vmatmul.msk.bf16.gmra.mxu3 %vm1181_vm1, %v3980_v48  ;;  %v3983_v47 = vrot.slane %v7936_v33, 1  ;;  %v3053_v52 = vor.u32 %v3051_v45, %v3049_v15 }
 0x2e9   : > { %v4639_v56 = vadd.f32 %v4418_v42, %v3821_v51  ;;  %5871 = vmatmul.msk.bf16.gmra.mxu0 %vm1181_vm1, %v1015_v53  ;;  %v1028_v42 = vshll.u32 %v7933_v32, 16  ;;  %v3057_v53 = vrot.slane %v3055_v46, 1 }
 0x2eb   : > { %v4775_v58 = vadd.f32 %v7637_v14, %v4639_v56  ;;  %6273 = vmatmul.msk.bf16.gmra.mxu2 %vm1181_vm1, %v3042_v54  ;;  %v4421_v60 = vpop.f32.mrf.mxu3  ;;  %v1020_v14 = vshll.u32 %v7906_v61, 16  ;;  %v1030_v51 = vrot.slane %v1028_v42, 1 }
 0x2ed   : > { %vm4907_vm12 = vcmp.ge.f32.partialorder %v4775_v58, 0.0  ;;  %v5039_v63 = vmul.f32 0.2, %v4775_v58  ;;  %v1022_v13 = vrot.slane %v1020_v14, 1 }
 0x2ee   : > { %v3603_v0 = vpop.f32.mrf.mxu2  ;;  %v1580_v5 = vpop.f32.mrf.mxu0 }
 0x2ef   : > { %v5171_v3 = vsel %vm4907_vm12, %v4775_v58, %v5039_v63  ;;  %v3822_v4 = vadd.f32 %v3603_v0, %v2058_v59  ;;  %v2062_v7 = vpop.f32.mrf.mxu1  ;;  %v2060_v16 = vadd.f32 %v2059_v55, %v1580_v5  ;;  %v1023_v23 = vsel %vm643_vm3, %v1018_v41, %v1022_v13  ;;  %v7958_v5 = vld [vmem:[%s6991_s6 + $0x198] sm:$0xff] }
 0x2f0   : > { %v6690_v6 = vpack.c.bf16 %v5171_v3, %v5170_v2  ;;  %v1026_v50 = vor.u32 %v1024_v36, %v1022_v13  ;;  %v3984_v55 = vsel %vm3887_vm2, %v3981_v10, %v3983_v47 }
 0x2f1   : > { %v4640_v11 = vadd.f32 %v4421_v60, %v3822_v4  ;;  %v7955_v4 = vld [vmem:[%s6991_s6 + $0x188] sm:$0xff] }
 0x2f2   : > { %6876 = vst [vmem:[%s7109_s13 + $0x120] sm:$0xff] %v6690_v6   ;;  %5942 = vmatmul.msk.bf16.gmra.mxu1 %vm1181_vm1, %v7884_v24  ;;  %v3050_v24 = vsel %vm643_vm3, %v3045_v27, %v3049_v15  ;;  %v1031_v60 = vsel %vm643_vm3, %v1026_v50, %v1030_v51  ;;  %v3059_v27 = vshrl.u32 %v7936_v33, 16  ;;  %v3063_v15 = vshll.u32 %v7958_v5, 16 }
 0x2f3   : > { %v4423_v12 = vpop.f32.mrf.mxu3  ;;  %v4776_v20 = vadd.f32 %v7923_v19, %v4640_v11 }
 0x2f5   : > { %v5040_v28 = vmul.f32 0.2, %v4776_v20  ;;  %vm4908_vm13 = vcmp.ge.f32.partialorder %v4776_v20, 0.0 }
 0x2f6   : > { %v3605_v18 = vpop.f32.mrf.mxu2  ;;  %v1583_v22 = vpop.f32.mrf.mxu0 }
 0x2f7   : > { %v3823_v21 = vadd.f32 %v3605_v18, %v2060_v16  ;;  %v2064_v25 = vpop.f32.mrf.mxu1  ;;  %v2063_v30 = vadd.f32 %v2062_v7, %v1583_v22  ;;  %v5172_v37 = vsel %vm4908_vm13, %v4776_v20, %v5040_v28  ;;  %v1032_v7 = vshrl.u32 %v7933_v32, 16 }
 0x2f8   : > { %6346 = vmatmul.msk.bf16.gmra.mxu3 %vm1181_vm1, %v3982_v17  ;;  %v3985_v16 = vrot.slane %v7958_v5, 1  ;;  %v3061_v22 = vor.u32 %v3059_v27, %v3057_v53 }
 0x2f9   : > { %v4641_v26 = vadd.f32 %v4423_v12, %v3823_v21  ;;  %5872 = vmatmul.msk.bf16.gmra.mxu0 %vm1181_vm1, %v1023_v23  ;;  %v1036_v12 = vshll.u32 %v7955_v4, 16  ;;  %v1034_v20 = vor.u32 %v1032_v7, %v1030_v51  ;;  %v3065_v23 = vrot.slane %v3063_v15, 1 }
 0x2fb   : > { %v4777_v29 = vadd.f32 %v7923_v19, %v4641_v26  ;;  %6274 = vmatmul.msk.bf16.gmra.mxu2 %vm1181_vm1, %v3050_v24  ;;  %v4426_v31 = vpop.f32.mrf.mxu3  ;;  %v1038_v21 = vrot.slane %v1036_v12, 1 }
 0x2fd   : > { %vm4909_vm14 = vcmp.ge.f32.partialorder %v4777_v29, 0.0  ;;  %v5041_v34 = vmul.f32 0.2, %v4777_v29 }
 0x2fe   : > { %v3608_v35 = vpop.f32.mrf.mxu2  ;;  %v1585_v40 = vpop.f32.mrf.mxu0 }
 0x2ff   : > { %v5173_v38 = vsel %vm4909_vm14, %v4777_v29, %v5041_v34  ;;  %v3824_v39 = vadd.f32 %v3608_v35, %v2063_v30  ;;  %v2067_v44 = vpop.f32.mrf.mxu1  ;;  %v2065_v54 = vadd.f32 %v2064_v25, %v1585_v40  ;;  %v3986_v25 = vsel %vm3887_vm2, %v3983_v47, %v3985_v16  ;;  %v7980_v40 = vld [vmem:[%s6991_s6 + $0x1a0] sm:$0xff] }
 0x300   : > { %v6695_v43 = vpack.c.bf16 %v5173_v38, %v5172_v37 }
 0x301   : > { %v4642_v48 = vadd.f32 %v4426_v31, %v3824_v39  ;;  %v1039_v31 = vsel %vm643_vm3, %v1034_v20, %v1038_v21  ;;  %v7977_v39 = vld [vmem:[%s6991_s6 + $0x190] sm:$0xff] }
 0x302   : > { %6877 = vst [vmem:[%s7109_s13 + $0x128] sm:$0xff] %v6695_v43   ;;  %5943 = vmatmul.msk.bf16.gmra.mxu1 %vm1181_vm1, %v7906_v61  ;;  %v3058_v61 = vsel %vm643_vm3, %v3053_v52, %v3057_v53  ;;  %v3067_v52 = vshrl.u32 %v7958_v5, 16  ;;  %v3071_v53 = vshll.u32 %v7980_v40, 16 }
 0x303   : > { %v4428_v49 = vpop.f32.mrf.mxu3  ;;  %v4778_v57 = vadd.f32 %v7923_v19, %v4642_v48 }
 0x305   : > { %v5042_v0 = vmul.f32 0.2, %v4778_v57  ;;  %vm4910_vm15 = vcmp.ge.f32.partialorder %v4778_v57, 0.0 }
 0x306   : > { %v3610_v56 = vpop.f32.mrf.mxu2  ;;  %v1588_v59 = vpop.f32.mrf.mxu0 }
 0x307   : > { %v3825_v58 = vadd.f32 %v3610_v56, %v2065_v54  ;;  %v2069_v62 = vpop.f32.mrf.mxu1  ;;  %v2068_v2 = vadd.f32 %v2067_v44, %v1588_v59  ;;  %v5174_v8 = vsel %vm4910_vm15, %v4778_v57, %v5042_v0  ;;  %v1040_v44 = vshrl.u32 %v7955_v4, 16 }
 0x308   : > { %6347 = vmatmul.msk.bf16.gmra.mxu3 %vm1181_vm1, %v3984_v55  ;;  %v3987_v54 = vrot.slane %v7980_v40, 1  ;;  %v3069_v59 = vor.u32 %v3067_v52, %v3065_v23 }
 0x309   : > { %v4643_v63 = vadd.f32 %v4428_v49, %v3825_v58  ;;  %5873 = vmatmul.msk.bf16.gmra.mxu0 %vm1181_vm1, %v1031_v60  ;;  %v1044_v49 = vshll.u32 %v7977_v39, 16  ;;  %v1042_v57 = vor.u32 %v1040_v44, %v1038_v21  ;;  %v3073_v60 = vrot.slane %v3071_v53, 1 }
 0x30b   : > { %v4779_v1 = vadd.f32 %v7923_v19, %v4643_v63  ;;  %6275 = vmatmul.msk.bf16.gmra.mxu2 %vm1181_vm1, %v3058_v61  ;;  %v4431_v3 = vpop.f32.mrf.mxu3  ;;  %v1046_v58 = vrot.slane %v1044_v49, 1 }
 0x30d   : > { %vm4911_vm0 = vcmp.ge.f32.partialorder %v4779_v1, 0.0  ;;  %v5043_v14 = vmul.f32 0.2, %v4779_v1 }
 0x30e   : > { %v3613_v6 = vpop.f32.mrf.mxu2  ;;  %v1590_v11 = vpop.f32.mrf.mxu0 }
 0x30f   : > { %v5175_v9 = vsel %vm4911_vm0, %v4779_v1, %v5043_v14  ;;  %v3826_v10 = vadd.f32 %v3613_v6, %v2068_v2  ;;  %v2072_v13 = vpop.f32.mrf.mxu1  ;;  %v2070_v24 = vadd.f32 %v2069_v62, %v1590_v11  ;;  %v3988_v62 = vsel %vm3887_vm2, %v3985_v16, %v3987_v54  ;;  %v8002_v11 = vld [vmem:[%s6991_s6 + $0x1a8] sm:$0xff] }
 0x310   : > { %v6700_v41 = vpack.c.bf16 %v5175_v9, %v5174_v8 }
 0x311   : > { %v4644_v17 = vadd.f32 %v4431_v3, %v3826_v10  ;;  %v1047_v3 = vsel %vm643_vm3, %v1042_v57, %v1046_v58  ;;  %v7999_v10 = vld [vmem:[%s6991_s6 + $0x198] sm:$0xff] }
 0x312   : > { %6878 = vst [vmem:[%s7109_s13 + $0x130] sm:$0xff] %v6700_v41   ;;  %5944 = vmatmul.msk.bf16.gmra.mxu1 %vm1181_vm1, %v7933_v32  ;;  %v3066_v32 = vsel %vm643_vm3, %v3061_v22, %v3065_v23  ;;  %v3075_v22 = vshrl.u32 %v7980_v40, 16  ;;  %v3079_v23 = vshll.u32 %v8002_v11, 16 }
 0x313   : > { %v4433_v18 = vpop.f32.mrf.mxu3  ;;  %v4780_v28 = vadd.f32 %v7923_v19, %v4644_v17 }
 0x315   : > { %v5044_v35 = vmul.f32 0.2, %v4780_v28  ;;  %vm4912_vm4 = vcmp.ge.f32.partialorder %v4780_v28, 0.0 }
 0x316   : > { %v3615_v26 = vpop.f32.mrf.mxu2  ;;  %v1593_v30 = vpop.f32.mrf.mxu0 }
 0x317   : > { %v3827_v29 = vadd.f32 %v3615_v26, %v2070_v24  ;;  %v2074_v33 = vpop.f32.mrf.mxu1  ;;  %v2073_v37 = vadd.f32 %v2072_v13, %v1593_v30  ;;  %v5176_v45 = vsel %vm4912_vm4, %v4780_v28, %v5044_v35  ;;  %v1048_v13 = vshrl.u32 %v7977_v39, 16 }
 0x318   : > { %6348 = vmatmul.msk.bf16.gmra.mxu3 %vm1181_vm1, %v3986_v25  ;;  %v3989_v24 = vrot.slane %v8002_v11, 1  ;;  %v3077_v30 = vor.u32 %v3075_v22, %v3073_v60 }
 0x319   : > { %v4645_v34 = vadd.f32 %v4433_v18, %v3827_v29  ;;  %5874 = vmatmul.msk.bf16.gmra.mxu0 %vm1181_vm1, %v1039_v31  ;;  %v1052_v18 = vshll.u32 %v7999_v10, 16  ;;  %v1050_v28 = vor.u32 %v1048_v13, %v1046_v58  ;;  %v3081_v31 = vrot.slane %v3079_v23, 1 }
 0x31b   : > { %v4781_v36 = vadd.f32 %v7923_v19, %v4645_v34  ;;  %6276 = vmatmul.msk.bf16.gmra.mxu2 %vm1181_vm1, %v3066_v32  ;;  %v4436_v38 = vpop.f32.mrf.mxu3  ;;  %v1054_v29 = vrot.slane %v1052_v18, 1 }
 0x31d   : > { %vm4913_vm5 = vcmp.ge.f32.partialorder %v4781_v36, 0.0  ;;  %v5045_v42 = vmul.f32 0.2, %v4781_v36 }
 0x31e   : > { %v3618_v43 = vpop.f32.mrf.mxu2  ;;  %v1595_v48 = vpop.f32.mrf.mxu0 }
 0x31f   : > { %v5177_v46 = vsel %vm4913_vm5, %v4781_v36, %v5045_v42  ;;  %v3828_v47 = vadd.f32 %v3618_v43, %v2073_v37  ;;  %v2077_v51 = vpop.f32.mrf.mxu1  ;;  %v2075_v61 = vadd.f32 %v2074_v33, %v1595_v48  ;;  %v3990_v33 = vsel %vm3887_vm2, %v3987_v54, %v3989_v24  ;;  %v8024_v48 = vld [vmem:[%s6991_s6 + $0x1b0] sm:$0xff] }
 0x320   : > { %v6705_v50 = vpack.c.bf16 %v5177_v46, %v5176_v45 }
 0x321   : > { %v4646_v55 = vadd.f32 %v4436_v38, %v3828_v47  ;;  %v1055_v38 = vsel %vm643_vm3, %v1050_v28, %v1054_v29  ;;  %v8021_v47 = vld [vmem:[%s6991_s6 + $0x1a0] sm:$0xff] }
 0x322   : > { %6879 = vst [vmem:[%s7109_s13 + $0x138] sm:$0xff] %v6705_v50   ;;  %5945 = vmatmul.msk.bf16.gmra.mxu1 %vm1181_vm1, %v7955_v4  ;;  %v3074_v4 = vsel %vm643_vm3, %v3069_v59, %v3073_v60  ;;  %v3083_v59 = vshrl.u32 %v8002_v11, 16  ;;  %v3087_v60 = vshll.u32 %v8024_v48, 16 }
 0x323   : > { %v4438_v56 = vpop.f32.mrf.mxu3  ;;  %v4782_v0 = vadd.f32 %v7923_v19, %v4646_v55 }
 0x325   : > { %v5046_v6 = vmul.f32 0.2, %v4782_v0  ;;  %vm4914_vm6 = vcmp.ge.f32.partialorder %v4782_v0, 0.0 }
 0x326   : > { %v3620_v63 = vpop.f32.mrf.mxu2  ;;  %v1598_v2 = vpop.f32.mrf.mxu0 }
 0x327   : > { %v3829_v1 = vadd.f32 %v3620_v63, %v2075_v61  ;;  %v2079_v5 = vpop.f32.mrf.mxu1  ;;  %v2078_v8 = vadd.f32 %v2077_v51, %v1598_v2  ;;  %v5178_v27 = vsel %vm4914_vm6, %v4782_v0, %v5046_v6  ;;  %v1056_v51 = vshrl.u32 %v7999_v10, 16 }
 0x328   : > { %6349 = vmatmul.msk.bf16.gmra.mxu3 %vm1181_vm1, %v3988_v62  ;;  %v3991_v61 = vrot.slane %v8024_v48, 1  ;;  %v3085_v2 = vor.u32 %v3083_v59, %v3081_v31 }
 0x329   : > { %v4647_v14 = vadd.f32 %v4438_v56, %v3829_v1  ;;  %5875 = vmatmul.msk.bf16.gmra.mxu0 %vm1181_vm1, %v1047_v3  ;;  %v1060_v56 = vshll.u32 %v8021_v47, 16  ;;  %v1058_v0 = vor.u32 %v1056_v51, %v1054_v29  ;;  %v3089_v3 = vrot.slane %v3087_v60, 1 }
 0x32b   : > { %v4783_v7 = vadd.f32 %v7923_v19, %v4647_v14  ;;  %6277 = vmatmul.msk.bf16.gmra.mxu2 %vm1181_vm1, %v3074_v4  ;;  %v4441_v9 = vpop.f32.mrf.mxu3  ;;  %v1062_v1 = vrot.slane %v1060_v56, 1 }
 0x32d   : > { %vm4915_vm7 = vcmp.ge.f32.partialorder %v4783_v7, 0.0  ;;  %v5047_v12 = vmul.f32 0.2, %v4783_v7 }
 0x32e   : > { %v3623_v41 = vpop.f32.mrf.mxu2  ;;  %v1600_v17 = vpop.f32.mrf.mxu0 }
 0x32f   : > { %v5179_v15 = vsel %vm4915_vm7, %v4783_v7, %v5047_v12  ;;  %v3830_v16 = vadd.f32 %v3623_v41, %v2078_v8  ;;  %v2082_v21 = vpop.f32.mrf.mxu1  ;;  %v2080_v32 = vadd.f32 %v2079_v5, %v1600_v17  ;;  %v3992_v5 = vsel %vm3887_vm2, %v3989_v24, %v3991_v61  ;;  %v8046_v17 = vld [vmem:[%s6991_s6 + $0x1b8] sm:$0xff] }
 0x330   : > { %v6710_v20 = vpack.c.bf16 %v5179_v15, %v5178_v27 }
 0x331   : > { %v4648_v25 = vadd.f32 %v4441_v9, %v3830_v16  ;;  %v1063_v9 = vsel %vm643_vm3, %v1058_v0, %v1062_v1  ;;  %v8043_v16 = vld [vmem:[%s6991_s6 + $0x1a8] sm:$0xff] }
 0x332   : > { %6880 = vst [vmem:[%s7109_s13 + $0x140] sm:$0xff] %v6710_v20   ;;  %5946 = vmatmul.msk.bf16.gmra.mxu1 %vm1181_vm1, %v7977_v39  ;;  %v3082_v39 = vsel %vm643_vm3, %v3077_v30, %v3081_v31  ;;  %v3091_v30 = vshrl.u32 %v8024_v48, 16  ;;  %v3095_v31 = vshll.u32 %v8046_v17, 16 }
 0x333   : > { %v4443_v26 = vpop.f32.mrf.mxu3  ;;  %v4784_v35 = vadd.f32 %v7923_v19, %v4648_v25 }
 0x335   : > { %v5048_v43 = vmul.f32 0.2, %v4784_v35  ;;  %vm4916_vm8 = vcmp.ge.f32.partialorder %v4784_v35, 0.0 }
 0x336   : > { %v3625_v34 = vpop.f32.mrf.mxu2  ;;  %v1603_v37 = vpop.f32.mrf.mxu0 }
 0x337   : > { %v3831_v36 = vadd.f32 %v3625_v34, %v2080_v32  ;;  %v2084_v40 = vpop.f32.mrf.mxu1  ;;  %v2083_v45 = vadd.f32 %v2082_v21, %v1603_v37  ;;  %v5180_v52 = vsel %vm4916_vm8, %v4784_v35, %v5048_v43  ;;  %v1064_v21 = vshrl.u32 %v8021_v47, 16 }
 0x338   : > { %6350 = vmatmul.msk.bf16.gmra.mxu3 %vm1181_vm1, %v3990_v33  ;;  %v3993_v32 = vrot.slane %v8046_v17, 1  ;;  %v3093_v37 = vor.u32 %v3091_v30, %v3089_v3 }
 0x339   : > { %v4649_v42 = vadd.f32 %v4443_v26, %v3831_v36  ;;  %5876 = vmatmul.msk.bf16.gmra.mxu0 %vm1181_vm1, %v1055_v38  ;;  %v1068_v26 = vshll.u32 %v8043_v16, 16  ;;  %v1066_v35 = vor.u32 %v1064_v21, %v1062_v1  ;;  %v3097_v38 = vrot.slane %v3095_v31, 1 }
 0x33b   : > { %v4785_v44 = vadd.f32 %v7923_v19, %v4649_v42  ;;  %6278 = vmatmul.msk.bf16.gmra.mxu2 %vm1181_vm1, %v3082_v39  ;;  %v4446_v46 = vpop.f32.mrf.mxu3  ;;  %v1070_v36 = vrot.slane %v1068_v26, 1 }
 0x33d   : > { %vm4917_vm9 = vcmp.ge.f32.partialorder %v4785_v44, 0.0  ;;  %v5049_v49 = vmul.f32 0.2, %v4785_v44 }
 0x33e   : > { %v3628_v50 = vpop.f32.mrf.mxu2  ;;  %v1605_v55 = vpop.f32.mrf.mxu0 }
 0x33f   : > { %v5181_v53 = vsel %vm4917_vm9, %v4785_v44, %v5049_v49  ;;  %v3832_v54 = vadd.f32 %v3628_v50, %v2083_v45  ;;  %v2087_v58 = vpop.f32.mrf.mxu1  ;;  %v2085_v4 = vadd.f32 %v2084_v40, %v1605_v55  ;;  %v3994_v40 = vsel %vm3887_vm2, %v3991_v61, %v3993_v32  ;;  %v8068_v55 = vld [vmem:[%s6991_s6 + $0x1c0] sm:$0xff] }
 0x340   : > { %v6715_v57 = vpack.c.bf16 %v5181_v53, %v5180_v52 }
 0x341   : > { %v4650_v62 = vadd.f32 %v4446_v46, %v3832_v54  ;;  %v1071_v46 = vsel %vm643_vm3, %v1066_v35, %v1070_v36  ;;  %v8065_v54 = vld [vmem:[%s6991_s6 + $0x1b0] sm:$0xff] }
 0x342   : > { %6881 = vst [vmem:[%s7109_s13 + $0x148] sm:$0xff] %v6715_v57   ;;  %5947 = vmatmul.msk.bf16.gmra.mxu1 %vm1181_vm1, %v7999_v10  ;;  %v3090_v10 = vsel %vm643_vm3, %v3085_v2, %v3089_v3  ;;  %v3099_v2 = vshrl.u32 %v8046_v17, 16  ;;  %v3103_v3 = vshll.u32 %v8068_v55, 16 }
 0x343   : > { %v4448_v63 = vpop.f32.mrf.mxu3  ;;  %v4786_v6 = vadd.f32 %v7923_v19, %v4650_v62 }
 0x345   : > { %v5050_v41 = vmul.f32 0.2, %v4786_v6  ;;  %vm4918_vm10 = vcmp.ge.f32.partialorder %v4786_v6, 0.0 }
 0x346   : > { %v3630_v14 = vpop.f32.mrf.mxu2  ;;  %v1608_v8 = vpop.f32.mrf.mxu0 }
 0x347   : > { %v3833_v7 = vadd.f32 %v3630_v14, %v2085_v4  ;;  %v2089_v11 = vpop.f32.mrf.mxu1  ;;  %v2088_v27 = vadd.f32 %v2087_v58, %v1608_v8  ;;  %v5182_v22 = vsel %vm4918_vm10, %v4786_v6, %v5050_v41  ;;  %v1072_v58 = vshrl.u32 %v8043_v16, 16 }
 0x348   : > { %6351 = vmatmul.msk.bf16.gmra.mxu3 %vm1181_vm1, %v3992_v5  ;;  %v3995_v4 = vrot.slane %v8068_v55, 1  ;;  %v3101_v8 = vor.u32 %v3099_v2, %v3097_v38 }
 0x349   : > { %v4651_v12 = vadd.f32 %v4448_v63, %v3833_v7  ;;  %5877 = vmatmul.msk.bf16.gmra.mxu0 %vm1181_vm1, %v1063_v9  ;;  %v1076_v63 = vshll.u32 %v8065_v54, 16  ;;  %v1074_v6 = vor.u32 %v1072_v58, %v1070_v36  ;;  %v3105_v9 = vrot.slane %v3103_v3, 1 }
 0x34b   : > { %v4787_v13 = vadd.f32 %v7923_v19, %v4651_v12  ;;  %6279 = vmatmul.msk.bf16.gmra.mxu2 %vm1181_vm1, %v3090_v10  ;;  %v4451_v15 = vpop.f32.mrf.mxu3  ;;  %v1078_v7 = vrot.slane %v1076_v63, 1 }
 0x34d   : > { %vm4919_vm11 = vcmp.ge.f32.partialorder %v4787_v13, 0.0  ;;  %v5051_v18 = vmul.f32 0.2, %v4787_v13 }
 0x34e   : > { %v3633_v20 = vpop.f32.mrf.mxu2  ;;  %v1610_v25 = vpop.f32.mrf.mxu0 }
 0x34f   : > { %v5183_v23 = vsel %vm4919_vm11, %v4787_v13, %v5051_v18  ;;  %v3834_v24 = vadd.f32 %v3633_v20, %v2088_v27  ;;  %v2092_v29 = vpop.f32.mrf.mxu1  ;;  %v2090_v39 = vadd.f32 %v2089_v11, %v1610_v25  ;;  %v3996_v11 = vsel %vm3887_vm2, %v3993_v32, %v3995_v4  ;;  %v8090_v25 = vld [vmem:[%s6991_s6 + $0x1c8] sm:$0xff] }
 0x350   : > { %v6720_v28 = vpack.c.bf16 %v5183_v23, %v5182_v22 }
 0x351   : > { %v4652_v33 = vadd.f32 %v4451_v15, %v3834_v24  ;;  %v1079_v15 = vsel %vm643_vm3, %v1074_v6, %v1078_v7  ;;  %v8087_v24 = vld [vmem:[%s6991_s6 + $0x1b8] sm:$0xff] }
 0x352   : > { %6882 = vst [vmem:[%s7109_s13 + $0x150] sm:$0xff] %v6720_v28   ;;  %5948 = vmatmul.msk.bf16.gmra.mxu1 %vm1181_vm1, %v8021_v47  ;;  %v3098_v47 = vsel %vm643_vm3, %v3093_v37, %v3097_v38  ;;  %v3107_v37 = vshrl.u32 %v8068_v55, 16  ;;  %v3111_v38 = vshll.u32 %v8090_v25, 16 }
 0x353   : > { %v4453_v34 = vpop.f32.mrf.mxu3  ;;  %v4788_v43 = vadd.f32 %v7923_v19, %v4652_v33 }
 0x355   : > { %v5052_v50 = vmul.f32 0.2, %v4788_v43  ;;  %vm4920_vm12 = vcmp.ge.f32.partialorder %v4788_v43, 0.0 }
 0x356   : > { %v3635_v42 = vpop.f32.mrf.mxu2  ;;  %v1613_v45 = vpop.f32.mrf.mxu0 }
 0x357   : > { %v3835_v44 = vadd.f32 %v3635_v42, %v2090_v39  ;;  %v2094_v48 = vpop.f32.mrf.mxu1  ;;  %v2093_v52 = vadd.f32 %v2092_v29, %v1613_v45  ;;  %v5184_v59 = vsel %vm4920_vm12, %v4788_v43, %v5052_v50  ;;  %v1080_v29 = vshrl.u32 %v8065_v54, 16 }
 0x358   : > { %6352 = vmatmul.msk.bf16.gmra.mxu3 %vm1181_vm1, %v3994_v40  ;;  %v3997_v39 = vrot.slane %v8090_v25, 1  ;;  %v3109_v45 = vor.u32 %v3107_v37, %v3105_v9 }
 0x359   : > { %v4653_v49 = vadd.f32 %v4453_v34, %v3835_v44  ;;  %5878 = vmatmul.msk.bf16.gmra.mxu0 %vm1181_vm1, %v1071_v46  ;;  %v1084_v34 = vshll.u32 %v8087_v24, 16  ;;  %v1082_v43 = vor.u32 %v1080_v29, %v1078_v7  ;;  %v3113_v46 = vrot.slane %v3111_v38, 1 }
 0x35b   : > { %v4789_v51 = vadd.f32 %v7923_v19, %v4653_v49  ;;  %6280 = vmatmul.msk.bf16.gmra.mxu2 %vm1181_vm1, %v3098_v47  ;;  %v4456_v53 = vpop.f32.mrf.mxu3  ;;  %v1086_v44 = vrot.slane %v1084_v34, 1 }
 0x35d   : > { %vm4921_vm13 = vcmp.ge.f32.partialorder %v4789_v51, 0.0  ;;  %v5053_v56 = vmul.f32 0.2, %v4789_v51 }
 0x35e   : > { %v3638_v57 = vpop.f32.mrf.mxu2  ;;  %v1615_v62 = vpop.f32.mrf.mxu0 }
 0x35f   : > { %v5185_v60 = vsel %vm4921_vm13, %v4789_v51, %v5053_v56  ;;  %v3836_v61 = vadd.f32 %v3638_v57, %v2093_v52  ;;  %v2097_v1 = vpop.f32.mrf.mxu1  ;;  %v2095_v10 = vadd.f32 %v2094_v48, %v1615_v62  ;;  %v3998_v48 = vsel %vm3887_vm2, %v3995_v4, %v3997_v39  ;;  %v8112_v62 = vld [vmem:[%s6991_s6 + $0x1d0] sm:$0xff] }
 0x360   : > { %v6725_v0 = vpack.c.bf16 %v5185_v60, %v5184_v59 }
 0x361   : > { %v4654_v5 = vadd.f32 %v4456_v53, %v3836_v61  ;;  %v1087_v53 = vsel %vm643_vm3, %v1082_v43, %v1086_v44  ;;  %v8109_v61 = vld [vmem:[%s6991_s6 + $0x1c0] sm:$0xff] }
 0x362   : > { %6883 = vst [vmem:[%s7109_s13 + $0x158] sm:$0xff] %v6725_v0   ;;  %5949 = vmatmul.msk.bf16.gmra.mxu1 %vm1181_vm1, %v8043_v16  ;;  %v3106_v16 = vsel %vm643_vm3, %v3101_v8, %v3105_v9  ;;  %v3115_v8 = vshrl.u32 %v8090_v25, 16  ;;  %v3119_v9 = vshll.u32 %v8112_v62, 16 }
 0x363   : > { %v4458_v14 = vpop.f32.mrf.mxu3  ;;  %v4790_v41 = vadd.f32 %v7923_v19, %v4654_v5 }
 0x365   : > { %v5054_v20 = vmul.f32 0.2, %v4790_v41  ;;  %vm4922_vm14 = vcmp.ge.f32.partialorder %v4790_v41, 0.0 }
 0x366   : > { %v3640_v12 = vpop.f32.mrf.mxu2  ;;  %v1618_v27 = vpop.f32.mrf.mxu0 }
 0x367   : > { %v3837_v13 = vadd.f32 %v3640_v12, %v2095_v10  ;;  %v2099_v17 = vpop.f32.mrf.mxu1  ;;  %v2098_v22 = vadd.f32 %v2097_v1, %v1618_v27  ;;  %v5186_v30 = vsel %vm4922_vm14, %v4790_v41, %v5054_v20  ;;  %v1088_v1 = vshrl.u32 %v8087_v24, 16 }
 0x368   : > { %6353 = vmatmul.msk.bf16.gmra.mxu3 %vm1181_vm1, %v3996_v11  ;;  %v3999_v10 = vrot.slane %v8112_v62, 1  ;;  %v3117_v27 = vor.u32 %v3115_v8, %v3113_v46 }
 0x369   : > { %v4655_v18 = vadd.f32 %v4458_v14, %v3837_v13  ;;  %5879 = vmatmul.msk.bf16.gmra.mxu0 %vm1181_vm1, %v1079_v15  ;;  %v1092_v14 = vshll.u32 %v8109_v61, 16  ;;  %v1090_v41 = vor.u32 %v1088_v1, %v1086_v44  ;;  %v3121_v15 = vrot.slane %v3119_v9, 1 }
 0x36b   : > { %v4791_v21 = vadd.f32 %v7923_v19, %v4655_v18  ;;  %6281 = vmatmul.msk.bf16.gmra.mxu2 %vm1181_vm1, %v3106_v16  ;;  %v4461_v23 = vpop.f32.mrf.mxu3  ;;  %v1094_v13 = vrot.slane %v1092_v14, 1 }
 0x36d   : > { %vm4923_vm15 = vcmp.ge.f32.partialorder %v4791_v21, 0.0  ;;  %v5055_v26 = vmul.f32 0.2, %v4791_v21 }
 0x36e   : > { %v3643_v28 = vpop.f32.mrf.mxu2  ;;  %v1620_v33 = vpop.f32.mrf.mxu0 }
 0x36f   : > { %v5187_v31 = vsel %vm4923_vm15, %v4791_v21, %v5055_v26  ;;  %v3838_v32 = vadd.f32 %v3643_v28, %v2098_v22  ;;  %v2102_v36 = vpop.f32.mrf.mxu1  ;;  %v2100_v47 = vadd.f32 %v2099_v17, %v1620_v33  ;;  %v4000_v17 = vsel %vm3887_vm2, %v3997_v39, %v3999_v10  ;;  %v8134_v33 = vld [vmem:[%s6991_s6 + $0x1d8] sm:$0xff] }
 0x370   : > { %v6730_v35 = vpack.c.bf16 %v5187_v31, %v5186_v30 }
 0x371   : > { %v4656_v40 = vadd.f32 %v4461_v23, %v3838_v32  ;;  %v1095_v23 = vsel %vm643_vm3, %v1090_v41, %v1094_v13  ;;  %v8131_v32 = vld [vmem:[%s6991_s6 + $0x1c8] sm:$0xff] }
 0x372   : > { %6884 = vst [vmem:[%s7109_s13 + $0x160] sm:$0xff] %v6730_v35   ;;  %5950 = vmatmul.msk.bf16.gmra.mxu1 %vm1181_vm1, %v8065_v54  ;;  %v3114_v54 = vsel %vm643_vm3, %v3109_v45, %v3113_v46  ;;  %v3123_v45 = vshrl.u32 %v8112_v62, 16  ;;  %v3127_v46 = vshll.u32 %v8134_v33, 16 }
 0x373   : > { %v4463_v42 = vpop.f32.mrf.mxu3  ;;  %v4792_v50 = vadd.f32 %v7923_v19, %v4656_v40 }
 0x375   : > { %v5056_v57 = vmul.f32 0.2, %v4792_v50  ;;  %vm4924_vm0 = vcmp.ge.f32.partialorder %v4792_v50, 0.0 }
 0x376   : > { %v3645_v49 = vpop.f32.mrf.mxu2  ;;  %v1623_v52 = vpop.f32.mrf.mxu0 }
 0x377   : > { %v3839_v51 = vadd.f32 %v3645_v49, %v2100_v47  ;;  %v2104_v55 = vpop.f32.mrf.mxu1  ;;  %v2103_v59 = vadd.f32 %v2102_v36, %v1623_v52  ;;  %v5188_v2 = vsel %vm4924_vm0, %v4792_v50, %v5056_v57  ;;  %v1096_v36 = vshrl.u32 %v8109_v61, 16 }
 0x378   : > { %6354 = vmatmul.msk.bf16.gmra.mxu3 %vm1181_vm1, %v3998_v48  ;;  %v4001_v47 = vrot.slane %v8134_v33, 1  ;;  %v3125_v52 = vor.u32 %v3123_v45, %v3121_v15 }
 0x379   : > { %v4657_v56 = vadd.f32 %v4463_v42, %v3839_v51  ;;  %5880 = vmatmul.msk.bf16.gmra.mxu0 %vm1181_vm1, %v1087_v53  ;;  %v1100_v42 = vshll.u32 %v8131_v32, 16  ;;  %v1098_v50 = vor.u32 %v1096_v36, %v1094_v13  ;;  %v3129_v53 = vrot.slane %v3127_v46, 1 }
 0x37b   : > { %v4793_v58 = vadd.f32 %v7923_v19, %v4657_v56  ;;  %6282 = vmatmul.msk.bf16.gmra.mxu2 %vm1181_vm1, %v3114_v54  ;;  %v4466_v60 = vpop.f32.mrf.mxu3  ;;  %v1102_v51 = vrot.slane %v1100_v42, 1 }
 0x37d   : > { %vm4925_vm4 = vcmp.ge.f32.partialorder %v4793_v58, 0.0  ;;  %v5057_v63 = vmul.f32 0.2, %v4793_v58 }
 0x37e   : > { %v3648_v0 = vpop.f32.mrf.mxu2  ;;  %v1625_v5 = vpop.f32.mrf.mxu0 }
 0x37f   : > { %v5189_v3 = vsel %vm4925_vm4, %v4793_v58, %v5057_v63  ;;  %v3840_v4 = vadd.f32 %v3648_v0, %v2103_v59  ;;  %v2107_v7 = vpop.f32.mrf.mxu1  ;;  %v2105_v16 = vadd.f32 %v2104_v55, %v1625_v5  ;;  %v4002_v55 = vsel %vm3887_vm2, %v3999_v10, %v4001_v47  ;;  %v8156_v5 = vld [vmem:[%s6991_s6 + $0x1e0] sm:$0xff] }
 0x380   : > { %v6735_v6 = vpack.c.bf16 %v5189_v3, %v5188_v2 }
 0x381   : > { %v4658_v11 = vadd.f32 %v4466_v60, %v3840_v4  ;;  %v1103_v60 = vsel %vm643_vm3, %v1098_v50, %v1102_v51  ;;  %v8153_v4 = vld [vmem:[%s6991_s6 + $0x1d0] sm:$0xff] }
 0x382   : > { %6885 = vst [vmem:[%s7109_s13 + $0x168] sm:$0xff] %v6735_v6   ;;  %5951 = vmatmul.msk.bf16.gmra.mxu1 %vm1181_vm1, %v8087_v24  ;;  %v3122_v24 = vsel %vm643_vm3, %v3117_v27, %v3121_v15  ;;  %v3131_v27 = vshrl.u32 %v8134_v33, 16  ;;  %v3135_v15 = vshll.u32 %v8156_v5, 16 }
 0x383   : > { %v4468_v12 = vpop.f32.mrf.mxu3  ;;  %v4794_v20 = vadd.f32 %v7923_v19, %v4658_v11 }
 0x385   : > { %v5058_v28 = vmul.f32 0.2, %v4794_v20  ;;  %vm4926_vm5 = vcmp.ge.f32.partialorder %v4794_v20, 0.0 }
 0x386   : > { %v3650_v18 = vpop.f32.mrf.mxu2  ;;  %v1628_v22 = vpop.f32.mrf.mxu0 }
 0x387   : > { %v3841_v21 = vadd.f32 %v3650_v18, %v2105_v16  ;;  %v2109_v25 = vpop.f32.mrf.mxu1  ;;  %v2108_v30 = vadd.f32 %v2107_v7, %v1628_v22  ;;  %v5190_v37 = vsel %vm4926_vm5, %v4794_v20, %v5058_v28  ;;  %v1104_v7 = vshrl.u32 %v8131_v32, 16 }
 0x388   : > { %6355 = vmatmul.msk.bf16.gmra.mxu3 %vm1181_vm1, %v4000_v17  ;;  %v4003_v16 = vrot.slane %v8156_v5, 1  ;;  %v3133_v22 = vor.u32 %v3131_v27, %v3129_v53 }
 0x389   : > { %v4659_v26 = vadd.f32 %v4468_v12, %v3841_v21  ;;  %5881 = vmatmul.msk.bf16.gmra.mxu0 %vm1181_vm1, %v1095_v23  ;;  %v1108_v12 = vshll.u32 %v8153_v4, 16  ;;  %v1106_v20 = vor.u32 %v1104_v7, %v1102_v51  ;;  %v3137_v23 = vrot.slane %v3135_v15, 1  ;;  %v8197_v7 = vld [vmem:[%s8383_s2] ss:$0 sm:$0xff] }
 0x38b   : > { %v4795_v29 = vadd.f32 %v7923_v19, %v4659_v26  ;;  %6283 = vmatmul.msk.bf16.gmra.mxu2 %vm1181_vm1, %v3122_v24  ;;  %v4471_v31 = vpop.f32.mrf.mxu3  ;;  %v1110_v21 = vrot.slane %v1108_v12, 1 }
 0x38d   : > { %vm4927_vm6 = vcmp.ge.f32.partialorder %v4795_v29, 0.0  ;;  %v5059_v34 = vmul.f32 0.2, %v4795_v29 }
 0x38e   : > { %v3653_v35 = vpop.f32.mrf.mxu2  ;;  %v1630_v40 = vpop.f32.mrf.mxu0 }
 0x38f   : > { %v5191_v38 = vsel %vm4927_vm6, %v4795_v29, %v5059_v34  ;;  %v3842_v39 = vadd.f32 %v3653_v35, %v2108_v30  ;;  %v2112_v44 = vpop.f32.mrf.mxu1  ;;  %v2110_v54 = vadd.f32 %v2109_v25, %v1630_v40  ;;  %v4004_v25 = vsel %vm3887_vm2, %v4001_v47, %v4003_v16  ;;  %v8178_v40 = vld [vmem:[%s6991_s6 + $0x1e8] sm:$0xff] }
 0x390   : > { %v6740_v43 = vpack.c.bf16 %v5191_v38, %v5190_v37 }
 0x391   : > { %v4660_v48 = vadd.f32 %v4471_v31, %v3842_v39  ;;  %v1111_v31 = vsel %vm643_vm3, %v1106_v20, %v1110_v21  ;;  %v8175_v39 = vld [vmem:[%s6991_s6 + $0x1d8] sm:$0xff] }
 0x392   : > { %6886 = vst [vmem:[%s7109_s13 + $0x170] sm:$0xff] %v6740_v43   ;;  %5952 = vmatmul.msk.bf16.gmra.mxu1 %vm1181_vm1, %v8109_v61  ;;  %v3130_v61 = vsel %vm643_vm3, %v3125_v52, %v3129_v53  ;;  %v3139_v52 = vshrl.u32 %v8156_v5, 16  ;;  %v3143_v53 = vshll.u32 %v8178_v40, 16 }
 0x393   : > { %v4473_v49 = vpop.f32.mrf.mxu3  ;;  %v4796_v57 = vadd.f32 %v7923_v19, %v4660_v48 }
 0x395   : > { %v5060_v0 = vmul.f32 0.2, %v4796_v57  ;;  %vm4928_vm7 = vcmp.ge.f32.partialorder %v4796_v57, 0.0 }
 0x396   : > { %v3655_v56 = vpop.f32.mrf.mxu2  ;;  %v1633_v59 = vpop.f32.mrf.mxu0 }
 0x397   : > { %v3843_v58 = vadd.f32 %v3655_v56, %v2110_v54  ;;  %v2114_v62 = vpop.f32.mrf.mxu1  ;;  %v2113_v2 = vadd.f32 %v2112_v44, %v1633_v59  ;;  %v5192_v8 = vsel %vm4928_vm7, %v4796_v57, %v5060_v0  ;;  %v1112_v44 = vshrl.u32 %v8153_v4, 16 }
 0x398   : > { %6356 = vmatmul.msk.bf16.gmra.mxu3 %vm1181_vm1, %v4002_v55  ;;  %v4005_v54 = vrot.slane %v8178_v40, 1  ;;  %v3141_v59 = vor.u32 %v3139_v52, %v3137_v23 }
 0x399   : > { %v4661_v63 = vadd.f32 %v4473_v49, %v3843_v58  ;;  %5882 = vmatmul.msk.bf16.gmra.mxu0 %vm1181_vm1, %v1103_v60  ;;  %v1116_v49 = vshll.u32 %v8175_v39, 16  ;;  %v1114_v57 = vor.u32 %v1112_v44, %v1110_v21  ;;  %v3145_v60 = vrot.slane %v3143_v53, 1 }
 0x39b   : > { %v4797_v1 = vadd.f32 %v7923_v19, %v4661_v63  ;;  %6284 = vmatmul.msk.bf16.gmra.mxu2 %vm1181_vm1, %v3130_v61  ;;  %v4476_v3 = vpop.f32.mrf.mxu3  ;;  %v1118_v58 = vrot.slane %v1116_v49, 1 }
 0x39d   : > { %vm4929_vm8 = vcmp.ge.f32.partialorder %v4797_v1, 0.0  ;;  %v5061_v14 = vmul.f32 0.2, %v4797_v1 }
 0x39e   : > { %v3658_v6 = vpop.f32.mrf.mxu2  ;;  %v1635_v11 = vpop.f32.mrf.mxu0 }
 0x39f   : > { %v5193_v9 = vsel %vm4929_vm8, %v4797_v1, %v5061_v14  ;;  %v3844_v10 = vadd.f32 %v3658_v6, %v2113_v2  ;;  %v2117_v13 = vpop.f32.mrf.mxu1  ;;  %v2115_v24 = vadd.f32 %v2114_v62, %v1635_v11  ;;  %v4006_v62 = vsel %vm3887_vm2, %v4003_v16, %v4005_v54  ;;  %v8205_v11 = vld [vmem:[%s6991_s6 + $0x1f0] sm:$0xff] }
 0x3a0   : > { %v6745_v41 = vpack.c.bf16 %v5193_v9, %v5192_v8 }
 0x3a1   : > { %v4662_v17 = vadd.f32 %v4476_v3, %v3844_v10  ;;  %v1119_v3 = vsel %vm643_vm3, %v1114_v57, %v1118_v58  ;;  %v8202_v10 = vld [vmem:[%s6991_s6 + $0x1e0] sm:$0xff] }
 0x3a2   : > { %6887 = vst [vmem:[%s7109_s13 + $0x178] sm:$0xff] %v6745_v41   ;;  %5953 = vmatmul.msk.bf16.gmra.mxu1 %vm1181_vm1, %v8131_v32  ;;  %v3138_v32 = vsel %vm643_vm3, %v3133_v22, %v3137_v23  ;;  %v3147_v22 = vshrl.u32 %v8178_v40, 16  ;;  %v3151_v23 = vshll.u32 %v8205_v11, 16 }
 0x3a3   : > { %v4478_v18 = vpop.f32.mrf.mxu3  ;;  %v4798_v28 = vadd.f32 %v7923_v19, %v4662_v17 }
 0x3a5   : > { %v5062_v35 = vmul.f32 0.2, %v4798_v28  ;;  %vm4930_vm9 = vcmp.ge.f32.partialorder %v4798_v28, 0.0 }
 0x3a6   : > { %v3660_v26 = vpop.f32.mrf.mxu2  ;;  %v1638_v30 = vpop.f32.mrf.mxu0 }
 0x3a7   : > { %v3845_v29 = vadd.f32 %v3660_v26, %v2115_v24  ;;  %v2119_v33 = vpop.f32.mrf.mxu1  ;;  %v2118_v37 = vadd.f32 %v2117_v13, %v1638_v30  ;;  %v5194_v45 = vsel %vm4930_vm9, %v4798_v28, %v5062_v35  ;;  %v1120_v13 = vshrl.u32 %v8175_v39, 16 }
 0x3a8   : > { %6357 = vmatmul.msk.bf16.gmra.mxu3 %vm1181_vm1, %v4004_v25  ;;  %v4007_v24 = vrot.slane %v8205_v11, 1  ;;  %v3149_v30 = vor.u32 %v3147_v22, %v3145_v60 }
 0x3a9   : > { %v4663_v34 = vadd.f32 %v4478_v18, %v3845_v29  ;;  %5883 = vmatmul.msk.bf16.gmra.mxu0 %vm1181_vm1, %v1111_v31  ;;  %v1124_v18 = vshll.u32 %v8202_v10, 16  ;;  %v1122_v28 = vor.u32 %v1120_v13, %v1118_v58  ;;  %v3153_v31 = vrot.slane %v3151_v23, 1 }
 0x3ab   : > { %v4799_v36 = vadd.f32 %v7923_v19, %v4663_v34  ;;  %6285 = vmatmul.msk.bf16.gmra.mxu2 %vm1181_vm1, %v3138_v32  ;;  %v4481_v38 = vpop.f32.mrf.mxu3  ;;  %v1126_v29 = vrot.slane %v1124_v18, 1 }
 0x3ad   : > { %vm4931_vm10 = vcmp.ge.f32.partialorder %v4799_v36, 0.0  ;;  %v5063_v42 = vmul.f32 0.2, %v4799_v36 }
 0x3ae   : > { %v3663_v43 = vpop.f32.mrf.mxu2  ;;  %v1640_v48 = vpop.f32.mrf.mxu0 }
 0x3af   : > { %v5195_v46 = vsel %vm4931_vm10, %v4799_v36, %v5063_v42  ;;  %v3846_v47 = vadd.f32 %v3663_v43, %v2118_v37  ;;  %v2122_v51 = vpop.f32.mrf.mxu1  ;;  %v2120_v61 = vadd.f32 %v2119_v33, %v1640_v48  ;;  %v4008_v33 = vsel %vm3887_vm2, %v4005_v54, %v4007_v24  ;;  %v8227_v48 = vld [vmem:[%s6991_s6 + $0x1f8] sm:$0xff] }
 0x3b0   : > { %v6750_v50 = vpack.c.bf16 %v5195_v46, %v5194_v45 }
 0x3b1   : > { %v4664_v55 = vadd.f32 %v4481_v38, %v3846_v47  ;;  %v1127_v38 = vsel %vm643_vm3, %v1122_v28, %v1126_v29  ;;  %v8224_v47 = vld [vmem:[%s6991_s6 + $0x1e8] sm:$0xff] }
 0x3b2   : > { %6888 = vst [vmem:[%s7109_s13 + $0x180] sm:$0xff] %v6750_v50   ;;  %5954 = vmatmul.msk.bf16.gmra.mxu1 %vm1181_vm1, %v8153_v4  ;;  %v3146_v4 = vsel %vm643_vm3, %v3141_v59, %v3145_v60  ;;  %v3155_v59 = vshrl.u32 %v8205_v11, 16  ;;  %v3159_v60 = vshll.u32 %v8227_v48, 16 }
 0x3b3   : > { %v4483_v56 = vpop.f32.mrf.mxu3  ;;  %v4800_v0 = vadd.f32 %v7923_v19, %v4664_v55 }
 0x3b5   : > { %v5064_v6 = vmul.f32 0.2, %v4800_v0  ;;  %vm4932_vm11 = vcmp.ge.f32.partialorder %v4800_v0, 0.0 }
 0x3b6   : > { %v3665_v63 = vpop.f32.mrf.mxu2  ;;  %v1643_v2 = vpop.f32.mrf.mxu0 }
 0x3b7   : > { %v3847_v1 = vadd.f32 %v3665_v63, %v2120_v61  ;;  %v2124_v5 = vpop.f32.mrf.mxu1  ;;  %v2123_v8 = vadd.f32 %v2122_v51, %v1643_v2  ;;  %v5196_v27 = vsel %vm4932_vm11, %v4800_v0, %v5064_v6  ;;  %v1128_v51 = vshrl.u32 %v8202_v10, 16 }
 0x3b8   : > { %6358 = vmatmul.msk.bf16.gmra.mxu3 %vm1181_vm1, %v4006_v62  ;;  %v4009_v61 = vrot.slane %v8227_v48, 1  ;;  %v3157_v2 = vor.u32 %v3155_v59, %v3153_v31 }
 0x3b9   : > { %v4665_v14 = vadd.f32 %v4483_v56, %v3847_v1  ;;  %5884 = vmatmul.msk.bf16.gmra.mxu0 %vm1181_vm1, %v1119_v3  ;;  %v1132_v56 = vshll.u32 %v8224_v47, 16  ;;  %v1130_v0 = vor.u32 %v1128_v51, %v1126_v29  ;;  %v3161_v3 = vrot.slane %v3159_v60, 1 }
 0x3bb   : > { %v4801_v19 = vadd.f32 %v8197_v7, %v4665_v14  ;;  %6286 = vmatmul.msk.bf16.gmra.mxu2 %vm1181_vm1, %v3146_v4  ;;  %v4486_v9 = vpop.f32.mrf.mxu3  ;;  %v1134_v1 = vrot.slane %v1132_v56, 1 }
 0x3bd   : > { %vm4933_vm12 = vcmp.ge.f32.partialorder %v4801_v19, 0.0  ;;  %v5065_v12 = vmul.f32 0.2, %v4801_v19 }
 0x3be   : > { %v3668_v41 = vpop.f32.mrf.mxu2  ;;  %v1645_v17 = vpop.f32.mrf.mxu0 }
 0x3bf   : > { %v5197_v15 = vsel %vm4933_vm12, %v4801_v19, %v5065_v12  ;;  %v3848_v16 = vadd.f32 %v3668_v41, %v2123_v8  ;;  %v2127_v21 = vpop.f32.mrf.mxu1  ;;  %v2125_v32 = vadd.f32 %v2124_v5, %v1645_v17  ;;  %v4010_v5 = vsel %vm3887_vm2, %v4007_v24, %v4009_v61  ;;  %v8249_v17 = vld [vmem:[%s6991_s6 + $0x200] sm:$0xff] }
 0x3c0   : > { %v6755_v20 = vpack.c.bf16 %v5197_v15, %v5196_v27 }
 0x3c1   : > { %v4666_v25 = vadd.f32 %v4486_v9, %v3848_v16  ;;  %v1135_v9 = vsel %vm643_vm3, %v1130_v0, %v1134_v1  ;;  %v8246_v16 = vld [vmem:[%s6991_s6 + $0x1f0] sm:$0xff] }
 0x3c2   : > { %6889 = vst [vmem:[%s7109_s13 + $0x188] sm:$0xff] %v6755_v20   ;;  %5955 = vmatmul.msk.bf16.gmra.mxu1 %vm1181_vm1, %v8175_v39  ;;  %v3154_v39 = vsel %vm643_vm3, %v3149_v30, %v3153_v31  ;;  %v3163_v30 = vshrl.u32 %v8227_v48, 16  ;;  %v3167_v31 = vshll.u32 %v8249_v17, 16 }
 0x3c3   : > { %v4488_v26 = vpop.f32.mrf.mxu3  ;;  %v4802_v35 = vadd.f32 %v8197_v7, %v4666_v25 }
 0x3c5   : > { %v5066_v43 = vmul.f32 0.2, %v4802_v35  ;;  %vm4934_vm13 = vcmp.ge.f32.partialorder %v4802_v35, 0.0 }
 0x3c6   : > { %v3670_v34 = vpop.f32.mrf.mxu2  ;;  %v1648_v37 = vpop.f32.mrf.mxu0 }
 0x3c7   : > { %v3849_v36 = vadd.f32 %v3670_v34, %v2125_v32  ;;  %v2129_v40 = vpop.f32.mrf.mxu1  ;;  %v2128_v45 = vadd.f32 %v2127_v21, %v1648_v37  ;;  %v5198_v52 = vsel %vm4934_vm13, %v4802_v35, %v5066_v43  ;;  %v1136_v21 = vshrl.u32 %v8224_v47, 16 }
 0x3c8   : > { %6359 = vmatmul.msk.bf16.gmra.mxu3 %vm1181_vm1, %v4008_v33  ;;  %v4011_v32 = vrot.slane %v8249_v17, 1  ;;  %v3165_v37 = vor.u32 %v3163_v30, %v3161_v3 }
 0x3c9   : > { %v4667_v42 = vadd.f32 %v4488_v26, %v3849_v36  ;;  %5885 = vmatmul.msk.bf16.gmra.mxu0 %vm1181_vm1, %v1127_v38  ;;  %v1140_v26 = vshll.u32 %v8246_v16, 16  ;;  %v1138_v35 = vor.u32 %v1136_v21, %v1134_v1  ;;  %v3169_v38 = vrot.slane %v3167_v31, 1 }
 0x3cb   : > { %v4803_v44 = vadd.f32 %v8197_v7, %v4667_v42  ;;  %6287 = vmatmul.msk.bf16.gmra.mxu2 %vm1181_vm1, %v3154_v39  ;;  %v4491_v46 = vpop.f32.mrf.mxu3  ;;  %v1142_v36 = vrot.slane %v1140_v26, 1 }
 0x3cd   : > { %vm4935_vm14 = vcmp.ge.f32.partialorder %v4803_v44, 0.0  ;;  %v5067_v49 = vmul.f32 0.2, %v4803_v44 }
 0x3ce   : > { %v3673_v50 = vpop.f32.mrf.mxu2  ;;  %v1650_v55 = vpop.f32.mrf.mxu0 }
 0x3cf   : > { %v5199_v53 = vsel %vm4935_vm14, %v4803_v44, %v5067_v49  ;;  %v3850_v54 = vadd.f32 %v3673_v50, %v2128_v45  ;;  %v2132_v58 = vpop.f32.mrf.mxu1  ;;  %v2130_v4 = vadd.f32 %v2129_v40, %v1650_v55  ;;  %v4012_v40 = vsel %vm3887_vm2, %v4009_v61, %v4011_v32  ;;  %v8271_v55 = vld [vmem:[%s6991_s6 + $0x208] sm:$0xff] }
 0x3d0   : > { %v6760_v57 = vpack.c.bf16 %v5199_v53, %v5198_v52 }
 0x3d1   : > { %v4668_v62 = vadd.f32 %v4491_v46, %v3850_v54  ;;  %v1143_v46 = vsel %vm643_vm3, %v1138_v35, %v1142_v36  ;;  %v8268_v54 = vld [vmem:[%s6991_s6 + $0x1f8] sm:$0xff] }
 0x3d2   : > { %6890 = vst [vmem:[%s7109_s13 + $0x190] sm:$0xff] %v6760_v57   ;;  %5956 = vmatmul.msk.bf16.gmra.mxu1 %vm1181_vm1, %v8202_v10  ;;  %v3162_v10 = vsel %vm643_vm3, %v3157_v2, %v3161_v3  ;;  %v3171_v2 = vshrl.u32 %v8249_v17, 16  ;;  %v3175_v3 = vshll.u32 %v8271_v55, 16 }
 0x3d3   : > { %v4493_v63 = vpop.f32.mrf.mxu3  ;;  %v4804_v6 = vadd.f32 %v8197_v7, %v4668_v62 }
 0x3d5   : > { %v5068_v41 = vmul.f32 0.2, %v4804_v6  ;;  %vm4936_vm15 = vcmp.ge.f32.partialorder %v4804_v6, 0.0 }
 0x3d6   : > { %v3675_v14 = vpop.f32.mrf.mxu2  ;;  %v1653_v8 = vpop.f32.mrf.mxu0 }
 0x3d7   : > { %v3851_v19 = vadd.f32 %v3675_v14, %v2130_v4  ;;  %v2134_v11 = vpop.f32.mrf.mxu1  ;;  %v2133_v27 = vadd.f32 %v2132_v58, %v1653_v8  ;;  %v5200_v22 = vsel %vm4936_vm15, %v4804_v6, %v5068_v41  ;;  %v1144_v58 = vshrl.u32 %v8246_v16, 16 }
 0x3d8   : > { %6360 = vmatmul.msk.bf16.gmra.mxu3 %vm1181_vm1, %v4010_v5  ;;  %v4013_v4 = vrot.slane %v8271_v55, 1  ;;  %v3173_v8 = vor.u32 %v3171_v2, %v3169_v38 }
 0x3d9   : > { %v4669_v12 = vadd.f32 %v4493_v63, %v3851_v19  ;;  %5886 = vmatmul.msk.bf16.gmra.mxu0 %vm1181_vm1, %v1135_v9  ;;  %v1148_v63 = vshll.u32 %v8268_v54, 16  ;;  %v1146_v6 = vor.u32 %v1144_v58, %v1142_v36  ;;  %v3177_v9 = vrot.slane %v3175_v3, 1 }
 0x3db   : > { %v4805_v13 = vadd.f32 %v8197_v7, %v4669_v12  ;;  %6288 = vmatmul.msk.bf16.gmra.mxu2 %vm1181_vm1, %v3162_v10  ;;  %v4496_v15 = vpop.f32.mrf.mxu3  ;;  %v1150_v19 = vrot.slane %v1148_v63, 1 }
 0x3dd   : > { %vm4937_vm0 = vcmp.ge.f32.partialorder %v4805_v13, 0.0  ;;  %v5069_v18 = vmul.f32 0.2, %v4805_v13 }
 0x3de   : > { %v3678_v20 = vpop.f32.mrf.mxu2  ;;  %v1655_v25 = vpop.f32.mrf.mxu0 }
 0x3df   : > { %v5201_v23 = vsel %vm4937_vm0, %v4805_v13, %v5069_v18  ;;  %v3852_v24 = vadd.f32 %v3678_v20, %v2133_v27  ;;  %v2137_v29 = vpop.f32.mrf.mxu1  ;;  %v2135_v39 = vadd.f32 %v2134_v11, %v1655_v25  ;;  %v4014_v11 = vsel %vm3887_vm2, %v4011_v32, %v4013_v4  ;;  %v8293_v25 = vld [vmem:[%s6991_s6 + $0x210] sm:$0xff] }
 0x3e0   : > { %v6765_v28 = vpack.c.bf16 %v5201_v23, %v5200_v22 }
 0x3e1   : > { %v4670_v33 = vadd.f32 %v4496_v15, %v3852_v24  ;;  %v1151_v15 = vsel %vm643_vm3, %v1146_v6, %v1150_v19  ;;  %v8290_v24 = vld [vmem:[%s6991_s6 + $0x200] sm:$0xff] }
 0x3e2   : > { %6891 = vst [vmem:[%s7109_s13 + $0x198] sm:$0xff] %v6765_v28   ;;  %5957 = vmatmul.msk.bf16.gmra.mxu1 %vm1181_vm1, %v8224_v47  ;;  %v3170_v47 = vsel %vm643_vm3, %v3165_v37, %v3169_v38  ;;  %v3179_v37 = vshrl.u32 %v8271_v55, 16  ;;  %v3183_v38 = vshll.u32 %v8293_v25, 16 }
 0x3e3   : > { %v4498_v34 = vpop.f32.mrf.mxu3  ;;  %v4806_v43 = vadd.f32 %v8197_v7, %v4670_v33 }
 0x3e5   : > { %v5070_v50 = vmul.f32 0.2, %v4806_v43  ;;  %vm4938_vm4 = vcmp.ge.f32.partialorder %v4806_v43, 0.0 }
 0x3e6   : > { %v3680_v42 = vpop.f32.mrf.mxu2  ;;  %v1658_v45 = vpop.f32.mrf.mxu0 }
 0x3e7   : > { %v3853_v44 = vadd.f32 %v3680_v42, %v2135_v39  ;;  %v2139_v48 = vpop.f32.mrf.mxu1  ;;  %v2138_v52 = vadd.f32 %v2137_v29, %v1658_v45  ;;  %v5202_v59 = vsel %vm4938_vm4, %v4806_v43, %v5070_v50  ;;  %v1152_v29 = vshrl.u32 %v8268_v54, 16 }
 0x3e8   : > { %6361 = vmatmul.msk.bf16.gmra.mxu3 %vm1181_vm1, %v4012_v40  ;;  %v4015_v39 = vrot.slane %v8293_v25, 1  ;;  %v3181_v45 = vor.u32 %v3179_v37, %v3177_v9 }
 0x3e9   : > { %v4671_v49 = vadd.f32 %v4498_v34, %v3853_v44  ;;  %5887 = vmatmul.msk.bf16.gmra.mxu0 %vm1181_vm1, %v1143_v46  ;;  %v1156_v34 = vshll.u32 %v8290_v24, 16  ;;  %v1154_v43 = vor.u32 %v1152_v29, %v1150_v19  ;;  %v3185_v46 = vrot.slane %v3183_v38, 1 }
 0x3eb   : > { %v4807_v51 = vadd.f32 %v8197_v7, %v4671_v49  ;;  %6289 = vmatmul.msk.bf16.gmra.mxu2 %vm1181_vm1, %v3170_v47  ;;  %v4501_v53 = vpop.f32.mrf.mxu3  ;;  %v1158_v44 = vrot.slane %v1156_v34, 1 }
 0x3ed   : > { %vm4939_vm5 = vcmp.ge.f32.partialorder %v4807_v51, 0.0  ;;  %v5071_v56 = vmul.f32 0.2, %v4807_v51 }
 0x3ee   : > { %v3683_v57 = vpop.f32.mrf.mxu2  ;;  %v1660_v62 = vpop.f32.mrf.mxu0 }
 0x3ef   : > { %v5203_v60 = vsel %vm4939_vm5, %v4807_v51, %v5071_v56  ;;  %v3854_v61 = vadd.f32 %v3683_v57, %v2138_v52  ;;  %v2142_v1 = vpop.f32.mrf.mxu1  ;;  %v2140_v10 = vadd.f32 %v2139_v48, %v1660_v62  ;;  %v4016_v48 = vsel %vm3887_vm2, %v4013_v4, %v4015_v39  ;;  %v8315_v62 = vld [vmem:[%s6991_s6 + $0x218] sm:$0xff] }
 0x3f0   : > { %v6770_v0 = vpack.c.bf16 %v5203_v60, %v5202_v59 }
 0x3f1   : > { %v4672_v5 = vadd.f32 %v4501_v53, %v3854_v61  ;;  %v1159_v53 = vsel %vm643_vm3, %v1154_v43, %v1158_v44  ;;  %v8312_v61 = vld [vmem:[%s6991_s6 + $0x208] sm:$0xff] }
 0x3f2   : > { %6892 = vst [vmem:[%s7109_s13 + $0x1a0] sm:$0xff] %v6770_v0   ;;  %5958 = vmatmul.msk.bf16.gmra.mxu1 %vm1181_vm1, %v8246_v16  ;;  %v3178_v16 = vsel %vm643_vm3, %v3173_v8, %v3177_v9  ;;  %v3187_v8 = vshrl.u32 %v8293_v25, 16  ;;  %v3191_v9 = vshll.u32 %v8315_v62, 16 }
 0x3f3   : > { %v4503_v14 = vpop.f32.mrf.mxu3  ;;  %v4808_v41 = vadd.f32 %v8197_v7, %v4672_v5 }
 0x3f5   : > { %v5072_v20 = vmul.f32 0.2, %v4808_v41  ;;  %vm4940_vm6 = vcmp.ge.f32.partialorder %v4808_v41, 0.0 }
 0x3f6   : > { %v3685_v12 = vpop.f32.mrf.mxu2  ;;  %v1663_v27 = vpop.f32.mrf.mxu0 }
 0x3f7   : > { %v3855_v13 = vadd.f32 %v3685_v12, %v2140_v10  ;;  %v2144_v17 = vpop.f32.mrf.mxu1  ;;  %v2143_v22 = vadd.f32 %v2142_v1, %v1663_v27  ;;  %v5204_v30 = vsel %vm4940_vm6, %v4808_v41, %v5072_v20  ;;  %v1160_v1 = vshrl.u32 %v8290_v24, 16  ;;  %v2334_v20 = vld [vmem:[%s6991_s6 + $0x220] sm:$0x1] }
 0x3f8   : > { %6362 = vmatmul.msk.bf16.gmra.mxu3 %vm1181_vm1, %v4014_v11  ;;  %v4017_v10 = vrot.slane %v8315_v62, 1  ;;  %v3189_v27 = vor.u32 %v3187_v8, %v3185_v46 }
 0x3f9   : > { %v4673_v18 = vadd.f32 %v4503_v14, %v3855_v13  ;;  %5888 = vmatmul.msk.bf16.gmra.mxu0 %vm1181_vm1, %v1151_v15  ;;  %v1164_v14 = vshll.u32 %v8312_v61, 16  ;;  %v1162_v41 = vor.u32 %v1160_v1, %v1158_v44  ;;  %v3193_v15 = vrot.slane %v3191_v9, 1 }
 0x3fb   : > { %v4809_v21 = vadd.f32 %v8197_v7, %v4673_v18  ;;  %6290 = vmatmul.msk.bf16.gmra.mxu2 %vm1181_vm1, %v3178_v16  ;;  %v4506_v23 = vpop.f32.mrf.mxu3  ;;  %v1166_v13 = vrot.slane %v1164_v14, 1  ;;  %v306_v16 = vld [vmem:[%s6991_s6 + $0x210] sm:$0x1]  ;;  %v4018_v18 = vsel %vm3887_vm2, %v4015_v39, %v4017_v10 }
 0x3fd   : > { %vm4941_vm7 = vcmp.ge.f32.partialorder %v4809_v21, 0.0  ;;  %v5073_v26 = vmul.f32 0.2, %v4809_v21 }
 0x3fe   : > { %v3688_v28 = vpop.f32.mrf.mxu2  ;;  %v1665_v33 = vpop.f32.mrf.mxu0 }
 0x3ff   : > { %v5205_v31 = vsel %vm4941_vm7, %v4809_v21, %v5073_v26  ;;  %v3856_v32 = vadd.f32 %v3688_v28, %v2143_v22  ;;  %v2147_v36 = vpop.f32.mrf.mxu1  ;;  %v2145_v47 = vadd.f32 %v2144_v17, %v1665_v33  ;;  %v1167_v26 = vsel %vm643_vm3, %v1162_v41, %v1166_v13 }
 0x400   : > { %v6775_v35 = vpack.c.bf16 %v5205_v31, %v5204_v30  ;;  %v575_v28 = vunpack.c.l.b16 %v306_v16  ;;  %v2603_v30 = vunpack.c.l.b16 %v2334_v20 }
 0x401   : > { %v4674_v40 = vadd.f32 %v4506_v23, %v3856_v32 }
 0x402   : > { %6893 = vst [vmem:[%s7109_s13 + $0x1a8] sm:$0xff] %v6775_v35   ;;  %5959 = vmatmul.msk.bf16.gmra.mxu1 %vm1181_vm1, %v8268_v54  ;;  %v3186_v54 = vsel %vm643_vm3, %v3181_v45, %v3185_v46  ;;  %v2670_v37 = vpack.c.b16 %v2603_v30, %v2603_v30 }
 0x403   : > { %v4508_v42 = vpop.f32.mrf.mxu3  ;;  %v4810_v50 = vadd.f32 %v8197_v7, %v4674_v40  ;;  %v1168_v40 = vshrl.u32 %v8312_v61, 16 }
 0x405   : > { %v5074_v57 = vmul.f32 0.2, %v4810_v50  ;;  %vm4942_vm8 = vcmp.ge.f32.partialorder %v4810_v50, 0.0 }
 0x406   : > { %v3690_v49 = vpop.f32.mrf.mxu2  ;;  %v1668_v52 = vpop.f32.mrf.mxu0 }
 0x407   : > { %v3857_v51 = vadd.f32 %v3690_v49, %v2145_v47  ;;  %v2149_v55 = vpop.f32.mrf.mxu1  ;;  %v2148_v59 = vadd.f32 %v2147_v36, %v1668_v52  ;;  %v5206_v2 = vsel %vm4942_vm8, %v4810_v50, %v5074_v57  ;;  %v642_v36 = vpack.c.b16 %v575_v28, %v575_v28 }
 0x408   : > { %6363 = vmatmul.msk.bf16.gmra.mxu3 %vm1181_vm1, %v4016_v48  ;;  %v3195_v49 = vshrl.u32 %v8315_v62, 16  ;;  %v3199_v50 = vshll.u32 %v2670_v37, 16 }
 0x409   : > { %v4675_v56 = vadd.f32 %v4508_v42, %v3857_v51  ;;  %5889 = vmatmul.msk.bf16.gmra.mxu0 %vm1181_vm1, %v1159_v53  ;;  %v1172_v46 = vshll.u32 %v642_v36, 16  ;;  %v4019_v51 = vrot.slane %v2670_v37, 1 }
 0x40a   : > { %v3201_v57 = vrot.slane %v3199_v50, 1 }
 0x40b   : > { %v4811_v58 = vadd.f32 %v8197_v7, %v4675_v56  ;;  %6291 = vmatmul.msk.bf16.gmra.mxu2 %vm1181_vm1, %v3186_v54  ;;  %v4511_v60 = vpop.f32.mrf.mxu3  ;;  %v1170_v54 = vor.u32 %v1168_v40, %v1166_v13  ;;  %v3197_v56 = vor.u32 %v3195_v49, %v3193_v15 }
 0x40d   : > { %vm4943_vm9 = vcmp.ge.f32.partialorder %v4811_v58, 0.0  ;;  %v5075_v63 = vmul.f32 0.2, %v4811_v58 }
 0x40e   : > { %v3693_v0 = vpop.f32.mrf.mxu2  ;;  %v1670_v5 = vpop.f32.mrf.mxu0 }
 0x40f   : > { %v5207_v3 = vsel %vm4943_vm9, %v4811_v58, %v5075_v63  ;;  %v3858_v4 = vadd.f32 %v3693_v0, %v2148_v59  ;;  %v2152_v19 = vpop.f32.mrf.mxu1  ;;  %v2150_v17 = vadd.f32 %v2149_v55, %v1670_v5  ;;  %v1174_v55 = vrot.slane %v1172_v46, 1 }
 0x410   : > { %v6780_v6 = vpack.c.bf16 %v5207_v3, %v5206_v2  ;;  %v4020_v59 = vsel %vm3887_vm2, %v4017_v10, %v4019_v51  ;;  %v3202_v2 = vsel %vm643_vm3, %v3197_v56, %v3201_v57 }
 0x411   : > { %v4676_v11 = vadd.f32 %v4511_v60, %v3858_v4  ;;  %v1175_v1 = vsel %vm643_vm3, %v1170_v54, %v1174_v55 }
 0x412   : > { %6894 = vst [vmem:[%s7109_s13 + $0x1b0] sm:$0xff] %v6780_v6   ;;  %5960 = vmatmul.msk.bf16.gmra.mxu1 %vm1181_vm1, %v8290_v24  ;;  %v3194_v24 = vsel %vm643_vm3, %v3189_v27, %v3193_v15 }
 0x413   : > { %v4513_v12 = vpop.f32.mrf.mxu3  ;;  %v4812_v22 = vadd.f32 %v8197_v7, %v4676_v11 }
 0x415   : > { %v5076_v32 = vmul.f32 0.2, %v4812_v22  ;;  %vm4944_vm10 = vcmp.ge.f32.partialorder %v4812_v22, 0.0 }
 0x416   : > { %v3695_v21 = vpop.f32.mrf.mxu2  ;;  %v1673_v25 = vpop.f32.mrf.mxu0 }
 0x417   : > { %v3859_v23 = vadd.f32 %v3695_v21, %v2150_v17  ;;  %v2154_v29 = vpop.f32.mrf.mxu1  ;;  %v2153_v34 = vadd.f32 %v2152_v19, %v1673_v25  ;;  %v5208_v42 = vsel %vm4944_vm10, %v4812_v22, %v5076_v32 }
 0x418   : > { %6364 = vmatmul.msk.bf16.gmra.mxu3 %vm1181_vm1, %v4018_v18 }
 0x419   : > { %v4677_v31 = vadd.f32 %v4513_v12, %v3859_v23  ;;  %5890 = vmatmul.msk.bf16.gmra.mxu0 %vm1181_vm1, %v1167_v26 }
 0x41b   : > { %v4813_v33 = vadd.f32 %v8197_v7, %v4677_v31  ;;  %6292 = vmatmul.msk.bf16.gmra.mxu2 %vm1181_vm1, %v3194_v24  ;;  %v4516_v35 = vpop.f32.mrf.mxu3 }
 0x41d   : > { %vm4945_vm11 = vcmp.ge.f32.partialorder %v4813_v33, 0.0  ;;  %v5077_v38 = vmul.f32 0.2, %v4813_v33 }
 0x41e   : > { %v3698_v39 = vpop.f32.mrf.mxu2  ;;  %v1675_v45 = vpop.f32.mrf.mxu0 }
 0x41f   : > { %v5209_v43 = vsel %vm4945_vm11, %v4813_v33, %v5077_v38  ;;  %v3860_v44 = vadd.f32 %v3698_v39, %v2153_v34  ;;  %v2157_v48 = vpop.f32.mrf.mxu1  ;;  %v2155_v58 = vadd.f32 %v2154_v29, %v1675_v45 }
 0x420   : > { %v6785_v47 = vpack.c.bf16 %v5209_v43, %v5208_v42 }
 0x421   : > { %v4678_v52 = vadd.f32 %v4516_v35, %v3860_v44 }
 0x422   : > { %6895 = vst [vmem:[%s7109_s13 + $0x1b8] sm:$0xff] %v6785_v47   ;;  %5961 = vmatmul.msk.bf16.gmra.mxu1 %vm1181_vm1, %v8312_v61 }
 0x423   : > { %v4518_v53 = vpop.f32.mrf.mxu3  ;;  %v4814_v63 = vadd.f32 %v8197_v7, %v4678_v52 }
 0x425   : > { %v5078_v4 = vmul.f32 0.2, %v4814_v63  ;;  %vm4946_vm2 = vcmp.ge.f32.partialorder %v4814_v63, 0.0 }
 0x426   : > { %v3700_v60 = vpop.f32.mrf.mxu2  ;;  %v1678_v62 = vpop.f32.mrf.mxu0 }
 0x427   : > { %v3861_v0 = vadd.f32 %v3700_v60, %v2155_v58  ;;  %v2159_v3 = vpop.f32.mrf.mxu1  ;;  %v2158_v14 = vadd.f32 %v2157_v48, %v1678_v62  ;;  %v5210_v9 = vsel %vm4946_vm2, %v4814_v63, %v5078_v4 }
 0x428   : > { %6365 = vmatmul.msk.bf16.gmra.mxu3 %vm1181_vm1, %v4020_v59 }
 0x429   : > { %v4679_v61 = vadd.f32 %v4518_v53, %v3861_v0  ;;  %5891 = vmatmul.msk.bf16.gmra.mxu0 %vm1181_vm1, %v1175_v1 }
 0x42b   : > { %v4815_v5 = vadd.f32 %v8197_v7, %v4679_v61  ;;  %6293 = vmatmul.msk.bf16.gmra.mxu2 %vm1181_vm1, %v3202_v2  ;;  %v4521_v6 = vpop.f32.mrf.mxu3 }
 0x42d   : > { %vm4947_vm12 = vcmp.ge.f32.partialorder %v4815_v5, 0.0  ;;  %v5079_v19 = vmul.f32 0.2, %v4815_v5 }
 0x42e   : > { %v3703_v8 = vpop.f32.mrf.mxu2  ;;  %v1680_v12 = vpop.f32.mrf.mxu0 }
 0x42f   : > { %v5211_v10 = vsel %vm4947_vm12, %v4815_v5, %v5079_v19  ;;  %v3862_v11 = vadd.f32 %v3703_v8, %v2158_v14  ;;  %v2162_v13 = vpop.f32.mrf.mxu1  ;;  %v2160_v16 = vadd.f32 %v2159_v3, %v1680_v12 }
 0x430   : > { %v6790_v41 = vpack.c.bf16 %v5211_v10, %v5210_v9 }
 0x431   : > { %v4680_v27 = vadd.f32 %v4521_v6, %v3862_v11 }
 0x432   : > { %6896 = vst [vmem:[%s7109_s13 + $0x1c0] sm:$0xff] %v6790_v41  }
 0x433   : > { %v4523_v15 = vpop.f32.mrf.mxu3  ;;  %v4816_v18 = vadd.f32 %v8197_v7, %v4680_v27 }
 0x435   : > { %v5080_v25 = vmul.f32 0.2, %v4816_v18  ;;  %vm4948_vm1 = vcmp.ge.f32.partialorder %v4816_v18, 0.0 }
 0x436   : > { %v3705_v17 = vpop.f32.mrf.mxu2  ;;  %v1683_v21 = vpop.f32.mrf.mxu0 }
 0x437   : > { %v3863_v20 = vadd.f32 %v3705_v17, %v2160_v16  ;;  %v2164_v22 = vpop.f32.mrf.mxu1  ;;  %v2163_v28 = vadd.f32 %v2162_v13, %v1683_v21  ;;  %v5212_v31 = vsel %vm4948_vm1, %v4816_v18, %v5080_v25 }
 0x439   : > { %v4681_v23 = vadd.f32 %v4523_v15, %v3863_v20 }
 0x43b   : > { %v4817_v26 = vadd.f32 %v8197_v7, %v4681_v23  ;;  %v4526_v24 = vpop.f32.mrf.mxu3 }
 0x43d   : > { %vm4949_vm3 = vcmp.ge.f32.partialorder %v4817_v26, 0.0  ;;  %v5081_v29 = vmul.f32 0.2, %v4817_v26 }
 0x43e   : > { %v3708_v30 = vpop.f32.mrf.mxu2  ;;  %v1685_v34 = vpop.f32.mrf.mxu0 }
 0x43f   : > { %v5213_v32 = vsel %vm4949_vm3, %v4817_v26, %v5081_v29  ;;  %v3864_v33 = vadd.f32 %v3708_v30, %v2163_v28  ;;  %v2167_v36 = vpop.f32.mrf.mxu1  ;;  %v2165_v39 = vadd.f32 %v2164_v22, %v1685_v34 }
 0x440   : > { %v6795_v35 = vpack.c.bf16 %v5213_v32, %v5212_v31 }
 0x441   : > { %v4682_v37 = vadd.f32 %v4526_v24, %v3864_v33 }
 0x442   : > { %6897 = vst [vmem:[%s7109_s13 + $0x1c8] sm:$0xff] %v6795_v35  }
 0x443   : > { %v4528_v38 = vpop.f32.mrf.mxu3  ;;  %v4818_v42 = vadd.f32 %v8197_v7, %v4682_v37 }
 0x445   : > { %v5082_v47 = vmul.f32 0.2, %v4818_v42  ;;  %vm4950_vm13 = vcmp.ge.f32.partialorder %v4818_v42, 0.0 }
 0x446   : > { %v3710_v40 = vpop.f32.mrf.mxu2  ;;  %v1688_v44 = vpop.f32.mrf.mxu0 }
 0x447   : > { %v3865_v43 = vadd.f32 %v3710_v40, %v2165_v39  ;;  %v2169_v45 = vpop.f32.mrf.mxu1  ;;  %v2168_v49 = vadd.f32 %v2167_v36, %v1688_v44  ;;  %v5214_v53 = vsel %vm4950_vm13, %v4818_v42, %v5082_v47 }
 0x449   : > { %v4683_v46 = vadd.f32 %v4528_v38, %v3865_v43 }
 0x44b   : > { %v4819_v48 = vadd.f32 %v8197_v7, %v4683_v46  ;;  %v4531_v50 = vpop.f32.mrf.mxu3 }
 0x44d   : > { %vm4951_vm14 = vcmp.ge.f32.partialorder %v4819_v48, 0.0  ;;  %v5083_v51 = vmul.f32 0.2, %v4819_v48 }
 0x44e   : > { %v3713_v52 = vpop.f32.mrf.mxu2  ;;  %v1690_v56 = vpop.f32.mrf.mxu0 }
 0x44f   : > { %v5215_v54 = vsel %vm4951_vm14, %v4819_v48, %v5083_v51  ;;  %v3866_v55 = vadd.f32 %v3713_v52, %v2168_v49  ;;  %v2172_v58 = vpop.f32.mrf.mxu1  ;;  %v2170_v63 = vadd.f32 %v2169_v45, %v1690_v56 }
 0x450   : > { %v6800_v57 = vpack.c.bf16 %v5215_v54, %v5214_v53 }
 0x451   : > { %v4684_v59 = vadd.f32 %v4531_v50, %v3866_v55 }
 0x452   : > { %6898 = vst [vmem:[%s7109_s13 + $0x1d0] sm:$0xff] %v6800_v57  }
 0x453   : > { %v4533_v60 = vpop.f32.mrf.mxu3  ;;  %v4820_v62 = vadd.f32 %v8197_v7, %v4684_v59 }
 0x455   : > { %v5084_v4 = vmul.f32 0.2, %v4820_v62  ;;  %vm4952_vm15 = vcmp.ge.f32.partialorder %v4820_v62, 0.0 }
 0x456   : > { %v3715_v0 = vpop.f32.mrf.mxu2  ;;  %v1693_v2 = vpop.f32.mrf.mxu0 }
 0x457   : > { %v3867_v1 = vadd.f32 %v3715_v0, %v2170_v63  ;;  %v2174_v3 = vpop.f32.mrf.mxu1  ;;  %v2173_v14 = vadd.f32 %v2172_v58, %v1693_v2  ;;  %v5216_v9 = vsel %vm4952_vm15, %v4820_v62, %v5084_v4 }
 0x459   : > { %v4685_v61 = vadd.f32 %v4533_v60, %v3867_v1 }
 0x45b   : > { %v4821_v5 = vadd.f32 %v8197_v7, %v4685_v61  ;;  %v4536_v6 = vpop.f32.mrf.mxu3 }
 0x45d   : > { %vm4953_vm0 = vcmp.ge.f32.partialorder %v4821_v5, 0.0  ;;  %v5085_v19 = vmul.f32 0.2, %v4821_v5 }
 0x45e   : > { %v3718_v8 = vpop.f32.mrf.mxu2  ;;  %v1695_v12 = vpop.f32.mrf.mxu0 }
 0x45f   : > { %v5217_v10 = vsel %vm4953_vm0, %v4821_v5, %v5085_v19  ;;  %v3868_v11 = vadd.f32 %v3718_v8, %v2173_v14  ;;  %v2177_v13 = vpop.f32.mrf.mxu1  ;;  %v2175_v16 = vadd.f32 %v2174_v3, %v1695_v12 }
 0x460   : > { %v6805_v41 = vpack.c.bf16 %v5217_v10, %v5216_v9 }
 0x461   : > { %v4686_v27 = vadd.f32 %v4536_v6, %v3868_v11 }
 0x462   : > { %6899 = vst [vmem:[%s7109_s13 + $0x1d8] sm:$0xff] %v6805_v41  }
 0x463   : > { %v4538_v15 = vpop.f32.mrf.mxu3  ;;  %v4822_v18 = vadd.f32 %v8197_v7, %v4686_v27 }
 0x465   : > { %v5086_v25 = vmul.f32 0.2, %v4822_v18  ;;  %vm4954_vm4 = vcmp.ge.f32.partialorder %v4822_v18, 0.0 }
 0x466   : > { %v3720_v17 = vpop.f32.mrf.mxu2  ;;  %v1698_v21 = vpop.f32.mrf.mxu0 }
 0x467   : > { %v3869_v20 = vadd.f32 %v3720_v17, %v2175_v16  ;;  %v2179_v22 = vpop.f32.mrf.mxu1  ;;  %v2178_v28 = vadd.f32 %v2177_v13, %v1698_v21  ;;  %v5218_v31 = vsel %vm4954_vm4, %v4822_v18, %v5086_v25 }
 0x469   : > { %v4687_v23 = vadd.f32 %v4538_v15, %v3869_v20 }
 0x46b   : > { %v4823_v26 = vadd.f32 %v8197_v7, %v4687_v23  ;;  %v4541_v24 = vpop.f32.mrf.mxu3 }
 0x46d   : > { %vm4955_vm5 = vcmp.ge.f32.partialorder %v4823_v26, 0.0  ;;  %v5087_v29 = vmul.f32 0.2, %v4823_v26 }
 0x46e   : > { %v3723_v30 = vpop.f32.mrf.mxu2  ;;  %v1700_v34 = vpop.f32.mrf.mxu0 }
 0x46f   : > { %v5219_v32 = vsel %vm4955_vm5, %v4823_v26, %v5087_v29  ;;  %v3870_v33 = vadd.f32 %v3723_v30, %v2178_v28  ;;  %v2182_v36 = vpop.f32.mrf.mxu1  ;;  %v2180_v39 = vadd.f32 %v2179_v22, %v1700_v34 }
 0x470   : > { %v6810_v35 = vpack.c.bf16 %v5219_v32, %v5218_v31 }
 0x471   : > { %v4688_v37 = vadd.f32 %v4541_v24, %v3870_v33 }
 0x472   : > { %6900 = vst [vmem:[%s7109_s13 + $0x1e0] sm:$0xff] %v6810_v35  }
 0x473   : > { %v4543_v38 = vpop.f32.mrf.mxu3  ;;  %v4824_v42 = vadd.f32 %v8197_v7, %v4688_v37 }
 0x475   : > { %v5088_v47 = vmul.f32 0.2, %v4824_v42  ;;  %vm4956_vm6 = vcmp.ge.f32.partialorder %v4824_v42, 0.0 }
 0x476   : > { %v3725_v40 = vpop.f32.mrf.mxu2  ;;  %v1703_v44 = vpop.f32.mrf.mxu0 }
 0x477   : > { %v3871_v43 = vadd.f32 %v3725_v40, %v2180_v39  ;;  %v2184_v45 = vpop.f32.mrf.mxu1  ;;  %v2183_v49 = vadd.f32 %v2182_v36, %v1703_v44  ;;  %v5220_v53 = vsel %vm4956_vm6, %v4824_v42, %v5088_v47 }
 0x479   : > { %v4689_v46 = vadd.f32 %v4543_v38, %v3871_v43 }
 0x47b   : > { %v4825_v48 = vadd.f32 %v8197_v7, %v4689_v46  ;;  %v4546_v50 = vpop.f32.mrf.mxu3 }
 0x47d   : > { %vm4957_vm7 = vcmp.ge.f32.partialorder %v4825_v48, 0.0  ;;  %v5089_v51 = vmul.f32 0.2, %v4825_v48 }
 0x47e   : > { %v3728_v52 = vpop.f32.mrf.mxu2  ;;  %v1705_v56 = vpop.f32.mrf.mxu0 }
 0x47f   : > { %v5221_v54 = vsel %vm4957_vm7, %v4825_v48, %v5089_v51  ;;  %v3872_v55 = vadd.f32 %v3728_v52, %v2183_v49  ;;  %v2187_v58 = vpop.f32.mrf.mxu1  ;;  %v2185_v63 = vadd.f32 %v2184_v45, %v1705_v56 }
 0x480   : > { %v6815_v57 = vpack.c.bf16 %v5221_v54, %v5220_v53 }
 0x481   : > { %v4690_v59 = vadd.f32 %v4546_v50, %v3872_v55 }
 0x482   : > { %6901 = vst [vmem:[%s7109_s13 + $0x1e8] sm:$0xff] %v6815_v57  }
 0x483   : > { %v4548_v60 = vpop.f32.mrf.mxu3  ;;  %v4826_v62 = vadd.f32 %v8197_v7, %v4690_v59 }
 0x485   : > { %v5090_v61 = vmul.f32 0.2, %v4826_v62  ;;  %vm4958_vm8 = vcmp.ge.f32.partialorder %v4826_v62, 0.0 }
 0x486   : > { %v3730_v0 = vpop.f32.mrf.mxu2  ;;  %v1708_v2 = vpop.f32.mrf.mxu0 }
 0x487   : > { %v3873_v1 = vadd.f32 %v3730_v0, %v2185_v63  ;;  %v2188_v5 = vadd.f32 %v2187_v58, %v1708_v2  ;;  %v2189_v6 = vpop.f32.mrf.mxu1  ;;  %v5222_v9 = vsel %vm4958_vm8, %v4826_v62, %v5090_v61 }
 0x489   : > { %v4691_v3 = vadd.f32 %v4548_v60, %v3873_v1 }
 0x48b   : > { %v4827_v4 = vadd.f32 %v8197_v7, %v4691_v3  ;;  %v4551_v14 = vpop.f32.mrf.mxu3  ;;  %v6921_v3 = vld [vmem:[%s8383_s2] ss:$0 sm:$0xff] }
 0x48d   : > { %vm4959_vm9 = vcmp.ge.f32.partialorder %v4827_v4, 0.0  ;;  %v5091_v19 = vmul.f32 0.2, %v4827_v4 }
 0x48e   : > { %v3733_v8 = vpop.f32.mrf.mxu2  ;;  %v1710_v12 = vpop.f32.mrf.mxu0 }
 0x48f   : > { %v5223_v10 = vsel %vm4959_vm9, %v4827_v4, %v5091_v19  ;;  %v3874_v11 = vadd.f32 %v3733_v8, %v2188_v5  ;;  %v2190_v15 = vadd.f32 %v2189_v6, %v1710_v12  ;;  %v2192_v16 = vpop.f32.mrf.mxu1 }
 0x490   : > { %v6820_v41 = vpack.c.bf16 %v5223_v10, %v5222_v9 }
 0x491   : > { %v4692_v13 = vadd.f32 %v4551_v14, %v3874_v11 }
 0x492   : > { %6902 = vst [vmem:[%s7109_s13 + $0x1f0] sm:$0xff] %v6820_v41  }
 0x493   : > { %v4553_v27 = vpop.f32.mrf.mxu3  ;;  %v4828_v18 = vadd.f32 %v8197_v7, %v4692_v13 }
 0x495   : > { %v5092_v23 = vmul.f32 0.2, %v4828_v18  ;;  %vm4960_vm10 = vcmp.ge.f32.partialorder %v4828_v18, 0.0 }
 0x496   : > { %v3735_v17 = vpop.f32.mrf.mxu2  ;;  %v1713_v21 = vpop.f32.mrf.mxu0 }
 0x497   : > { %v3875_v20 = vadd.f32 %v3735_v17, %v2190_v15  ;;  %v2193_v26 = vadd.f32 %v2192_v16, %v1713_v21  ;;  %v5224_v30 = vsel %vm4960_vm10, %v4828_v18, %v5092_v23  ;;  %v2194_v35 = vpop.f32.mrf.mxu1 }
 0x499   : > { %v4693_v22 = vadd.f32 %v4553_v27, %v3875_v20 }
 0x49b   : > { %v4829_v25 = vadd.f32 %v8197_v7, %v4693_v22  ;;  %v4556_v28 = vpop.f32.mrf.mxu3 }
 0x49d   : > { %vm4961_vm11 = vcmp.ge.f32.partialorder %v4829_v25, 0.0  ;;  %v5093_v24 = vmul.f32 0.2, %v4829_v25 }
 0x49e   : > { %v3738_v29 = vpop.f32.mrf.mxu2  ;;  %v1715_v33 = vpop.f32.mrf.mxu0 }
 0x49f   : > { %v5225_v31 = vsel %vm4961_vm11, %v4829_v25, %v5093_v24  ;;  %v3876_v32 = vadd.f32 %v3738_v29, %v2193_v26  ;;  %v2195_v38 = vadd.f32 %v2194_v35, %v1715_v33  ;;  %v2197_v45 = vpop.f32.mrf.mxu1 }
 0x4a0   : > { %v6825_v34 = vpack.c.bf16 %v5225_v31, %v5224_v30 }
 0x4a1   : > { %v4694_v36 = vadd.f32 %v4556_v28, %v3876_v32 }
 0x4a2   : > { %6903 = vst [vmem:[%s7109_s13 + $0x1f8] sm:$0xff] %v6825_v34  }
 0x4a3   : > { %v4558_v37 = vpop.f32.mrf.mxu3  ;;  %v4830_v40 = vadd.f32 %v8197_v7, %v4694_v36 }
 0x4a5   : > { %v5094_v46 = vmul.f32 0.2, %v4830_v40  ;;  %vm4962_vm2 = vcmp.ge.f32.partialorder %v4830_v40, 0.0 }
 0x4a6   : > { %v3740_v39 = vpop.f32.mrf.mxu2  ;;  %v1718_v43 = vpop.f32.mrf.mxu0 }
 0x4a7   : > { %v3877_v42 = vadd.f32 %v3740_v39, %v2195_v38  ;;  %v2198_v48 = vadd.f32 %v2197_v45, %v1718_v43  ;;  %v5226_v52 = vsel %vm4962_vm2, %v4830_v40, %v5094_v46  ;;  %v2199_v58 = vpop.f32.mrf.mxu1 }
 0x4a9   : > { %v4695_v44 = vadd.f32 %v4558_v37, %v3877_v42 }
 0x4ab   : > { %v4831_v47 = vadd.f32 %v8197_v7, %v4695_v44  ;;  %v4561_v50 = vpop.f32.mrf.mxu3 }
 0x4ad   : > { %vm4963_vm12 = vcmp.ge.f32.partialorder %v4831_v47, 0.0  ;;  %v5095_v49 = vmul.f32 0.2, %v4831_v47 }
 0x4ae   : > { %v3743_v51 = vpop.f32.mrf.mxu2  ;;  %v1720_v56 = vpop.f32.mrf.mxu0 }
 0x4af   : > { %v5227_v53 = vsel %vm4963_vm12, %v4831_v47, %v5095_v49  ;;  %v3878_v54 = vadd.f32 %v3743_v51, %v2198_v48  ;;  %v2200_v59 = vadd.f32 %v2199_v58, %v1720_v56 }
 0x4b0   : > { %v6830_v55 = vpack.c.bf16 %v5227_v53, %v5226_v52 }
 0x4b1   : > { %v4696_v57 = vadd.f32 %v4561_v50, %v3878_v54 }
 0x4b2   : > { %6904 = vst [vmem:[%s7109_s13 + $0x200] sm:$0xff] %v6830_v55  }
 0x4b3   : > { %v4832_v63 = vadd.f32 %v8197_v7, %v4696_v57  ;;  %v4563_v62 = vpop.f32.mrf.mxu3 }
 0x4b5   : > { %v5096_v2 = vmul.f32 0.2, %v4832_v63  ;;  %vm4964_vm1 = vcmp.ge.f32.partialorder %v4832_v63, 0.0 }
 0x4b6   : > { %v3745_v60 = vpop.f32.mrf.mxu2 }
 0x4b7   : > { %v3879_v0 = vadd.f32 %v3745_v60, %v2200_v59  ;;  %v5228_v5 = vsel %vm4964_vm1, %v4832_v63, %v5096_v2 }
 0x4b9   : > { %v4697_v1 = vadd.f32 %v4563_v62, %v3879_v0 }
 0x4bb   : > { %v4833_v61 = vadd.f32 %v6921_v3, %v4697_v1 }
 0x4bd   : > { %vm4965_vm3 = vcmp.ge.f32.partialorder %v4833_v61, 0.0  ;;  %v5097_v4 = vmul.f32 0.2, %v4833_v61 }
 0x4bf   : > { %v5229_v14 = vsel %vm4965_vm3, %v4833_v61, %v5097_v4 }
 0x4c0   : > { %v6835_v6 = vpack.c.bf16 %v5229_v14, %v5228_v5 }
 0x4c2   : > { %6905 = vst [vmem:[%s7109_s13 + $0x208] sm:$0xff] %v6835_v6  }
 0x4c3 PF: > { %s13_s12 = sadd.s32 1, %s6928_s12  }
 0x4c4   : > { %p10_p4 = scmp.ge.s32.totalorder %s13_s12, 4  }
 0x4c6   :  { %12 = sbr.rel (!%p10_p4) target bundleno = 1 (0x1), region = 65 }

// kernel: critic_forward.5
= control target key start
LH: loop header
LB: loop body
LE: loop exit
PB: predicated region body
PF: predicated region fallthrough
CT: control target
= control target key end

     0   :  { %s2595_s18 = smov 0   ;;  %s3523_s0 = inlined_call_operand.vmem [shape: bf16[2,296,16], index: 0, kind: input, shape index: {}]   ;;  %s3524_s1 = inlined_call_operand.vmem [shape: bf16[4,16,128], index: 1, kind: input, shape index: {}]   ;;  %s3525_s2 = inlined_call_operand.vmem [shape: f32[1,128], index: 2, kind: input, shape index: {}]   ;;  %s3526_s3 = inlined_call_operand.vmem [shape: f32[1,128], index: 3, kind: input, shape index: {}]   ;;  %s3527_s4 = inlined_call_operand.vmem [shape: f32[272,1], index: 4, kind: input, shape index: {}]   ;;  %s3528_s5 = inlined_call_operand.vmem [shape: bf16[2,272,128], index: 5, kind: output, shape index: {}]  }
   0x1 LB: > { %s2163_s19 = sadd.s32 4294967295, %s2562_s18   ;;  %p2167_p0 = scmp.ge.s32.totalorder %s2562_s18, 1  ;;  %s2562_s18 = sphi %s2595_s18, %s15_s18  }
   0x2   : > { %p187_p1 = scmp.lt.s32.totalorder %s2562_s18, 3 }
   0x4   : > { %p188_p2 = pnand %p2167_p0, %p187_p1 }
   0x6   : > { %191 = sbr.rel (%p188_p2) target bundleno = 525 (0x20d), region = 40 }
   0xb   : > { %v2411_v0 = vld [vmem:[%s3524_s1] sm:$0xff]  ;;  %v2430_v1 = vld [vmem:[%s3524_s1 + $0x18] sm:$0xff]  ;;  %p215_p3 = scmp.lt.s32.totalorder %s2163_s19, 1  ;;  %v2429_v2 = vld [vmem:[%s3524_s1 + $0x10] sm:$0xff]  ;;  %v2564_v5 = vmov 0   ;;  %vm501_vm0 = vcmask 130048  }
   0xc   : > { %v2412_v3 = vld [vmem:[%s3524_s1 + $0x8] sm:$0xff]  ;;  %694 = vmatpush.bf16.msra.mxu1 %v2411_v0  ;;  %1339 = vmatpush.bf16.msra.mxu3 %v2430_v1  ;;  %v1460_v4 = vld [vmem:[%s3527_s4] sm:$0xff]  ;;  %vm1239_vm1 = vcmask 1046528   ;;  %vm354_vm2 = vsmask.f32 7424  ;;  %v1462_v32 = vld [vmem:[%s3527_s4 + $0x10] sm:$0xff] }
   0xd   : > { %s3582_s19 = smov (!%p215_p3, %s2163_s19), 1  ;;  %1111 = vmatpush.bf16.msra.mxu2 %v2429_v2  ;;  %560 = vmatpush.bf16.msra.mxu0 %v2412_v3  ;;  %v1461_v20 = vld [vmem:[%s3527_s4 + $0x8] sm:$0xff]  ;;  %v1463_v41 = vld [vmem:[%s3527_s4 + $0x18] sm:$0xff]  ;;  %v1466_v62 = vld [vmem:[%s3527_s4 + $0x30] sm:$0xff] }
   0xe   : > { %s2540_s30 = smul.u32 148, %s3582_s19  ;;  %2551 = vset.pattern.permute.xlu0 %v2564_v5  ;;  %2552 = vset.pattern.permute.xlu1 %v2564_v5 }
   0xf   : > { %1496 = vperm.xlu0 %2551, %v1460_v4   ;;  %2553 = vset.pattern.permute.xlu2 %v2564_v5  ;;  %s2541_s12 = smul.u32 136, %s3582_s19 }
  0x10   : > { %s2624_s8 = scalar_lea.vmem %s3523_s0, %s2540_s30  ;;  %1506 = vperm.xlu1 %2552, %v1462_v32  }
  0x11   : > { %v2394_v6 = vld [vmem:[%s2624_s8] sm:$0xff]  ;;  %v2521_v7 = vld [vmem:[%s2624_s8 + $0x8] sm:$0xf0]  ;;  %v2413_v8 = vld [vmem:[%s2624_s8 + $0x10] sm:$0xff]  ;;  %s3419_s15 = scalar_lea.vmem %s3528_s5, %s2541_s12 }
  0x12   : > { %v2522_v9 = vld [vmem:[%s2624_s8 + $0x8] sm:$0xe]  ;;  %v358_v12 = vshll.u32 %v2394_v6, 16  ;;  %2265 = vmatmul.msk.bf16.vlgmr.msra.gmra.mxu1 %vm501_vm0, %v2394_v6  ;;  %v1241_v14 = vrot.slane %v2413_v8, 1  ;;  %v915_v17 = vshll.u32 %v2413_v8, 16  ;;  %v356_v18 = vshrl.u32 %v2394_v6, 16 }
  0x13   : > { %v2520_v10 = vld [vmem:[%s2624_s8 + $0x8] sm:$0xff]   ;;  %v2523_v13 = vor.u32 %v2522_v9, %v2521_v7  ;;  %v2396_v31 = vld [vmem:[%s2624_s8 + $0x10] sm:$0xff]  ;;  %v2414_v33 = vld [vmem:[%s2624_s8 + $0x18] sm:$0xff]  ;;  %v919_v36 = vshrl.u32 %v2413_v8, 16 }
  0x14   : > { %v2395_v11 = vld [vmem:[%s2624_s8 + $0x8] sm:$0xff]  ;;  %v908_v15 = vshrl.u32 %v2520_v10, 16  ;;  %v910_v16 = vshll.u32 %v2520_v10, 16  ;;  %v360_v22 = vrot.slane %v358_v12, 1  ;;  %v917_v24 = vrot.slane %v915_v17, 1  ;;  %v2397_v47 = vld [vmem:[%s2624_s8 + $0x18] sm:$0xff] }
  0x15   : > { %v363_v19 = vshll.u32 %v2395_v11, 16  ;;  %v1240_v21 = vrot.slane %v2523_v13, 1  ;;  %v367_v34 = vshrl.u32 %v2395_v11, 16  ;;  %v371_v35 = vshll.u32 %v2396_v31, 16  ;;  %v2415_v48 = vld [vmem:[%s2624_s8 + $0x20] sm:$0xff]  ;;  %v2416_v63 = vld [vmem:[%s2624_s8 + $0x28] sm:$0xff] }
  0x16   : > { %v912_v23 = vrot.slane %v910_v16, 1  ;;  %v361_v27 = vor.u32 %v360_v22, %v356_v18  ;;  %v923_v37 = vshll.u32 %v2414_v33, 16  ;;  %v1243_v38 = vrot.slane %v2414_v33, 1  ;;  %v2398_v61 = vld [vmem:[%s2624_s8 + $0x20] sm:$0xff]  ;;  %v1467_v8 = vld [vmem:[%s3527_s4 + $0x38] sm:$0xff]  ;;  %v2417_v16 = vld [vmem:[%s2624_s8 + $0x30] sm:$0xff] }
  0x17   : > { %v365_v25 = vrot.slane %v363_v19, 1  ;;  %v1242_v26 = vsel %vm1239_vm1, %v1240_v21, %v1241_v14  ;;  %1501 = vperm.xlu0 %2551, %v1461_v20   ;;  %v373_v40 = vrot.slane %v371_v35, 1  ;;  %v921_v42 = vor.u32 %v919_v36, %v917_v24  ;;  %v1464_v7 = vld [vmem:[%s3527_s4 + $0x20] sm:$0xff]  ;;  %v2418_v32 = vld [vmem:[%s2624_s8 + $0x38] sm:$0xff] }
  0x18   : > { %2375 = vmatmul.msk.bf16.vlgmr.msra.gmra.mxu3 %vm501_vm0, %v1242_v26  ;;  %v913_v28 = vor.u32 %v912_v23, %v908_v15  ;;  %v925_v43 = vrot.slane %v923_v37, 1  ;;  %1511 = vperm.xlu1 %2552, %v1463_v41   ;;  %v1244_v44 = vsel %vm1239_vm1, %v1241_v14, %v1243_v38  ;;  %v375_v49 = vshrl.u32 %v2396_v31, 16  ;;  %v2399_v14 = vld [vmem:[%s2624_s8 + $0x28] sm:$0xff] }
  0x19   : > { %v366_v29 = vsel %vm354_vm2, %v361_v27, %v365_v25  ;;  %v369_v39 = vor.u32 %v367_v34, %v365_v25  ;;  %v379_v50 = vshll.u32 %v2397_v47, 16  ;;  %v927_v51 = vshrl.u32 %v2414_v33, 16  ;;  %1516 = vperm.xlu2 %2553, %v1464_v7   ;;  %v1465_v15 = vld [vmem:[%s3527_s4 + $0x28] sm:$0xff] }
  0x1a   : > { %v918_v30 = vsel %vm354_vm2, %v913_v28, %v917_v24  ;;  %2244 = vmatmul.msk.bf16.vlgmr.msra.gmra.mxu0 %vm501_vm0, %v366_v29  ;;  %v926_v46 = vsel %vm354_vm2, %v921_v42, %v925_v43  ;;  %v931_v52 = vshll.u32 %v2415_v48, 16  ;;  %v1245_v53 = vrot.slane %v2415_v48, 1  ;;  %v1469_v24 = vld [vmem:[%s3527_s4 + $0x48] sm:$0xff] }
  0x1b   : > { %2352 = vmatmul.msk.bf16.vlgmr.msra.gmra.mxu2 %vm501_vm0, %v918_v30  ;;  %v374_v45 = vsel %vm354_vm2, %v369_v39, %v373_v40  ;;  %v377_v54 = vor.u32 %v375_v49, %v373_v40  ;;  %v381_v55 = vrot.slane %v379_v50, 1  ;;  %v929_v56 = vor.u32 %v927_v51, %v925_v43  ;;  %v2400_v30 = vld [vmem:[%s2624_s8 + $0x30] sm:$0xff]  ;;  %v1468_v40 = vld [vmem:[%s3527_s4 + $0x40] sm:$0xff] }
  0x1c   : > { %v933_v57 = vrot.slane %v931_v52, 1  ;;  %v1246_v58 = vsel %vm1239_vm1, %v1243_v38, %v1245_v53  ;;  %v383_v0 = vshrl.u32 %v2397_v47, 16  ;;  %v387_v1 = vshll.u32 %v2398_v61, 16 }
  0x1d   : > { %v382_v59 = vsel %vm354_vm2, %v377_v54, %v381_v55  ;;  %v935_v2 = vshrl.u32 %v2415_v48, 16  ;;  %v939_v3 = vshll.u32 %v2416_v63, 16  ;;  %v1247_v4 = vrot.slane %v2416_v63, 1  ;;  %v2419_v48 = vld [vmem:[%s2624_s8 + $0x40] sm:$0xff] }
  0x1e   : > { %v934_v60 = vsel %vm354_vm2, %v929_v56, %v933_v57  ;;  %v385_v5 = vor.u32 %v383_v0, %v381_v55  ;;  %v389_v6 = vrot.slane %v387_v1, 1  ;;  %v391_v17 = vshrl.u32 %v2398_v61, 16  ;;  %v1473_v56 = vld [vmem:[%s3527_s4 + $0x68] sm:$0xff] }
  0x1f   : > { %1526 = vperm.xlu0 %2551, %v1466_v62   ;;  %v937_v9 = vor.u32 %v935_v2, %v933_v57  ;;  %v941_v10 = vrot.slane %v939_v3, 1  ;;  %v395_v18 = vshll.u32 %v2399_v14, 16  ;;  %v943_v19 = vshrl.u32 %v2416_v63, 16  ;;  %v2402_v62 = vld [vmem:[%s2624_s8 + $0x40] sm:$0xff]  ;;  %v2420_v63 = vld [vmem:[%s2624_s8 + $0x48] sm:$0xff]  ;;  %v1471_v2 = vld [vmem:[%s3527_s4 + $0x58] sm:$0xff] }
  0x20   : > { %1531 = vperm.xlu1 %2552, %v1467_v8   ;;  %v390_v12 = vsel %vm354_vm2, %v385_v5, %v389_v6  ;;  %v947_v20 = vshll.u32 %v2417_v16, 16  ;;  %v1249_v21 = vrot.slane %v2417_v16, 1  ;;  %v393_v22 = vor.u32 %v391_v17, %v389_v6 }
  0x21   : > { %v942_v13 = vsel %vm354_vm2, %v937_v9, %v941_v10  ;;  %1521 = vperm.xlu2 %2553, %v1465_v15   ;;  %v397_v23 = vrot.slane %v395_v18, 1  ;;  %v945_v25 = vor.u32 %v943_v19, %v941_v10  ;;  %v399_v33 = vshrl.u32 %v2399_v14, 16  ;;  %v2421_v15 = vld [vmem:[%s2624_s8 + $0x50] sm:$0xff]  ;;  %v1476_v18 = vld [vmem:[%s3527_s4 + $0x80] sm:$0xff] }
  0x22   : > { %2266 = vmatmul.msk.bf16.gmra.mxu1 %vm501_vm0, %v2395_v11  ;;  %v1248_v11 = vsel %vm1239_vm1, %v1245_v53, %v1247_v4  ;;  %v949_v26 = vrot.slane %v947_v20, 1  ;;  %v1250_v27 = vsel %vm1239_vm1, %v1247_v4, %v1249_v21  ;;  %v403_v34 = vshll.u32 %v2400_v30, 16 }
  0x23   : > { %v398_v28 = vsel %vm354_vm2, %v393_v22, %v397_v23  ;;  %v951_v35 = vshrl.u32 %v2417_v16, 16  ;;  %v955_v36 = vshll.u32 %v2418_v32, 16  ;;  %v1251_v37 = vrot.slane %v2418_v32, 1 }
  0x24   : > { %v950_v29 = vsel %vm354_vm2, %v945_v25, %v949_v26  ;;  %v401_v38 = vor.u32 %v399_v33, %v397_v23  ;;  %v405_v39 = vrot.slane %v403_v34, 1  ;;  %v407_v49 = vshrl.u32 %v2400_v30, 16 }
  0x25   : > { %v953_v41 = vor.u32 %v951_v35, %v949_v26  ;;  %v957_v42 = vrot.slane %v955_v36, 1  ;;  %v1252_v43 = vsel %vm1239_vm1, %v1249_v21, %v1251_v37  ;;  %v959_v51 = vshrl.u32 %v2418_v32, 16  ;;  %v2404_v36 = vld [vmem:[%s2624_s8 + $0x50] sm:$0xff] }
  0x26   : > { %v963_v52 = vshll.u32 %v2419_v48, 16  ;;  %v1253_v53 = vrot.slane %v2419_v48, 1  ;;  %v409_v54 = vor.u32 %v407_v49, %v405_v39  ;;  %v419_v1 = vshll.u32 %v2402_v62, 16 }
  0x27   : > { %1541 = vperm.xlu0 %2551, %v1469_v24   ;;  %v961_v57 = vor.u32 %v959_v51, %v957_v42  ;;  %v967_v3 = vshrl.u32 %v2419_v48, 16  ;;  %v971_v4 = vshll.u32 %v2420_v63, 16  ;;  %v1255_v5 = vrot.slane %v2420_v63, 1 }
  0x28   : > { %2376 = vmatmul.msk.bf16.gmra.mxu3 %vm501_vm0, %v1244_v44  ;;  %v406_v44 = vsel %vm354_vm2, %v401_v38, %v405_v39  ;;  %v421_v7 = vrot.slane %v419_v1, 1  ;;  %v423_v16 = vshrl.u32 %v2402_v62, 16  ;;  %v975_v20 = vshrl.u32 %v2420_v63, 16 }
  0x29   : > { %1536 = vperm.xlu2 %2553, %v1468_v40   ;;  %v973_v9 = vrot.slane %v971_v4, 1  ;;  %v1256_v10 = vsel %vm1239_vm1, %v1253_v53, %v1255_v5  ;;  %v979_v21 = vshll.u32 %v2421_v15, 16  ;;  %v1257_v22 = vrot.slane %v2421_v15, 1  ;;  %v1482_v4 = vld [vmem:[%s3527_s4 + $0xb0] sm:$0xff] }
  0x2a   : > { %2245 = vmatmul.msk.bf16.gmra.mxu0 %vm501_vm0, %v374_v45  ;;  %v958_v45 = vsel %vm354_vm2, %v953_v41, %v957_v42  ;;  %v425_v23 = vor.u32 %v423_v16, %v421_v7  ;;  %v435_v42 = vshll.u32 %v2404_v36, 16 }
  0x2b   : > { %2353 = vmatmul.msk.bf16.gmra.mxu2 %vm501_vm0, %v926_v46  ;;  %v2401_v46 = vld [vmem:[%s2624_s8 + $0x38] sm:$0xff]  ;;  %v977_v25 = vor.u32 %v975_v20, %v973_v9  ;;  %v981_v26 = vrot.slane %v979_v21, 1 }
  0x2c   : > { %v411_v50 = vshll.u32 %v2401_v46, 16  ;;  %v415_v0 = vshrl.u32 %v2401_v46, 16 }
  0x2d   : > { %v982_v33 = vsel %vm354_vm2, %v977_v25, %v981_v26 }
  0x2e   : > { %v413_v55 = vrot.slane %v411_v50, 1 }
  0x30   : > { %v417_v6 = vor.u32 %v415_v0, %v413_v55 }
  0x31   : > { %1551 = vperm.xlu2 %2553, %v1471_v2  }
  0x32   : > { %2267 = vmatmul.msk.bf16.gmra.mxu1 %vm501_vm0, %v2396_v31  ;;  %v1470_v31 = vld [vmem:[%s3527_s4 + $0x50] sm:$0xff] }
  0x33   : > { %1546 = vperm.xlu1 %2552, %v1470_v31   ;;  %v1478_v31 = vld [vmem:[%s3527_s4 + $0x90] sm:$0xff] }
  0x38   : > { %2377 = vmatmul.msk.bf16.gmra.mxu3 %vm501_vm0, %v1246_v58  ;;  %v965_v58 = vrot.slane %v963_v52, 1  ;;  %v437_v52 = vrot.slane %v435_v42, 1 }
  0x3a   : > { %2246 = vmatmul.msk.bf16.gmra.mxu0 %vm501_vm0, %v382_v59  ;;  %v1254_v59 = vsel %vm1239_vm1, %v1251_v37, %v1253_v53  ;;  %v969_v8 = vor.u32 %v967_v3, %v965_v58  ;;  %v2764_v37 = vld [vmem:[%s2624_s8 + $0x58] sm:$0xff] }
  0x3b   : > { %2354 = vmatmul.msk.bf16.gmra.mxu2 %vm501_vm0, %v934_v60  ;;  %1561 = vperm.xlu1 %2552, %v1473_v56   ;;  %v414_v60 = vsel %vm354_vm2, %v409_v54, %v413_v55  ;;  %v1259_v49 = vrot.slane %v2764_v37, 1  ;;  %v1479_v53 = vld [vmem:[%s3527_s4 + $0x98] sm:$0xff] }
  0x3c   : > { %v2789_v3 = vld [vmem:[%s2624_s8 + $0x58] sm:$0xff] }
  0x3d   : > { %v1260_v56 = vsel %vm1239_vm1, %v1257_v22, %v1259_v49 }
  0x42   : > { %2268 = vmatmul.msk.bf16.gmra.mxu1 %vm501_vm0, %v2397_v47  ;;  %v1472_v47 = vld [vmem:[%s3527_s4 + $0x60] sm:$0xff] }
  0x43   : > { %1556 = vperm.xlu0 %2551, %v1472_v47   ;;  %1576 = vperm.xlu1 %2552, %v1476_v18   ;;  %v987_v47 = vshll.u32 %v2764_v37, 16 }
  0x45   : > { %v989_v55 = vrot.slane %v987_v47, 1 }
  0x48   : > { %2378 = vmatmul.msk.bf16.gmra.mxu3 %vm501_vm0, %v1248_v11  ;;  %v422_v11 = vsel %vm354_vm2, %v417_v6, %v421_v7 }
  0x4a   : > { %2247 = vmatmul.msk.bf16.gmra.mxu0 %vm501_vm0, %v390_v12  ;;  %v1475_v12 = vld [vmem:[%s3527_s4 + $0x78] sm:$0xff] }
  0x4b   : > { %2355 = vmatmul.msk.bf16.gmra.mxu2 %vm501_vm0, %v942_v13  ;;  %v974_v13 = vsel %vm354_vm2, %v969_v8, %v973_v9  ;;  %1571 = vperm.xlu0 %2551, %v1475_v12   ;;  %v439_v9 = vshrl.u32 %v2404_v36, 16  ;;  %v1487_v12 = vld [vmem:[%s3527_s4 + $0xd8] sm:$0xff] }
  0x4c   : > { %1591 = vperm.xlu1 %2552, %v1479_v53  }
  0x4d   : > { %v441_v20 = vor.u32 %v439_v9, %v437_v52  ;;  %v1486_v9 = vld [vmem:[%s3527_s4 + $0xd0] sm:$0xff] }
  0x52   : > { %2269 = vmatmul.msk.bf16.gmra.mxu1 %vm501_vm0, %v2398_v61  ;;  %v966_v61 = vsel %vm354_vm2, %v961_v57, %v965_v58 }
  0x53   : > { %1586 = vperm.xlu0 %2551, %v1478_v31  }
  0x54   : > { %1606 = vperm.xlu1 %2552, %v1482_v4  }
  0x58   : > { %2379 = vmatmul.msk.bf16.gmra.mxu3 %vm501_vm0, %v1250_v27  ;;  %v1258_v27 = vsel %vm1239_vm1, %v1255_v5, %v1257_v22  ;;  %v2795_v5 = vld [vmem:[%s2624_s8 + $0x60] sm:$0xff]  ;;  %v1485_v22 = vld [vmem:[%s3527_s4 + $0xc8] sm:$0xff] }
  0x59   : > { %v995_v16 = vshll.u32 %v2795_v5, 16  ;;  %v1261_v18 = vrot.slane %v2795_v5, 1 }
  0x5a   : > { %2248 = vmatmul.msk.bf16.gmra.mxu0 %vm501_vm0, %v398_v28 }
  0x5b   : > { %2356 = vmatmul.msk.bf16.gmra.mxu2 %vm501_vm0, %v950_v29  ;;  %v1262_v25 = vsel %vm1239_vm1, %v1259_v49, %v1261_v18  ;;  %v999_v49 = vshrl.u32 %v2795_v5, 16 }
  0x5c   : > { %1621 = vperm.xlu1 %2552, %v1485_v22  }
  0x62   : > { %2270 = vmatmul.msk.bf16.gmra.mxu1 %vm501_vm0, %v2399_v14  ;;  %v2403_v14 = vld [vmem:[%s2624_s8 + $0x48] sm:$0xff] }
  0x63   : > { %v427_v17 = vshll.u32 %v2403_v14, 16  ;;  %v431_v41 = vshrl.u32 %v2403_v14, 16 }
  0x65   : > { %v429_v24 = vrot.slane %v427_v17, 1 }
  0x67   : > { %v430_v29 = vsel %vm354_vm2, %v425_v23, %v429_v24  ;;  %v433_v51 = vor.u32 %v431_v41, %v429_v24  ;;  %v997_v24 = vrot.slane %v995_v16, 1 }
  0x68   : > { %2380 = vmatmul.msk.bf16.gmra.mxu3 %vm501_vm0, %v1252_v43  ;;  %v1481_v43 = vld [vmem:[%s3527_s4 + $0xa8] sm:$0xff] }
  0x69   : > { %1601 = vperm.xlu0 %2551, %v1481_v43   ;;  %v447_v43 = vshrl.u32 %v2789_v3, 16 }
  0x6a   : > { %2249 = vmatmul.msk.bf16.gmra.mxu0 %vm501_vm0, %v406_v44 }
  0x6b   : > { %2357 = vmatmul.msk.bf16.gmra.mxu2 %vm501_vm0, %v958_v45 }
  0x72   : > { %2271 = vmatmul.msk.bf16.gmra.mxu1 %vm501_vm0, %v2400_v30  ;;  %v1474_v30 = vld [vmem:[%s3527_s4 + $0x70] sm:$0xff] }
  0x73   : > { %1566 = vperm.xlu2 %2553, %v1474_v30   ;;  %v1490_v30 = vld [vmem:[%s3527_s4 + $0xf0] sm:$0xff] }
  0x78   : > { %2381 = vmatmul.msk.bf16.gmra.mxu3 %vm501_vm0, %v1254_v59 }
  0x7a   : > { %2250 = vmatmul.msk.bf16.gmra.mxu0 %vm501_vm0, %v414_v60  ;;  %v438_v60 = vsel %vm354_vm2, %v433_v51, %v437_v52 }
  0x7b   : > { %2358 = vmatmul.msk.bf16.gmra.mxu2 %vm501_vm0, %v966_v61  ;;  %v1484_v61 = vld [vmem:[%s3527_s4 + $0xc0] sm:$0xff] }
  0x7c   : > { %1616 = vperm.xlu0 %2551, %v1484_v61  }
  0x82   : > { %2272 = vmatmul.msk.bf16.gmra.mxu1 %vm501_vm0, %v2401_v46  ;;  %v983_v46 = vshrl.u32 %v2421_v15, 16  ;;  %v991_v15 = vshrl.u32 %v2764_v37, 16  ;;  %v1488_v37 = vld [vmem:[%s3527_s4 + $0xe0] sm:$0xff] }
  0x83   : > { %1636 = vperm.xlu1 %2552, %v1488_v37  }
  0x84   : > { %v985_v54 = vor.u32 %v983_v46, %v981_v26  ;;  %1631 = vperm.xlu0 %2551, %v1487_v12   ;;  %v993_v23 = vor.u32 %v991_v15, %v989_v55 }
  0x86   : > { %v990_v63 = vsel %vm354_vm2, %v985_v54, %v989_v55 }
  0x88   : > { %2382 = vmatmul.msk.bf16.gmra.mxu3 %vm501_vm0, %v1256_v10  ;;  %v443_v10 = vshll.u32 %v2789_v3, 16 }
  0x8a   : > { %2251 = vmatmul.msk.bf16.gmra.mxu0 %vm501_vm0, %v422_v11  ;;  %v1477_v11 = vld [vmem:[%s3527_s4 + $0x88] sm:$0xff]  ;;  %v445_v21 = vrot.slane %v443_v10, 1 }
  0x8b   : > { %2359 = vmatmul.msk.bf16.gmra.mxu2 %vm501_vm0, %v974_v13  ;;  %1581 = vperm.xlu2 %2553, %v1477_v11  }
  0x8c   : > { %1646 = vperm.xlu0 %2551, %v1490_v30   ;;  %v449_v54 = vor.u32 %v447_v43, %v445_v21 }
  0x8f   : > { %v696_v19 = vpop.f32.mrf.mxu1 }
  0x92   : > { %2273 = vmatmul.msk.bf16.gmra.mxu1 %vm501_vm0, %v2402_v62 }
  0x97   : > { %v562_v28 = vpop.f32.mrf.mxu0  ;;  %v698_v34 = vpop.f32.mrf.mxu1 }
  0x98   : > { %2383 = vmatmul.msk.bf16.gmra.mxu3 %vm501_vm0, %v1258_v27  ;;  %v697_v32 = vadd.f32 %v696_v19, %v562_v28 }
  0x9a   : > { %2252 = vmatmul.msk.bf16.gmra.mxu0 %vm501_vm0, %v430_v29  ;;  %v446_v29 = vsel %vm354_vm2, %v441_v20, %v445_v21 }
  0x9b   : > { %2360 = vmatmul.msk.bf16.gmra.mxu2 %vm501_vm0, %v982_v33  ;;  %v1341_v35 = vpop.f32.mrf.mxu3 }
  0x9e   : > { %v1113_v38 = vpop.f32.mrf.mxu2 }
  0x9f   : > { %v1198_v39 = vadd.f32 %v1113_v38, %v697_v32  ;;  %v564_v40 = vpop.f32.mrf.mxu0  ;;  %v701_v45 = vpop.f32.mrf.mxu1  ;;  %v998_v32 = vsel %vm354_vm2, %v993_v23, %v997_v24  ;;  %v2829_v38 = vld [vmem:[%s2624_s8 + $0x68] sm:$0xff] }
  0xa0   : > { %v699_v44 = vadd.f32 %v698_v34, %v564_v40  ;;  %v1263_v52 = vrot.slane %v2829_v38, 1 }
  0xa1   : > { %v2770_v48 = vadd.f32 %v1341_v35, %v1198_v39  ;;  %v1480_v39 = vld [vmem:[%s3527_s4 + $0xa0] sm:$0xff] }
  0xa2   : > { %2274 = vmatmul.msk.bf16.gmra.mxu1 %vm501_vm0, %v2403_v14  ;;  %1596 = vperm.xlu2 %2553, %v1480_v39   ;;  %v2408_v39 = vld [vmem:[%s2624_s8 + $0x70] sm:$0xff] }
  0xa3   : > { %3541 = vst [vmem:[#allocation2_spill] sm:$0xff] %v2770_v48  ;;  %v1343_v50 = vpop.f32.mrf.mxu3 }
  0xa6   : > { %v1115_v57 = vpop.f32.mrf.mxu2 }
  0xa7   : > { %v1199_v58 = vadd.f32 %v1115_v57, %v699_v44  ;;  %v567_v59 = vpop.f32.mrf.mxu0  ;;  %v703_v0 = vpop.f32.mrf.mxu1  ;;  %v1001_v57 = vor.u32 %v999_v49, %v997_v24 }
  0xa8   : > { %2384 = vmatmul.msk.bf16.gmra.mxu3 %vm501_vm0, %v1260_v56  ;;  %v702_v62 = vadd.f32 %v701_v45, %v567_v59  ;;  %v1493_v45 = vld [vmem:[%s3527_s4 + $0x108] sm:$0xff]  ;;  %v1491_v56 = vld [vmem:[%s3527_s4 + $0xf8] sm:$0xff]  ;;  %v1264_v59 = vsel %vm1239_vm1, %v1261_v18, %v1263_v52  ;;  %v1007_v18 = vshrl.u32 %v2829_v38, 16 }
  0xa9   : > { %v2784_v1 = vadd.f32 %v1343_v50, %v1199_v58  ;;  %v1003_v50 = vshll.u32 %v2829_v38, 16  ;;  %1661 = vperm.xlu0 %2551, %v1493_v45   ;;  %1651 = vperm.xlu1 %2552, %v1491_v56  }
  0xaa   : > { %2253 = vmatmul.msk.bf16.gmra.mxu0 %vm501_vm0, %v438_v60  ;;  %v1483_v60 = vld [vmem:[%s3527_s4 + $0xb8] sm:$0xff] }
  0xab   : > { %3542 = vst [vmem:[#allocation3_spill] sm:$0xff] %v2784_v1  ;;  %2361 = vmatmul.msk.bf16.gmra.mxu2 %vm501_vm0, %v990_v63  ;;  %v1346_v2 = vpop.f32.mrf.mxu3  ;;  %v1005_v58 = vrot.slane %v1003_v50, 1  ;;  %1611 = vperm.xlu2 %2553, %v1483_v60  }
  0xae   : > { %v1118_v6 = vpop.f32.mrf.mxu2 }
  0xaf   : > { %v1200_v7 = vadd.f32 %v1118_v6, %v702_v62  ;;  %v569_v8 = vpop.f32.mrf.mxu0  ;;  %v706_v14 = vpop.f32.mrf.mxu1 }
  0xb0   : > { %v704_v13 = vadd.f32 %v703_v0, %v569_v8  ;;  %v2425_v8 = vld [vmem:[%s2624_s8 + $0x70] sm:$0xff] }
  0xb1   : > { %v2806_v17 = vadd.f32 %v1346_v2, %v1200_v7  ;;  %v2407_v7 = vld [vmem:[%s2624_s8 + $0x68] sm:$0xff]  ;;  %v1265_v21 = vrot.slane %v2425_v8, 1  ;;  %v1015_v50 = vshrl.u32 %v2425_v8, 16 }
  0xb2   : > { %2275 = vmatmul.msk.bf16.gmra.mxu1 %vm501_vm0, %v2404_v36  ;;  %v2406_v36 = vld [vmem:[%s2624_s8 + $0x60] sm:$0xff]  ;;  %v463_v45 = vshrl.u32 %v2407_v7, 16 }
  0xb3   : > { %3543 = vst [vmem:[#allocation4_spill] sm:$0xff] %v2806_v17  ;;  %v1348_v19 = vpop.f32.mrf.mxu3  ;;  %v451_v44 = vshll.u32 %v2406_v36, 16  ;;  %1626 = vperm.xlu2 %2553, %v1486_v9   ;;  %v2427_v9 = vld [vmem:[%s2624_s8 + $0x80] sm:$0xff] }
  0xb5   : > { %v453_v55 = vrot.slane %v451_v44, 1 }
  0xb6   : > { %v1120_v26 = vpop.f32.mrf.mxu2 }
  0xb7   : > { %v1201_v27 = vadd.f32 %v1120_v26, %v704_v13  ;;  %v572_v28 = vpop.f32.mrf.mxu0  ;;  %v708_v33 = vpop.f32.mrf.mxu1  ;;  %v454_v0 = vsel %vm354_vm2, %v449_v54, %v453_v55  ;;  %v455_v13 = vshrl.u32 %v2406_v36, 16 }
  0xb8   : > { %2385 = vmatmul.msk.bf16.gmra.mxu3 %vm501_vm0, %v1262_v25  ;;  %v707_v31 = vadd.f32 %v706_v14, %v572_v28  ;;  %v459_v14 = vshll.u32 %v2407_v7, 16  ;;  %v1009_v25 = vor.u32 %v1007_v18, %v1005_v58  ;;  %v1489_v28 = vld [vmem:[%s3527_s4 + $0xe8] sm:$0xff] }
  0xb9   : > { %v2820_v34 = vadd.f32 %v1348_v19, %v1201_v27  ;;  %v1011_v19 = vshll.u32 %v2425_v8, 16  ;;  %v457_v23 = vor.u32 %v455_v13, %v453_v55  ;;  %v1266_v27 = vsel %vm1239_vm1, %v1263_v52, %v1265_v21  ;;  %v2409_v8 = vld [vmem:[%s2624_s8 + $0x78] sm:$0xff] }
  0xba   : > { %2254 = vmatmul.msk.bf16.gmra.mxu0 %vm501_vm0, %v446_v29  ;;  %v461_v24 = vrot.slane %v459_v14, 1  ;;  %v471_v13 = vshrl.u32 %v2408_v39, 16  ;;  %v475_v14 = vshll.u32 %v2409_v8, 16 }
  0xbb   : > { %2362 = vmatmul.msk.bf16.gmra.mxu2 %vm501_vm0, %v998_v32  ;;  %v1351_v35 = vpop.f32.mrf.mxu3  ;;  %v1013_v26 = vrot.slane %v1011_v19, 1  ;;  %1641 = vperm.xlu2 %2553, %v1489_v28   ;;  %v1027_v19 = vshll.u32 %v2427_v9, 16 }
  0xbc   : > { %v462_v32 = vsel %vm354_vm2, %v457_v23, %v461_v24  ;;  %v465_v56 = vor.u32 %v463_v45, %v461_v24  ;;  %v479_v45 = vshrl.u32 %v2409_v8, 16 }
  0xbe   : > { %v1123_v40 = vpop.f32.mrf.mxu2 }
  0xbf   : > { %v1202_v41 = vadd.f32 %v1123_v40, %v707_v31  ;;  %v574_v42 = vpop.f32.mrf.mxu0  ;;  %v711_v47 = vpop.f32.mrf.mxu1  ;;  %v2426_v40 = vld [vmem:[%s2624_s8 + $0x78] sm:$0xff] }
  0xc0   : > { %v709_v46 = vadd.f32 %v708_v33, %v574_v42  ;;  %v1019_v52 = vshll.u32 %v2426_v40, 16  ;;  %v1267_v54 = vrot.slane %v2426_v40, 1  ;;  %v1023_v18 = vshrl.u32 %v2426_v40, 16  ;;  %v2410_v40 = vld [vmem:[%s2624_s8 + $0x80] sm:$0xff] }
  0xc1   : > { %v2840_v51 = vadd.f32 %v1351_v35, %v1202_v41  ;;  %v1014_v35 = vsel %vm354_vm2, %v1009_v25, %v1013_v26  ;;  %v1492_v41 = vld [vmem:[%s3527_s4 + $0x100] sm:$0xff]  ;;  %v477_v25 = vrot.slane %v475_v14, 1 }
  0xc2   : > { %2276 = vmatmul.msk.bf16.gmra.mxu1 %vm501_vm0, %v2789_v3  ;;  %v1006_v3 = vsel %vm354_vm2, %v1001_v57, %v1005_v58  ;;  %v1017_v58 = vor.u32 %v1015_v50, %v1013_v26  ;;  %v1268_v60 = vsel %vm1239_vm1, %v1265_v21, %v1267_v54  ;;  %v1031_v50 = vshrl.u32 %v2427_v9, 16 }
  0xc3   : > { %3544 = vst [vmem:[#allocation5_spill] sm:$0xff] %v2840_v51  ;;  %v1353_v53 = vpop.f32.mrf.mxu3  ;;  %1656 = vperm.xlu2 %2553, %v1492_v41   ;;  %v2428_v41 = vld [vmem:[%s2624_s8 + $0x88] sm:$0xff] }
  0xc6   : > { %v1125_v61 = vpop.f32.mrf.mxu2 }
  0xc7   : > { %v1203_v62 = vadd.f32 %v1125_v61, %v709_v46  ;;  %v577_v63 = vpop.f32.mrf.mxu0  ;;  %v713_v4 = vpop.f32.mrf.mxu1  ;;  %v467_v46 = vshll.u32 %v2408_v39, 16 }
  0xc8   : > { %2386 = vmatmul.msk.bf16.gmra.mxu3 %vm501_vm0, %v1264_v59  ;;  %v712_v2 = vadd.f32 %v711_v47, %v577_v63  ;;  %v1021_v59 = vrot.slane %v1019_v52, 1  ;;  %v1035_v52 = vshll.u32 %v2428_v41, 16 }
  0xc9   : > { %v2855_v5 = vadd.f32 %v1353_v53, %v1203_v62  ;;  %v469_v57 = vrot.slane %v467_v46, 1  ;;  %v483_v46 = vshll.u32 %v2410_v40, 16 }
  0xca   : > { %2255 = vmatmul.msk.bf16.gmra.mxu0 %vm501_vm0, %v454_v0  ;;  %v1025_v26 = vor.u32 %v1023_v18, %v1021_v59 }
  0xcb   : > { %3545 = vst [vmem:[#allocation6_spill] sm:$0xff] %v2855_v5  ;;  %2363 = vmatmul.msk.bf16.gmra.mxu2 %vm501_vm0, %v1006_v3  ;;  %v1356_v6 = vpop.f32.mrf.mxu3  ;;  %v470_v0 = vsel %vm354_vm2, %v465_v56, %v469_v57  ;;  %v1022_v3 = vsel %vm354_vm2, %v1017_v58, %v1021_v59  ;;  %v473_v24 = vor.u32 %v471_v13, %v469_v57  ;;  %v485_v58 = vrot.slane %v483_v46, 1 }
  0xcc   : > { %v481_v57 = vor.u32 %v479_v45, %v477_v25 }
  0xce   : > { %v1128_v10 = vpop.f32.mrf.mxu2 }
  0xcf   : > { %v1204_v11 = vadd.f32 %v1128_v10, %v712_v2  ;;  %v579_v12 = vpop.f32.mrf.mxu0  ;;  %v716_v16 = vpop.f32.mrf.mxu1 }
  0xd0   : > { %v714_v15 = vadd.f32 %v713_v4, %v579_v12 }
  0xd1   : > { %v2865_v20 = vadd.f32 %v1356_v6, %v1204_v11 }
  0xd2   : > { %2277 = vmatmul.msk.bf16.gmra.mxu1 %vm501_vm0, %v2406_v36 }
  0xd3   : > { %v1358_v22 = vpop.f32.mrf.mxu3 }
  0xd6   : > { %v1130_v29 = vpop.f32.mrf.mxu2 }
  0xd7   : > { %v1205_v30 = vadd.f32 %v1130_v29, %v714_v15  ;;  %v582_v31 = vpop.f32.mrf.mxu0  ;;  %v718_v36 = vpop.f32.mrf.mxu1 }
  0xd8   : > { %2387 = vmatmul.msk.bf16.gmra.mxu3 %vm501_vm0, %v1266_v27  ;;  %v717_v33 = vadd.f32 %v716_v16, %v582_v31  ;;  %v1029_v27 = vrot.slane %v1027_v19, 1 }
  0xd9   : > { %v2875_v37 = vadd.f32 %v1358_v22, %v1205_v30  ;;  %v1269_v22 = vrot.slane %v2427_v9, 1 }
  0xda   : > { %2256 = vmatmul.msk.bf16.gmra.mxu0 %vm501_vm0, %v462_v32  ;;  %v478_v32 = vsel %vm354_vm2, %v473_v24, %v477_v25  ;;  %v1033_v59 = vor.u32 %v1031_v50, %v1029_v27 }
  0xdb   : > { %2364 = vmatmul.msk.bf16.gmra.mxu2 %vm501_vm0, %v1014_v35  ;;  %v1361_v38 = vpop.f32.mrf.mxu3  ;;  %v1270_v28 = vsel %vm1239_vm1, %v1267_v54, %v1269_v22  ;;  %v1030_v35 = vsel %vm354_vm2, %v1025_v26, %v1029_v27  ;;  %v1039_v26 = vshrl.u32 %v2428_v41, 16 }
  0xde   : > { %v1133_v42 = vpop.f32.mrf.mxu2 }
  0xdf   : > { %v1206_v43 = vadd.f32 %v1133_v42, %v717_v33  ;;  %v584_v44 = vpop.f32.mrf.mxu0  ;;  %v721_v49 = vpop.f32.mrf.mxu1 }
  0xe0   : > { %v719_v47 = vadd.f32 %v718_v36, %v584_v44 }
  0xe1   : > { %v2884_v53 = vadd.f32 %v1361_v38, %v1206_v43 }
  0xe2   : > { %2278 = vmatmul.msk.bf16.gmra.mxu1 %vm501_vm0, %v2407_v7 }
  0xe3   : > { %v1363_v55 = vpop.f32.mrf.mxu3 }
  0xe6   : > { %v1135_v61 = vpop.f32.mrf.mxu2 }
  0xe7   : > { %v1207_v62 = vadd.f32 %v1135_v61, %v719_v47  ;;  %v587_v63 = vpop.f32.mrf.mxu0  ;;  %v723_v4 = vpop.f32.mrf.mxu1  ;;  %v262_v61 = vld [vmem:[%s2624_s8 + $0x88] sm:$0x1] }
  0xe8   : > { %2388 = vmatmul.msk.bf16.gmra.mxu3 %vm501_vm0, %v1268_v60  ;;  %v722_v2 = vadd.f32 %v721_v49, %v587_v63  ;;  %v1037_v60 = vrot.slane %v1035_v52, 1  ;;  %v815_v63 = vld [vmem:[%s2624_s8 + $0x90] sm:$0x1] }
  0xe9   : > { %v2891_v6 = vadd.f32 %v1363_v55, %v1207_v62  ;;  %v1271_v55 = vrot.slane %v2428_v41, 1 }
  0xea   : > { %2257 = vmatmul.msk.bf16.gmra.mxu0 %vm501_vm0, %v470_v0 }
  0xeb   : > { %3546 = vst [vmem:[#allocation7_spill] sm:$0xff] %v2891_v6  ;;  %2365 = vmatmul.msk.bf16.gmra.mxu2 %vm501_vm0, %v1022_v3  ;;  %v1366_v7 = vpop.f32.mrf.mxu3  ;;  %v1272_v62 = vsel %vm1239_vm1, %v1269_v22, %v1271_v55  ;;  %v487_v22 = vshrl.u32 %v2410_v40, 16 }
  0xee   : > { %v1138_v10 = vpop.f32.mrf.mxu2 }
  0xef   : > { %v1208_v11 = vadd.f32 %v1138_v10, %v722_v2  ;;  %v589_v12 = vpop.f32.mrf.mxu0  ;;  %v726_v16 = vpop.f32.mrf.mxu1  ;;  %v1038_v10 = vsel %vm354_vm2, %v1033_v59, %v1037_v60 }
  0xf0   : > { %v724_v15 = vadd.f32 %v723_v4, %v589_v12  ;;  %v486_v4 = vsel %vm354_vm2, %v481_v57, %v485_v58 }
  0xf1   : > { %v2897_v21 = vadd.f32 %v1366_v7, %v1208_v11  ;;  %v335_v7 = vunpack.c.l.b16 %v262_v61  ;;  %v888_v11 = vunpack.c.l.b16 %v815_v63 }
  0xf2   : > { %2279 = vmatmul.msk.bf16.gmra.mxu1 %vm501_vm0, %v2408_v39 }
  0xf3   : > { %3547 = vst [vmem:[#allocation8_spill] sm:$0xff] %v2897_v21  ;;  %v1368_v23 = vpop.f32.mrf.mxu3  ;;  %v353_v14 = vpack.c.b16 %v335_v7, %v335_v7 }
  0xf6   : > { %v1140_v29 = vpop.f32.mrf.mxu2 }
  0xf7   : > { %v1209_v30 = vadd.f32 %v1140_v29, %v724_v15  ;;  %v592_v31 = vpop.f32.mrf.mxu0  ;;  %v728_v36 = vpop.f32.mrf.mxu1  ;;  %v906_v15 = vpack.c.b16 %v888_v11, %v888_v11 }
  0xf8   : > { %2389 = vmatmul.msk.bf16.gmra.mxu3 %vm501_vm0, %v1270_v28  ;;  %v727_v33 = vadd.f32 %v726_v16, %v592_v31  ;;  %v489_v31 = vor.u32 %v487_v22, %v485_v58 }
  0xf9   : > { %v2904_v38 = vadd.f32 %v1368_v23, %v1209_v30  ;;  %v491_v23 = vshll.u32 %v353_v14, 16  ;;  %v1043_v27 = vshll.u32 %v906_v15, 16  ;;  %v1273_v29 = vrot.slane %v906_v15, 1 }
  0xfa   : > { %2258 = vmatmul.msk.bf16.gmra.mxu0 %vm501_vm0, %v478_v32 }
  0xfb   : > { %3548 = vst [vmem:[#allocation9_spill] sm:$0xff] %v2904_v38  ;;  %2366 = vmatmul.msk.bf16.gmra.mxu2 %vm501_vm0, %v1030_v35  ;;  %v1371_v39 = vpop.f32.mrf.mxu3  ;;  %v493_v32 = vrot.slane %v491_v23, 1  ;;  %v1045_v35 = vrot.slane %v1043_v27, 1 }
  0xfe   : > { %v1143_v42 = vpop.f32.mrf.mxu2 }
  0xff   : > { %v1210_v43 = vadd.f32 %v1143_v42, %v727_v33  ;;  %v594_v44 = vpop.f32.mrf.mxu0  ;;  %v731_v49 = vpop.f32.mrf.mxu1  ;;  %v1041_v33 = vor.u32 %v1039_v26, %v1037_v60 }
 0x100   : > { %v729_v47 = vadd.f32 %v728_v36, %v594_v44  ;;  %v1274_v36 = vsel %vm1239_vm1, %v1271_v55, %v1273_v29  ;;  %v494_v44 = vsel %vm354_vm2, %v489_v31, %v493_v32  ;;  %v1497_v31 = vpop.permute.xlu0 %1496 }
 0x101   : > { %v2910_v54 = vadd.f32 %v1371_v39, %v1210_v43  ;;  %v1046_v45 = vsel %vm354_vm2, %v1041_v33, %v1045_v35 }
 0x102   : > { %2280 = vmatmul.msk.bf16.gmra.mxu1 %vm501_vm0, %v2409_v8 }
 0x103   : > { %3549 = vst [vmem:[#allocation10_spill] sm:$0xff] %v2910_v54  ;;  %v1373_v56 = vpop.f32.mrf.mxu3 }
 0x106   : > { %v1145_v0 = vpop.f32.mrf.mxu2 }
 0x107   : > { %v1211_v2 = vadd.f32 %v1145_v0, %v729_v47  ;;  %v597_v3 = vpop.f32.mrf.mxu0  ;;  %v733_v8 = vpop.f32.mrf.mxu1 }
 0x108   : > { %2390 = vmatmul.msk.bf16.gmra.mxu3 %vm501_vm0, %v1272_v62  ;;  %v732_v9 = vadd.f32 %v731_v49, %v597_v3 }
 0x109   : > { %v2919_v12 = vadd.f32 %v1373_v56, %v1211_v2 }
 0x10a   : > { %2259 = vmatmul.msk.bf16.gmra.mxu0 %vm501_vm0, %v486_v4 }
 0x10b   : > { %3550 = vst [vmem:[#allocation11_spill] sm:$0xff] %v2919_v12  ;;  %2367 = vmatmul.msk.bf16.gmra.mxu2 %vm501_vm0, %v1038_v10  ;;  %v1376_v13 = vpop.f32.mrf.mxu3 }
 0x10e   : > { %v1148_v16 = vpop.f32.mrf.mxu2 }
 0x10f   : > { %v1212_v18 = vadd.f32 %v1148_v16, %v732_v9  ;;  %v599_v19 = vpop.f32.mrf.mxu0  ;;  %v736_v25 = vpop.f32.mrf.mxu1 }
 0x110   : > { %v734_v24 = vadd.f32 %v733_v8, %v599_v19 }
 0x111   : > { %v2923_v28 = vadd.f32 %v1376_v13, %v1212_v18 }
 0x112   : > { %2281 = vmatmul.msk.bf16.gmra.mxu1 %vm501_vm0, %v2410_v40 }
 0x113   : > { %v1378_v30 = vpop.f32.mrf.mxu3 }
 0x116   : > { %v1150_v39 = vpop.f32.mrf.mxu2 }
 0x117   : > { %v1213_v42 = vadd.f32 %v1150_v39, %v734_v24  ;;  %v602_v43 = vpop.f32.mrf.mxu0  ;;  %v738_v46 = vpop.f32.mrf.mxu1 }
 0x118   : > { %2391 = vmatmul.msk.bf16.gmra.mxu3 %vm501_vm0, %v1274_v36  ;;  %v737_v41 = vadd.f32 %v736_v25, %v602_v43 }
 0x119   : > { %v2930_v47 = vadd.f32 %v1378_v30, %v1213_v42  ;;  %v1507_v42 = vpop.permute.xlu1 %1506 }
 0x11a   : > { %2260 = vmatmul.msk.bf16.gmra.mxu0 %vm501_vm0, %v494_v44 }
 0x11b   : > { %3551 = vst [vmem:[#allocation12_spill] sm:$0xff] %v2930_v47  ;;  %2368 = vmatmul.msk.bf16.gmra.mxu2 %vm501_vm0, %v1046_v45  ;;  %v1381_v40 = vpop.f32.mrf.mxu3 }
 0x11e   : > { %v1153_v49 = vpop.f32.mrf.mxu2 }
 0x11f   : > { %v1214_v50 = vadd.f32 %v1153_v49, %v737_v41  ;;  %v604_v52 = vpop.f32.mrf.mxu0  ;;  %v741_v56 = vpop.f32.mrf.mxu1 }
 0x120   : > { %v739_v55 = vadd.f32 %v738_v46, %v604_v52  ;;  %v1517_v41 = vpop.permute.xlu2 %1516  ;;  %v1502_v49 = vpop.permute.xlu0 %1501 }
 0x121   : > { %v2934_v57 = vadd.f32 %v1381_v40, %v1214_v50 }
 0x123   : > { %v1383_v58 = vpop.f32.mrf.mxu3 }
 0x126   : > { %v1155_v59 = vpop.f32.mrf.mxu2 }
 0x127   : > { %v1215_v60 = vadd.f32 %v1155_v59, %v739_v55  ;;  %v607_v61 = vpop.f32.mrf.mxu0  ;;  %v743_v63 = vpop.f32.mrf.mxu1 }
 0x128   : > { %v742_v62 = vadd.f32 %v741_v56, %v607_v61  ;;  %v1512_v55 = vpop.permute.xlu1 %1511  ;;  %v1527_v61 = vpop.permute.xlu0 %1526 }
 0x129   : > { %v2936_v0 = vadd.f32 %v1383_v58, %v1215_v60  ;;  %v1522_v58 = vpop.permute.xlu2 %1521 }
 0x12b   : > { %3552 = vst [vmem:[#allocation13_spill] sm:$0xff] %v2936_v0  ;;  %v1386_v2 = vpop.f32.mrf.mxu3 }
 0x12e   : > { %v1158_v3 = vpop.f32.mrf.mxu2 }
 0x12f   : > { %v1216_v4 = vadd.f32 %v1158_v3, %v742_v62  ;;  %v609_v7 = vpop.f32.mrf.mxu0  ;;  %v746_v10 = vpop.f32.mrf.mxu1 }
 0x130   : > { %v744_v9 = vadd.f32 %v743_v63, %v609_v7  ;;  %v1532_v63 = vpop.permute.xlu1 %1531 }
 0x131   : > { %v2938_v8 = vadd.f32 %v1386_v2, %v1216_v4  ;;  %v1537_v3 = vpop.permute.xlu2 %1536 }
 0x133   : > { %v1388_v11 = vpop.f32.mrf.mxu3 }
 0x136   : > { %v1160_v13 = vpop.f32.mrf.mxu2 }
 0x137   : > { %v1217_v14 = vadd.f32 %v1160_v13, %v744_v9  ;;  %v612_v15 = vpop.f32.mrf.mxu0  ;;  %v748_v18 = vpop.f32.mrf.mxu1 }
 0x138   : > { %v747_v16 = vadd.f32 %v746_v10, %v612_v15  ;;  %v2968_v9 = vpop.permute.xlu0 %1541  ;;  %v2974_v13 = vpop.permute.xlu1 %1546  ;;  %v1738_v15 = vmul.f32 %v2770_v48, %v2770_v48 }
 0x139   : > { %v2940_v19 = vadd.f32 %v1388_v11, %v1217_v14  ;;  %v1739_v11 = vmul.f32 %v2784_v1, %v2784_v1 }
 0x13b   : > { %v1391_v22 = vpop.f32.mrf.mxu3 }
 0x13e   : > { %v1163_v23 = vpop.f32.mrf.mxu2 }
 0x13f   : > { %v1218_v24 = vadd.f32 %v1163_v23, %v747_v16  ;;  %v614_v25 = vpop.f32.mrf.mxu0  ;;  %v751_v27 = vpop.f32.mrf.mxu1  ;;  %v1740_v16 = vmul.f32 %v2806_v17, %v2806_v17 }
 0x140   : > { %v749_v26 = vadd.f32 %v748_v18, %v614_v25  ;;  %v1665_v18 = vmul.f32 %v1502_v49, %v2784_v1  ;;  %v1741_v25 = vmul.f32 %v2820_v34, %v2820_v34  ;;  %v1743_v1 = vmul.f32 %v2855_v5, %v2855_v5 }
 0x141   : > { %v2942_v29 = vadd.f32 %v1391_v22, %v1218_v24  ;;  %v2983_v22 = vpop.permute.xlu2 %1551  ;;  %v1773_v24 = vmul.f32 %v1739_v11, %v1502_v49 }
 0x142   : > { %v1775_v11 = vmul.f32 %v1741_v25, %v1512_v55 }
 0x143   : > { %v1393_v30 = vpop.f32.mrf.mxu3 }
 0x146   : > { %v1165_v32 = vpop.f32.mrf.mxu2 }
 0x147   : > { %v1219_v33 = vadd.f32 %v1165_v32, %v749_v26  ;;  %v617_v35 = vpop.f32.mrf.mxu0  ;;  %v2944_v39 = vpop.f32.mrf.mxu1 }
 0x148   : > { %v752_v36 = vadd.f32 %v751_v27, %v617_v35  ;;  %v1664_v27 = vmul.f32 %v1497_v31, %v2770_v48  ;;  %v2993_v32 = vpop.permute.xlu0 %1556  ;;  %v1772_v35 = vmul.f32 %v1738_v15, %v1497_v31  ;;  %v3002_v48 = vpop.permute.xlu1 %1561  ;;  %v1744_v15 = vmul.f32 %v2865_v20, %v2865_v20 }
 0x149   : > { %v2946_v43 = vadd.f32 %v1393_v30, %v1219_v33  ;;  %v1666_v30 = vmul.f32 %v1507_v42, %v2806_v17 }
 0x14a   : > { %v1806_v49 = vadd.f32 %v1773_v24, %v1772_v35  ;;  %v3010_v24 = vpop.permute.xlu2 %1566  ;;  %v1745_v35 = vmul.f32 %v2875_v37, %v2875_v37 }
 0x14b   : > { %v1396_v44 = vpop.f32.mrf.mxu3 }
 0x14e   : > { %v1168_v45 = vpop.f32.mrf.mxu2 }
 0x14f   : > { %v1220_v46 = vadd.f32 %v1168_v45, %v752_v36  ;;  %v2948_v40 = vpop.f32.mrf.mxu0  ;;  %v2950_v50 = vpop.f32.mrf.mxu1  ;;  %v1774_v36 = vmul.f32 %v1740_v16, %v1507_v42  ;;  %v1698_v45 = vadd.f32 %v1665_v18, %v1664_v27  ;;  %v1669_v18 = vmul.f32 %v1522_v58, %v2855_v5 }
 0x150   : > { %v1777_v27 = vmul.f32 %v1743_v1, %v1522_v58  ;;  %v1671_v5 = vmul.f32 %v1532_v63, %v2875_v37  ;;  %v1779_v58 = vmul.f32 %v1745_v35, %v1532_v63 }
 0x151   : > { %v2952_v52 = vadd.f32 %v1396_v44, %v1220_v46  ;;  %v1742_v44 = vmul.f32 %v2840_v51, %v2840_v51  ;;  %v1667_v46 = vmul.f32 %v1512_v55, %v2820_v34  ;;  %v1807_v31 = vadd.f32 %v1806_v49, %v1774_v36  ;;  %v1572_v36 = vpop.permute.xlu0 %1571 }
 0x152   : > { %v1778_v49 = vmul.f32 %v1744_v15, %v1527_v61 }
 0x153   : > { %v2954_v56 = vpop.f32.mrf.mxu3  ;;  %v1776_v42 = vmul.f32 %v1742_v44, %v1517_v41  ;;  %v1808_v25 = vadd.f32 %v1807_v31, %v1775_v11  ;;  %v1747_v11 = vmul.f32 %v2891_v6, %v2891_v6  ;;  %v1577_v31 = vpop.permute.xlu1 %1576 }
 0x155   : > { %v1809_v44 = vadd.f32 %v1808_v25, %v1776_v42  ;;  %v1672_v42 = vmul.f32 %v1537_v3, %v2884_v53 }
 0x156   : > { %v2956_v59 = vpop.f32.mrf.mxu2 }
 0x157   : > { %v2958_v60 = vpop.f32.mrf.mxu0  ;;  %v2960_v62 = vpop.f32.mrf.mxu1  ;;  %v1810_v1 = vadd.f32 %v1809_v44, %v1777_v27  ;;  %v1781_v44 = vmul.f32 %v1747_v11, %v2968_v9 }
 0x158   : > { %v1582_v27 = vpop.permute.xlu2 %1581 }
 0x15b   : > { %v2962_v2 = vpop.f32.mrf.mxu3 }
 0x15e   : > { %v2964_v4 = vpop.f32.mrf.mxu2 }
 0x15f   : > { %v2966_v7 = vpop.f32.mrf.mxu0  ;;  %v2970_v10 = vpop.f32.mrf.mxu1 }
 0x163   : > { %v2976_v14 = vpop.f32.mrf.mxu3 }
 0x164   : > { %3553 = vst [vmem:[#allocation14_spill] sm:$0xff] %v2976_v14  ;;  %v1699_v14 = vadd.f32 %v1698_v45, %v1666_v30 }
 0x166   : > { %v2985_v23 = vpop.f32.mrf.mxu2  ;;  %v1700_v16 = vadd.f32 %v1699_v14, %v1667_v46  ;;  %v1746_v14 = vmul.f32 %v2884_v53, %v2884_v53 }
 0x167   : > { %v2989_v26 = vpop.f32.mrf.mxu0  ;;  %v2995_v33 = vpop.f32.mrf.mxu1 }
 0x168   : > { %3554 = vst [vmem:[#allocation15_spill] sm:$0xff] %v2995_v33  ;;  %v1668_v33 = vmul.f32 %v1517_v41, %v2840_v51  ;;  %v1670_v41 = vmul.f32 %v1527_v61, %v2865_v20  ;;  %v1811_v61 = vadd.f32 %v1810_v1, %v1778_v49  ;;  %v1780_v15 = vmul.f32 %v1746_v14, %v1537_v3  ;;  %v1587_v14 = vpop.permute.xlu0 %1586 }
 0x169   : > { %v1674_v3 = vmul.f32 %v2974_v13, %v2897_v21 }
 0x16a   : > { %v1701_v45 = vadd.f32 %v1700_v16, %v1668_v33  ;;  %v1812_v35 = vadd.f32 %v1811_v61, %v1779_v58  ;;  %v1592_v61 = vpop.permute.xlu1 %1591 }
 0x16b   : > { %v3004_v17 = vpop.f32.mrf.mxu3 }
 0x16c   : > { %v1702_v46 = vadd.f32 %v1701_v45, %v1669_v18  ;;  %v1748_v18 = vmul.f32 %v2897_v21, %v2897_v21  ;;  %v1673_v45 = vmul.f32 %v2968_v9, %v2891_v6  ;;  %v1675_v9 = vmul.f32 %v2983_v22, %v2904_v38 }
 0x16e   : > { %v3012_v55 = vpop.f32.mrf.mxu2  ;;  %v1703_v16 = vadd.f32 %v1702_v46, %v1670_v41  ;;  %v1749_v41 = vmul.f32 %v2904_v38, %v2904_v38  ;;  %v1782_v1 = vmul.f32 %v1748_v18, %v2974_v13  ;;  %v1676_v13 = vmul.f32 %v2993_v32, %v2910_v54 }
 0x16f   : > { %v3016_v30 = vpop.f32.mrf.mxu0  ;;  %v3022_v51 = vpop.f32.mrf.mxu1 }
 0x170   : > { %v1704_v25 = vadd.f32 %v1703_v16, %v1671_v5  ;;  %v1813_v5 = vadd.f32 %v1812_v35, %v1780_v15  ;;  %v1750_v16 = vmul.f32 %v2910_v54, %v2910_v54  ;;  %v1783_v11 = vmul.f32 %v1749_v41, %v2983_v22  ;;  %v1597_v41 = vpop.permute.xlu2 %1596 }
 0x171   : > { %v1752_v35 = vmul.f32 %v2923_v28, %v2923_v28  ;;  %v1677_v22 = vmul.f32 %v3002_v48, %v2919_v12 }
 0x172   : > { %v1705_v49 = vadd.f32 %v1704_v25, %v1672_v42  ;;  %v1814_v58 = vadd.f32 %v1813_v5, %v1781_v44  ;;  %v1751_v42 = vmul.f32 %v2919_v12, %v2919_v12 }
 0x173   : > { %v3026_v33 = vpop.f32.mrf.mxu3 }
 0x174   : > { %v1706_v6 = vadd.f32 %v1705_v49, %v1673_v45  ;;  %v1815_v18 = vadd.f32 %v1814_v58, %v1782_v1  ;;  %v1784_v45 = vmul.f32 %v1750_v16, %v2993_v32  ;;  %v1678_v32 = vmul.f32 %v3010_v24, %v2923_v28 }
 0x175   : > { %v1679_v58 = vmul.f32 %v1572_v36, %v2930_v47 }
 0x176   : > { %v3033_v63 = vpop.f32.mrf.mxu2  ;;  %v1707_v21 = vadd.f32 %v1706_v6, %v1674_v3  ;;  %v1816_v5 = vadd.f32 %v1815_v18, %v1783_v11  ;;  %v1785_v6 = vmul.f32 %v1751_v42, %v3002_v48  ;;  %v1753_v3 = vmul.f32 %v2930_v47, %v2930_v47  ;;  %v1602_v18 = vpop.permute.xlu0 %1601 }
 0x177   : > { %v3038_v46 = vpop.f32.mrf.mxu0  ;;  %v3054_v15 = vpop.f32.mrf.mxu1  ;;  %v1754_v11 = vmul.f32 %v2934_v57, %v2934_v57 }
 0x178   : > { %v1708_v44 = vadd.f32 %v1707_v21, %v1675_v9  ;;  %v1817_v16 = vadd.f32 %v1816_v5, %v1784_v45  ;;  %v1786_v21 = vmul.f32 %v1752_v35, %v3010_v24  ;;  %v1787_v42 = vmul.f32 %v1753_v3, %v1572_v36  ;;  %v1607_v5 = vpop.permute.xlu1 %1606 }
 0x179   : > { %v1788_v35 = vmul.f32 %v1754_v11, %v1577_v31  ;;  %v754_v3 = vadd.f32 %v2944_v39, %v2948_v40  ;;  %v1758_v39 = vmul.f32 %v2942_v29, %v2942_v29 }
 0x17a   : > { %v1709_v1 = vadd.f32 %v1708_v44, %v1676_v13  ;;  %v1818_v48 = vadd.f32 %v1817_v16, %v1785_v6  ;;  %v1680_v13 = vmul.f32 %v1577_v31, %v2934_v57  ;;  %v1755_v44 = vmul.f32 %v2936_v0, %v2936_v0 }
 0x17b   : > { %v3050_v25 = vpop.f32.mrf.mxu3  ;;  %v1757_v31 = vmul.f32 %v2940_v19, %v2940_v19  ;;  %v1221_v11 = vadd.f32 %v2956_v59, %v754_v3  ;;  %v762_v59 = vadd.f32 %v2970_v10, %v2989_v26 }
 0x17c   : > { %v1710_v9 = vadd.f32 %v1709_v1, %v1677_v22  ;;  %v1819_v45 = vadd.f32 %v1818_v48, %v1786_v21  ;;  %v1681_v22 = vmul.f32 %v1582_v27, %v2936_v0  ;;  %v1756_v1 = vmul.f32 %v2938_v8, %v2938_v8 }
 0x17e   : > { %v3061_v49 = vpop.f32.mrf.mxu2  ;;  %v1711_v38 = vadd.f32 %v1710_v9, %v1678_v32  ;;  %v1820_v36 = vadd.f32 %v1819_v45, %v1787_v42  ;;  %v757_v32 = vadd.f32 %v2950_v50, %v2958_v60  ;;  %v1789_v9 = vmul.f32 %v1755_v44, %v1582_v27 }
 0x17f   : > { %v3066_v54 = vpop.f32.mrf.mxu0  ;;  %v771_v47 = vpop.f32.mrf.mxu1  ;;  %v1790_v42 = vmul.f32 %v1756_v1, %v1587_v14  ;;  %v1683_v45 = vmul.f32 %v1592_v61, %v2940_v19  ;;  %v759_v50 = vadd.f32 %v2960_v62, %v2966_v7  ;;  %v1791_v44 = vmul.f32 %v1757_v31, %v1592_v61 }
 0x180   : > { %v1712_v24 = vadd.f32 %v1711_v38, %v1679_v58  ;;  %v1682_v38 = vmul.f32 %v1587_v14, %v2938_v8  ;;  %v1612_v58 = vpop.permute.xlu2 %1611  ;;  %v1821_v48 = vadd.f32 %v1820_v36, %v1788_v35  ;;  %v1222_v40 = vadd.f32 %v2964_v4, %v757_v32  ;;  %v1622_v32 = vpop.permute.xlu1 %1621 }
 0x181   : > { %v1684_v14 = vmul.f32 %v1597_v41, %v2942_v29  ;;  %v1759_v35 = vmul.f32 %v2946_v43, %v2946_v43  ;;  %v1223_v4 = vadd.f32 %v2985_v23, %v759_v50  ;;  %v1792_v36 = vmul.f32 %v1758_v39, %v1597_v41 }
 0x182   : > { %v1713_v21 = vadd.f32 %v1712_v24, %v1680_v13  ;;  %v1822_v27 = vadd.f32 %v1821_v48, %v1789_v9  ;;  %v1617_v24 = vpop.permute.xlu0 %1616  ;;  %v1760_v61 = vmul.f32 %v2952_v52, %v2952_v52  ;;  %v3113_v10 = vadd.f32 %v2962_v2, %v1222_v40  ;;  %v3556_v48 = vld [vmem:[#allocation14_spill] sm:$0xff] }
 0x183   : > { %v3074_v12 = vpop.f32.mrf.mxu3  ;;  %v767_v9 = vadd.f32 %v3022_v51, %v3038_v46  ;;  %v1793_v31 = vmul.f32 %v1759_v35, %v1602_v18  ;;  %v3123_v2 = vadd.f32 %v3556_v48, %v1223_v4 }
 0x184   : > { %v1714_v0 = vadd.f32 %v1713_v21, %v1681_v22  ;;  %v3106_v22 = vadd.f32 %v2954_v56, %v1221_v11  ;;  %v1823_v62 = vadd.f32 %v1822_v27, %v1790_v42  ;;  %v1224_v56 = vadd.f32 %v3012_v55, %v762_v59  ;;  %v3555_v21 = vld [vmem:[#allocation15_spill] sm:$0xff] }
 0x185   : > { %v764_v23 = vadd.f32 %v3555_v21, %v3016_v30  ;;  %v1794_v30 = vmul.f32 %v1760_v61, %v1607_v5  ;;  %v1762_v51 = vmul.f32 %v3113_v10, %v3113_v10  ;;  %v1226_v50 = vadd.f32 %v3061_v49, %v767_v9 }
 0x186   : > { %v3082_v6 = vpop.f32.mrf.mxu2  ;;  %v1715_v13 = vadd.f32 %v1714_v0, %v1682_v38  ;;  %v1685_v0 = vmul.f32 %v1602_v18, %v2946_v43  ;;  %v1824_v3 = vadd.f32 %v1823_v62, %v1791_v44  ;;  %v1761_v11 = vmul.f32 %v3106_v22, %v3106_v22 }
 0x187   : > { %v637_v16 = vpop.f32.mrf.mxu0  ;;  %v773_v41 = vpop.f32.mrf.mxu1  ;;  %v1225_v55 = vadd.f32 %v3033_v63, %v764_v23  ;;  %v1687_v46 = vmul.f32 %v1612_v58, %v3106_v22  ;;  %v3131_v18 = vadd.f32 %v3004_v17, %v1224_v56  ;;  %v769_v27 = vadd.f32 %v3054_v15, %v3066_v54 }
 0x188   : > { %v1716_v7 = vadd.f32 %v1715_v13, %v1683_v45  ;;  %v1627_v42 = vpop.permute.xlu2 %1626  ;;  %v1686_v45 = vmul.f32 %v1607_v5, %v2952_v52  ;;  %v1825_v39 = vadd.f32 %v1824_v3, %v1792_v36  ;;  %v1795_v59 = vmul.f32 %v1761_v11, %v1612_v58  ;;  %v1637_v56 = vpop.permute.xlu1 %1636 }
 0x189   : > { %v1763_v63 = vmul.f32 %v3123_v2, %v3123_v2  ;;  %v772_v5 = vadd.f32 %v771_v47, %v637_v16  ;;  %v1688_v4 = vmul.f32 %v1617_v24, %v3113_v10  ;;  %v3140_v62 = vadd.f32 %v3026_v33, %v1225_v55 }
 0x18a   : > { %v1717_v38 = vadd.f32 %v1716_v7, %v1684_v14  ;;  %v1826_v44 = vadd.f32 %v1825_v39, %v1793_v31  ;;  %v1632_v14 = vpop.permute.xlu0 %1631  ;;  %v1227_v17 = vadd.f32 %v3082_v6, %v769_v27  ;;  %v1796_v36 = vmul.f32 %v1762_v51, %v1617_v24 }
 0x18b   : > { %v3098_v60 = vpop.f32.mrf.mxu3  ;;  %v1689_v15 = vmul.f32 %v1622_v32, %v3123_v2  ;;  %v1764_v58 = vmul.f32 %v3131_v18, %v3131_v18  ;;  %v3147_v47 = vadd.f32 %v3050_v25, %v1226_v50  ;;  %v1797_v61 = vmul.f32 %v1763_v63, %v1622_v32 }
 0x18c   : > { %v1718_v40 = vadd.f32 %v1717_v38, %v1685_v0  ;;  %v1827_v7 = vadd.f32 %v1826_v44, %v1794_v30  ;;  %v1690_v6 = vmul.f32 %v1627_v42, %v3131_v18  ;;  %v1765_v24 = vmul.f32 %v3140_v62, %v3140_v62 }
 0x18d   : > { %v3153_v23 = vadd.f32 %v3074_v12, %v1227_v17  ;;  %v1692_v12 = vmul.f32 %v1637_v56, %v3147_v47 }
 0x18e   : > { %v1188_v1 = vpop.f32.mrf.mxu2  ;;  %v1719_v35 = vadd.f32 %v1718_v40, %v1686_v45  ;;  %v1828_v0 = vadd.f32 %v1827_v7, %v1795_v59  ;;  %v1798_v45 = vmul.f32 %v1764_v58, %v1627_v42  ;;  %v1799_v39 = vmul.f32 %v1765_v24, %v1632_v14 }
 0x18f   : > { %v639_v26 = vpop.f32.mrf.mxu0  ;;  %v1228_v3 = vadd.f32 %v1188_v1, %v772_v5  ;;  %v776_v9 = vpop.f32.mrf.mxu1  ;;  %v1691_v1 = vmul.f32 %v1632_v14, %v3140_v62  ;;  %v1767_v40 = vmul.f32 %v3153_v23, %v3153_v23 }
 0x190   : > { %v1720_v54 = vadd.f32 %v1719_v35, %v1687_v46  ;;  %v774_v33 = vadd.f32 %v773_v41, %v639_v26  ;;  %v1829_v38 = vadd.f32 %v1828_v0, %v1796_v36  ;;  %v1642_v11 = vpop.permute.xlu2 %1641  ;;  %v1766_v26 = vmul.f32 %v3147_v47, %v3147_v47  ;;  %v1652_v7 = vpop.permute.xlu1 %1651 }
 0x191   : > { %v3159_v41 = vadd.f32 %v3098_v60, %v1228_v3  ;;  %v1693_v63 = vmul.f32 %v1642_v11, %v3153_v23 }
 0x192   : > { %v1721_v21 = vadd.f32 %v1720_v54, %v1688_v4  ;;  %v1830_v32 = vadd.f32 %v1829_v38, %v1797_v61  ;;  %v1647_v50 = vpop.permute.xlu0 %1646  ;;  %v1800_v59 = vmul.f32 %v1766_v26, %v1637_v56  ;;  %v1801_v4 = vmul.f32 %v1767_v40, %v1642_v11 }
 0x193   : > { %v1418_v13 = vpop.f32.mrf.mxu3  ;;  %v1768_v60 = vmul.f32 %v3159_v41, %v3159_v41 }
 0x194   : > { %v1722_v48 = vadd.f32 %v1721_v21, %v1689_v15  ;;  %v1831_v27 = vadd.f32 %v1830_v32, %v1798_v45 }
 0x195   : > { %v1802_v58 = vmul.f32 %v1768_v60, %v1647_v50 }
 0x196   : > { %v1190_v49 = vpop.f32.mrf.mxu2  ;;  %v1723_v55 = vadd.f32 %v1722_v48, %v1690_v6  ;;  %v1832_v14 = vadd.f32 %v1831_v27, %v1799_v39 }
 0x197   : > { %v642_v16 = vpop.f32.mrf.mxu0  ;;  %v1229_v31 = vadd.f32 %v1190_v49, %v774_v33  ;;  %v1694_v49 = vmul.f32 %v1647_v50, %v3159_v41  ;;  %v778_v15 = vpop.f32.mrf.mxu1 }
 0x198   : > { %v777_v25 = vadd.f32 %v776_v9, %v642_v16  ;;  %v1724_v44 = vadd.f32 %v1723_v55, %v1691_v1  ;;  %v1833_v36 = vadd.f32 %v1832_v14, %v1800_v59  ;;  %v1657_v3 = vpop.permute.xlu2 %1656 }
 0x199   : > { %v3164_v46 = vadd.f32 %v1418_v13, %v1229_v31 }
 0x19a   : > { %v1725_v35 = vadd.f32 %v1724_v44, %v1692_v12  ;;  %v1834_v33 = vadd.f32 %v1833_v36, %v1801_v4  ;;  %v1662_v45 = vpop.permute.xlu0 %1661 }
 0x19b   : > { %v1421_v30 = vpop.f32.mrf.mxu3  ;;  %v1769_v13 = vmul.f32 %v3164_v46, %v3164_v46  ;;  %v1695_v16 = vmul.f32 %v1652_v7, %v3164_v46 }
 0x19c   : > { %v1726_v54 = vadd.f32 %v1725_v35, %v1693_v63  ;;  %v1835_v31 = vadd.f32 %v1834_v33, %v1802_v58  ;;  %v1848_v33 = vld [vmem:[%s3525_s2] sm:$0x1] }
 0x19d   : > { %v1803_v6 = vmul.f32 %v1769_v13, %v1652_v7 }
 0x19e   : > { %v1193_v51 = vpop.f32.mrf.mxu2  ;;  %v1727_v21 = vadd.f32 %v1726_v54, %v1694_v49 }
 0x19f   : > { %v1230_v42 = vadd.f32 %v1193_v51, %v777_v25  ;;  %v644_v17 = vpop.f32.mrf.mxu0  ;;  %v1836_v1 = vadd.f32 %v1835_v31, %v1803_v6  ;;  %v3557_v31 = vld [vmem:[#allocation2_spill] sm:$0xff] }
 0x1a0   : > { %v779_v61 = vadd.f32 %v778_v15, %v644_v17  ;;  %v1728_v25 = vadd.f32 %v1727_v21, %v1695_v16 }
 0x1a1   : > { %v3169_v5 = vadd.f32 %v1421_v30, %v1230_v42 }
 0x1a3   : > { %v1770_v0 = vmul.f32 %v3169_v5, %v3169_v5  ;;  %v1696_v24 = vmul.f32 %v1657_v3, %v3169_v5  ;;  %v1423_v38 = vpop.f32.mrf.mxu3 }
 0x1a5   : > { %v1804_v11 = vmul.f32 %v1770_v0, %v1657_v3  ;;  %v1729_v26 = vadd.f32 %v1728_v25, %v1696_v24 }
 0x1a6   : > { %v1195_v56 = vpop.f32.mrf.mxu2 }
 0x1a7   : > { %v1231_v9 = vadd.f32 %v1195_v56, %v779_v61  ;;  %v1837_v39 = vadd.f32 %v1836_v1, %v1804_v11  ;;  %v3558_v11 = vld [vmem:[#allocation3_spill] sm:$0xff]  ;;  %v3559_v1 = vld [vmem:[#allocation4_spill] sm:$0xff] }
 0x1a9   : > { %v3178_v48 = vadd.f32 %v1423_v38, %v1231_v9  ;;  %v1861_v9 = vld [vmem:[%s3526_s3] sm:$0x1] }
 0x1ab   : > { %v1697_v32 = vmul.f32 %v1662_v45, %v3178_v48  ;;  %v1771_v55 = vmul.f32 %v3178_v48, %v3178_v48 }
 0x1ad   : > { %v1730_v12 = vadd.f32 %v1729_v26, %v1697_v32  ;;  %v1805_v40 = vmul.f32 %v1771_v55, %v1662_v45  ;;  %v3560_v55 = vld [vmem:[#allocation5_spill] sm:$0xff] }
 0x1af   : > { %v1731_v30 = vrot.slane %v1730_v12, 4  ;;  %v1838_v51 = vadd.f32 %v1837_v39, %v1805_v40 }
 0x1b1   : > { %v1732_v42 = vadd.f32 %v1731_v30, %v1730_v12  ;;  %v1839_v50 = vrot.slane %v1838_v51, 4  ;;  %v3561_v12 = vld [vmem:[#allocation6_spill] sm:$0xff] }
 0x1b3   : > { %v1733_v27 = vrot.slane %v1732_v42, 2  ;;  %v1840_v44 = vadd.f32 %v1839_v50, %v1838_v51  ;;  %v3562_v50 = vld [vmem:[#allocation7_spill] sm:$0xff] }
 0x1b5   : > { %v1734_v59 = vadd.f32 %v1733_v27, %v1732_v42  ;;  %v1841_v63 = vrot.slane %v1840_v44, 2 }
 0x1b7   : > { %v1735_v60 = vrot.slane %v1734_v59, 1  ;;  %v1842_v14 = vadd.f32 %v1841_v63, %v1840_v44  ;;  %v3563_v44 = vld [vmem:[#allocation8_spill] sm:$0xff]  ;;  %v3564_v63 = vld [vmem:[#allocation9_spill] sm:$0xff] }
 0x1b9   : > { %v1736_v35 = vadd.f32 %v1735_v60, %v1734_v59  ;;  %v1843_v4 = vrot.slane %v1842_v14, 1 }
 0x1bb   : > { %v1737_v17 = vmul.f32 0.00390625, %v1736_v35  ;;  %v1844_v49 = vadd.f32 %v1843_v4, %v1842_v14  ;;  %v3565_v14 = vld [vmem:[#allocation10_spill] sm:$0xff]  ;;  %v3566_v4 = vld [vmem:[#allocation11_spill] sm:$0xff] }
 0x1bd   : > { %v1845_v13 = vmul.f32 0.00390625, %v1844_v49  ;;  %v1846_v7 = vmul.f32 %v1737_v17, %v1737_v17  ;;  %v3567_v49 = vld [vmem:[#allocation12_spill] sm:$0xff] }
 0x1bf   : > { %v1847_v36 = vsub.f32 %v1845_v13, %v1846_v7  ;;  %v3568_v7 = vld [vmem:[#allocation13_spill] sm:$0xff] }
 0x1c1   : > { %v1849_v54 = vadd.f32 1e-05, %v1847_v36 }
 0x1c3   : > { %2554 = vrsqrt.f32 %v1849_v54  ;;  %vm1856_vm4 = vweird.f32 %v1849_v54 }
 0x1c9   : > { %v2555_v15 = vpop.eup %2554 }
 0x1ca   : > { %v1851_v58 = vmul.f32 %v2555_v15, %v1849_v54  ;;  %vm1857_vm3 = vweird.f32 %v2555_v15 }
 0x1cb   : > { %vm1858_vm5 = vmor %vm1856_vm4, %vm1857_vm3 }
 0x1cc   : > { %v1852_v16 = vmul.f32 %v2555_v15, %v1851_v58 }
 0x1ce   : > { %v1853_v0 = vmul.f32 0.5, %v1852_v16 }
 0x1d0   : > { %v1854_v61 = vsub.f32 1.5, %v1853_v0 }
 0x1d2   : > { %v1855_v3 = vmul.f32 %v2555_v15, %v1854_v61 }
 0x1d4   : > { %v1859_v56 = vsel %vm1858_vm5, %v2555_v15, %v1855_v3 }
 0x1d5   : > { %v1860_v21 = vmul.f32 %v1859_v56, %v1848_v33 }
 0x1d7   : > { %v1862_v6 = vmul.f32 %v1860_v21, %v1737_v17  ;;  %v1865_v24 = vperm.slane %v1860_v21, 0 }
 0x1d9   : > { %v1863_v38 = vsub.f32 %v1861_v9, %v1862_v6  ;;  %v1867_v25 = vmul.f32 %v1865_v24, %v3557_v31  ;;  %v1868_v45 = vmul.f32 %v1865_v24, %v3558_v11  ;;  %v1869_v26 = vmul.f32 %v1865_v24, %v3559_v1 }
 0x1da   : > { %v1870_v32 = vmul.f32 %v1865_v24, %v2820_v34  ;;  %v1871_v39 = vmul.f32 %v1865_v24, %v3560_v55  ;;  %v1872_v40 = vmul.f32 %v1865_v24, %v3561_v12  ;;  %v1873_v30 = vmul.f32 %v1865_v24, %v2865_v20 }
 0x1db   : > { %v1874_v51 = vmul.f32 %v1865_v24, %v2875_v37  ;;  %v1875_v42 = vmul.f32 %v1865_v24, %v2884_v53  ;;  %v1876_v27 = vmul.f32 %v1865_v24, %v3562_v50  ;;  %v1877_v59 = vmul.f32 %v1865_v24, %v3563_v44 }
 0x1dc   : > { %v1878_v60 = vmul.f32 %v1865_v24, %v3564_v63  ;;  %v1879_v35 = vmul.f32 %v1865_v24, %v3565_v14  ;;  %v1880_v34 = vmul.f32 %v1865_v24, %v3566_v4  ;;  %v1881_v17 = vmul.f32 %v1865_v24, %v2923_v28 }
 0x1dd   : > { %v1882_v13 = vmul.f32 %v1865_v24, %v3567_v49  ;;  %v1883_v20 = vmul.f32 %v1865_v24, %v2934_v57  ;;  %v1884_v37 = vmul.f32 %v1865_v24, %v3568_v7  ;;  %v1885_v53 = vmul.f32 %v1865_v24, %v2938_v8 }
 0x1de   : > { %v1886_v36 = vmul.f32 %v1865_v24, %v2940_v19  ;;  %v1887_v54 = vmul.f32 %v1865_v24, %v2942_v29  ;;  %v3210_v15 = vperm.slane %v1863_v38, 0  ;;  %v1888_v58 = vmul.f32 %v1865_v24, %v2946_v43 }
 0x1df   : > { %v1889_v16 = vmul.f32 %v1865_v24, %v2952_v52  ;;  %v1890_v28 = vmul.f32 %v1865_v24, %v3106_v22  ;;  %v1891_v0 = vmul.f32 %v1865_v24, %v3113_v10  ;;  %v1892_v57 = vmul.f32 %v1865_v24, %v3123_v2 }
 0x1e0   : > { %v1893_v61 = vmul.f32 %v1865_v24, %v3131_v18  ;;  %v1894_v8 = vmul.f32 %v1865_v24, %v3140_v62  ;;  %v1895_v19 = vmul.f32 %v1865_v24, %v3147_v47  ;;  %v1896_v29 = vmul.f32 %v1865_v24, %v3153_v23 }
 0x1e1   : > { %v1897_v3 = vmul.f32 %v1865_v24, %v3159_v41  ;;  %v1898_v43 = vmul.f32 %v1865_v24, %v3164_v46  ;;  %v1899_v52 = vmul.f32 %v1865_v24, %v3169_v5  ;;  %v1900_v22 = vmul.f32 %v1865_v24, %v3178_v48 }
 0x1e2   : > { %v3226_v10 = vadd.f32 %v3210_v15, %v1867_v25  ;;  %v3229_v2 = vadd.f32 %v3210_v15, %v1868_v45  ;;  %v3232_v18 = vadd.f32 %v3210_v15, %v1869_v26  ;;  %v3235_v62 = vadd.f32 %v3210_v15, %v1870_v32 }
 0x1e3   : > { %v3238_v47 = vadd.f32 %v3210_v15, %v1871_v39  ;;  %v3241_v23 = vadd.f32 %v3210_v15, %v1872_v40  ;;  %v3244_v41 = vadd.f32 %v3210_v15, %v1873_v30  ;;  %v3247_v46 = vadd.f32 %v3210_v15, %v1874_v51 }
 0x1e4   : > { %v3250_v5 = vadd.f32 %v3210_v15, %v1875_v42  ;;  %v3253_v48 = vadd.f32 %v3210_v15, %v1876_v27  ;;  %v3256_v33 = vadd.f32 %v3210_v15, %v1877_v59  ;;  %v3259_v56 = vadd.f32 %v3210_v15, %v1878_v60 }
 0x1e5   : > { %v3262_v21 = vadd.f32 %v3210_v15, %v1879_v35  ;;  %v3265_v6 = vadd.f32 %v3210_v15, %v1880_v34  ;;  %v3268_v24 = vadd.f32 %v3210_v15, %v1881_v17  ;;  %v3271_v9 = vadd.f32 %v3210_v15, %v1882_v13 }
 0x1e6   : > { %v3274_v38 = vadd.f32 %v3210_v15, %v1883_v20  ;;  %v3277_v31 = vadd.f32 %v3210_v15, %v1884_v37  ;;  %v3280_v25 = vadd.f32 %v3210_v15, %v1885_v53  ;;  %v3283_v11 = vadd.f32 %v3210_v15, %v1886_v36 }
 0x1e7   : > { %v3286_v45 = vadd.f32 %v3210_v15, %v1887_v54  ;;  %v3289_v1 = vadd.f32 %v3210_v15, %v1888_v58  ;;  %v3292_v26 = vadd.f32 %v3210_v15, %v1889_v16  ;;  %v3295_v32 = vadd.f32 %v3210_v15, %v1890_v28 }
 0x1e8   : > { %v3298_v55 = vadd.f32 %v3210_v15, %v1891_v0  ;;  %v3301_v39 = vadd.f32 %v3210_v15, %v1892_v57  ;;  %v3304_v12 = vadd.f32 %v3210_v15, %v1893_v61  ;;  %v3307_v40 = vadd.f32 %v3210_v15, %v1894_v8 }
 0x1e9   : > { %v3310_v30 = vadd.f32 %v3210_v15, %v1895_v19  ;;  %v3313_v51 = vadd.f32 %v3210_v15, %v1899_v52  ;;  %v3316_v42 = vadd.f32 %v3210_v15, %v1900_v22  ;;  %vm1938_vm6 = vcmp.ge.f32.partialorder %v3226_v10, 0.0 }
 0x1ea   : > { %vm1939_vm7 = vcmp.ge.f32.partialorder %v3229_v2, 0.0  ;;  %vm1940_vm8 = vcmp.ge.f32.partialorder %v3232_v18, 0.0  ;;  %vm1941_vm9 = vcmp.ge.f32.partialorder %v3235_v62, 0.0  ;;  %vm1942_vm10 = vcmp.ge.f32.partialorder %v3238_v47, 0.0 }
 0x1eb   : > { %vm1943_vm11 = vcmp.ge.f32.partialorder %v3241_v23, 0.0  ;;  %vm1944_vm12 = vcmp.ge.f32.partialorder %v3244_v41, 0.0  ;;  %vm1945_vm13 = vcmp.ge.f32.partialorder %v3247_v46, 0.0  ;;  %vm1946_vm14 = vcmp.ge.f32.partialorder %v3250_v5, 0.0 }
 0x1ec   : > { %vm1947_vm15 = vcmp.ge.f32.partialorder %v3253_v48, 0.0  ;;  %vm1948_vm0 = vcmp.ge.f32.partialorder %v3256_v33, 0.0  ;;  %vm1949_vm1 = vcmp.ge.f32.partialorder %v3259_v56, 0.0  ;;  %v1972_v50 = vmul.f32 0.2, %v3226_v10 }
 0x1ed   : > { %v3333_v27 = vadd.f32 %v3210_v15, %v1896_v29  ;;  %v1973_v44 = vmul.f32 0.2, %v3229_v2  ;;  %v1974_v59 = vmul.f32 0.2, %v3232_v18  ;;  %v1975_v63 = vmul.f32 0.2, %v3235_v62 }
 0x1ee   : > { %v3341_v60 = vadd.f32 %v3210_v15, %v1897_v3  ;;  %v1976_v14 = vmul.f32 0.2, %v3238_v47  ;;  %v1977_v35 = vmul.f32 0.2, %v3241_v23  ;;  %v1978_v4 = vmul.f32 0.2, %v3244_v41 }
 0x1ef   : > { %v3349_v34 = vadd.f32 %v3210_v15, %v1898_v43  ;;  %v1979_v17 = vmul.f32 0.2, %v3247_v46  ;;  %v1980_v49 = vmul.f32 0.2, %v3250_v5  ;;  %v1981_v13 = vmul.f32 0.2, %v3253_v48 }
 0x1f0   : > { %v1982_v20 = vmul.f32 0.2, %v3256_v33  ;;  %v1983_v7 = vmul.f32 0.2, %v3259_v56  ;;  %v1984_v37 = vmul.f32 0.2, %v3262_v21  ;;  %v2006_v53 = vsel %vm1938_vm6, %v3226_v10, %v1972_v50 }
 0x1f1   : > { %vm1956_vm2 = vcmp.ge.f32.partialorder %v3280_v25, 0.0  ;;  %v1985_v36 = vmul.f32 0.2, %v3265_v6  ;;  %v1986_v54 = vmul.f32 0.2, %v3268_v24  ;;  %v2007_v58 = vsel %vm1939_vm7, %v3229_v2, %v1973_v44 }
 0x1f2   : > { %v1987_v15 = vmul.f32 0.2, %v3271_v9  ;;  %vm1958_vm4 = vcmp.ge.f32.partialorder %v3286_v45, 0.0  ;;  %v1988_v16 = vmul.f32 0.2, %v3274_v38  ;;  %v2008_v57 = vsel %vm1940_vm8, %v3232_v18, %v1974_v59 }
 0x1f3   : > { %v1989_v28 = vmul.f32 0.2, %v3277_v31  ;;  %v1990_v0 = vmul.f32 0.2, %v3280_v25  ;;  %vm1960_vm6 = vcmp.ge.f32.partialorder %v3292_v26, 0.0  ;;  %v2009_v29 = vsel %vm1941_vm9, %v3235_v62, %v1975_v63 }
 0x1f4   : > { %v1991_v61 = vmul.f32 0.2, %v3283_v11  ;;  %v1992_v8 = vmul.f32 0.2, %v3286_v45  ;;  %v1993_v19 = vmul.f32 0.2, %v3289_v1  ;;  %v2010_v22 = vsel %vm1942_vm10, %v3238_v47, %v1976_v14 }
 0x1f5   : > { %vm1962_vm7 = vcmp.ge.f32.partialorder %v3298_v55, 0.0  ;;  %v1994_v3 = vmul.f32 0.2, %v3292_v26  ;;  %v1995_v43 = vmul.f32 0.2, %v3295_v32  ;;  %vm1964_vm8 = vcmp.ge.f32.partialorder %v3304_v12, 0.0 }
 0x1f6   : > { %v1996_v52 = vmul.f32 0.2, %v3298_v55  ;;  %vm1965_vm3 = vcmp.ge.f32.partialorder %v3307_v40, 0.0  ;;  %v1997_v10 = vmul.f32 0.2, %v3301_v39  ;;  %v2011_v62 = vsel %vm1943_vm11, %v3241_v23, %v1977_v35 }
 0x1f7   : > { %v2004_v2 = vmul.f32 0.2, %v3313_v51  ;;  %v2005_v18 = vmul.f32 0.2, %v3316_v42  ;;  %vm1966_vm9 = vcmp.ge.f32.partialorder %v3310_v30, 0.0  ;;  %vm1967_vm5 = vcmp.ge.f32.partialorder %v3333_v27, 0.0 }
 0x1f8   : > { %v1998_v47 = vmul.f32 0.2, %v3304_v12  ;;  %v1999_v50 = vmul.f32 0.2, %v3307_v40  ;;  %v2012_v44 = vsel %vm1944_vm12, %v3244_v41, %v1978_v4  ;;  %v2013_v59 = vsel %vm1945_vm13, %v3247_v46, %v1979_v17 }
 0x1f9   : > { %vm1968_vm10 = vcmp.ge.f32.partialorder %v3341_v60, 0.0  ;;  %v2014_v23 = vsel %vm1946_vm14, %v3250_v5, %v1980_v49  ;;  %v2015_v41 = vsel %vm1947_vm15, %v3253_v48, %v1981_v13  ;;  %v2016_v46 = vsel %vm1948_vm0, %v3256_v33, %v1982_v20 }
 0x1fa   : > { %v2017_v63 = vsel %vm1949_vm1, %v3259_v56, %v1983_v7  ;;  %vm3569_vm11 = vcmp.ge.f32.partialorder %v3262_v21, 0.0  ;;  %vm3570_vm12 = vcmp.ge.f32.partialorder %v3265_v6, 0.0  ;;  %v2438_v35 = vpack.c.bf16 %v2007_v58, %v2006_v53 }
 0x1fb   : > { %v2018_v14 = vsel %vm3569_vm11, %v3262_v21, %v1984_v37  ;;  %v2019_v5 = vsel %vm3570_vm12, %v3265_v6, %v1985_v36  ;;  %v2443_v4 = vpack.c.bf16 %v2009_v29, %v2008_v57  ;;  %vm3571_vm13 = vcmp.ge.f32.partialorder %v3313_v51, 0.0 }
 0x1fc   : > { %v2038_v48 = vsel %vm3571_vm13, %v3313_v51, %v2004_v2  ;;  %vm3572_vm14 = vcmp.ge.f32.partialorder %v3316_v42, 0.0  ;;  %v2448_v56 = vpack.c.bf16 %v2011_v62, %v2010_v22  ;;  %v2453_v17 = vpack.c.bf16 %v2013_v59, %v2012_v44  ;;  %2439 = vst [vmem:[%s3419_s15] sm:$0xff] %v2438_v35  }
 0x1fd   : > { %v2039_v33 = vsel %vm3572_vm14, %v3316_v42, %v2005_v18  ;;  %v2000_v21 = vmul.f32 0.2, %v3310_v30  ;;  %vm3573_vm15 = vcmp.ge.f32.partialorder %v3268_v24, 0.0  ;;  %vm3574_vm0 = vcmp.ge.f32.partialorder %v3271_v9, 0.0  ;;  %2524 = vst [vmem:[%s3419_s15 + $0x8] sm:$0xff] %v2443_v4  }
 0x1fe   : > { %v2020_v49 = vsel %vm3573_vm15, %v3268_v24, %v1986_v54  ;;  %v2021_v6 = vsel %vm3574_vm0, %v3271_v9, %v1987_v15  ;;  %v2458_v51 = vpack.c.bf16 %v2015_v41, %v2014_v23  ;;  %v2001_v13 = vmul.f32 0.2, %v3333_v27  ;;  %2525 = vst [vmem:[%s3419_s15 + $0x10] sm:$0xff] %v2448_v56  }
 0x1ff   : > { %vm3575_vm1 = vcmp.ge.f32.partialorder %v3274_v38, 0.0  ;;  %vm3576_vm11 = vcmp.ge.f32.partialorder %v3277_v31, 0.0  ;;  %v2463_v24 = vpack.c.bf16 %v2017_v63, %v2016_v46  ;;  %v2024_v9 = vsel %vm1956_vm2, %v3280_v25, %v1990_v0  ;;  %2526 = vst [vmem:[%s3419_s15 + $0x18] sm:$0xff] %v2453_v17  }
 0x200   : > { %v2022_v42 = vsel %vm3575_vm1, %v3274_v38, %v1988_v16  ;;  %v2023_v20 = vsel %vm3576_vm11, %v3277_v31, %v1989_v28  ;;  %vm3577_vm12 = vcmp.ge.f32.partialorder %v3283_v11, 0.0  ;;  %v2468_v37 = vpack.c.bf16 %v2019_v5, %v2018_v14  ;;  %2527 = vst [vmem:[%s3419_s15 + $0x20] sm:$0xff] %v2458_v51  }
 0x201   : > { %v2025_v7 = vsel %vm3577_vm12, %v3283_v11, %v1991_v61  ;;  %v2518_v53 = vpack.c.bf16 %v2039_v33, %v2038_v48  ;;  %v2002_v38 = vmul.f32 0.2, %v3341_v60  ;;  %v2026_v31 = vsel %vm1958_vm4, %v3286_v45, %v1992_v8  ;;  %2528 = vst [vmem:[%s3419_s15 + $0x28] sm:$0xff] %v2463_v24  }
 0x202   : > { %vm3578_vm13 = vcmp.ge.f32.partialorder %v3289_v1, 0.0  ;;  %v2473_v25 = vpack.c.bf16 %v2021_v6, %v2020_v49  ;;  %v2003_v54 = vmul.f32 0.2, %v3349_v34  ;;  %v2028_v11 = vsel %vm1960_vm6, %v3292_v26, %v1994_v3  ;;  %2529 = vst [vmem:[%s3419_s15 + $0x30] sm:$0xff] %v2468_v37  }
 0x203   : > { %v2027_v36 = vsel %vm3578_vm13, %v3289_v1, %v1993_v19  ;;  %vm3579_vm2 = vcmp.ge.f32.partialorder %v3295_v32, 0.0  ;;  %v2478_v45 = vpack.c.bf16 %v2023_v20, %v2022_v42  ;;  %vm1969_vm4 = vcmp.ge.f32.partialorder %v3349_v34, 0.0  ;;  %2539 = vst [vmem:[%s3419_s15 + $0x80] sm:$0xff] %v2518_v53  }
 0x204   : > { %v2029_v15 = vsel %vm3579_vm2, %v3295_v32, %v1995_v43  ;;  %v2030_v1 = vsel %vm1962_vm7, %v3298_v55, %v1996_v52  ;;  %vm3580_vm14 = vcmp.ge.f32.partialorder %v3301_v39, 0.0  ;;  %v2483_v26 = vpack.c.bf16 %v2025_v7, %v2024_v9  ;;  %2530 = vst [vmem:[%s3419_s15 + $0x38] sm:$0xff] %v2473_v25  }
 0x205   : > { %v2031_v58 = vsel %vm3580_vm14, %v3301_v39, %v1997_v10  ;;  %v2032_v32 = vsel %vm1964_vm8, %v3304_v12, %v1998_v47  ;;  %v2033_v16 = vsel %vm1965_vm3, %v3307_v40, %v1999_v50  ;;  %v2488_v55 = vpack.c.bf16 %v2027_v36, %v2026_v31  ;;  %2531 = vst [vmem:[%s3419_s15 + $0x40] sm:$0xff] %v2478_v45  }
 0x206   : > { %v2034_v39 = vsel %vm1966_vm9, %v3310_v30, %v2000_v21  ;;  %v2035_v28 = vsel %vm1967_vm5, %v3333_v27, %v2001_v13  ;;  %v2493_v12 = vpack.c.bf16 %v2029_v15, %v2028_v11  ;;  %v2036_v40 = vsel %vm1968_vm10, %v3341_v60, %v2002_v38  ;;  %2532 = vst [vmem:[%s3419_s15 + $0x48] sm:$0xff] %v2483_v26  }
 0x207   : > { %v2037_v0 = vsel %vm1969_vm4, %v3349_v34, %v2003_v54  ;;  %v2498_v57 = vpack.c.bf16 %v2031_v58, %v2030_v1  ;;  %v2503_v61 = vpack.c.bf16 %v2033_v16, %v2032_v32  ;;  %2533 = vst [vmem:[%s3419_s15 + $0x50] sm:$0xff] %v2488_v55   ;;  %v2508_v30 = vpack.c.bf16 %v2035_v28, %v2034_v39 }
 0x208   : > { %2534 = vst [vmem:[%s3419_s15 + $0x58] sm:$0xff] %v2493_v12   ;;  %v2513_v8 = vpack.c.bf16 %v2037_v0, %v2036_v40 }
 0x209   : > { %2535 = vst [vmem:[%s3419_s15 + $0x60] sm:$0xff] %v2498_v57  }
 0x20a   : > { %2536 = vst [vmem:[%s3419_s15 + $0x68] sm:$0xff] %v2503_v61  }
 0x20b   : > { %2537 = vst [vmem:[%s3419_s15 + $0x70] sm:$0xff] %v2508_v30  }
 0x20c   : > { %2538 = vst [vmem:[%s3419_s15 + $0x78] sm:$0xff] %v2513_v8  }
 0x20d PF: > { %s15_s18 = sadd.s32 1, %s2562_s18  }
 0x20e   : > { %p12_p4 = scmp.ge.s32.totalorder %s15_s18, 4  }
 0x210   :  { %14 = sbr.rel (!%p12_p4) target bundleno = 1 (0x1), region = 73 }

// kernel: critic_forward.6
= control target key start
LH: loop header
LB: loop body
LE: loop exit
PB: predicated region body
PF: predicated region fallthrough
CT: control target
= control target key end

     0   :  { %s1119_s18 = smov 0   ;;  %s1302_s0 = inlined_call_operand.vmem [shape: bf16[2,88,32], index: 0, kind: input, shape index: {}]   ;;  %s1303_s1 = inlined_call_operand.vmem [shape: bf16[4,32,128], index: 1, kind: input, shape index: {}]   ;;  %s1304_s2 = inlined_call_operand.vmem [shape: f32[1,128], index: 2, kind: input, shape index: {}]   ;;  %s1305_s3 = inlined_call_operand.vmem [shape: f32[1,128], index: 3, kind: input, shape index: {}]   ;;  %s1306_s4 = inlined_call_operand.vmem [shape: f32[72,1], index: 4, kind: input, shape index: {}]   ;;  %s1307_s5 = inlined_call_operand.vmem [shape: bf16[2,72,128], index: 5, kind: output, shape index: {}]  }
   0x1 LB: > { %s917_s19 = sadd.s32 4294967295, %s1086_s18   ;;  %p921_p0 = scmp.ge.s32.totalorder %s1086_s18, 1  ;;  %s1086_s18 = sphi %s1119_s18, %s15_s18  }
   0x2   : > { %p187_p1 = scmp.lt.s32.totalorder %s1086_s18, 3 }
   0x4   : > { %p188_p2 = pnand %p921_p0, %p187_p1 }
   0x5   : > { %p215_p3 = scmp.lt.s32.totalorder (!%p188_p2), %s917_s19, 1 }
   0x6   : > { %191 = sbr.rel (%p188_p2) target bundleno = 290 (0x122), region = 40 }
   0xb   : > { %v1027_v0 = vld [vmem:[%s1303_s1 + $0x8] sm:$0xff]  ;;  %v1037_v1 = vld [vmem:[%s1303_s1 + $0x38] sm:$0xff]  ;;  %v1026_v4 = vld [vmem:[%s1303_s1] sm:$0xff]  ;;  %s1309_s19 = smov (!%p215_p3, %s917_s19), 1  ;;  %v1088_v9 = vmov 0   ;;  %vm322_vm0 = vcmask 261120  }
   0xc   : > { %v1029_v2 = vld [vmem:[%s1303_s1 + $0x18] sm:$0xff]  ;;  %v1035_v3 = vld [vmem:[%s1303_s1 + $0x28] sm:$0xff]  ;;  %401 = vmatpush.bf16.msra.mxu1 %v1027_v0  ;;  %628 = vmatpush.bf16.msra.mxu3 %v1037_v1  ;;  %v1036_v5 = vld [vmem:[%s1303_s1 + $0x30] sm:$0xff]  ;;  %s1061_s13 = smul.u32 44, %s1309_s19  ;;  %vm585_vm1 = vcmask 1046528  }
   0xd   : > { %344 = vmatpush.bf16.msra.mxu0 %v1029_v2  ;;  %540 = vmatpush.bf16.msra.mxu2 %v1035_v3  ;;  %v1028_v6 = vld [vmem:[%s1303_s1 + $0x10] sm:$0xff]  ;;  %v1034_v7 = vld [vmem:[%s1303_s1 + $0x20] sm:$0xff]  ;;  %vm270_vm2 = vsmask.f32 7424  ;;  %v665_v33 = vld [vmem:[%s1306_s4 + $0x8] sm:$0xff]  ;;  %s1062_s14 = smul.u32 36, %s1309_s19 }
   0xe   : > { %v664_v8 = vld [vmem:[%s1306_s4] sm:$0xff]  ;;  %1072 = vset.pattern.permute.xlu0 %v1088_v9  ;;  %1073 = vset.pattern.permute.xlu1 %v1088_v9  ;;  %s1160_s16 = scalar_lea.vmem %s1302_s0, %s1061_s13  ;;  %v666_v36 = vld [vmem:[%s1306_s4 + $0x10] sm:$0xff]  ;;  %v667_v50 = vld [vmem:[%s1306_s4 + $0x18] sm:$0xff] }
   0xf   : > { %675 = vperm.xlu0 %1072, %v664_v8   ;;  %1074 = vset.pattern.permute.xlu2 %v1088_v9  ;;  %v1022_v10 = vld [vmem:[%s1160_s16] sm:$0xff]  ;;  %v1077_v12 = vld [vmem:[%s1160_s16 + $0x4] sm:$0xf0]  ;;  %v1030_v13 = vld [vmem:[%s1160_s16 + $0xc] sm:$0xff] }
  0x10   : > { %402 = vmatpush.bf16.msra.mxu1 %v1026_v4  ;;  %629 = vmatpush.bf16.msra.mxu3 %v1036_v5  ;;  %v429_v11 = vld [vmem:[%s1160_s16 + $0x4] sm:$0xff]   ;;  %v274_v16 = vshll.u32 %v1022_v10, 16  ;;  %v272_v17 = vshrl.u32 %v1022_v10, 16  ;;  %v476_v19 = vshll.u32 %v1030_v13, 16  ;;  %v587_v21 = vrot.slane %v1030_v13, 1  ;;  %v1024_v34 = vld [vmem:[%s1160_s16 + $0x10] sm:$0xff] }
  0x11   : > { %345 = vmatpush.bf16.msra.mxu0 %v1028_v6  ;;  %541 = vmatpush.bf16.msra.mxu2 %v1034_v7  ;;  %v1078_v14 = vld [vmem:[%s1160_s16 + $0x4] sm:$0xe]  ;;  %v1023_v15 = vld [vmem:[%s1160_s16 + $0x8] sm:$0xff]  ;;  %v469_v24 = vshrl.u32 %v429_v11, 16  ;;  %v471_v25 = vshll.u32 %v429_v11, 16  ;;  %v1031_v37 = vld [vmem:[%s1160_s16 + $0x14] sm:$0xff] }
  0x12   : > { %v279_v18 = vshll.u32 %v1023_v15, 16  ;;  %v1079_v20 = vor.u32 %v1078_v14, %v1077_v12  ;;  %v276_v22 = vrot.slane %v274_v16, 1  ;;  %v478_v29 = vrot.slane %v476_v19, 1  ;;  %685 = vperm.xlu1 %1073, %v666_v36   ;;  %v1025_v51 = vld [vmem:[%s1160_s16 + $0x18] sm:$0xff]  ;;  %v234_v60 = vld [vmem:[%s1160_s16 + $0x20] sm:$0xf] }
  0x13   : > { %965 = vmatmul.msk.bf16.vlgmr.msra.gmra.mxu1 %vm322_vm0, %v1022_v10  ;;  %v473_v28 = vrot.slane %v471_v25, 1  ;;  %v283_v38 = vshrl.u32 %v1023_v15, 16  ;;  %v287_v39 = vshll.u32 %v1024_v34, 16  ;;  %v480_v40 = vshrl.u32 %v1030_v13, 16  ;;  %v1032_v52 = vld [vmem:[%s1160_s16 + $0x1c] sm:$0xff]  ;;  %v670_v5 = vld [vmem:[%s1306_s4 + $0x30] sm:$0xff] }
  0x14   : > { %v281_v23 = vrot.slane %v279_v18, 1  ;;  %v586_v26 = vrot.slane %v1079_v20, 1  ;;  %v277_v27 = vor.u32 %v276_v22, %v272_v17  ;;  %v484_v41 = vshll.u32 %v1031_v37, 16  ;;  %v239_v61 = vld [vmem:[%s1160_s16 + $0x24] sm:$0x1]  ;;  %v671_v9 = vld [vmem:[%s1306_s4 + $0x38] sm:$0xff] }
  0x15   : > { %v474_v32 = vor.u32 %v473_v28, %v469_v24  ;;  %v589_v42 = vrot.slane %v1031_v37, 1  ;;  %v289_v44 = vrot.slane %v287_v39, 1  ;;  %v482_v45 = vor.u32 %v480_v40, %v478_v29  ;;  %v988_v7 = vld [vmem:[%s1160_s16 + $0x24] sm:$0xf]  ;;  %v1033_v8 = vld [vmem:[%s1160_s16 + $0x24] sm:$0x10]  ;;  %s224_s16 = scalar_lea.vmem %s1307_s5, %s1062_s14 }
  0x16   : > { %v588_v30 = vsel %vm585_vm1, %v586_v26, %v587_v21  ;;  %v282_v31 = vsel %vm270_vm2, %v277_v27, %v281_v23  ;;  %v285_v43 = vor.u32 %v283_v38, %v281_v23  ;;  %v486_v46 = vrot.slane %v484_v41, 1  ;;  %v668_v10 = vld [vmem:[%s1306_s4 + $0x20] sm:$0xff]  ;;  %v669_v19 = vld [vmem:[%s1306_s4 + $0x28] sm:$0xff] }
  0x17   : > { %1015 = vmatmul.msk.bf16.vlgmr.msra.gmra.mxu3 %vm322_vm0, %v588_v30  ;;  %952 = vmatmul.msk.bf16.vlgmr.msra.gmra.mxu0 %vm322_vm0, %v282_v31  ;;  %v479_v35 = vsel %vm270_vm2, %v474_v32, %v478_v29  ;;  %v590_v47 = vsel %vm585_vm1, %v587_v21, %v589_v42  ;;  %v291_v53 = vshrl.u32 %v1024_v34, 16  ;;  %v295_v54 = vshll.u32 %v1025_v51, 16  ;;  %v672_v25 = vld [vmem:[%s1306_s4 + $0x40] sm:$0xff] }
  0x18   : > { %680 = vperm.xlu0 %1072, %v665_v33   ;;  %998 = vmatmul.msk.bf16.vlgmr.msra.gmra.mxu2 %vm322_vm0, %v479_v35  ;;  %v290_v48 = vsel %vm270_vm2, %v285_v43, %v289_v44  ;;  %v487_v49 = vsel %vm270_vm2, %v482_v45, %v486_v46  ;;  %v488_v55 = vshrl.u32 %v1031_v37, 16  ;;  %v492_v56 = vshll.u32 %v1032_v52, 16 }
  0x19   : > { %v591_v57 = vrot.slane %v1032_v52, 1  ;;  %v293_v58 = vor.u32 %v291_v53, %v289_v44  ;;  %v297_v59 = vrot.slane %v295_v54, 1  ;;  %v263_v2 = vunpack.c.l.b16 %v234_v60  ;;  %695 = vperm.xlu2 %1074, %v668_v10  }
  0x1a   : > { %690 = vperm.xlu1 %1073, %v667_v50   ;;  %v490_v62 = vor.u32 %v488_v55, %v486_v46  ;;  %v494_v63 = vrot.slane %v492_v56, 1  ;;  %v264_v3 = vunpack.c.l.b16 %v239_v61  ;;  %v989_v11 = vor.u32 %v1033_v8, %v988_v7 }
  0x1b   : > { %v592_v0 = vsel %vm585_vm1, %v589_v42, %v591_v57  ;;  %v298_v1 = vsel %vm270_vm2, %v293_v58, %v297_v59  ;;  %v299_v12 = vshrl.u32 %v1025_v51, 16  ;;  %v496_v14 = vshrl.u32 %v1032_v52, 16 }
  0x1c   : > { %v495_v4 = vsel %vm270_vm2, %v490_v62, %v494_v63  ;;  %v269_v6 = vpack.c.b16 %v264_v3, %v263_v2  ;;  %v593_v16 = vrot.slane %v989_v11, 1  ;;  %v371_v26 = vpack.c.b16 %v263_v2, %v263_v2 }
  0x1d   : > { %v301_v17 = vor.u32 %v299_v12, %v297_v59  ;;  %v498_v20 = vor.u32 %v496_v14, %v494_v63  ;;  %v504_v28 = vshrl.u32 %v989_v11, 16 }
  0x1e   : > { %v303_v13 = vshll.u32 %v269_v6, 16  ;;  %v594_v22 = vsel %vm585_vm1, %v591_v57, %v593_v16  ;;  %v307_v27 = vshrl.u32 %v269_v6, 16 }
  0x20   : > { %705 = vperm.xlu0 %1072, %v670_v5   ;;  %v305_v18 = vrot.slane %v303_v13, 1 }
  0x21   : > { %700 = vperm.xlu2 %1074, %v669_v19  }
  0x22   : > { %710 = vperm.xlu1 %1073, %v671_v9   ;;  %v306_v23 = vsel %vm270_vm2, %v301_v17, %v305_v18  ;;  %v309_v29 = vor.u32 %v307_v27, %v305_v18 }
  0x23   : > { %966 = vmatmul.msk.bf16.gmra.mxu1 %vm322_vm0, %v1023_v15  ;;  %v500_v15 = vshll.u32 %v989_v11, 16 }
  0x25   : > { %v502_v21 = vrot.slane %v500_v15, 1 }
  0x27   : > { %1016 = vmatmul.msk.bf16.gmra.mxu3 %vm322_vm0, %v590_v47  ;;  %953 = vmatmul.msk.bf16.gmra.mxu0 %vm322_vm0, %v290_v48  ;;  %v503_v24 = vsel %vm270_vm2, %v498_v20, %v502_v21  ;;  %v506_v30 = vor.u32 %v504_v28, %v502_v21 }
  0x28   : > { %999 = vmatmul.msk.bf16.gmra.mxu2 %vm322_vm0, %v487_v49 }
  0x29   : > { %715 = vperm.xlu2 %1074, %v672_v25  }
  0x33   : > { %967 = vmatmul.msk.bf16.gmra.mxu1 %vm322_vm0, %v1024_v34 }
  0x37   : > { %1017 = vmatmul.msk.bf16.gmra.mxu3 %vm322_vm0, %v592_v0  ;;  %954 = vmatmul.msk.bf16.gmra.mxu0 %vm322_vm0, %v298_v1 }
  0x38   : > { %1000 = vmatmul.msk.bf16.gmra.mxu2 %vm322_vm0, %v495_v4 }
  0x43   : > { %968 = vmatmul.msk.bf16.gmra.mxu1 %vm322_vm0, %v1025_v51 }
  0x47   : > { %1018 = vmatmul.msk.bf16.gmra.mxu3 %vm322_vm0, %v594_v22  ;;  %955 = vmatmul.msk.bf16.gmra.mxu0 %vm322_vm0, %v306_v23 }
  0x48   : > { %1001 = vmatmul.msk.bf16.gmra.mxu2 %vm322_vm0, %v503_v24 }
  0x53   : > { %969 = vmatmul.msk.bf16.gmra.mxu1 %vm322_vm0, %v371_v26 }
  0x57   : > { %1019 = vmatmul.msk.bf16.gmra.mxu3 %vm322_vm0, %v593_v16  ;;  %956 = vmatmul.msk.bf16.gmra.mxu0 %vm322_vm0, %v309_v29 }
  0x58   : > { %1002 = vmatmul.msk.bf16.gmra.mxu2 %vm322_vm0, %v506_v30 }
  0x73   : > { %v696_v7 = vpop.permute.xlu2 %695 }
  0x81   : > { %v676_v55 = vpop.permute.xlu0 %675 }
  0x84   : > { %v686_v2 = vpop.permute.xlu1 %685 }
  0x8a   : > { %v681_v16 = vpop.permute.xlu0 %680 }
  0x8c   : > { %v691_v27 = vpop.permute.xlu1 %690 }
  0x90   : > { %v404_v31 = vpop.f32.mrf.mxu1 }
  0x94   : > { %v347_v32 = vpop.f32.mrf.mxu0 }
  0x95   : > { %v405_v57 = vadd.f32 %v404_v31, %v347_v32 }
  0x98   : > { %v406_v33 = vpop.f32.mrf.mxu1 }
  0x9a   : > { %v631_v34 = vpop.f32.mrf.mxu3 }
  0x9b   : > { %v543_v36 = vpop.f32.mrf.mxu2 }
  0x9c   : > { %v349_v35 = vpop.f32.mrf.mxu0  ;;  %v567_v63 = vadd.f32 %v543_v36, %v405_v57 }
  0x9d   : > { %v407_v58 = vadd.f32 %v406_v33, %v349_v35 }
  0x9e   : > { %v1234_v9 = vadd.f32 %v631_v34, %v567_v63 }
  0xa0   : > { %v409_v37 = vpop.f32.mrf.mxu1  ;;  %v742_v20 = vmul.f32 %v1234_v9, %v1234_v9  ;;  %v718_v29 = vmul.f32 %v676_v55, %v1234_v9 }
  0xa2   : > { %v633_v38 = vpop.f32.mrf.mxu3  ;;  %v751_v34 = vmul.f32 %v742_v20, %v676_v55 }
  0xa3   : > { %v545_v40 = vpop.f32.mrf.mxu2 }
  0xa4   : > { %v352_v39 = vpop.f32.mrf.mxu0  ;;  %v568_v62 = vadd.f32 %v545_v40, %v407_v58  ;;  %v706_v58 = vpop.permute.xlu0 %705 }
  0xa5   : > { %v410_v59 = vadd.f32 %v409_v37, %v352_v39 }
  0xa6   : > { %v1232_v5 = vadd.f32 %v633_v38, %v568_v62 }
  0xa8   : > { %v411_v41 = vpop.f32.mrf.mxu1  ;;  %v743_v17 = vmul.f32 %v1232_v5, %v1232_v5  ;;  %v719_v23 = vmul.f32 %v681_v16, %v1232_v5 }
  0xaa   : > { %v636_v42 = vpop.f32.mrf.mxu3  ;;  %v752_v26 = vmul.f32 %v743_v17, %v681_v16  ;;  %v727_v39 = vadd.f32 %v719_v23, %v718_v29 }
  0xab   : > { %v548_v44 = vpop.f32.mrf.mxu2 }
  0xac   : > { %v354_v43 = vpop.f32.mrf.mxu0  ;;  %v569_v1 = vadd.f32 %v548_v44, %v410_v59 }
  0xad   : > { %v412_v0 = vadd.f32 %v411_v41, %v354_v43  ;;  %v760_v43 = vadd.f32 %v752_v26, %v751_v34 }
  0xae   : > { %v1236_v10 = vadd.f32 %v636_v42, %v569_v1  ;;  %v711_v1 = vpop.permute.xlu1 %710 }
  0xb0   : > { %v414_v45 = vpop.f32.mrf.mxu1  ;;  %v744_v21 = vmul.f32 %v1236_v10, %v1236_v10  ;;  %v720_v30 = vmul.f32 %v686_v2, %v1236_v10 }
  0xb2   : > { %v638_v46 = vpop.f32.mrf.mxu3  ;;  %v753_v35 = vmul.f32 %v744_v21, %v686_v2 }
  0xb3   : > { %v550_v48 = vpop.f32.mrf.mxu2 }
  0xb4   : > { %v357_v47 = vpop.f32.mrf.mxu0  ;;  %v570_v6 = vadd.f32 %v550_v48, %v412_v0 }
  0xb5   : > { %v415_v3 = vadd.f32 %v414_v45, %v357_v47  ;;  %v701_v45 = vpop.permute.xlu2 %700 }
  0xb6   : > { %v1240_v18 = vadd.f32 %v638_v46, %v570_v6  ;;  %v728_v46 = vadd.f32 %v727_v39, %v720_v30 }
  0xb8   : > { %v416_v49 = vpop.f32.mrf.mxu1  ;;  %v745_v28 = vmul.f32 %v1240_v18, %v1240_v18  ;;  %v721_v40 = vmul.f32 %v691_v27, %v1240_v18 }
  0xba   : > { %v641_v50 = vpop.f32.mrf.mxu3  ;;  %v754_v44 = vmul.f32 %v745_v28, %v691_v27 }
  0xbb   : > { %v553_v52 = vpop.f32.mrf.mxu2 }
  0xbc   : > { %v359_v51 = vpop.f32.mrf.mxu0  ;;  %v571_v11 = vadd.f32 %v553_v52, %v415_v3  ;;  %v729_v52 = vadd.f32 %v728_v46, %v721_v40 }
  0xbd   : > { %v417_v14 = vadd.f32 %v416_v49, %v359_v51 }
  0xbe   : > { %v1246_v22 = vadd.f32 %v641_v50, %v571_v11  ;;  %v761_v50 = vadd.f32 %v760_v43, %v753_v35 }
  0xc0   : > { %v419_v53 = vpop.f32.mrf.mxu1  ;;  %v746_v36 = vmul.f32 %v1246_v22, %v1246_v22  ;;  %v722_v47 = vmul.f32 %v696_v7, %v1246_v22  ;;  %v762_v57 = vadd.f32 %v761_v50, %v754_v44 }
  0xc2   : > { %v643_v54 = vpop.f32.mrf.mxu3  ;;  %v755_v51 = vmul.f32 %v746_v36, %v696_v7  ;;  %v730_v59 = vadd.f32 %v729_v52, %v722_v47  ;;  %v777_v52 = vld [vmem:[%s1304_s2] sm:$0x1] }
  0xc3   : > { %v555_v60 = vpop.f32.mrf.mxu2 }
  0xc4   : > { %v362_v56 = vpop.f32.mrf.mxu0  ;;  %v572_v19 = vadd.f32 %v555_v60, %v417_v14  ;;  %v763_v0 = vadd.f32 %v762_v57, %v755_v51  ;;  %v716_v14 = vpop.permute.xlu2 %715 }
  0xc5   : > { %v420_v15 = vadd.f32 %v419_v53, %v362_v56 }
  0xc6   : > { %v1253_v31 = vadd.f32 %v643_v54, %v572_v19 }
  0xc8   : > { %v421_v61 = vpop.f32.mrf.mxu1  ;;  %v747_v48 = vmul.f32 %v1253_v31, %v1253_v31  ;;  %v723_v53 = vmul.f32 %v701_v45, %v1253_v31 }
  0xca   : > { %v646_v4 = vpop.f32.mrf.mxu3  ;;  %v756_v60 = vmul.f32 %v747_v48, %v701_v45  ;;  %v731_v3 = vadd.f32 %v730_v59, %v723_v53 }
  0xcb   : > { %v558_v12 = vpop.f32.mrf.mxu2 }
  0xcc   : > { %v364_v8 = vpop.f32.mrf.mxu0  ;;  %v573_v24 = vadd.f32 %v558_v12, %v420_v15 }
  0xcd   : > { %v422_v32 = vadd.f32 %v421_v61, %v364_v8  ;;  %v764_v8 = vadd.f32 %v763_v0, %v756_v60 }
  0xce   : > { %v1258_v41 = vadd.f32 %v646_v4, %v573_v24 }
  0xd0   : > { %v424_v13 = vpop.f32.mrf.mxu1  ;;  %v748_v54 = vmul.f32 %v1258_v41, %v1258_v41  ;;  %v724_v61 = vmul.f32 %v706_v58, %v1258_v41 }
  0xd2   : > { %v648_v25 = vpop.f32.mrf.mxu3  ;;  %v757_v4 = vmul.f32 %v748_v54, %v706_v58  ;;  %v732_v11 = vadd.f32 %v731_v3, %v724_v61 }
  0xd3   : > { %v560_v37 = vpop.f32.mrf.mxu2 }
  0xd4   : > { %v367_v33 = vpop.f32.mrf.mxu0  ;;  %v574_v42 = vadd.f32 %v560_v37, %v422_v32  ;;  %v765_v15 = vadd.f32 %v764_v8, %v757_v4 }
  0xd5   : > { %v425_v55 = vadd.f32 %v424_v13, %v367_v33 }
  0xd6   : > { %v1263_v49 = vadd.f32 %v648_v25, %v574_v42 }
  0xd8   : > { %v426_v38 = vpop.f32.mrf.mxu1  ;;  %v749_v62 = vmul.f32 %v1263_v49, %v1263_v49  ;;  %v725_v6 = vmul.f32 %v711_v1, %v1263_v49 }
  0xda   : > { %v651_v56 = vpop.f32.mrf.mxu3  ;;  %v758_v12 = vmul.f32 %v749_v62, %v711_v1  ;;  %v733_v16 = vadd.f32 %v732_v11, %v725_v6 }
  0xdb   : > { %v563_v2 = vpop.f32.mrf.mxu2 }
  0xdc   : > { %v369_v63 = vpop.f32.mrf.mxu0  ;;  %v575_v7 = vadd.f32 %v563_v2, %v425_v55  ;;  %v766_v21 = vadd.f32 %v765_v15, %v758_v12 }
  0xde   : > { %v663_v13 = vadd.f32 %v651_v56, %v575_v7  ;;  %v790_v56 = vld [vmem:[%s1305_s3] sm:$0x1] }
  0xe0   : > { %v726_v17 = vmul.f32 %v716_v14, %v663_v13  ;;  %v750_v19 = vmul.f32 %v663_v13, %v663_v13 }
  0xe2   : > { %v653_v20 = vpop.f32.mrf.mxu3  ;;  %v734_v23 = vadd.f32 %v733_v16, %v726_v17  ;;  %v759_v24 = vmul.f32 %v750_v19, %v716_v14 }
  0xe3   : > { %v565_v25 = vpop.f32.mrf.mxu2 }
  0xe4   : > { %v735_v26 = vrot.slane %v734_v23, 4  ;;  %v767_v27 = vadd.f32 %v766_v21, %v759_v24 }
  0xe6   : > { %v736_v28 = vadd.f32 %v735_v26, %v734_v23  ;;  %v768_v29 = vrot.slane %v767_v27, 4 }
  0xe8   : > { %v737_v30 = vrot.slane %v736_v28, 2  ;;  %v769_v32 = vadd.f32 %v768_v29, %v767_v27 }
  0xea   : > { %v738_v33 = vadd.f32 %v737_v30, %v736_v28  ;;  %v770_v34 = vrot.slane %v769_v32, 2 }
  0xec   : > { %v739_v35 = vrot.slane %v738_v33, 1  ;;  %v771_v36 = vadd.f32 %v770_v34, %v769_v32 }
  0xee   : > { %v740_v37 = vadd.f32 %v739_v35, %v738_v33  ;;  %v772_v38 = vrot.slane %v771_v36, 1 }
  0xf0   : > { %v741_v39 = vmul.f32 0.015625, %v740_v37  ;;  %v773_v40 = vadd.f32 %v772_v38, %v771_v36 }
  0xf2   : > { %v774_v42 = vmul.f32 0.015625, %v773_v40  ;;  %v775_v43 = vmul.f32 %v741_v39, %v741_v39 }
  0xf4   : > { %v776_v44 = vsub.f32 %v774_v42, %v775_v43 }
  0xf6   : > { %v778_v45 = vadd.f32 1e-05, %v776_v44 }
  0xf8   : > { %1075 = vrsqrt.f32 %v778_v45  ;;  %vm785_vm4 = vweird.f32 %v778_v45 }
  0xfe   : > { %v1076_v46 = vpop.eup %1075 }
  0xff   : > { %v780_v47 = vmul.f32 %v1076_v46, %v778_v45  ;;  %vm786_vm3 = vweird.f32 %v1076_v46 }
 0x100   : > { %vm787_vm5 = vmor %vm785_vm4, %vm786_vm3 }
 0x101   : > { %v781_v48 = vmul.f32 %v1076_v46, %v780_v47 }
 0x103   : > { %v782_v50 = vmul.f32 0.5, %v781_v48 }
 0x105   : > { %v783_v51 = vsub.f32 1.5, %v782_v50 }
 0x107   : > { %v784_v53 = vmul.f32 %v1076_v46, %v783_v51 }
 0x109   : > { %v788_v54 = vsel %vm787_vm5, %v1076_v46, %v784_v53 }
 0x10a   : > { %v789_v55 = vmul.f32 %v788_v54, %v777_v52 }
 0x10c   : > { %v791_v57 = vmul.f32 %v789_v55, %v741_v39  ;;  %v794_v58 = vperm.slane %v789_v55, 0 }
 0x10e   : > { %v792_v59 = vsub.f32 %v790_v56, %v791_v57  ;;  %v796_v60 = vmul.f32 %v794_v58, %v1234_v9  ;;  %v797_v61 = vmul.f32 %v794_v58, %v1232_v5  ;;  %v798_v62 = vmul.f32 %v794_v58, %v1236_v10 }
 0x10f   : > { %v799_v63 = vmul.f32 %v794_v58, %v1240_v18  ;;  %v800_v0 = vmul.f32 %v794_v58, %v1246_v22  ;;  %v801_v2 = vmul.f32 %v794_v58, %v1253_v31  ;;  %v802_v3 = vmul.f32 %v794_v58, %v1258_v41 }
 0x110   : > { %v806_v1 = vperm.slane %v792_v59, 0  ;;  %v803_v4 = vmul.f32 %v794_v58, %v1263_v49  ;;  %v804_v6 = vmul.f32 %v794_v58, %v663_v13 }
 0x112   : > { %v808_v7 = vadd.f32 %v806_v1, %v796_v60  ;;  %v809_v8 = vadd.f32 %v806_v1, %v797_v61  ;;  %v810_v9 = vadd.f32 %v806_v1, %v798_v62  ;;  %v811_v11 = vadd.f32 %v806_v1, %v799_v63 }
 0x113   : > { %v812_v5 = vadd.f32 %v806_v1, %v800_v0  ;;  %v813_v12 = vadd.f32 %v806_v1, %v801_v2  ;;  %v814_v10 = vadd.f32 %v806_v1, %v802_v3  ;;  %v815_v14 = vadd.f32 %v806_v1, %v803_v4 }
 0x114   : > { %v816_v18 = vadd.f32 %v806_v1, %v804_v6  ;;  %vm817_vm6 = vcmp.ge.f32.partialorder %v808_v7, 0.0  ;;  %vm818_vm7 = vcmp.ge.f32.partialorder %v809_v8, 0.0  ;;  %vm819_vm8 = vcmp.ge.f32.partialorder %v810_v9, 0.0 }
 0x115   : > { %vm820_vm9 = vcmp.ge.f32.partialorder %v811_v11, 0.0  ;;  %vm821_vm10 = vcmp.ge.f32.partialorder %v812_v5, 0.0  ;;  %vm822_vm11 = vcmp.ge.f32.partialorder %v813_v12, 0.0  ;;  %vm823_vm12 = vcmp.ge.f32.partialorder %v814_v10, 0.0 }
 0x116   : > { %vm824_vm13 = vcmp.ge.f32.partialorder %v815_v14, 0.0  ;;  %vm825_vm14 = vcmp.ge.f32.partialorder %v816_v18, 0.0  ;;  %v826_v22 = vmul.f32 0.2, %v808_v7  ;;  %v827_v31 = vmul.f32 0.2, %v809_v8 }
 0x117   : > { %v828_v41 = vmul.f32 0.2, %v810_v9  ;;  %v829_v49 = vmul.f32 0.2, %v811_v11  ;;  %v830_v13 = vmul.f32 0.2, %v812_v5 }
 0x118   : > { %v831_v15 = vmul.f32 0.2, %v813_v12  ;;  %v832_v16 = vmul.f32 0.2, %v814_v10  ;;  %v833_v17 = vmul.f32 0.2, %v815_v14  ;;  %v835_v19 = vsel %vm817_vm6, %v808_v7, %v826_v22 }
 0x119   : > { %v834_v20 = vmul.f32 0.2, %v816_v18  ;;  %v836_v21 = vsel %vm818_vm7, %v809_v8, %v827_v31  ;;  %v837_v23 = vsel %vm819_vm8, %v810_v9, %v828_v41  ;;  %v838_v24 = vsel %vm820_vm9, %v811_v11, %v829_v49 }
 0x11a   : > { %v839_v25 = vsel %vm821_vm10, %v812_v5, %v830_v13  ;;  %v840_v26 = vsel %vm822_vm11, %v813_v12, %v831_v15  ;;  %v841_v27 = vsel %vm823_vm12, %v814_v10, %v832_v16  ;;  %v842_v28 = vsel %vm824_vm13, %v815_v14, %v833_v17 }
 0x11b   : > { %v843_v29 = vsel %vm825_vm14, %v816_v18, %v834_v20  ;;  %v1041_v30 = vpack.c.bf16 %v836_v21, %v835_v19  ;;  %v1046_v32 = vpack.c.bf16 %v838_v24, %v837_v23  ;;  %v1051_v33 = vpack.c.bf16 %v840_v26, %v839_v25 }
 0x11c   : > { %v1056_v34 = vpack.c.bf16 %v842_v28, %v841_v27  ;;  %v852_v35 = vpack.c.bf16 %v843_v29, %v843_v29 }
 0x11d   : > { %1042 = vst [vmem:[%s224_s16] sm:$0xff] %v1041_v30  }
 0x11e   : > { %1058 = vst [vmem:[%s224_s16 + $0x8] sm:$0xff] %v1046_v32  }
 0x11f   : > { %1059 = vst [vmem:[%s224_s16 + $0x10] sm:$0xff] %v1051_v33  }
 0x120   : > { %1060 = vst [vmem:[%s224_s16 + $0x18] sm:$0xff] %v1056_v34  }
 0x121   : > { %861 = vst [vmem:[%s224_s16 + $0x20] sm:$0xf] %v852_v35 }
 0x122 PF: > { %s15_s18 = sadd.s32 1, %s1086_s18  }
 0x123   : > { %p12_p4 = scmp.ge.s32.totalorder %s15_s18, 4  }
 0x125   :  { %14 = sbr.rel (!%p12_p4) target bundleno = 1 (0x1), region = 73 }

// kernel: critic_forward.7
= control target key start
LH: loop header
LB: loop body
LE: loop exit
PB: predicated region body
PF: predicated region fallthrough
CT: control target
= control target key end

     0   :  { %s928_s24 = smov 0   ;;  %s1059_s0 = inlined_call_operand.vmem [shape: bf16[2,32,64], index: 0, kind: input, shape index: {}]   ;;  %s1060_s1 = inlined_call_operand.vmem [shape: bf16[4,64,128], index: 1, kind: input, shape index: {}]   ;;  %s1061_s2 = inlined_call_operand.vmem [shape: f32[1,128], index: 2, kind: input, shape index: {}]   ;;  %s1062_s3 = inlined_call_operand.vmem [shape: f32[1,128], index: 3, kind: input, shape index: {}]   ;;  %s1063_s4 = inlined_call_operand.vmem [shape: f32[20,1], index: 4, kind: input, shape index: {}]   ;;  %s1064_s5 = inlined_call_operand.vmem [shape: f32[20,128], index: 5, kind: input, shape index: {}]   ;;  %s1065_s6 = inlined_call_operand.vmem [shape: f32[1,128], index: 6, kind: input, shape index: {}]   ;;  %s1066_s7 = inlined_call_operand.vmem [shape: f32[2,1,128], index: 7, kind: output, shape index: {}]  }
   0x1 LB: > { %s734_s25 = sadd.s32 4294967295, %s885_s24   ;;  %p738_p0 = scmp.ge.s32.totalorder %s885_s24, 1  ;;  %s885_s24 = sphi %s928_s24, %s17_s24  }
   0x2   : > { %p237_p1 = scmp.lt.s32.totalorder %s885_s24, 3 }
   0x4   : > { %p238_p2 = pnand %p738_p0, %p237_p1 }
   0x5   : > { %p267_p3 = scmp.lt.s32.totalorder (!%p238_p2), %s734_s25, 1 }
   0x6   : > { %241 = sbr.rel (%p238_p2) target bundleno = 375 (0x177), region = 48 }
   0xb   : > { %v856_v0 = vld [vmem:[%s1060_s1 + $0x38] sm:$0xff]  ;;  %v855_v4 = vld [vmem:[%s1060_s1 + $0x30] sm:$0xff]  ;;  %s1068_s25 = smov (!%p267_p3, %s734_s25), 1  ;;  %v854_v8 = vld [vmem:[%s1060_s1 + $0x28] sm:$0xff]  ;;  %v887_v10 = vmov 0   ;;  %vm525_vm1 = vcmask 1044480  }
   0xc   : > { %v852_v1 = vld [vmem:[%s1060_s1 + $0x18] sm:$0xff]  ;;  %356 = vmatpush.bf16.msra.mxu0 %v856_v0  ;;  %v851_v5 = vld [vmem:[%s1060_s1 + $0x10] sm:$0xff]  ;;  %v850_v9 = vld [vmem:[%s1060_s1 + $0x8] sm:$0xff]  ;;  %s847_s23 = sshll.u32 %s1068_s25, 4  ;;  %875 = vset.pattern.permute.xlu0 %v887_v10  ;;  %vm305_vm0 = vsmask.f32 7424  ;;  %s274_s17 = scalar_lea.vmem %s1066_s7, %s1068_s25 }
   0xd   : > { %v861_v2 = vld [vmem:[%s1060_s1 + $0x58] sm:$0xff]  ;;  %406 = vmatpush.bf16.msra.mxu1 %v852_v1  ;;  %v860_v6 = vld [vmem:[%s1060_s1 + $0x50] sm:$0xff]  ;;  %876 = vset.pattern.permute.xlu1 %v887_v10  ;;  %v859_v11 = vld [vmem:[%s1060_s1 + $0x48] sm:$0xff]  ;;  %s978_s9 = scalar_lea.vmem %s1059_s0, %s847_s23  ;;  %vm345_vm2 = vcmask 523264   ;;  %vm443_vm3 = vsmask.f32 5376 }
   0xe   : > { %v865_v3 = vld [vmem:[%s1060_s1 + $0x78] sm:$0xff]  ;;  %495 = vmatpush.bf16.msra.mxu2 %v861_v2  ;;  %v864_v7 = vld [vmem:[%s1060_s1 + $0x70] sm:$0xff]  ;;  %v863_v12 = vld [vmem:[%s1060_s1 + $0x68] sm:$0xff]  ;;  %vm602_vm4 = vcmask 1043456  }
   0xf   : > { %563 = vmatpush.bf16.msra.mxu3 %v865_v3  ;;  %v580_v13 = vld [vmem:[%s1063_s4] sm:$0xff]  ;;  %v287_v15 = vld [vmem:[%s978_s9 + $0x8] sm:$0x7]  ;;  %v857_v20 = vld [vmem:[%s978_s9 + $0x8] sm:$0x10] }
  0x10   : > { %357 = vmatpush.bf16.msra.mxu0 %v855_v4  ;;  %v848_v14 = vld [vmem:[%s978_s9] sm:$0xff]  ;;  %v302_v17 = vunpack.c.l.b16 %v287_v15  ;;  %v799_v19 = vld [vmem:[%s978_s9 + $0x8] sm:$0xf]  ;;  %585 = vperm.xlu0 %875, %v580_v13   ;;  %v582_v29 = vld [vmem:[%s1063_s4 + $0x10] sm:$0xf] }
  0x11   : > { %407 = vmatpush.bf16.msra.mxu1 %v851_v5  ;;  %v420_v16 = vld [vmem:[%s978_s9] sm:$0xc]  ;;  %v421_v18 = vld [vmem:[%s978_s9 + $0x4] sm:$0xf]  ;;  %v307_v22 = vshrl.u32 %v848_v14, 16  ;;  %v309_v23 = vshll.u32 %v848_v14, 16  ;;  %v800_v25 = vor.u32 %v857_v20, %v799_v19  ;;  %595 = vperm.xlu1 %876, %v582_v29  }
  0x12   : > { %496 = vmatpush.bf16.msra.mxu2 %v860_v6  ;;  %v437_v21 = vunpack.c.l.b16 %v420_v16  ;;  %v438_v24 = vunpack.c.l.b16 %v421_v18  ;;  %v512_v26 = vld [vmem:[%s978_s9] sm:$0x8]  ;;  %v304_v27 = vpack.c.b16 %v302_v17, %v302_v17  ;;  %v581_v48 = vld [vmem:[%s1063_s4 + $0x8] sm:$0xff] }
  0x13   : > { %564 = vmatpush.bf16.msra.mxu3 %v864_v7  ;;  %v523_v28 = vunpack.c.l.b16 %v512_v26  ;;  %v853_v30 = vld [vmem:[%s1060_s1 + $0x20] sm:$0xff]  ;;  %v311_v32 = vrot.slane %v309_v23, 1  ;;  %v453_v34 = vshrl.u32 %v800_v25, 16  ;;  %v456_v35 = vshll.u32 %v800_v25, 16  ;;  %v278_v56 = vld [vmem:[%s978_s9 + $0x8] sm:$0x3] }
  0x14   : > { %358 = vmatpush.bf16.msra.mxu0 %v854_v8  ;;  %v849_v31 = vld [vmem:[%s1060_s1] sm:$0xff]  ;;  %v441_v33 = vpack.c.b16 %v438_v24, %v437_v21  ;;  %v314_v38 = vshll.u32 %v304_v27, 16  ;;  %v527_v40 = vrot.slane %v800_v25, 3  ;;  %v318_v57 = vshrl.u32 %v304_v27, 16 }
  0x15   : > { %408 = vmatpush.bf16.msra.mxu1 %v850_v9  ;;  %v858_v36 = vld [vmem:[%s1060_s1 + $0x40] sm:$0xff]  ;;  %v524_v39 = vpack.c.b16 %v438_v24, %v523_v28  ;;  %v312_v41 = vor.u32 %v311_v32, %v307_v22  ;;  %v455_v44 = vrot.slane %v453_v34, 2  ;;  %v458_v46 = vrot.slane %v456_v35, 3 }
  0x16   : > { %497 = vmatpush.bf16.msra.mxu2 %v859_v11  ;;  %v862_v37 = vld [vmem:[%s1060_s1 + $0x60] sm:$0xff]  ;;  %v445_v42 = vshrl.u32 %v441_v33, 16  ;;  %v448_v43 = vshll.u32 %v441_v33, 16  ;;  %v316_v45 = vrot.slane %v314_v38, 1  ;;  %v371_v58 = vunpack.c.l.b16 %v278_v56 }
  0x17   : > { %565 = vmatpush.bf16.msra.mxu3 %v863_v12  ;;  %v526_v47 = vrot.slane %v524_v39, 3  ;;  %v459_v52 = vor.u32 %v458_v46, %v455_v44 }
  0x18   : > { %359 = vmatpush.bf16.msra.mxu0 %v853_v30  ;;  %v447_v49 = vrot.slane %v445_v42, 2  ;;  %v450_v50 = vrot.slane %v448_v43, 3  ;;  %v317_v51 = vsel %vm305_vm0, %v312_v41, %v316_v45  ;;  %590 = vperm.xlu0 %875, %v581_v48   ;;  %v320_v59 = vor.u32 %v318_v57, %v316_v45 }
  0x19   : > { %409 = vmatpush.bf16.msra.mxu1 %v849_v31  ;;  %v528_v53 = vsel %vm525_vm1, %v526_v47, %v527_v40  ;;  %v372_v60 = vpack.c.b16 %v371_v58, %v371_v58 }
  0x1a   : > { %498 = vmatpush.bf16.msra.mxu2 %v858_v36  ;;  %v451_v54 = vor.u32 %v450_v50, %v447_v49 }
  0x1b   : > { %566 = vmatpush.bf16.msra.mxu3 %v862_v37  ;;  %769 = vmatmul.msk.bf16.vlgmr.msra.gmra.mxu0 %vm345_vm2, %v317_v51 }
  0x1c   : > { %787 = vmatmul.msk.bf16.vlgmr.msra.gmra.mxu1 %vm345_vm2, %v848_v14  ;;  %v460_v55 = vsel %vm443_vm3, %v451_v54, %v459_v52 }
  0x1d   : > { %817 = vmatmul.msk.bf16.vlgmr.msra.gmra.mxu2 %vm345_vm2, %v460_v55 }
  0x1e   : > { %843 = vmatmul.msk.bf16.vlgmr.msra.gmra.mxu3 %vm345_vm2, %v528_v53 }
  0x2b   : > { %770 = vmatmul.msk.bf16.gmra.mxu0 %vm345_vm2, %v320_v59 }
  0x2c   : > { %788 = vmatmul.msk.bf16.gmra.mxu1 %vm345_vm2, %v372_v60 }
  0x2d   : > { %818 = vmatmul.msk.bf16.gmra.mxu2 %vm345_vm2, %v459_v52 }
  0x2e   : > { %844 = vmatmul.msk.bf16.gmra.mxu3 %vm345_vm2, %v527_v40 }
  0x82   : > { %v586_v3 = vpop.permute.xlu0 %585 }
  0x83   : > { %v596_v24 = vpop.permute.xlu1 %595 }
  0x8a   : > { %v591_v15 = vpop.permute.xlu0 %590 }
  0x98   : > { %v361_v61 = vpop.f32.mrf.mxu0 }
  0x99   : > { %v411_v62 = vpop.f32.mrf.mxu1 }
  0x9a   : > { %v412_v4 = vadd.f32 %v411_v62, %v361_v61  ;;  %v630_v62 = vld [vmem:[%s1061_s2] sm:$0x1] }
  0xa0   : > { %v500_v0 = vpop.f32.mrf.mxu2  ;;  %v363_v1 = vpop.f32.mrf.mxu0 }
  0xa1   : > { %v568_v63 = vpop.f32.mrf.mxu3  ;;  %v413_v2 = vpop.f32.mrf.mxu1  ;;  %v509_v11 = vadd.f32 %v500_v0, %v412_v4 }
  0xa2   : > { %v414_v5 = vadd.f32 %v413_v2, %v363_v1  ;;  %v643_v2 = vld [vmem:[%s1062_s3] sm:$0x1] }
  0xa3   : > { %v1021_v14 = vadd.f32 %v568_v63, %v509_v11 }
  0xa5   : > { %v612_v22 = vmul.f32 %v1021_v14, %v1021_v14  ;;  %v598_v26 = vmul.f32 %v586_v3, %v1021_v14 }
  0xa7   : > { %v615_v30 = vmul.f32 %v612_v22, %v586_v3 }
  0xa8   : > { %v502_v7 = vpop.f32.mrf.mxu2  ;;  %v366_v8 = vpop.f32.mrf.mxu0 }
  0xa9   : > { %v570_v6 = vpop.f32.mrf.mxu3  ;;  %v510_v9 = vadd.f32 %v502_v7, %v414_v5  ;;  %v416_v10 = vpop.f32.mrf.mxu1 }
  0xaa   : > { %v417_v13 = vadd.f32 %v416_v10, %v366_v8 }
  0xab   : > { %v1019_v12 = vadd.f32 %v570_v6, %v510_v9 }
  0xad   : > { %v613_v17 = vmul.f32 %v1019_v12, %v1019_v12  ;;  %v599_v23 = vmul.f32 %v591_v15, %v1019_v12 }
  0xaf   : > { %v616_v27 = vmul.f32 %v613_v17, %v591_v15  ;;  %v601_v31 = vadd.f32 %v599_v23, %v598_v26  ;;  %v669_v15 = vld [vmem:[%s1064_s5 + $0x10] sm:$0xf] }
  0xb0   : > { %v505_v18 = vpop.f32.mrf.mxu2  ;;  %v368_v19 = vpop.f32.mrf.mxu0 }
  0xb1   : > { %v573_v16 = vpop.f32.mrf.mxu3  ;;  %v511_v20 = vadd.f32 %v505_v18, %v417_v13  ;;  %v418_v21 = vpop.f32.mrf.mxu1  ;;  %v618_v35 = vadd.f32 %v616_v27, %v615_v30  ;;  %v667_v19 = vld [vmem:[%s1064_s5] sm:$0xff] }
  0xb3   : > { %v579_v25 = vadd.f32 %v573_v16, %v511_v20 }
  0xb5   : > { %v600_v28 = vmul.f32 %v596_v24, %v579_v25  ;;  %v614_v29 = vmul.f32 %v579_v25, %v579_v25 }
  0xb7   : > { %v603_v32 = vsel %vm602_vm4, %v600_v28, 0.0  ;;  %v617_v33 = vmul.f32 %v614_v29, %v596_v24 }
  0xb8   : > { %v604_v36 = vadd.f32 %v603_v32, %v601_v31  ;;  %v507_v37 = vpop.f32.mrf.mxu2 }
  0xb9   : > { %v575_v34 = vpop.f32.mrf.mxu3  ;;  %v619_v38 = vsel %vm602_vm4, %v617_v33, 0.0 }
  0xba   : > { %v605_v39 = vrot.slane %v604_v36, 4  ;;  %v620_v40 = vadd.f32 %v619_v38, %v618_v35  ;;  %v684_v34 = vld [vmem:[%s1065_s6] sm:$0x1] }
  0xbc   : > { %v606_v41 = vadd.f32 %v605_v39, %v604_v36  ;;  %v621_v42 = vrot.slane %v620_v40, 4 }
  0xbe   : > { %v607_v43 = vrot.slane %v606_v41, 2  ;;  %v622_v44 = vadd.f32 %v621_v42, %v620_v40 }
  0xc0   : > { %v608_v45 = vadd.f32 %v607_v43, %v606_v41  ;;  %v623_v46 = vrot.slane %v622_v44, 2 }
  0xc2   : > { %v609_v47 = vrot.slane %v608_v45, 1  ;;  %v624_v48 = vadd.f32 %v623_v46, %v622_v44 }
  0xc4   : > { %v610_v49 = vadd.f32 %v609_v47, %v608_v45  ;;  %v625_v50 = vrot.slane %v624_v48, 1 }
  0xc6   : > { %v611_v51 = vmul.f32 0.0625, %v610_v49  ;;  %v626_v52 = vadd.f32 %v625_v50, %v624_v48 }
  0xc8   : > { %v627_v53 = vmul.f32 0.0625, %v626_v52  ;;  %v628_v54 = vmul.f32 %v611_v51, %v611_v51 }
  0xca   : > { %v629_v55 = vsub.f32 %v627_v53, %v628_v54 }
  0xcc   : > { %v631_v56 = vadd.f32 1e-05, %v629_v55 }
  0xce   : > { %877 = vrsqrt.f32 %v631_v56  ;;  %vm638_vm6 = vweird.f32 %v631_v56 }
  0xd4   : > { %v878_v57 = vpop.eup %877 }
  0xd5   : > { %v633_v58 = vmul.f32 %v878_v57, %v631_v56  ;;  %vm639_vm5 = vweird.f32 %v878_v57 }
  0xd6   : > { %vm640_vm7 = vmor %vm638_vm6, %vm639_vm5 }
  0xd7   : > { %v634_v59 = vmul.f32 %v878_v57, %v633_v58 }
  0xd9   : > { %v635_v60 = vmul.f32 0.5, %v634_v59 }
  0xdb   : > { %v636_v61 = vsub.f32 1.5, %v635_v60 }
  0xdd   : > { %v637_v63 = vmul.f32 %v878_v57, %v636_v61 }
  0xdf   : > { %v641_v0 = vsel %vm640_vm7, %v878_v57, %v637_v63 }
  0xe0   : > { %v642_v1 = vmul.f32 %v641_v0, %v630_v62 }
  0xe2   : > { %v644_v3 = vmul.f32 %v642_v1, %v611_v51  ;;  %v647_v4 = vperm.slane %v642_v1, 0 }
  0xe4   : > { %v645_v5 = vsub.f32 %v643_v2, %v644_v3  ;;  %v651_v6 = vmul.f32 %v647_v4, %v579_v25  ;;  %v649_v8 = vmul.f32 %v647_v4, %v1021_v14  ;;  %v650_v9 = vmul.f32 %v647_v4, %v1019_v12  ;;  %v668_v12 = vld [vmem:[%s1064_s5 + $0x8] sm:$0xff] }
  0xe6   : > { %v653_v7 = vperm.slane %v645_v5, 0 }
  0xe8   : > { %v657_v10 = vadd.f32 %v653_v7, %v651_v6  ;;  %v655_v11 = vadd.f32 %v653_v7, %v649_v8  ;;  %v656_v13 = vadd.f32 %v653_v7, %v650_v9 }
  0xea   : > { %vm660_vm8 = vcmp.ge.f32.partialorder %v657_v10, 0.0  ;;  %v663_v16 = vmul.f32 0.2, %v657_v10  ;;  %vm658_vm9 = vcmp.ge.f32.partialorder %v655_v11, 0.0  ;;  %vm659_vm10 = vcmp.ge.f32.partialorder %v656_v13, 0.0 }
  0xeb   : > { %v661_v17 = vmul.f32 0.2, %v655_v11  ;;  %v662_v18 = vmul.f32 0.2, %v656_v13 }
  0xec   : > { %v666_v14 = vsel %vm660_vm8, %v657_v10, %v663_v16 }
  0xed   : > { %v672_v20 = vmul.f32 %v669_v15, %v666_v14  ;;  %v664_v21 = vsel %vm658_vm9, %v655_v11, %v661_v17  ;;  %v665_v22 = vsel %vm659_vm10, %v656_v13, %v662_v18 }
  0xee   : > { %v670_v23 = vmul.f32 %v667_v19, %v664_v21  ;;  %v671_v24 = vmul.f32 %v668_v12, %v665_v22 }
  0xef   : > { %v674_v25 = vsel %vm602_vm4, %v672_v20, 0.0 }
  0xf0   : > { %v673_v26 = vadd.f32 %v671_v24, %v670_v23 }
  0xf2   : > { %v675_v27 = vadd.f32 %v674_v25, %v673_v26 }
  0xf4   : > { %v676_v28 = vrot.slane %v675_v27, 4 }
  0xf6   : > { %v677_v29 = vadd.f32 %v676_v28, %v675_v27 }
  0xf8   : > { %v678_v30 = vrot.slane %v677_v29, 2 }
  0xfa   : > { %v679_v31 = vadd.f32 %v678_v30, %v677_v29 }
  0xfc   : > { %v680_v32 = vrot.slane %v679_v31, 1 }
  0xfe   : > { %v681_v33 = vadd.f32 %v680_v32, %v679_v31 }
 0x100   : > { %682 = vadd.xlane.f32.xlu1 %v681_v33 }
 0x173   : > { %v683_v35 = vpop.xlane.xlu1 %682 }
 0x174   : > { %v685_v36 = vadd.f32 %v684_v34, %v683_v35 }
 0x176   : > { %686 = vst [vmem:[%s274_s17] sm:$0x1] %v685_v36 }
 0x177 PF: > { %s17_s24 = sadd.s32 1, %s885_s24  }
 0x178   : > { %p14_p4 = scmp.ge.s32.totalorder %s17_s24, 4  }
 0x17a   :  { %16 = sbr.rel (!%p14_p4) target bundleno = 1 (0x1), region = 81 }

</bundles_post_ra>
